<compile_context>
chip_gen: v7x
topology: tpu7x:2x2x1
jax: 0.10.0
libtpu: 0.0.40
codegen_flags: <defaults>
</compile_context>

<pallas_src>
import functools

import jax
import jax.numpy as jnp
from jax.experimental import pallas as pl
from jax.experimental.pallas import tpu as pltpu


# ------------------------------ helpers ------------------------------------

def _tile(dim, target, mult):
    """Largest block size <= target that either equals the full dim or is a
    multiple of `mult` evenly dividing dim (TPU (8,128) tiling constraint).
    NOTE: falls back to the full dim when no divisor exists — keep row counts
    multiples of 8 and feature dims multiples of 128 at production sizes."""
    if dim <= target:
        return dim
    t = (target // mult) * mult
    while t >= mult:
        if dim % t == 0:
            return t
        t -= mult
    return dim


def _chip_config():
    """Per-generation (row-tile target, vmem_limit_bytes).  v5e/v6e have 128 MiB
    VMEM -> bigger tiles; v7x (and unknown chips) get the conservative budget."""
    try:
        kind = jax.devices()[0].device_kind.lower()
    except Exception:  # pragma: no cover - defensive
        kind = ""
    if "v6" in kind or "v5 lit" in kind or "v5e" in kind:
        return 512, 64 * 1024 * 1024
    return 256, 40 * 1024 * 1024


def _layernorm(x, w, b, eps=1e-5):
    mu = jnp.mean(x, axis=-1, keepdims=True)
    var = jnp.mean(jnp.square(x - mu), axis=-1, keepdims=True)
    return (x - mu) * jax.lax.rsqrt(var + eps) * w + b


def _rel_shift(bd):
    """Exact in-VMEM equivalent of the Transformer-XL `_rel_shift` pad/reshape
    trick for a square [S, S] score block (klen == qlen):
        out[i, j]   = bd[i, j + S-1-i]   for j <= i
        out[i, i+1] = 0
        out[i, j]   = bd[i+1, j-i-2]     for j >= i+2
    One strided XLU roll does the per-row rotate-by-(i+1); one static sublane
    roll provides the "row i+1" values for the upper triangle."""
    s = bd.shape[0]
    row = jax.lax.broadcasted_iota(jnp.int32, (s, s), 0)
    col = jax.lax.broadcasted_iota(jnp.int32, (s, s), 1)
    # lower[i, j] = bd[i, (j - (i+1)) mod S]
    lower = pltpu.roll(bd, 1, 1, stride=1, stride_axis=0)
    # upper[i, j] = lower[i+1, j]   (wrap at i == S-1 is never selected)
    upper = pltpu.roll(lower, s - 1, 0)
    return jnp.where(col <= row, lower,
                     jnp.where(col == row + 1, jnp.float32(0.0), upper))


# --------------------------- tiled qkv projection ---------------------------

def _matmul_kernel(x_ref, w_ref, o_ref, acc_ref):
    @pl.when(pl.program_id(2) == 0)
    def _():
        acc_ref[...] = jnp.zeros_like(acc_ref)

    acc_ref[...] += jnp.dot(x_ref[...].astype(jnp.bfloat16), w_ref[...],
                            preferred_element_type=jnp.float32)

    @pl.when(pl.program_id(2) == pl.num_programs(2) - 1)
    def _():
        o_ref[...] = acc_ref[...].astype(o_ref.dtype)


def qkv_project(x, w, *, tm, tn=256, tk=512, vmem_limit):
    """[B*S, D] f32 @ [D, 3D] bf16 -> [B*S, 3D] bf16 (f32 accumulation)."""
    m, k = x.shape
    _, n = w.shape
    tm = _tile(m, tm, 8)
    tn = _tile(n, tn, 128)
    tk = _tile(k, tk, 128)
    grid = (m // tm, n // tn, k // tk)
    return pl.pallas_call(
        _matmul_kernel,
        grid=grid,
        in_specs=[pl.BlockSpec((tm, tk), lambda i, j, kk: (i, kk)),
                  pl.BlockSpec((tk, tn), lambda i, j, kk: (kk, j))],
        out_specs=pl.BlockSpec((tm, tn), lambda i, j, kk: (i, j)),
        out_shape=jax.ShapeDtypeStruct((m, n), jnp.bfloat16),
        scratch_shapes=[pltpu.VMEM((tm, tn), jnp.float32)],
        compiler_params=pltpu.CompilerParams(
            dimension_semantics=("parallel", "parallel", "arbitrary"),
            vmem_limit_bytes=vmem_limit),
    )(x, w)


# ------------------- fused relative multi-head attention --------------------
# grid = (batch, head), both parallel.  Per step: dense [S, dh] q/k/v blocks,
# AC/BD matmuls (bf16 -> f32), exact TXL rel_shift, additive key-padding mask,
# softmax, P @ V.  The [S, S] score tensors never leave VMEM.

def _rel_attn_kernel(qkv_ref, rk_ref, rwb_ref, rrb_ref, amask_ref, o_ref, *,
                     scale):
    q = qkv_ref[0].astype(jnp.float32)            # [S, dh]
    k = qkv_ref[1]                                # [S, dh] bf16 (MXU operand)
    v = qkv_ref[2]                                # [S, dh] bf16
    rk = rk_ref[...]                              # [S, dh] bf16
    rwb = rwb_ref[...].astype(jnp.float32)        # [1, dh]
    rrb = rrb_ref[...].astype(jnp.float32)        # [1, dh]
    am = amask_ref[...]                           # [1, S] additive (-1e30 at pads)

    # fold 1/sqrt(d_head) into the query before the MXU
    q_rw = ((q + rwb) * scale).astype(jnp.bfloat16)
    q_rr = ((q + rrb) * scale).astype(jnp.bfloat16)

    # AC[i,j] = (q_i + r_w_bias) . k_j        (einsum 'ibnd,jbnd->ijbn')
    ac = jax.lax.dot_general(q_rw, k, (((1,), (1,)), ((), ())),
                             preferred_element_type=jnp.float32)    # [S, S]
    # BD[i,j] = (q_i + r_r_bias) . rk_j       (einsum 'ibnd,jnd->ijbn')
    bd = jax.lax.dot_general(q_rr, rk, (((1,), (1,)), ((), ())),
                             preferred_element_type=jnp.float32)    # [S, S]

    s = ac + _rel_shift(bd) + am
    s = s - jnp.max(s, axis=-1, keepdims=True)    # softmax over the key dim
    p = jnp.exp(s)
    p = p * pl.reciprocal(jnp.sum(p, axis=-1, keepdims=True), approx=True)

    o_ref[...] = jnp.dot(p.astype(jnp.bfloat16), v,
                         preferred_element_type=jnp.float32).astype(o_ref.dtype)


def rel_attention(qkv_h, rk_h, rwb, rrb, add_mask, *, scale, vmem_limit):
    """qkv_h: [3, B, nhead, S, dh] bf16; rk_h: [nhead, S, dh] bf16;
    rwb/rrb: [nhead, 1, dh] f32; add_mask: [B, 1, S] f32 -> [B, nhead, S, dh]."""
    _, b, nhead, s, dh = qkv_h.shape
    kernel = functools.partial(_rel_attn_kernel, scale=scale)
    return pl.pallas_call(
        kernel,
        grid=(b, nhead),
        in_specs=[
            pl.BlockSpec((3, None, None, s, dh), lambda bi, hi: (0, bi, hi, 0, 0)),
            pl.BlockSpec((None, s, dh), lambda bi, hi: (hi, 0, 0)),
            pl.BlockSpec((None, 1, dh), lambda bi, hi: (hi, 0, 0)),
            pl.BlockSpec((None, 1, dh), lambda bi, hi: (hi, 0, 0)),
            pl.BlockSpec((None, 1, s), lambda bi, hi: (bi, 0, 0)),
        ],
        out_specs=pl.BlockSpec((None, None, s, dh), lambda bi, hi: (bi, hi, 0, 0)),
        out_shape=jax.ShapeDtypeStruct((b, nhead, s, dh), jnp.bfloat16),
        compiler_params=pltpu.CompilerParams(
            dimension_semantics=("parallel", "parallel"),
            vmem_limit_bytes=vmem_limit),
    )(qkv_h, rk_h, rwb, rrb, add_mask)


# --------- fused o_net + residual + LN + FFN + residual + LN (+final LN) ----
# grid = (row tiles, FF tiles): the FF dimension is a reduction axis with a
# resident f32 accumulator so w1/w2 never need to be fully VMEM-resident.

def _post_attn_kernel(av_ref, res_ref, wo_ref, ln1w_ref, ln1b_ref,
                      w1_ref, b1_ref, w2_ref, b2_ref, ln2w_ref, ln2b_ref,
                      lnfw_ref, lnfb_ref, o_ref, h_ref, acc_ref, *,
                      apply_final_ln):
    j = pl.program_id(1)

    @pl.when(j == 0)
    def _():
        attn_out = jnp.dot(av_ref[...], wo_ref[...],
                           preferred_element_type=jnp.float32)
        h_ref[...] = _layernorm(res_ref[...] + attn_out,
                                ln1w_ref[...], ln1b_ref[...])
        acc_ref[...] = jnp.zeros_like(acc_ref)

    # feed-forward slice over this FF block (dropouts are identity at inference)
    f = jnp.dot(h_ref[...].astype(jnp.bfloat16), w1_ref[...],
                preferred_element_type=jnp.float32) + b1_ref[...]
    f = jnp.maximum(f, 0.0)
    acc_ref[...] += jnp.dot(f.astype(jnp.bfloat16), w2_ref[...],
                            preferred_element_type=jnp.float32)

    @pl.when(j == pl.num_programs(1) - 1)
    def _():
        y = _layernorm(h_ref[...] + acc_ref[...] + b2_ref[...],
                       ln2w_ref[...], ln2b_ref[...])
        if apply_final_ln:
            y = _layernorm(y, lnfw_ref[...], lnfb_ref[...])
        o_ref[...] = y


def post_attention(av2d, res2d, lp, lnf_w, lnf_b, *, apply_final_ln,
                   tm, tff=512, vmem_limit):
    m, d = res2d.shape
    ff = lp["w1"].shape[1]
    tm = _tile(m, tm, 8)
    tff = _tile(ff, tff, 128)

    row = pl.BlockSpec((tm, d), lambda i, j: (i, 0))

    def full(shape):
        return pl.BlockSpec(shape, lambda i, j: (0, 0))

    kernel = functools.partial(_post_attn_kernel, apply_final_ln=apply_final_ln)
    return pl.pallas_call(
        kernel,
        grid=(m // tm, ff // tff),
        in_specs=[row, row,
                  full((d, d)), full((1, d)), full((1, d)),
                  pl.BlockSpec((d, tff), lambda i, j: (0, j)),
                  pl.BlockSpec((1, tff), lambda i, j: (0, j)),
                  pl.BlockSpec((tff, d), lambda i, j: (j, 0)),
                  full((1, d)), full((1, d)), full((1, d)),
                  full((1, d)), full((1, d))],
        out_specs=row,
        out_shape=jax.ShapeDtypeStruct((m, d), jnp.float32),
        scratch_shapes=[pltpu.VMEM((tm, d), jnp.float32),
                        pltpu.VMEM((tm, d), jnp.float32)],
        compiler_params=pltpu.CompilerParams(
            dimension_semantics=("parallel", "arbitrary"),
            vmem_limit_bytes=vmem_limit),
    )(av2d, res2d, lp["w_o"], lp["ln1_w"], lp["ln1_b"],
      lp["w1"], lp["b1"], lp["w2"], lp["b2"], lp["ln2_w"], lp["ln2_b"],
      lnf_w, lnf_b)


# ------------------------------- glue / model -------------------------------

def positional_embedding(qlen, d_model, clamp_len):
    pos_seq = jnp.arange(qlen - 1, -1, -1, dtype=jnp.float32)
    if clamp_len > 0:
        pos_seq = jnp.minimum(pos_seq, float(clamp_len))
    inv_freq = 1.0 / (10000.0 ** (jnp.arange(0, d_model, 2,
                                              dtype=jnp.float32) / d_model))
    sinusoid = pos_seq[:, None] * inv_freq[None, :]
    return jnp.concatenate([jnp.sin(sinusoid), jnp.cos(sinusoid)], axis=-1)


def transformer_xl_encoder(src, key_padding_mask, params, *, nhead, clamp_len):
    """src: [B, S, D] float32; key_padding_mask: [B, S] bool (True = pad)."""
    b, s, d = src.shape
    dh = d // nhead
    scale = 1.0 / (dh ** 0.5)
    row_tile, vmem_limit = _chip_config()
    n_layers = len(params["layers"])

    # batch-major token layout; the seq-first transposes of the PyTorch code are
    # pure data movement and are skipped.
    x2d = src.reshape(b * s, d)
    add_mask = (key_padding_mask.astype(jnp.float32)
                * jnp.float32(-1e30))[:, None, :]                 # [B, 1, S]
    pos_emb = positional_embedding(s, d, clamp_len)               # [S, D]
    # self.drop: dropout == identity at inference

    # hoist the tiny per-layer r_net projections out of the layer loop
    # (plain XLA glue, not a hot path) and pre-split them per head.
    w_r_all = jnp.stack([lp["w_r"] for lp in params["layers"]])   # [L, D, D]
    rk_all = jnp.einsum("sd,lde->lse", pos_emb, w_r_all)          # [L, S, D] f32
    rk_all = rk_all.reshape(n_layers, s, nhead, dh)
    rk_all = jnp.transpose(rk_all, (0, 2, 1, 3)).astype(jnp.bfloat16)  # [L,H,S,dh]

    for li, lp in enumerate(params["layers"]):
        qkv = qkv_project(x2d, lp["w_qkv"], tm=row_tile,
                          vmem_limit=vmem_limit)                  # [B*S, 3D] bf16
        qkv_h = jnp.transpose(qkv.reshape(b, s, 3, nhead, dh),
                              (2, 0, 3, 1, 4))                    # [3, B, H, S, dh]
        av = rel_attention(qkv_h, rk_all[li],
                           lp["r_w_bias"].reshape(nhead, 1, dh),
                           lp["r_r_bias"].reshape(nhead, 1, dh),
                           add_mask, scale=scale,
                           vmem_limit=vmem_limit)                 # [B, H, S, dh]
        av2d = jnp.transpose(av, (0, 2, 1, 3)).reshape(b * s, d)  # [B*S, D] bf16
        x2d = post_attention(av2d, x2d, lp,
                             params["ln_f_w"], params["ln_f_b"],
                             apply_final_ln=(li == n_layers - 1),
                             tm=row_tile, vmem_limit=vmem_limit)  # [B*S, D] f32

    return x2d.reshape(b, s, d)


def init_params(seed, d_model, nhead, dim_ff, num_layers):
    dh = d_model // nhead
    key = jax.random.PRNGKey(seed)

    def nxt():
        nonlocal key
        key, sub = jax.random.split(key)
        return sub

    def xavier(shape, dtype=jnp.float32):
        lim = (6.0 / (shape[0] + shape[-1])) ** 0.5
        return jax.random.uniform(nxt(), shape, jnp.float32, -lim, lim).astype(dtype)

    layers = []
    for _ in range(num_layers):
        layers.append(dict(
            w_qkv=xavier((d_model, 3 * d_model), jnp.bfloat16),   # qkv_net (no bias)
            w_r=xavier((d_model, d_model)),                       # r_net (no bias)
            w_o=xavier((d_model, d_model), jnp.bfloat16),         # o_net (no bias)
            r_w_bias=xavier((nhead, dh)),
            r_r_bias=xavier((nhead, dh)),
            ln1_w=jnp.ones((1, d_model), jnp.float32),            # attn layer_norm
            ln1_b=jnp.zeros((1, d_model), jnp.float32),
            w1=xavier((d_model, dim_ff), jnp.bfloat16),
            b1=jnp.zeros((1, dim_ff), jnp.float32),
            w2=xavier((dim_ff, d_model), jnp.bfloat16),
            b2=jnp.zeros((1, d_model), jnp.float32),
            ln2_w=jnp.ones((1, d_model), jnp.float32),            # norm2
            ln2_b=jnp.zeros((1, d_model), jnp.float32),
        ))
    return dict(layers=layers,
                ln_f_w=jnp.ones((1, d_model), jnp.float32),
                ln_f_b=jnp.zeros((1, d_model), jnp.float32))


if __name__ == "__main__":
    # S is a multiple of 128 so the [S, S] score block is fully (8,128)-aligned
    # for the strided XLU roll; other dims stay small.
    B, S, D = 2, 128, 32
    NHEAD, DIM_FF, NUM_LAYERS, CLAMP_LEN = 4, 64, 2, 50

    params = init_params(0, D, NHEAD, DIM_FF, NUM_LAYERS)

    key = jax.random.PRNGKey(0)
    k_src, _ = jax.random.split(key)
    src = jax.random.normal(k_src, (B, S, D), dtype=jnp.float32)
    # padding mask: True = padded key position
    src_key_padding_mask = jnp.zeros((B, S), dtype=bool).at[1, 100:].set(True)

    fwd = jax.jit(functools.partial(transformer_xl_encoder,
                                    nhead=NHEAD, clamp_len=CLAMP_LEN))
    out = fwd(src, src_key_padding_mask, params)
    out = jax.block_until_ready(out)
    assert out.shape == (B, S, D) and bool(jnp.all(jnp.isfinite(out)))
    print("KERNEL_OK")
</pallas_src>

<mosaic_0001>
module attributes {stable_mosaic.version = 11 : i64} {
  func.func @_matmul_kernel(%arg0: i32, %arg1: i32, %arg2: i32, %arg3: memref<256x32xf32, #tpu.memory_space<vmem>>, %arg4: memref<32x96xbf16, #tpu.memory_space<vmem>>, %arg5: memref<256x96xbf16, #tpu.memory_space<vmem>>, %arg6: memref<256x96xf32, #tpu.memory_space<vmem>>) attributes {dimension_semantics = [#tpu.dimension_semantics<parallel>, #tpu.dimension_semantics<parallel>, #tpu.dimension_semantics<arbitrary>], iteration_bounds = array<i64: 1, 1, 1>, scalar_prefetch = 0 : i64, scratch_operands = 1 : i64, tpu.core_type = #tpu.core_type<tc>, window_params = [{transform_indices = @transform_0, window_bounds = array<i64: 256, 32>}, {transform_indices = @transform_1, window_bounds = array<i64: 32, 96>}, {transform_indices = @transform_2, window_bounds = array<i64: 256, 96>}]} {
    %c0_i32 = arith.constant 0 : i32
    %0 = arith.cmpi eq, %arg2, %c0_i32 : i32
    %1 = arith.extui %0 : i1 to i32
    %c0_i32_0 = arith.constant 0 : i32
    %2 = arith.cmpi ne, %1, %c0_i32_0 : i32
    scf.if %2 {
      %cst_10 = arith.constant 0.000000e+00 : f32
      %13 = vector.broadcast %cst_10 : f32 to vector<256x96xf32>
      %c0_11 = arith.constant 0 : index
      %c0_12 = arith.constant 0 : index
      %14 = vector.load %arg6[%c0_11, %c0_12] : memref<256x96xf32, #tpu.memory_space<vmem>>, vector<256x96xf32>
      tpu.vector_store %arg6[%c0_11, %c0_12], %13 {strides = array<i32>} : memref<256x96xf32, #tpu.memory_space<vmem>>, vector<256x96xf32>,
    } else {
    }
    %c0 = arith.constant 0 : index
    %c0_1 = arith.constant 0 : index
    %3 = vector.load %arg6[%c0, %c0_1] : memref<256x96xf32, #tpu.memory_space<vmem>>, vector<256x96xf32>
    %c0_2 = arith.constant 0 : index
    %c0_3 = arith.constant 0 : index
    %4 = vector.load %arg3[%c0_2, %c0_3] : memref<256x32xf32, #tpu.memory_space<vmem>>, vector<256x32xf32>
    %5 = arith.truncf %4 : vector<256x32xf32> to vector<256x32xbf16>
    %c0_4 = arith.constant 0 : index
    %c0_5 = arith.constant 0 : index
    %6 = vector.load %arg4[%c0_4, %c0_5] : memref<32x96xbf16, #tpu.memory_space<vmem>>, vector<32x96xbf16>
    %cst = arith.constant dense<0.000000e+00> : vector<256x96xf32>
    %7 = tpu.matmul %5, %6, %cst {dimension_numbers = #tpu.dot_dimension_numbers<[1], [0], [0], [1], [0, 0, 1, 1], [], []>} : vector<256x32xbf16>, vector<32x96xbf16>, vector<256x96xf32> -> vector<256x96xf32>
    %8 = arith.addf %3, %7 : vector<256x96xf32>
    %c0_6 = arith.constant 0 : index
    %c0_7 = arith.constant 0 : index
    %9 = vector.load %arg6[%c0_6, %c0_7] : memref<256x96xf32, #tpu.memory_space<vmem>>, vector<256x96xf32>
    tpu.vector_store %arg6[%c0_6, %c0_7], %8 {strides = array<i32>} : memref<256x96xf32, #tpu.memory_space<vmem>>, vector<256x96xf32>,
    %c0_i32_8 = arith.constant 0 : i32
    %10 = arith.cmpi eq, %arg2, %c0_i32_8 : i32
    %11 = arith.extui %10 : i1 to i32
    %c0_i32_9 = arith.constant 0 : i32
    %12 = arith.cmpi ne, %11, %c0_i32_9 : i32
    scf.if %12 {
      %c0_10 = arith.constant 0 : index
      %c0_11 = arith.constant 0 : index
      %13 = vector.load %arg6[%c0_10, %c0_11] : memref<256x96xf32, #tpu.memory_space<vmem>>, vector<256x96xf32>
      %14 = arith.truncf %13 : vector<256x96xf32> to vector<256x96xbf16>
      %c0_12 = arith.constant 0 : index
      %c0_13 = arith.constant 0 : index
      %15 = vector.load %arg5[%c0_12, %c0_13] : memref<256x96xbf16, #tpu.memory_space<vmem>>, vector<256x96xbf16>
      tpu.vector_store %arg5[%c0_12, %c0_13], %14 {strides = array<i32>} : memref<256x96xbf16, #tpu.memory_space<vmem>>, vector<256x96xbf16>,
    } else {
    }
    return
  }
  func.func @transform_0(%arg0: i32, %arg1: i32, %arg2: i32) -> (i32, i32) {
    %c0_i32 = arith.constant 0 : i32
    return %arg0, %arg2 : i32, i32
  }
  func.func @transform_1(%arg0: i32, %arg1: i32, %arg2: i32) -> (i32, i32) {
    %c0_i32 = arith.constant 0 : i32
    return %arg2, %arg1 : i32, i32
  }
  func.func @transform_2(%arg0: i32, %arg1: i32, %arg2: i32) -> (i32, i32) {
    %c0_i32 = arith.constant 0 : i32
    return %arg0, %arg1 : i32, i32
  }
}

module attributes {stable_mosaic.version = 11 : i64} {
  func.func @_rel_attn_kernel(%arg0: i32, %arg1: i32, %arg2: memref<3x1x1x128x8xbf16, #tpu.memory_space<vmem>>, %arg3: memref<1x128x8xbf16, #tpu.memory_space<vmem>>, %arg4: memref<1x1x8xf32, #tpu.memory_space<vmem>>, %arg5: memref<1x1x8xf32, #tpu.memory_space<vmem>>, %arg6: memref<1x1x128xf32, #tpu.memory_space<vmem>>, %arg7: memref<1x1x128x8xbf16, #tpu.memory_space<vmem>>) attributes {dimension_semantics = [#tpu.dimension_semantics<parallel>, #tpu.dimension_semantics<parallel>], iteration_bounds = array<i64: 2, 4>, scalar_prefetch = 0 : i64, scratch_operands = 0 : i64, tpu.core_type = #tpu.core_type<tc>, window_params = [{transform_indices = @transform_0, window_bounds = array<i64: 3, 1, 1, 128, 8>}, {transform_indices = @transform_1, window_bounds = array<i64: 1, 128, 8>}, {transform_indices = @transform_2, window_bounds = array<i64: 1, 1, 8>}, {transform_indices = @transform_3, window_bounds = array<i64: 1, 1, 8>}, {transform_indices = @transform_4, window_bounds = array<i64: 1, 1, 128>}, {transform_indices = @transform_5, window_bounds = array<i64: 1, 1, 128, 8>}]} {
    %c0 = arith.constant 0 : index
    %c0_0 = arith.constant 0 : index
    %c0_1 = arith.constant 0 : index
    %c0_2 = arith.constant 0 : index
    %c0_3 = arith.constant 0 : index
    %0 = vector.load %arg2[%c0, %c0_0, %c0_1, %c0_2, %c0_3] : memref<3x1x1x128x8xbf16, #tpu.memory_space<vmem>>, vector<1x1x1x128x8xbf16>
    %1 = vector.shape_cast %0 : vector<1x1x1x128x8xbf16> to vector<128x8xbf16>
    %2 = arith.extf %1 : vector<128x8xbf16> to vector<128x8xf32>
    %c1 = arith.constant 1 : index
    %c0_4 = arith.constant 0 : index
    %c0_5 = arith.constant 0 : index
    %c0_6 = arith.constant 0 : index
    %c0_7 = arith.constant 0 : index
    %3 = vector.load %arg2[%c1, %c0_4, %c0_5, %c0_6, %c0_7] : memref<3x1x1x128x8xbf16, #tpu.memory_space<vmem>>, vector<1x1x1x128x8xbf16>
    %4 = vector.shape_cast %3 : vector<1x1x1x128x8xbf16> to vector<128x8xbf16>
    %c2 = arith.constant 2 : index
    %c0_8 = arith.constant 0 : index
    %c0_9 = arith.constant 0 : index
    %c0_10 = arith.constant 0 : index
    %c0_11 = arith.constant 0 : index
    %5 = vector.load %arg2[%c2, %c0_8, %c0_9, %c0_10, %c0_11] : memref<3x1x1x128x8xbf16, #tpu.memory_space<vmem>>, vector<1x1x1x128x8xbf16>
    %6 = vector.shape_cast %5 : vector<1x1x1x128x8xbf16> to vector<128x8xbf16>
    %c0_12 = arith.constant 0 : index
    %c0_13 = arith.constant 0 : index
    %c0_14 = arith.constant 0 : index
    %7 = vector.load %arg3[%c0_12, %c0_13, %c0_14] : memref<1x128x8xbf16, #tpu.memory_space<vmem>>, vector<1x128x8xbf16>
    %8 = vector.shape_cast %7 : vector<1x128x8xbf16> to vector<128x8xbf16>
    %c0_15 = arith.constant 0 : index
    %c0_16 = arith.constant 0 : index
    %c0_17 = arith.constant 0 : index
    %9 = vector.load %arg4[%c0_15, %c0_16, %c0_17] : memref<1x1x8xf32, #tpu.memory_space<vmem>>, vector<1x1x8xf32>
    %10 = vector.shape_cast %9 : vector<1x1x8xf32> to vector<1x8xf32>
    %c0_18 = arith.constant 0 : index
    %c0_19 = arith.constant 0 : index
    %c0_20 = arith.constant 0 : index
    %11 = vector.load %arg5[%c0_18, %c0_19, %c0_20] : memref<1x1x8xf32, #tpu.memory_space<vmem>>, vector<1x1x8xf32>
    %12 = vector.shape_cast %11 : vector<1x1x8xf32> to vector<1x8xf32>
    %c0_21 = arith.constant 0 : index
    %c0_22 = arith.constant 0 : index
    %c0_23 = arith.constant 0 : index
    %13 = vector.load %arg6[%c0_21, %c0_22, %c0_23] : memref<1x1x128xf32, #tpu.memory_space<vmem>>, vector<1x1x128xf32>
    %14 = vector.shape_cast %13 : vector<1x1x128xf32> to vector<1x128xf32>
    %15 = vector.broadcast %10 : vector<1x8xf32> to vector<128x8xf32>
    %16 = arith.addf %2, %15 : vector<128x8xf32>
    %cst = arith.constant 0.353553385 : f32
    %17 = vector.broadcast %cst : f32 to vector<128x8xf32>
    %18 = arith.mulf %16, %17 : vector<128x8xf32>
    %19 = arith.truncf %18 : vector<128x8xf32> to vector<128x8xbf16>
    %20 = vector.broadcast %12 : vector<1x8xf32> to vector<128x8xf32>
    %21 = arith.addf %2, %20 : vector<128x8xf32>
    %cst_24 = arith.constant 0.353553385 : f32
    %22 = vector.broadcast %cst_24 : f32 to vector<128x8xf32>
    %23 = arith.mulf %21, %22 : vector<128x8xf32>
    %24 = arith.truncf %23 : vector<128x8xf32> to vector<128x8xbf16>
    %cst_25 = arith.constant dense<0.000000e+00> : vector<128x128xf32>
    %25 = tpu.matmul %19, %4, %cst_25 {dimension_numbers = #tpu.dot_dimension_numbers<[1], [1], [0], [0], [0, 0, 1, 0], [], []>} : vector<128x8xbf16>, vector<128x8xbf16>, vector<128x128xf32> -> vector<128x128xf32>
    %cst_26 = arith.constant dense<0.000000e+00> : vector<128x128xf32>
    %26 = tpu.matmul %24, %8, %cst_26 {dimension_numbers = #tpu.dot_dimension_numbers<[1], [1], [0], [0], [0, 0, 1, 0], [], []>} : vector<128x8xbf16>, vector<128x8xbf16>, vector<128x128xf32> -> vector<128x128xf32>
    %27 = tpu.iota {dimensions = array<i32: 0>} : vector<128x128xi32>
    %28 = tpu.iota {dimensions = array<i32: 1>} : vector<128x128xi32>
    %c1_i32 = arith.constant 1 : i32
    %29 = tpu.dynamic_rotate %26 by %c1_i32 dim 1 {stride = 1 : si32, stride_dimension = 0 : si32} : vector<128x128xf32>, i32 -> vector<128x128xf32>
    %c127_i32 = arith.constant 127 : i32
    %30 = tpu.dynamic_rotate %29 by %c127_i32 dim 0 : vector<128x128xf32>, i32 -> vector<128x128xf32>
    %31 = arith.cmpi sle, %28, %27 : vector<128x128xi32>
    %c1_i32_27 = arith.constant 1 : i32
    %32 = vector.broadcast %c1_i32_27 : i32 to vector<128x128xi32>
    %33 = arith.addi %27, %32 : vector<128x128xi32>
    %34 = arith.cmpi eq, %28, %33 : vector<128x128xi32>
    %cst_28 = arith.constant 0.000000e+00 : f32
    %35 = vector.broadcast %cst_28 : f32 to vector<128x128xf32>
    %36 = arith.select %34, %35, %30 : vector<128x128xi1>, vector<128x128xf32>
    %37 = arith.select %31, %29, %36 : vector<128x128xi1>, vector<128x128xf32>
    %38 = arith.addf %25, %37 : vector<128x128xf32>
    %39 = vector.broadcast %14 : vector<1x128xf32> to vector<128x128xf32>
    %40 = arith.addf %38, %39 : vector<128x128xf32>
    %cst_29 = arith.constant dense<0xFF800000> : vector<128xf32>
    %41 = vector.multi_reduction <maximumf>, %40, %cst_29 [1] : vector<128x128xf32> to vector<128xf32>
    %42 = vector.shape_cast %41 : vector<128xf32> to vector<128x1xf32>
    %43 = vector.broadcast %42 : vector<128x1xf32> to vector<128x128xf32>
    %44 = arith.subf %40, %43 : vector<128x128xf32>
    %45 = math.exp %44 : vector<128x128xf32>
    %cst_30 = arith.constant dense<0.000000e+00> : vector<128xf32>
    %46 = vector.multi_reduction <add>, %45, %cst_30 [1] : vector<128x128xf32> to vector<128xf32>
    %47 = vector.shape_cast %46 : vector<128xf32> to vector<128x1xf32>
    %48 = tpu.reciprocal %47 {approx = true} : vector<128x1xf32> -> vector<128x1xf32>
    %49 = vector.broadcast %48 : vector<128x1xf32> to vector<128x128xf32>
    %50 = arith.mulf %45, %49 : vector<128x128xf32>
    %51 = arith.truncf %50 : vector<128x128xf32> to vector<128x128xbf16>
    %cst_31 = arith.constant dense<0.000000e+00> : vector<128x8xf32>
    %52 = tpu.matmul %51, %6, %cst_31 {dimension_numbers = #tpu.dot_dimension_numbers<[1], [0], [0], [1], [0, 0, 1, 1], [], []>} : vector<128x128xbf16>, vector<128x8xbf16>, vector<128x8xf32> -> vector<128x8xf32>
    %53 = arith.truncf %52 : vector<128x8xf32> to vector<128x8xbf16>
    %c0_32 = arith.constant 0 : index
    %c0_33 = arith.constant 0 : index
    %c0_34 = arith.constant 0 : index
    %c0_35 = arith.constant 0 : index
    %54 = vector.load %arg7[%c0_32, %c0_33, %c0_34, %c0_35] : memref<1x1x128x8xbf16, #tpu.memory_space<vmem>>, vector<1x1x128x8xbf16>
    %55 = vector.shape_cast %54 : vector<1x1x128x8xbf16> to vector<128x8xbf16>
    %56 = vector.shape_cast %53 : vector<128x8xbf16> to vector<1x1x128x8xbf16>
    tpu.vector_store %arg7[%c0_32, %c0_33, %c0_34, %c0_35], %56 {strides = array<i32>} : memref<1x1x128x8xbf16, #tpu.memory_space<vmem>>, vector<1x1x128x8xbf16>,
    return
  }
  func.func @transform_0(%arg0: i32, %arg1: i32) -> (i32, i32, i32, i32, i32) {
    %c0_i32 = arith.constant 0 : i32
    %c0_i32_0 = arith.constant 0 : i32
    %c0_i32_1 = arith.constant 0 : i32
    %c0_i32_2 = arith.constant 0 : i32
    return %c0_i32, %arg0, %arg1, %c0_i32_0, %c0_i32_1 : i32, i32, i32, i32, i32
  }
  func.func @transform_1(%arg0: i32, %arg1: i32) -> (i32, i32, i32) {
    %c0_i32 = arith.constant 0 : i32
    %c0_i32_0 = arith.constant 0 : i32
    %c0_i32_1 = arith.constant 0 : i32
    return %arg1, %c0_i32, %c0_i32_0 : i32, i32, i32
  }
  func.func @transform_2(%arg0: i32, %arg1: i32) -> (i32, i32, i32) {
    %c0_i32 = arith.constant 0 : i32
    %c0_i32_0 = arith.constant 0 : i32
    %c0_i32_1 = arith.constant 0 : i32
    return %arg1, %c0_i32, %c0_i32_0 : i32, i32, i32
  }
  func.func @transform_3(%arg0: i32, %arg1: i32) -> (i32, i32, i32) {
    %c0_i32 = arith.constant 0 : i32
    %c0_i32_0 = arith.constant 0 : i32
    %c0_i32_1 = arith.constant 0 : i32
    return %arg1, %c0_i32, %c0_i32_0 : i32, i32, i32
  }
  func.func @transform_4(%arg0: i32, %arg1: i32) -> (i32, i32, i32) {
    %c0_i32 = arith.constant 0 : i32
    %c0_i32_0 = arith.constant 0 : i32
    %c0_i32_1 = arith.constant 0 : i32
    return %arg0, %c0_i32, %c0_i32_0 : i32, i32, i32
  }
  func.func @transform_5(%arg0: i32, %arg1: i32) -> (i32, i32, i32, i32) {
    %c0_i32 = arith.constant 0 : i32
    %c0_i32_0 = arith.constant 0 : i32
    %c0_i32_1 = arith.constant 0 : i32
    return %arg0, %arg1, %c0_i32, %c0_i32_0 : i32, i32, i32, i32
  }
}

module attributes {stable_mosaic.version = 11 : i64} {
  func.func @_post_attn_kernel(%arg0: i32, %arg1: i32, %arg2: memref<256x32xbf16, #tpu.memory_space<vmem>>, %arg3: memref<256x32xf32, #tpu.memory_space<vmem>>, %arg4: memref<32x32xbf16, #tpu.memory_space<vmem>>, %arg5: memref<1x32xf32, #tpu.memory_space<vmem>>, %arg6: memref<1x32xf32, #tpu.memory_space<vmem>>, %arg7: memref<32x64xbf16, #tpu.memory_space<vmem>>, %arg8: memref<1x64xf32, #tpu.memory_space<vmem>>, %arg9: memref<64x32xbf16, #tpu.memory_space<vmem>>, %arg10: memref<1x32xf32, #tpu.memory_space<vmem>>, %arg11: memref<1x32xf32, #tpu.memory_space<vmem>>, %arg12: memref<1x32xf32, #tpu.memory_space<vmem>>, %arg13: memref<1x32xf32, #tpu.memory_space<vmem>>, %arg14: memref<1x32xf32, #tpu.memory_space<vmem>>, %arg15: memref<256x32xf32, #tpu.memory_space<vmem>>, %arg16: memref<256x32xf32, #tpu.memory_space<vmem>>, %arg17: memref<256x32xf32, #tpu.memory_space<vmem>>) attributes {dimension_semantics = [#tpu.dimension_semantics<parallel>, #tpu.dimension_semantics<arbitrary>], iteration_bounds = array<i64: 1, 1>, scalar_prefetch = 0 : i64, scratch_operands = 2 : i64, tpu.core_type = #tpu.core_type<tc>, window_params = [{transform_indices = @transform_0, window_bounds = array<i64: 256, 32>}, {transform_indices = @transform_1, window_bounds = array<i64: 256, 32>}, {pipeline_mode = #tpu.pipeline_mode<synchronous>, transform_indices = @transform_2, window_bounds = array<i64: 32, 32>}, {pipeline_mode = #tpu.pipeline_mode<synchronous>, transform_indices = @transform_3, window_bounds = array<i64: 1, 32>}, {pipeline_mode = #tpu.pipeline_mode<synchronous>, transform_indices = @transform_4, window_bounds = array<i64: 1, 32>}, {transform_indices = @transform_5, window_bounds = array<i64: 32, 64>}, {transform_indices = @transform_6, window_bounds = array<i64: 1, 64>}, {transform_indices = @transform_7, window_bounds = array<i64: 64, 32>}, {pipeline_mode = #tpu.pipeline_mode<synchronous>, transform_indices = @transform_8, window_bounds = array<i64: 1, 32>}, {pipeline_mode = #tpu.pipeline_mode<synchronous>, transform_indices = @transform_9, window_bounds = array<i64: 1, 32>}, {pipeline_mode = #tpu.pipeline_mode<synchronous>, transform_indices = @transform_10, window_bounds = array<i64: 1, 32>}, {pipeline_mode = #tpu.pipeline_mode<synchronous>, transform_indices = @transform_11, window_bounds = array<i64: 1, 32>}, {pipeline_mode = #tpu.pipeline_mode<synchronous>, transform_indices = @transform_12, window_bounds = array<i64: 1, 32>}, {transform_indices = @transform_13, window_bounds = array<i64: 256, 32>}]} {
    %c0_i32 = arith.constant 0 : i32
    %0 = arith.cmpi eq, %arg1, %c0_i32 : i32
    %1 = arith.extui %0 : i1 to i32
    %c0_i32_0 = arith.constant 0 : i32
    %2 = arith.cmpi ne, %1, %c0_i32_0 : i32
    scf.if %2 {
      %c0_16 = arith.constant 0 : index
      %c0_17 = arith.constant 0 : index
      %21 = vector.load %arg2[%c0_16, %c0_17] : memref<256x32xbf16, #tpu.memory_space<vmem>>, vector<256x32xbf16>
      %c0_18 = arith.constant 0 : index
      %c0_19 = arith.constant 0 : index
      %22 = vector.load %arg4[%c0_18, %c0_19] : memref<32x32xbf16, #tpu.memory_space<vmem>>, vector<32x32xbf16>
      %cst_20 = arith.constant dense<0.000000e+00> : vector<256x32xf32>
      %23 = tpu.matmul %21, %22, %cst_20 {dimension_numbers = #tpu.dot_dimension_numbers<[1], [0], [0], [1], [0, 0, 1, 1], [], []>} : vector<256x32xbf16>, vector<32x32xbf16>, vector<256x32xf32> -> vector<256x32xf32>
      %c0_21 = arith.constant 0 : index
      %c0_22 = arith.constant 0 : index
      %24 = vector.load %arg3[%c0_21, %c0_22] : memref<256x32xf32, #tpu.memory_space<vmem>>, vector<256x32xf32>
      %25 = arith.addf %24, %23 : vector<256x32xf32>
      %c0_23 = arith.constant 0 : index
      %c0_24 = arith.constant 0 : index
      %26 = vector.load %arg5[%c0_23, %c0_24] : memref<1x32xf32, #tpu.memory_space<vmem>>, vector<1x32xf32>
      %c0_25 = arith.constant 0 : index
      %c0_26 = arith.constant 0 : index
      %27 = vector.load %arg6[%c0_25, %c0_26] : memref<1x32xf32, #tpu.memory_space<vmem>>, vector<1x32xf32>
      %cst_27 = arith.constant dense<0.000000e+00> : vector<256xf32>
      %28 = vector.multi_reduction <add>, %25, %cst_27 [1] : vector<256x32xf32> to vector<256xf32>
      %29 = vector.shape_cast %28 : vector<256xf32> to vector<256x1xf32>
      %cst_28 = arith.constant 3.200000e+01 : f32
      %30 = vector.broadcast %cst_28 : f32 to vector<256x1xf32>
      %31 = arith.divf %29, %30 : vector<256x1xf32>
      %32 = vector.broadcast %31 : vector<256x1xf32> to vector<256x32xf32>
      %33 = arith.subf %25, %32 : vector<256x32xf32>
      %34 = arith.mulf %33, %33 : vector<256x32xf32>
      %cst_29 = arith.constant dense<0.000000e+00> : vector<256xf32>
      %35 = vector.multi_reduction <add>, %34, %cst_29 [1] : vector<256x32xf32> to vector<256xf32>
      %36 = vector.shape_cast %35 : vector<256xf32> to vector<256x1xf32>
      %cst_30 = arith.constant 3.200000e+01 : f32
      %37 = vector.broadcast %cst_30 : f32 to vector<256x1xf32>
      %38 = arith.divf %36, %37 : vector<256x1xf32>
      %39 = vector.broadcast %31 : vector<256x1xf32> to vector<256x32xf32>
      %40 = arith.subf %25, %39 : vector<256x32xf32>
      %cst_31 = arith.constant 9.99999974E-6 : f32
      %41 = vector.broadcast %cst_31 : f32 to vector<256x1xf32>
      %42 = arith.addf %38, %41 : vector<256x1xf32>
      %43 = math.rsqrt %42 : vector<256x1xf32>
      %44 = vector.broadcast %43 : vector<256x1xf32> to vector<256x32xf32>
      %45 = arith.mulf %40, %44 : vector<256x32xf32>
      %46 = vector.broadcast %26 : vector<1x32xf32> to vector<256x32xf32>
      %47 = arith.mulf %45, %46 : vector<256x32xf32>
      %48 = vector.broadcast %27 : vector<1x32xf32> to vector<256x32xf32>
      %49 = arith.addf %47, %48 : vector<256x32xf32>
      %c0_32 = arith.constant 0 : index
      %c0_33 = arith.constant 0 : index
      %50 = vector.load %arg16[%c0_32, %c0_33] : memref<256x32xf32, #tpu.memory_space<vmem>>, vector<256x32xf32>
      tpu.vector_store %arg16[%c0_32, %c0_33], %49 {strides = array<i32>} : memref<256x32xf32, #tpu.memory_space<vmem>>, vector<256x32xf32>,
      %cst_34 = arith.constant 0.000000e+00 : f32
      %51 = vector.broadcast %cst_34 : f32 to vector<256x32xf32>
      %c0_35 = arith.constant 0 : index
      %c0_36 = arith.constant 0 : index
      %52 = vector.load %arg17[%c0_35, %c0_36] : memref<256x32xf32, #tpu.memory_space<vmem>>, vector<256x32xf32>
      tpu.vector_store %arg17[%c0_35, %c0_36], %51 {strides = array<i32>} : memref<256x32xf32, #tpu.memory_space<vmem>>, vector<256x32xf32>,
    } else {
    }
    %c0 = arith.constant 0 : index
    %c0_1 = arith.constant 0 : index
    %3 = vector.load %arg16[%c0, %c0_1] : memref<256x32xf32, #tpu.memory_space<vmem>>, vector<256x32xf32>
    %4 = arith.truncf %3 : vector<256x32xf32> to vector<256x32xbf16>
    %c0_2 = arith.constant 0 : index
    %c0_3 = arith.constant 0 : index
    %5 = vector.load %arg7[%c0_2, %c0_3] : memref<32x64xbf16, #tpu.memory_space<vmem>>, vector<32x64xbf16>
    %cst = arith.constant dense<0.000000e+00> : vector<256x64xf32>
    %6 = tpu.matmul %4, %5, %cst {dimension_numbers = #tpu.dot_dimension_numbers<[1], [0], [0], [1], [0, 0, 1, 1], [], []>} : vector<256x32xbf16>, vector<32x64xbf16>, vector<256x64xf32> -> vector<256x64xf32>
    %c0_4 = arith.constant 0 : index
    %c0_5 = arith.constant 0 : index
    %7 = vector.load %arg8[%c0_4, %c0_5] : memref<1x64xf32, #tpu.memory_space<vmem>>, vector<1x64xf32>
    %8 = vector.broadcast %7 : vector<1x64xf32> to vector<256x64xf32>
    %9 = arith.addf %6, %8 : vector<256x64xf32>
    %cst_6 = arith.constant 0.000000e+00 : f32
    %10 = vector.broadcast %cst_6 : f32 to vector<256x64xf32>
    %11 = arith.maximumf %9, %10 : vector<256x64xf32>
    %c0_7 = arith.constant 0 : index
    %c0_8 = arith.constant 0 : index
    %12 = vector.load %arg17[%c0_7, %c0_8] : memref<256x32xf32, #tpu.memory_space<vmem>>, vector<256x32xf32>
    %13 = arith.truncf %11 : vector<256x64xf32> to vector<256x64xbf16>
    %c0_9 = arith.constant 0 : index
    %c0_10 = arith.constant 0 : index
    %14 = vector.load %arg9[%c0_9, %c0_10] : memref<64x32xbf16, #tpu.memory_space<vmem>>, vector<64x32xbf16>
    %cst_11 = arith.constant dense<0.000000e+00> : vector<256x32xf32>
    %15 = tpu.matmul %13, %14, %cst_11 {dimension_numbers = #tpu.dot_dimension_numbers<[1], [0], [0], [1], [0, 0, 1, 1], [], []>} : vector<256x64xbf16>, vector<64x32xbf16>, vector<256x32xf32> -> vector<256x32xf32>
    %16 = arith.addf %12, %15 : vector<256x32xf32>
    %c0_12 = arith.constant 0 : index
    %c0_13 = arith.constant 0 : index
    %17 = vector.load %arg17[%c0_12, %c0_13] : memref<256x32xf32, #tpu.memory_space<vmem>>, vector<256x32xf32>
    tpu.vector_store %arg17[%c0_12, %c0_13], %16 {strides = array<i32>} : memref<256x32xf32, #tpu.memory_space<vmem>>, vector<256x32xf32>,
    %c0_i32_14 = arith.constant 0 : i32
    %18 = arith.cmpi eq, %arg1, %c0_i32_14 : i32
    %19 = arith.extui %18 : i1 to i32
    %c0_i32_15 = arith.constant 0 : i32
    %20 = arith.cmpi ne, %19, %c0_i32_15 : i32
    scf.if %20 {
      %c0_16 = arith.constant 0 : index
      %c0_17 = arith.constant 0 : index
      %21 = vector.load %arg16[%c0_16, %c0_17] : memref<256x32xf32, #tpu.memory_space<vmem>>, vector<256x32xf32>
      %c0_18 = arith.constant 0 : index
      %c0_19 = arith.constant 0 : index
      %22 = vector.load %arg17[%c0_18, %c0_19] : memref<256x32xf32, #tpu.memory_space<vmem>>, vector<256x32xf32>
      %23 = arith.addf %21, %22 : vector<256x32xf32>
      %c0_20 = arith.constant 0 : index
      %c0_21 = arith.constant 0 : index
      %24 = vector.load %arg10[%c0_20, %c0_21] : memref<1x32xf32, #tpu.memory_space<vmem>>, vector<1x32xf32>
      %25 = vector.broadcast %24 : vector<1x32xf32> to vector<256x32xf32>
      %26 = arith.addf %23, %25 : vector<256x32xf32>
      %c0_22 = arith.constant 0 : index
      %c0_23 = arith.constant 0 : index
      %27 = vector.load %arg11[%c0_22, %c0_23] : memref<1x32xf32, #tpu.memory_space<vmem>>, vector<1x32xf32>
      %c0_24 = arith.constant 0 : index
      %c0_25 = arith.constant 0 : index
      %28 = vector.load %arg12[%c0_24, %c0_25] : memref<1x32xf32, #tpu.memory_space<vmem>>, vector<1x32xf32>
      %cst_26 = arith.constant dense<0.000000e+00> : vector<256xf32>
      %29 = vector.multi_reduction <add>, %26, %cst_26 [1] : vector<256x32xf32> to vector<256xf32>
      %30 = vector.shape_cast %29 : vector<256xf32> to vector<256x1xf32>
      %cst_27 = arith.constant 3.200000e+01 : f32
      %31 = vector.broadcast %cst_27 : f32 to vector<256x1xf32>
      %32 = arith.divf %30, %31 : vector<256x1xf32>
      %33 = vector.broadcast %32 : vector<256x1xf32> to vector<256x32xf32>
      %34 = arith.subf %26, %33 : vector<256x32xf32>
      %35 = arith.mulf %34, %34 : vector<256x32xf32>
      %cst_28 = arith.constant dense<0.000000e+00> : vector<256xf32>
      %36 = vector.multi_reduction <add>, %35, %cst_28 [1] : vector<256x32xf32> to vector<256xf32>
      %37 = vector.shape_cast %36 : vector<256xf32> to vector<256x1xf32>
      %cst_29 = arith.constant 3.200000e+01 : f32
      %38 = vector.broadcast %cst_29 : f32 to vector<256x1xf32>
      %39 = arith.divf %37, %38 : vector<256x1xf32>
      %40 = vector.broadcast %32 : vector<256x1xf32> to vector<256x32xf32>
      %41 = arith.subf %26, %40 : vector<256x32xf32>
      %cst_30 = arith.constant 9.99999974E-6 : f32
      %42 = vector.broadcast %cst_30 : f32 to vector<256x1xf32>
      %43 = arith.addf %39, %42 : vector<256x1xf32>
      %44 = math.rsqrt %43 : vector<256x1xf32>
      %45 = vector.broadcast %44 : vector<256x1xf32> to vector<256x32xf32>
      %46 = arith.mulf %41, %45 : vector<256x32xf32>
      %47 = vector.broadcast %27 : vector<1x32xf32> to vector<256x32xf32>
      %48 = arith.mulf %46, %47 : vector<256x32xf32>
      %49 = vector.broadcast %28 : vector<1x32xf32> to vector<256x32xf32>
      %50 = arith.addf %48, %49 : vector<256x32xf32>
      %c0_31 = arith.constant 0 : index
      %c0_32 = arith.constant 0 : index
      %51 = vector.load %arg15[%c0_31, %c0_32] : memref<256x32xf32, #tpu.memory_space<vmem>>, vector<256x32xf32>
      tpu.vector_store %arg15[%c0_31, %c0_32], %50 {strides = array<i32>} : memref<256x32xf32, #tpu.memory_space<vmem>>, vector<256x32xf32>,
    } else {
    }
    return
  }
  func.func @transform_0(%arg0: i32, %arg1: i32) -> (i32, i32) {
    %c0_i32 = arith.constant 0 : i32
    %c0_i32_0 = arith.constant 0 : i32
    return %arg0, %c0_i32 : i32, i32
  }
  func.func @transform_1(%arg0: i32, %arg1: i32) -> (i32, i32) {
    %c0_i32 = arith.constant 0 : i32
    %c0_i32_0 = arith.constant 0 : i32
    return %arg0, %c0_i32 : i32, i32
  }
  func.func @transform_2(%arg0: i32, %arg1: i32) -> (i32, i32) {
    %c0_i32 = arith.constant 0 : i32
    %c0_i32_0 = arith.constant 0 : i32
    %c0_i32_1 = arith.constant 0 : i32
    return %c0_i32, %c0_i32_0 : i32, i32
  }
  func.func @transform_3(%arg0: i32, %arg1: i32) -> (i32, i32) {
    %c0_i32 = arith.constant 0 : i32
    %c0_i32_0 = arith.constant 0 : i32
    %c0_i32_1 = arith.constant 0 : i32
    return %c0_i32, %c0_i32_0 : i32, i32
  }
  func.func @transform_4(%arg0: i32, %arg1: i32) -> (i32, i32) {
    %c0_i32 = arith.constant 0 : i32
    %c0_i32_0 = arith.constant 0 : i32
    %c0_i32_1 = arith.constant 0 : i32
    return %c0_i32, %c0_i32_0 : i32, i32
  }
  func.func @transform_5(%arg0: i32, %arg1: i32) -> (i32, i32) {
    %c0_i32 = arith.constant 0 : i32
    %c0_i32_0 = arith.constant 0 : i32
    return %c0_i32, %arg1 : i32, i32
  }
  func.func @transform_6(%arg0: i32, %arg1: i32) -> (i32, i32) {
    %c0_i32 = arith.constant 0 : i32
    %c0_i32_0 = arith.constant 0 : i32
    return %c0_i32, %arg1 : i32, i32
  }
  func.func @transform_7(%arg0: i32, %arg1: i32) -> (i32, i32) {
    %c0_i32 = arith.constant 0 : i32
    %c0_i32_0 = arith.constant 0 : i32
    return %arg1, %c0_i32 : i32, i32
  }
  func.func @transform_8(%arg0: i32, %arg1: i32) -> (i32, i32) {
    %c0_i32 = arith.constant 0 : i32
    %c0_i32_0 = arith.constant 0 : i32
    %c0_i32_1 = arith.constant 0 : i32
    return %c0_i32, %c0_i32_0 : i32, i32
  }
  func.func @transform_9(%arg0: i32, %arg1: i32) -> (i32, i32) {
    %c0_i32 = arith.constant 0 : i32
    %c0_i32_0 = arith.constant 0 : i32
    %c0_i32_1 = arith.constant 0 : i32
    return %c0_i32, %c0_i32_0 : i32, i32
  }
  func.func @transform_10(%arg0: i32, %arg1: i32) -> (i32, i32) {
    %c0_i32 = arith.constant 0 : i32
    %c0_i32_0 = arith.constant 0 : i32
    %c0_i32_1 = arith.constant 0 : i32
    return %c0_i32, %c0_i32_0 : i32, i32
  }
  func.func @transform_11(%arg0: i32, %arg1: i32) -> (i32, i32) {
    %c0_i32 = arith.constant 0 : i32
    %c0_i32_0 = arith.constant 0 : i32
    %c0_i32_1 = arith.constant 0 : i32
    return %c0_i32, %c0_i32_0 : i32, i32
  }
  func.func @transform_12(%arg0: i32, %arg1: i32) -> (i32, i32) {
    %c0_i32 = arith.constant 0 : i32
    %c0_i32_0 = arith.constant 0 : i32
    %c0_i32_1 = arith.constant 0 : i32
    return %c0_i32, %c0_i32_0 : i32, i32
  }
  func.func @transform_13(%arg0: i32, %arg1: i32) -> (i32, i32) {
    %c0_i32 = arith.constant 0 : i32
    %c0_i32_0 = arith.constant 0 : i32
    return %arg0, %c0_i32 : i32, i32
  }
}

module attributes {stable_mosaic.version = 11 : i64} {
  func.func @_post_attn_kernel(%arg0: i32, %arg1: i32, %arg2: memref<256x32xbf16, #tpu.memory_space<vmem>>, %arg3: memref<256x32xf32, #tpu.memory_space<vmem>>, %arg4: memref<32x32xbf16, #tpu.memory_space<vmem>>, %arg5: memref<1x32xf32, #tpu.memory_space<vmem>>, %arg6: memref<1x32xf32, #tpu.memory_space<vmem>>, %arg7: memref<32x64xbf16, #tpu.memory_space<vmem>>, %arg8: memref<1x64xf32, #tpu.memory_space<vmem>>, %arg9: memref<64x32xbf16, #tpu.memory_space<vmem>>, %arg10: memref<1x32xf32, #tpu.memory_space<vmem>>, %arg11: memref<1x32xf32, #tpu.memory_space<vmem>>, %arg12: memref<1x32xf32, #tpu.memory_space<vmem>>, %arg13: memref<1x32xf32, #tpu.memory_space<vmem>>, %arg14: memref<1x32xf32, #tpu.memory_space<vmem>>, %arg15: memref<256x32xf32, #tpu.memory_space<vmem>>, %arg16: memref<256x32xf32, #tpu.memory_space<vmem>>, %arg17: memref<256x32xf32, #tpu.memory_space<vmem>>) attributes {dimension_semantics = [#tpu.dimension_semantics<parallel>, #tpu.dimension_semantics<arbitrary>], iteration_bounds = array<i64: 1, 1>, scalar_prefetch = 0 : i64, scratch_operands = 2 : i64, tpu.core_type = #tpu.core_type<tc>, window_params = [{transform_indices = @transform_0, window_bounds = array<i64: 256, 32>}, {transform_indices = @transform_1, window_bounds = array<i64: 256, 32>}, {pipeline_mode = #tpu.pipeline_mode<synchronous>, transform_indices = @transform_2, window_bounds = array<i64: 32, 32>}, {pipeline_mode = #tpu.pipeline_mode<synchronous>, transform_indices = @transform_3, window_bounds = array<i64: 1, 32>}, {pipeline_mode = #tpu.pipeline_mode<synchronous>, transform_indices = @transform_4, window_bounds = array<i64: 1, 32>}, {transform_indices = @transform_5, window_bounds = array<i64: 32, 64>}, {transform_indices = @transform_6, window_bounds = array<i64: 1, 64>}, {transform_indices = @transform_7, window_bounds = array<i64: 64, 32>}, {pipeline_mode = #tpu.pipeline_mode<synchronous>, transform_indices = @transform_8, window_bounds = array<i64: 1, 32>}, {pipeline_mode = #tpu.pipeline_mode<synchronous>, transform_indices = @transform_9, window_bounds = array<i64: 1, 32>}, {pipeline_mode = #tpu.pipeline_mode<synchronous>, transform_indices = @transform_10, window_bounds = array<i64: 1, 32>}, {pipeline_mode = #tpu.pipeline_mode<synchronous>, transform_indices = @transform_11, window_bounds = array<i64: 1, 32>}, {pipeline_mode = #tpu.pipeline_mode<synchronous>, transform_indices = @transform_12, window_bounds = array<i64: 1, 32>}, {transform_indices = @transform_13, window_bounds = array<i64: 256, 32>}]} {
    %c0_i32 = arith.constant 0 : i32
    %0 = arith.cmpi eq, %arg1, %c0_i32 : i32
    %1 = arith.extui %0 : i1 to i32
    %c0_i32_0 = arith.constant 0 : i32
    %2 = arith.cmpi ne, %1, %c0_i32_0 : i32
    scf.if %2 {
      %c0_16 = arith.constant 0 : index
      %c0_17 = arith.constant 0 : index
      %21 = vector.load %arg2[%c0_16, %c0_17] : memref<256x32xbf16, #tpu.memory_space<vmem>>, vector<256x32xbf16>
      %c0_18 = arith.constant 0 : index
      %c0_19 = arith.constant 0 : index
      %22 = vector.load %arg4[%c0_18, %c0_19] : memref<32x32xbf16, #tpu.memory_space<vmem>>, vector<32x32xbf16>
      %cst_20 = arith.constant dense<0.000000e+00> : vector<256x32xf32>
      %23 = tpu.matmul %21, %22, %cst_20 {dimension_numbers = #tpu.dot_dimension_numbers<[1], [0], [0], [1], [0, 0, 1, 1], [], []>} : vector<256x32xbf16>, vector<32x32xbf16>, vector<256x32xf32> -> vector<256x32xf32>
      %c0_21 = arith.constant 0 : index
      %c0_22 = arith.constant 0 : index
      %24 = vector.load %arg3[%c0_21, %c0_22] : memref<256x32xf32, #tpu.memory_space<vmem>>, vector<256x32xf32>
      %25 = arith.addf %24, %23 : vector<256x32xf32>
      %c0_23 = arith.constant 0 : index
      %c0_24 = arith.constant 0 : index
      %26 = vector.load %arg5[%c0_23, %c0_24] : memref<1x32xf32, #tpu.memory_space<vmem>>, vector<1x32xf32>
      %c0_25 = arith.constant 0 : index
      %c0_26 = arith.constant 0 : index
      %27 = vector.load %arg6[%c0_25, %c0_26] : memref<1x32xf32, #tpu.memory_space<vmem>>, vector<1x32xf32>
      %cst_27 = arith.constant dense<0.000000e+00> : vector<256xf32>
      %28 = vector.multi_reduction <add>, %25, %cst_27 [1] : vector<256x32xf32> to vector<256xf32>
      %29 = vector.shape_cast %28 : vector<256xf32> to vector<256x1xf32>
      %cst_28 = arith.constant 3.200000e+01 : f32
      %30 = vector.broadcast %cst_28 : f32 to vector<256x1xf32>
      %31 = arith.divf %29, %30 : vector<256x1xf32>
      %32 = vector.broadcast %31 : vector<256x1xf32> to vector<256x32xf32>
      %33 = arith.subf %25, %32 : vector<256x32xf32>
      %34 = arith.mulf %33, %33 : vector<256x32xf32>
      %cst_29 = arith.constant dense<0.000000e+00> : vector<256xf32>
      %35 = vector.multi_reduction <add>, %34, %cst_29 [1] : vector<256x32xf32> to vector<256xf32>
      %36 = vector.shape_cast %35 : vector<256xf32> to vector<256x1xf32>
      %cst_30 = arith.constant 3.200000e+01 : f32
      %37 = vector.broadcast %cst_30 : f32 to vector<256x1xf32>
      %38 = arith.divf %36, %37 : vector<256x1xf32>
      %39 = vector.broadcast %31 : vector<256x1xf32> to vector<256x32xf32>
      %40 = arith.subf %25, %39 : vector<256x32xf32>
      %cst_31 = arith.constant 9.99999974E-6 : f32
      %41 = vector.broadcast %cst_31 : f32 to vector<256x1xf32>
      %42 = arith.addf %38, %41 : vector<256x1xf32>
      %43 = math.rsqrt %42 : vector<256x1xf32>
      %44 = vector.broadcast %43 : vector<256x1xf32> to vector<256x32xf32>
      %45 = arith.mulf %40, %44 : vector<256x32xf32>
      %46 = vector.broadcast %26 : vector<1x32xf32> to vector<256x32xf32>
      %47 = arith.mulf %45, %46 : vector<256x32xf32>
      %48 = vector.broadcast %27 : vector<1x32xf32> to vector<256x32xf32>
      %49 = arith.addf %47, %48 : vector<256x32xf32>
      %c0_32 = arith.constant 0 : index
      %c0_33 = arith.constant 0 : index
      %50 = vector.load %arg16[%c0_32, %c0_33] : memref<256x32xf32, #tpu.memory_space<vmem>>, vector<256x32xf32>
      tpu.vector_store %arg16[%c0_32, %c0_33], %49 {strides = array<i32>} : memref<256x32xf32, #tpu.memory_space<vmem>>, vector<256x32xf32>,
      %cst_34 = arith.constant 0.000000e+00 : f32
      %51 = vector.broadcast %cst_34 : f32 to vector<256x32xf32>
      %c0_35 = arith.constant 0 : index
      %c0_36 = arith.constant 0 : index
      %52 = vector.load %arg17[%c0_35, %c0_36] : memref<256x32xf32, #tpu.memory_space<vmem>>, vector<256x32xf32>
      tpu.vector_store %arg17[%c0_35, %c0_36], %51 {strides = array<i32>} : memref<256x32xf32, #tpu.memory_space<vmem>>, vector<256x32xf32>,
    } else {
    }
    %c0 = arith.constant 0 : index
    %c0_1 = arith.constant 0 : index
    %3 = vector.load %arg16[%c0, %c0_1] : memref<256x32xf32, #tpu.memory_space<vmem>>, vector<256x32xf32>
    %4 = arith.truncf %3 : vector<256x32xf32> to vector<256x32xbf16>
    %c0_2 = arith.constant 0 : index
    %c0_3 = arith.constant 0 : index
    %5 = vector.load %arg7[%c0_2, %c0_3] : memref<32x64xbf16, #tpu.memory_space<vmem>>, vector<32x64xbf16>
    %cst = arith.constant dense<0.000000e+00> : vector<256x64xf32>
    %6 = tpu.matmul %4, %5, %cst {dimension_numbers = #tpu.dot_dimension_numbers<[1], [0], [0], [1], [0, 0, 1, 1], [], []>} : vector<256x32xbf16>, vector<32x64xbf16>, vector<256x64xf32> -> vector<256x64xf32>
    %c0_4 = arith.constant 0 : index
    %c0_5 = arith.constant 0 : index
    %7 = vector.load %arg8[%c0_4, %c0_5] : memref<1x64xf32, #tpu.memory_space<vmem>>, vector<1x64xf32>
    %8 = vector.broadcast %7 : vector<1x64xf32> to vector<256x64xf32>
    %9 = arith.addf %6, %8 : vector<256x64xf32>
    %cst_6 = arith.constant 0.000000e+00 : f32
    %10 = vector.broadcast %cst_6 : f32 to vector<256x64xf32>
    %11 = arith.maximumf %9, %10 : vector<256x64xf32>
    %c0_7 = arith.constant 0 : index
    %c0_8 = arith.constant 0 : index
    %12 = vector.load %arg17[%c0_7, %c0_8] : memref<256x32xf32, #tpu.memory_space<vmem>>, vector<256x32xf32>
    %13 = arith.truncf %11 : vector<256x64xf32> to vector<256x64xbf16>
    %c0_9 = arith.constant 0 : index
    %c0_10 = arith.constant 0 : index
    %14 = vector.load %arg9[%c0_9, %c0_10] : memref<64x32xbf16, #tpu.memory_space<vmem>>, vector<64x32xbf16>
    %cst_11 = arith.constant dense<0.000000e+00> : vector<256x32xf32>
    %15 = tpu.matmul %13, %14, %cst_11 {dimension_numbers = #tpu.dot_dimension_numbers<[1], [0], [0], [1], [0, 0, 1, 1], [], []>} : vector<256x64xbf16>, vector<64x32xbf16>, vector<256x32xf32> -> vector<256x32xf32>
    %16 = arith.addf %12, %15 : vector<256x32xf32>
    %c0_12 = arith.constant 0 : index
    %c0_13 = arith.constant 0 : index
    %17 = vector.load %arg17[%c0_12, %c0_13] : memref<256x32xf32, #tpu.memory_space<vmem>>, vector<256x32xf32>
    tpu.vector_store %arg17[%c0_12, %c0_13], %16 {strides = array<i32>} : memref<256x32xf32, #tpu.memory_space<vmem>>, vector<256x32xf32>,
    %c0_i32_14 = arith.constant 0 : i32
    %18 = arith.cmpi eq, %arg1, %c0_i32_14 : i32
    %19 = arith.extui %18 : i1 to i32
    %c0_i32_15 = arith.constant 0 : i32
    %20 = arith.cmpi ne, %19, %c0_i32_15 : i32
    scf.if %20 {
      %c0_16 = arith.constant 0 : index
      %c0_17 = arith.constant 0 : index
      %21 = vector.load %arg16[%c0_16, %c0_17] : memref<256x32xf32, #tpu.memory_space<vmem>>, vector<256x32xf32>
      %c0_18 = arith.constant 0 : index
      %c0_19 = arith.constant 0 : index
      %22 = vector.load %arg17[%c0_18, %c0_19] : memref<256x32xf32, #tpu.memory_space<vmem>>, vector<256x32xf32>
      %23 = arith.addf %21, %22 : vector<256x32xf32>
      %c0_20 = arith.constant 0 : index
      %c0_21 = arith.constant 0 : index
      %24 = vector.load %arg10[%c0_20, %c0_21] : memref<1x32xf32, #tpu.memory_space<vmem>>, vector<1x32xf32>
      %25 = vector.broadcast %24 : vector<1x32xf32> to vector<256x32xf32>
      %26 = arith.addf %23, %25 : vector<256x32xf32>
      %c0_22 = arith.constant 0 : index
      %c0_23 = arith.constant 0 : index
      %27 = vector.load %arg11[%c0_22, %c0_23] : memref<1x32xf32, #tpu.memory_space<vmem>>, vector<1x32xf32>
      %c0_24 = arith.constant 0 : index
      %c0_25 = arith.constant 0 : index
      %28 = vector.load %arg12[%c0_24, %c0_25] : memref<1x32xf32, #tpu.memory_space<vmem>>, vector<1x32xf32>
      %cst_26 = arith.constant dense<0.000000e+00> : vector<256xf32>
      %29 = vector.multi_reduction <add>, %26, %cst_26 [1] : vector<256x32xf32> to vector<256xf32>
      %30 = vector.shape_cast %29 : vector<256xf32> to vector<256x1xf32>
      %cst_27 = arith.constant 3.200000e+01 : f32
      %31 = vector.broadcast %cst_27 : f32 to vector<256x1xf32>
      %32 = arith.divf %30, %31 : vector<256x1xf32>
      %33 = vector.broadcast %32 : vector<256x1xf32> to vector<256x32xf32>
      %34 = arith.subf %26, %33 : vector<256x32xf32>
      %35 = arith.mulf %34, %34 : vector<256x32xf32>
      %cst_28 = arith.constant dense<0.000000e+00> : vector<256xf32>
      %36 = vector.multi_reduction <add>, %35, %cst_28 [1] : vector<256x32xf32> to vector<256xf32>
      %37 = vector.shape_cast %36 : vector<256xf32> to vector<256x1xf32>
      %cst_29 = arith.constant 3.200000e+01 : f32
      %38 = vector.broadcast %cst_29 : f32 to vector<256x1xf32>
      %39 = arith.divf %37, %38 : vector<256x1xf32>
      %40 = vector.broadcast %32 : vector<256x1xf32> to vector<256x32xf32>
      %41 = arith.subf %26, %40 : vector<256x32xf32>
      %cst_30 = arith.constant 9.99999974E-6 : f32
      %42 = vector.broadcast %cst_30 : f32 to vector<256x1xf32>
      %43 = arith.addf %39, %42 : vector<256x1xf32>
      %44 = math.rsqrt %43 : vector<256x1xf32>
      %45 = vector.broadcast %44 : vector<256x1xf32> to vector<256x32xf32>
      %46 = arith.mulf %41, %45 : vector<256x32xf32>
      %47 = vector.broadcast %27 : vector<1x32xf32> to vector<256x32xf32>
      %48 = arith.mulf %46, %47 : vector<256x32xf32>
      %49 = vector.broadcast %28 : vector<1x32xf32> to vector<256x32xf32>
      %50 = arith.addf %48, %49 : vector<256x32xf32>
      %c0_31 = arith.constant 0 : index
      %c0_32 = arith.constant 0 : index
      %51 = vector.load %arg13[%c0_31, %c0_32] : memref<1x32xf32, #tpu.memory_space<vmem>>, vector<1x32xf32>
      %c0_33 = arith.constant 0 : index
      %c0_34 = arith.constant 0 : index
      %52 = vector.load %arg14[%c0_33, %c0_34] : memref<1x32xf32, #tpu.memory_space<vmem>>, vector<1x32xf32>
      %cst_35 = arith.constant dense<0.000000e+00> : vector<256xf32>
      %53 = vector.multi_reduction <add>, %50, %cst_35 [1] : vector<256x32xf32> to vector<256xf32>
      %54 = vector.shape_cast %53 : vector<256xf32> to vector<256x1xf32>
      %cst_36 = arith.constant 3.200000e+01 : f32
      %55 = vector.broadcast %cst_36 : f32 to vector<256x1xf32>
      %56 = arith.divf %54, %55 : vector<256x1xf32>
      %57 = vector.broadcast %56 : vector<256x1xf32> to vector<256x32xf32>
      %58 = arith.subf %50, %57 : vector<256x32xf32>
      %59 = arith.mulf %58, %58 : vector<256x32xf32>
      %cst_37 = arith.constant dense<0.000000e+00> : vector<256xf32>
      %60 = vector.multi_reduction <add>, %59, %cst_37 [1] : vector<256x32xf32> to vector<256xf32>
      %61 = vector.shape_cast %60 : vector<256xf32> to vector<256x1xf32>
      %cst_38 = arith.constant 3.200000e+01 : f32
      %62 = vector.broadcast %cst_38 : f32 to vector<256x1xf32>
      %63 = arith.divf %61, %62 : vector<256x1xf32>
      %64 = vector.broadcast %56 : vector<256x1xf32> to vector<256x32xf32>
      %65 = arith.subf %50, %64 : vector<256x32xf32>
      %cst_39 = arith.constant 9.99999974E-6 : f32
      %66 = vector.broadcast %cst_39 : f32 to vector<256x1xf32>
      %67 = arith.addf %63, %66 : vector<256x1xf32>
      %68 = math.rsqrt %67 : vector<256x1xf32>
      %69 = vector.broadcast %68 : vector<256x1xf32> to vector<256x32xf32>
      %70 = arith.mulf %65, %69 : vector<256x32xf32>
      %71 = vector.broadcast %51 : vector<1x32xf32> to vector<256x32xf32>
      %72 = arith.mulf %70, %71 : vector<256x32xf32>
      %73 = vector.broadcast %52 : vector<1x32xf32> to vector<256x32xf32>
      %74 = arith.addf %72, %73 : vector<256x32xf32>
      %c0_40 = arith.constant 0 : index
      %c0_41 = arith.constant 0 : index
      %75 = vector.load %arg15[%c0_40, %c0_41] : memref<256x32xf32, #tpu.memory_space<vmem>>, vector<256x32xf32>
      tpu.vector_store %arg15[%c0_40, %c0_41], %74 {strides = array<i32>} : memref<256x32xf32, #tpu.memory_space<vmem>>, vector<256x32xf32>,
    } else {
    }
    return
  }
  func.func @transform_0(%arg0: i32, %arg1: i32) -> (i32, i32) {
    %c0_i32 = arith.constant 0 : i32
    %c0_i32_0 = arith.constant 0 : i32
    return %arg0, %c0_i32 : i32, i32
  }
  func.func @transform_1(%arg0: i32, %arg1: i32) -> (i32, i32) {
    %c0_i32 = arith.constant 0 : i32
    %c0_i32_0 = arith.constant 0 : i32
    return %arg0, %c0_i32 : i32, i32
  }
  func.func @transform_2(%arg0: i32, %arg1: i32) -> (i32, i32) {
    %c0_i32 = arith.constant 0 : i32
    %c0_i32_0 = arith.constant 0 : i32
    %c0_i32_1 = arith.constant 0 : i32
    return %c0_i32, %c0_i32_0 : i32, i32
  }
  func.func @transform_3(%arg0: i32, %arg1: i32) -> (i32, i32) {
    %c0_i32 = arith.constant 0 : i32
    %c0_i32_0 = arith.constant 0 : i32
    %c0_i32_1 = arith.constant 0 : i32
    return %c0_i32, %c0_i32_0 : i32, i32
  }
  func.func @transform_4(%arg0: i32, %arg1: i32) -> (i32, i32) {
    %c0_i32 = arith.constant 0 : i32
    %c0_i32_0 = arith.constant 0 : i32
    %c0_i32_1 = arith.constant 0 : i32
    return %c0_i32, %c0_i32_0 : i32, i32
  }
  func.func @transform_5(%arg0: i32, %arg1: i32) -> (i32, i32) {
    %c0_i32 = arith.constant 0 : i32
    %c0_i32_0 = arith.constant 0 : i32
    return %c0_i32, %arg1 : i32, i32
  }
  func.func @transform_6(%arg0: i32, %arg1: i32) -> (i32, i32) {
    %c0_i32 = arith.constant 0 : i32
    %c0_i32_0 = arith.constant 0 : i32
    return %c0_i32, %arg1 : i32, i32
  }
  func.func @transform_7(%arg0: i32, %arg1: i32) -> (i32, i32) {
    %c0_i32 = arith.constant 0 : i32
    %c0_i32_0 = arith.constant 0 : i32
    return %arg1, %c0_i32 : i32, i32
  }
  func.func @transform_8(%arg0: i32, %arg1: i32) -> (i32, i32) {
    %c0_i32 = arith.constant 0 : i32
    %c0_i32_0 = arith.constant 0 : i32
    %c0_i32_1 = arith.constant 0 : i32
    return %c0_i32, %c0_i32_0 : i32, i32
  }
  func.func @transform_9(%arg0: i32, %arg1: i32) -> (i32, i32) {
    %c0_i32 = arith.constant 0 : i32
    %c0_i32_0 = arith.constant 0 : i32
    %c0_i32_1 = arith.constant 0 : i32
    return %c0_i32, %c0_i32_0 : i32, i32
  }
  func.func @transform_10(%arg0: i32, %arg1: i32) -> (i32, i32) {
    %c0_i32 = arith.constant 0 : i32
    %c0_i32_0 = arith.constant 0 : i32
    %c0_i32_1 = arith.constant 0 : i32
    return %c0_i32, %c0_i32_0 : i32, i32
  }
  func.func @transform_11(%arg0: i32, %arg1: i32) -> (i32, i32) {
    %c0_i32 = arith.constant 0 : i32
    %c0_i32_0 = arith.constant 0 : i32
    %c0_i32_1 = arith.constant 0 : i32
    return %c0_i32, %c0_i32_0 : i32, i32
  }
  func.func @transform_12(%arg0: i32, %arg1: i32) -> (i32, i32) {
    %c0_i32 = arith.constant 0 : i32
    %c0_i32_0 = arith.constant 0 : i32
    %c0_i32_1 = arith.constant 0 : i32
    return %c0_i32, %c0_i32_0 : i32, i32
  }
  func.func @transform_13(%arg0: i32, %arg1: i32) -> (i32, i32) {
    %c0_i32 = arith.constant 0 : i32
    %c0_i32_0 = arith.constant 0 : i32
    return %arg0, %c0_i32 : i32, i32
  }
}

</mosaic_0001>

<bundles_post_ra>
// kernel: transformer_xl_encoder.6
= control target key start
LH: loop header
LB: loop body
LE: loop exit
PB: predicated region body
PF: predicated region fallthrough
CT: control target
= control target key end

     0   :  { %vm16_vm0 = vcmask 785408   ;;  %v763_v1 = vmov 0.0   ;;  %vm145_vm1 = vcmask 261120   ;;  %vm583_vm2 = vcmask 781312   ;;  %s1089_s1 = inlined_call_operand.vmem [shape: bf16[32,96], index: 1, kind: input, shape index: {}]   ;;  %s1090_s0 = inlined_call_operand.vmem [shape: f32[256,32], index: 0, kind: input, shape index: {}]   ;;  %s1091_s2 = inlined_call_operand.vmem [shape: bf16[256,96], index: 2, kind: output, shape index: {}]  }
   0x1   :  { %v761_v0 = vld [vmem:[%s1089_s1] sm:$0xff]   ;;  %19 = vst.msk [vmem:[#allocation2 + $0x10] sm:$0xff] %vm16_vm0, %v763_v1  ;;  %17 = vst.msk [vmem:[#allocation2] sm:$0xff] %vm16_vm0, %v763_v1  ;;  %v762_v2 = vld [vmem:[%s1089_s1 + $0x8] sm:$0xff]  }
   0x2   :  { %18 = vst.msk [vmem:[#allocation2 + $0x8] sm:$0xff] %vm16_vm0, %v763_v1  ;;  %20 = vst.msk [vmem:[#allocation2 + $0x18] sm:$0xff] %vm16_vm0, %v763_v1  ;;  %720 = vmatprep.subr.bf16.mxu0 %v761_v0  ;;  %756 = vmatprep.subr.bf16.mxu1 %v761_v0  ;;  %v81_v3 = vld [vmem:[%s1090_s0] sm:$0xff]  ;;  %v82_v4 = vld [vmem:[%s1090_s0 + $0x8] sm:$0xff] }
   0x3   :  { %21 = vst.msk [vmem:[#allocation2 + $0x20] sm:$0xff] %vm16_vm0, %v763_v1  ;;  %22 = vst.msk [vmem:[#allocation2 + $0x28] sm:$0xff] %vm16_vm0, %v763_v1  ;;  %v97_v5 = vld [vmem:[%s1090_s0 + $0x80] sm:$0xff]  ;;  %721 = vmatpush3.bf16.msra.mxu0 %v761_v0  ;;  %758 = vmatpush3.bf16.msra.mxu1 %v761_v0  ;;  %v113_v6 = vpack.c.bf16 %v82_v4, %v81_v3  ;;  %v98_v7 = vld [vmem:[%s1090_s0 + $0x88] sm:$0xff] }
   0x4   :  { %23 = vst.msk [vmem:[#allocation2 + $0x30] sm:$0xff] %vm16_vm0, %v763_v1  ;;  %24 = vst.msk [vmem:[#allocation2 + $0x38] sm:$0xff] %vm16_vm0, %v763_v1  ;;  %v83_v8 = vld [vmem:[%s1090_s0 + $0x10] sm:$0xff]  ;;  %v84_v9 = vld [vmem:[%s1090_s0 + $0x18] sm:$0xff]  ;;  %722 = vmatprep.subr.bf16.mxu0 %v762_v2  ;;  %757 = vmatprep.subr.bf16.mxu1 %v762_v2  ;;  %v121_v10 = vpack.c.bf16 %v98_v7, %v97_v5 }
   0x5   :  { %25 = vst.msk [vmem:[#allocation2 + $0x40] sm:$0xff] %vm16_vm0, %v763_v1  ;;  %26 = vst.msk [vmem:[#allocation2 + $0x48] sm:$0xff] %vm16_vm0, %v763_v1  ;;  %v99_v11 = vld [vmem:[%s1090_s0 + $0x90] sm:$0xff]  ;;  %v100_v12 = vld [vmem:[%s1090_s0 + $0x98] sm:$0xff]  ;;  %724 = vmatprep.mubr.msk.bf16.mxu0 %vm145_vm1, %v113_v6  ;;  %v114_v17 = vpack.c.bf16 %v84_v9, %v83_v8 }
   0x6   :  { %27 = vst.msk [vmem:[#allocation2 + $0x50] sm:$0xff] %vm16_vm0, %v763_v1  ;;  %28 = vst.msk [vmem:[#allocation2 + $0x58] sm:$0xff] %vm16_vm0, %v763_v1  ;;  %v85_v13 = vld [vmem:[%s1090_s0 + $0x20] sm:$0xff]  ;;  %v86_v14 = vld [vmem:[%s1090_s0 + $0x28] sm:$0xff]  ;;  %740 = vmatprep.mubr.msk.bf16.mxu1 %vm145_vm1, %v121_v10  ;;  %v122_v18 = vpack.c.bf16 %v100_v12, %v99_v11 }
   0x7   :  { %29 = vst.msk [vmem:[#allocation2 + $0x60] sm:$0xff] %vm16_vm0, %v763_v1  ;;  %30 = vst.msk [vmem:[#allocation2 + $0x68] sm:$0xff] %vm16_vm0, %v763_v1  ;;  %v101_v15 = vld [vmem:[%s1090_s0 + $0xa0] sm:$0xff]  ;;  %v102_v16 = vld [vmem:[%s1090_s0 + $0xa8] sm:$0xff]  ;;  %723 = vmatpush3.bf16.msra.mxu0 %v762_v2  ;;  %759 = vmatpush3.bf16.msra.mxu1 %v762_v2  ;;  %v115_v19 = vpack.c.bf16 %v86_v14, %v85_v13 }
   0x8   :  { %31 = vst.msk [vmem:[#allocation2 + $0x70] sm:$0xff] %vm16_vm0, %v763_v1  ;;  %32 = vst.msk [vmem:[#allocation2 + $0x78] sm:$0xff] %vm16_vm0, %v763_v1  ;;  %v123_v20 = vpack.c.bf16 %v102_v16, %v101_v15  ;;  %v87_v21 = vld [vmem:[%s1090_s0 + $0x30] sm:$0xff]  ;;  %v88_v22 = vld [vmem:[%s1090_s0 + $0x38] sm:$0xff] }
   0x9   :  { %33 = vst.msk [vmem:[#allocation2 + $0x80] sm:$0xff] %vm16_vm0, %v763_v1  ;;  %34 = vst.msk [vmem:[#allocation2 + $0x88] sm:$0xff] %vm16_vm0, %v763_v1  ;;  %v103_v23 = vld [vmem:[%s1090_s0 + $0xb0] sm:$0xff]  ;;  %v104_v24 = vld [vmem:[%s1090_s0 + $0xb8] sm:$0xff]  ;;  %v116_v29 = vpack.c.bf16 %v88_v22, %v87_v21 }
   0xa   :  { %35 = vst.msk [vmem:[#allocation2 + $0x90] sm:$0xff] %vm16_vm0, %v763_v1  ;;  %36 = vst.msk [vmem:[#allocation2 + $0x98] sm:$0xff] %vm16_vm0, %v763_v1  ;;  %725 = vmatmul.mubr.msk.bf16.vlgmr.msra.gmra.mrb[0].mxu0 %vm145_vm1, %v114_v17  ;;  %741 = vmatmul.mubr.msk.bf16.vlgmr.msra.gmra.mrb[0].mxu1 %vm145_vm1, %v122_v18  ;;  %v89_v25 = vld [vmem:[%s1090_s0 + $0x40] sm:$0xff]  ;;  %v90_v26 = vld [vmem:[%s1090_s0 + $0x48] sm:$0xff]  ;;  %v124_v30 = vpack.c.bf16 %v104_v24, %v103_v23 }
   0xb   :  { %37 = vst.msk [vmem:[#allocation2 + $0xa0] sm:$0xff] %vm16_vm0, %v763_v1  ;;  %38 = vst.msk [vmem:[#allocation2 + $0xa8] sm:$0xff] %vm16_vm0, %v763_v1  ;;  %728 = vmatprep.mubr.msk.bf16.mxu0 %vm145_vm1, %v115_v19  ;;  %744 = vmatprep.mubr.msk.bf16.mxu1 %vm145_vm1, %v123_v20  ;;  %v105_v27 = vld [vmem:[%s1090_s0 + $0xc0] sm:$0xff]  ;;  %v106_v28 = vld [vmem:[%s1090_s0 + $0xc8] sm:$0xff]  ;;  %v117_v31 = vpack.c.bf16 %v90_v26, %v89_v25 }
   0xc   :  { %39 = vst.msk [vmem:[#allocation2 + $0xb0] sm:$0xff] %vm16_vm0, %v763_v1  ;;  %40 = vst.msk [vmem:[#allocation2 + $0xb8] sm:$0xff] %vm16_vm0, %v763_v1  ;;  %v125_v32 = vpack.c.bf16 %v106_v28, %v105_v27  ;;  %v91_v33 = vld [vmem:[%s1090_s0 + $0x50] sm:$0xff]  ;;  %v92_v34 = vld [vmem:[%s1090_s0 + $0x58] sm:$0xff] }
   0xd   :  { %41 = vst.msk [vmem:[#allocation2 + $0xc0] sm:$0xff] %vm16_vm0, %v763_v1  ;;  %42 = vst.msk [vmem:[#allocation2 + $0xc8] sm:$0xff] %vm16_vm0, %v763_v1  ;;  %v107_v35 = vld [vmem:[%s1090_s0 + $0xd0] sm:$0xff]  ;;  %v108_v36 = vld [vmem:[%s1090_s0 + $0xd8] sm:$0xff]  ;;  %v118_v41 = vpack.c.bf16 %v92_v34, %v91_v33 }
   0xe   :  { %43 = vst.msk [vmem:[#allocation2 + $0xd0] sm:$0xff] %vm16_vm0, %v763_v1  ;;  %44 = vst.msk [vmem:[#allocation2 + $0xd8] sm:$0xff] %vm16_vm0, %v763_v1  ;;  %v93_v37 = vld [vmem:[%s1090_s0 + $0x60] sm:$0xff]  ;;  %v94_v38 = vld [vmem:[%s1090_s0 + $0x68] sm:$0xff]  ;;  %v126_v42 = vpack.c.bf16 %v108_v36, %v107_v35 }
   0xf   :  { %45 = vst.msk [vmem:[#allocation2 + $0xe0] sm:$0xff] %vm16_vm0, %v763_v1  ;;  %46 = vst.msk [vmem:[#allocation2 + $0xe8] sm:$0xff] %vm16_vm0, %v763_v1  ;;  %v109_v39 = vld [vmem:[%s1090_s0 + $0xe0] sm:$0xff]  ;;  %v110_v40 = vld [vmem:[%s1090_s0 + $0xe8] sm:$0xff]  ;;  %v119_v43 = vpack.c.bf16 %v94_v38, %v93_v37 }
  0x10   :  { %47 = vst.msk [vmem:[#allocation2 + $0xf0] sm:$0xff] %vm16_vm0, %v763_v1  ;;  %48 = vst.msk [vmem:[#allocation2 + $0xf8] sm:$0xff] %vm16_vm0, %v763_v1  ;;  %v127_v44 = vpack.c.bf16 %v110_v40, %v109_v39  ;;  %v95_v45 = vld [vmem:[%s1090_s0 + $0x70] sm:$0xff]  ;;  %v96_v46 = vld [vmem:[%s1090_s0 + $0x78] sm:$0xff] }
  0x11   :  { %v111_v47 = vld [vmem:[%s1090_s0 + $0xf0] sm:$0xff]  ;;  %v112_v48 = vld [vmem:[%s1090_s0 + $0xf8] sm:$0xff]  ;;  %v120_v49 = vpack.c.bf16 %v96_v46, %v95_v45  ;;  %v49_v53 = vld [vmem:[#allocation2] sm:$0xff] }
  0x12   :  { %729 = vmatmul.mubr.msk.bf16.gmra.mrb[4].mxu0 %vm145_vm1, %v116_v29  ;;  %745 = vmatmul.mubr.msk.bf16.gmra.mrb[4].mxu1 %vm145_vm1, %v124_v30  ;;  %v128_v50 = vpack.c.bf16 %v112_v48, %v111_v47  ;;  %v51_v51 = vld [vmem:[#allocation2 + $0x10] sm:$0xff]  ;;  %v65_v54 = vld [vmem:[#allocation2 + $0x80] sm:$0xff]  ;;  %v52_v57 = vld [vmem:[#allocation2 + $0x18] sm:$0xff] }
  0x13   :  { %732 = vmatprep.mubr.msk.bf16.mxu0 %vm145_vm1, %v117_v31  ;;  %748 = vmatprep.mubr.msk.bf16.mxu1 %vm145_vm1, %v125_v32  ;;  %v67_v52 = vld [vmem:[#allocation2 + $0x90] sm:$0xff]  ;;  %v68_v58 = vld [vmem:[#allocation2 + $0x98] sm:$0xff]  ;;  %v50_v63 = vld [vmem:[#allocation2 + $0x8] sm:$0xff] }
  0x14   :  { %v66_v0 = vld [vmem:[#allocation2 + $0x88] sm:$0xff]  ;;  %v55_v11 = vld [vmem:[#allocation2 + $0x30] sm:$0xff]  ;;  %v53_v13 = vld [vmem:[#allocation2 + $0x20] sm:$0xff] }
  0x15   :  { %v71_v12 = vld [vmem:[#allocation2 + $0xb0] sm:$0xff]  ;;  %v69_v14 = vld [vmem:[#allocation2 + $0xa0] sm:$0xff]  ;;  %v56_v17 = vld [vmem:[#allocation2 + $0x38] sm:$0xff] }
  0x16   :  { %v72_v18 = vld [vmem:[#allocation2 + $0xb8] sm:$0xff]  ;;  %v54_v23 = vld [vmem:[#allocation2 + $0x28] sm:$0xff] }
  0x17   :  { %v70_v24 = vld [vmem:[#allocation2 + $0xa8] sm:$0xff] }
  0x1a   :  { %733 = vmatmul.mubr.msk.bf16.gmra.mrb[8].mxu0 %vm145_vm1, %v118_v41  ;;  %749 = vmatmul.mubr.msk.bf16.gmra.mrb[8].mxu1 %vm145_vm1, %v126_v42 }
  0x1b   :  { %736 = vmatprep.mubr.msk.bf16.mxu0 %vm145_vm1, %v119_v43  ;;  %752 = vmatprep.mubr.msk.bf16.mxu1 %vm145_vm1, %v127_v44 }
  0x22   :  { %737 = vmatmul.mubr.msk.bf16.gmra.mrb[12].mxu0 %vm145_vm1, %v120_v49  ;;  %753 = vmatmul.mubr.msk.bf16.gmra.mrb[12].mxu1 %vm145_vm1, %v128_v50 }
  0xdd   :  { %v726_v55 = vpop.f32.mrb[0].mxu0  ;;  %v742_v56 = vpop.f32.mrb[0].mxu1 }
  0xde   :  { %v357_v59 = vadd.f32 %v726_v55, %v51_v51  ;;  %v373_v60 = vadd.f32 %v742_v56, %v67_v52  ;;  %v228_v61 = vpop.f32.mrb[1].mxu0  ;;  %v292_v62 = vpop.f32.mrb[1].mxu1  ;;  %v59_v51 = vld [vmem:[#allocation2 + $0x50] sm:$0xff] }
  0xdf   :  { %v355_v1 = vadd.f32 %v228_v61, %v49_v53  ;;  %v371_v2 = vadd.f32 %v292_v62, %v65_v54  ;;  %v727_v3 = vpop.f32.mrb[2].mxu0  ;;  %v743_v4 = vpop.f32.mrb[2].mxu1  ;;  %v75_v52 = vld [vmem:[#allocation2 + $0xd0] sm:$0xff]  ;;  %v57_v53 = vld [vmem:[#allocation2 + $0x40] sm:$0xff] }
  0xe0   :  { %390 = vst.msk [vmem:[#allocation2 + $0x10] sm:$0xff] %vm16_vm0, %v357_v59  ;;  %406 = vst.msk [vmem:[#allocation2 + $0x90] sm:$0xff] %vm16_vm0, %v373_v60  ;;  %v358_v5 = vadd.f32 %v727_v3, %v52_v57  ;;  %v374_v6 = vadd.f32 %v743_v4, %v68_v58  ;;  %v231_v7 = vpop.f32.mrb[3].mxu0  ;;  %v295_v8 = vpop.f32.mrb[3].mxu1  ;;  %v73_v54 = vld [vmem:[#allocation2 + $0xc0] sm:$0xff]  ;;  %v60_v57 = vld [vmem:[#allocation2 + $0x58] sm:$0xff] }
  0xe1   :  { %388 = vst.msk [vmem:[#allocation2] sm:$0xff] %vm16_vm0, %v355_v1  ;;  %404 = vst.msk [vmem:[#allocation2 + $0x80] sm:$0xff] %vm16_vm0, %v371_v2  ;;  %v356_v9 = vadd.f32 %v231_v7, %v50_v63  ;;  %v372_v10 = vadd.f32 %v295_v8, %v66_v0  ;;  %v76_v58 = vld [vmem:[#allocation2 + $0xd8] sm:$0xff]  ;;  %v58_v63 = vld [vmem:[#allocation2 + $0x48] sm:$0xff] }
  0xe2   :  { %391 = vst.msk [vmem:[#allocation2 + $0x18] sm:$0xff] %vm16_vm0, %v358_v5  ;;  %407 = vst.msk [vmem:[#allocation2 + $0x98] sm:$0xff] %vm16_vm0, %v374_v6  ;;  %v74_v0 = vld [vmem:[#allocation2 + $0xc8] sm:$0xff] }
  0xe3   :  { %389 = vst.msk [vmem:[#allocation2 + $0x8] sm:$0xff] %vm16_vm0, %v356_v9  ;;  %405 = vst.msk [vmem:[#allocation2 + $0x88] sm:$0xff] %vm16_vm0, %v372_v10 }
  0xe5   :  { %v730_v15 = vpop.f32.mrb[4].mxu0  ;;  %v746_v16 = vpop.f32.mrb[4].mxu1 }
  0xe6   :  { %v361_v19 = vadd.f32 %v730_v15, %v55_v11  ;;  %v377_v20 = vadd.f32 %v746_v16, %v71_v12  ;;  %v244_v21 = vpop.f32.mrb[5].mxu0  ;;  %v308_v22 = vpop.f32.mrb[5].mxu1 }
  0xe7   :  { %v425_v25 = vld [vmem:[#allocation2 + $0x10] sm:$0xff]  ;;  %v359_v27 = vadd.f32 %v244_v21, %v53_v13  ;;  %v375_v28 = vadd.f32 %v308_v22, %v69_v14  ;;  %v731_v29 = vpop.f32.mrb[6].mxu0  ;;  %v747_v30 = vpop.f32.mrb[6].mxu1 }
  0xe8   :  { %v441_v26 = vld [vmem:[#allocation2 + $0x90] sm:$0xff]  ;;  %v672_v31 = vpack.c.bf16 %v425_v25, %v425_v25  ;;  %v423_v33 = vld [vmem:[#allocation2] sm:$0xff]  ;;  %394 = vst.msk [vmem:[#allocation2 + $0x30] sm:$0xff] %vm16_vm0, %v361_v19  ;;  %410 = vst.msk [vmem:[#allocation2 + $0xb0] sm:$0xff] %vm16_vm0, %v377_v20  ;;  %v362_v35 = vadd.f32 %v731_v29, %v56_v17  ;;  %v378_v36 = vadd.f32 %v747_v30, %v72_v18  ;;  %v247_v37 = vpop.f32.mrb[7].mxu0  ;;  %v311_v38 = vpop.f32.mrb[7].mxu1 }
  0xe9   :  { %v688_v32 = vpack.c.bf16 %v441_v26, %v441_v26  ;;  %v439_v34 = vld [vmem:[#allocation2 + $0x80] sm:$0xff]  ;;  %v670_v39 = vpack.c.bf16 %v423_v33, %v423_v33  ;;  %v426_v41 = vld [vmem:[#allocation2 + $0x18] sm:$0xff]  ;;  %392 = vst.msk [vmem:[#allocation2 + $0x20] sm:$0xff] %vm16_vm0, %v359_v27  ;;  %408 = vst.msk [vmem:[#allocation2 + $0xa0] sm:$0xff] %vm16_vm0, %v375_v28  ;;  %v360_v43 = vadd.f32 %v247_v37, %v54_v23 }
  0xea   :  { %v686_v40 = vpack.c.bf16 %v439_v34, %v439_v34  ;;  %v442_v42 = vld [vmem:[#allocation2 + $0x98] sm:$0xff]  ;;  %v376_v44 = vadd.f32 %v311_v38, %v70_v24  ;;  %586 = vst.msk [vmem:[%s1091_s2 + $0x8] sm:$0xf] %vm583_vm2, %v672_v31  ;;  %v673_v45 = vpack.c.bf16 %v426_v41, %v426_v41  ;;  %v424_v47 = vld [vmem:[#allocation2 + $0x8] sm:$0xff]  ;;  %v63_v27 = vld [vmem:[#allocation2 + $0x70] sm:$0xff] }
  0xeb   :  { %602 = vst.msk [vmem:[%s1091_s2 + $0x48] sm:$0xf] %vm583_vm2, %v688_v32  ;;  %v689_v46 = vpack.c.bf16 %v442_v42, %v442_v42  ;;  %v440_v48 = vld [vmem:[#allocation2 + $0x88] sm:$0xff]  ;;  %584 = vst.msk [vmem:[%s1091_s2] sm:$0xf] %vm583_vm2, %v670_v39  ;;  %v671_v49 = vpack.c.bf16 %v424_v47, %v424_v47  ;;  %v79_v28 = vld [vmem:[#allocation2 + $0xf0] sm:$0xff] }
  0xec   :  { %395 = vst.msk [vmem:[#allocation2 + $0x38] sm:$0xff] %vm16_vm0, %v362_v35  ;;  %411 = vst.msk [vmem:[#allocation2 + $0xb8] sm:$0xff] %vm16_vm0, %v378_v36  ;;  %v687_v50 = vpack.c.bf16 %v440_v48, %v440_v48  ;;  %v61_v29 = vld [vmem:[#allocation2 + $0x60] sm:$0xff]  ;;  %v64_v33 = vld [vmem:[#allocation2 + $0x78] sm:$0xff] }
  0xed   :  { %600 = vst.msk [vmem:[%s1091_s2 + $0x40] sm:$0xf] %vm583_vm2, %v686_v40  ;;  %587 = vst.msk [vmem:[%s1091_s2 + $0xc] sm:$0xf] %vm583_vm2, %v673_v45  ;;  %v734_v55 = vpop.f32.mrb[8].mxu0  ;;  %v750_v56 = vpop.f32.mrb[8].mxu1 }
  0xee   :  { %393 = vst.msk [vmem:[#allocation2 + $0x28] sm:$0xff] %vm16_vm0, %v360_v43  ;;  %409 = vst.msk [vmem:[#allocation2 + $0xa8] sm:$0xff] %vm16_vm0, %v376_v44  ;;  %v365_v59 = vadd.f32 %v734_v55, %v59_v51  ;;  %v381_v60 = vadd.f32 %v750_v56, %v75_v52  ;;  %v260_v61 = vpop.f32.mrb[9].mxu0  ;;  %v324_v62 = vpop.f32.mrb[9].mxu1  ;;  %v77_v30 = vld [vmem:[#allocation2 + $0xe0] sm:$0xff]  ;;  %v80_v34 = vld [vmem:[#allocation2 + $0xf8] sm:$0xff] }
  0xef   :  { %603 = vst.msk [vmem:[%s1091_s2 + $0x4c] sm:$0xf] %vm583_vm2, %v689_v46  ;;  %585 = vst.msk [vmem:[%s1091_s2 + $0x4] sm:$0xf] %vm583_vm2, %v671_v49  ;;  %v429_v1 = vld [vmem:[#allocation2 + $0x30] sm:$0xff]  ;;  %v363_v3 = vadd.f32 %v260_v61, %v57_v53  ;;  %v379_v4 = vadd.f32 %v324_v62, %v73_v54  ;;  %v735_v5 = vpop.f32.mrb[10].mxu0 }
  0xf0   :  { %601 = vst.msk [vmem:[%s1091_s2 + $0x44] sm:$0xf] %vm583_vm2, %v687_v50  ;;  %v445_v2 = vld [vmem:[#allocation2 + $0xb0] sm:$0xff]  ;;  %v751_v6 = vpop.f32.mrb[10].mxu1  ;;  %v676_v7 = vpack.c.bf16 %v429_v1, %v429_v1  ;;  %v427_v9 = vld [vmem:[#allocation2 + $0x20] sm:$0xff]  ;;  %v366_v11 = vadd.f32 %v735_v5, %v60_v57  ;;  %v263_v13 = vpop.f32.mrb[11].mxu0 }
  0xf1   :  { %v692_v8 = vpack.c.bf16 %v445_v2, %v445_v2  ;;  %v443_v10 = vld [vmem:[#allocation2 + $0xa0] sm:$0xff]  ;;  %398 = vst.msk [vmem:[#allocation2 + $0x50] sm:$0xff] %vm16_vm0, %v365_v59  ;;  %414 = vst.msk [vmem:[#allocation2 + $0xd0] sm:$0xff] %vm16_vm0, %v381_v60  ;;  %v382_v12 = vadd.f32 %v751_v6, %v76_v58  ;;  %v327_v14 = vpop.f32.mrb[11].mxu1  ;;  %v674_v15 = vpack.c.bf16 %v427_v9, %v427_v9  ;;  %v62_v39 = vld [vmem:[#allocation2 + $0x68] sm:$0xff] }
  0xf2   :  { %v690_v16 = vpack.c.bf16 %v443_v10, %v443_v10  ;;  %396 = vst.msk [vmem:[#allocation2 + $0x40] sm:$0xff] %vm16_vm0, %v363_v3  ;;  %412 = vst.msk [vmem:[#allocation2 + $0xc0] sm:$0xff] %vm16_vm0, %v379_v4  ;;  %v364_v19 = vadd.f32 %v263_v13, %v58_v63  ;;  %v380_v20 = vadd.f32 %v327_v14, %v74_v0  ;;  %v78_v40 = vld [vmem:[#allocation2 + $0xe8] sm:$0xff] }
  0xf3   :  { %v430_v17 = vld [vmem:[#allocation2 + $0x38] sm:$0xff]  ;;  %590 = vst.msk [vmem:[%s1091_s2 + $0x18] sm:$0xf] %vm583_vm2, %v676_v7  ;;  %606 = vst.msk [vmem:[%s1091_s2 + $0x58] sm:$0xf] %vm583_vm2, %v692_v8 }
  0xf4   :  { %v446_v18 = vld [vmem:[#allocation2 + $0xb8] sm:$0xff]  ;;  %v677_v21 = vpack.c.bf16 %v430_v17, %v430_v17  ;;  %399 = vst.msk [vmem:[#allocation2 + $0x58] sm:$0xff] %vm16_vm0, %v366_v11  ;;  %415 = vst.msk [vmem:[#allocation2 + $0xd8] sm:$0xff] %vm16_vm0, %v382_v12 }
  0xf5   :  { %v693_v22 = vpack.c.bf16 %v446_v18, %v446_v18  ;;  %v428_v23 = vld [vmem:[#allocation2 + $0x28] sm:$0xff]  ;;  %588 = vst.msk [vmem:[%s1091_s2 + $0x10] sm:$0xf] %vm583_vm2, %v674_v15  ;;  %604 = vst.msk [vmem:[%s1091_s2 + $0x50] sm:$0xf] %vm583_vm2, %v690_v16  ;;  %v738_v31 = vpop.f32.mrb[12].mxu0 }
  0xf6   :  { %v444_v24 = vld [vmem:[#allocation2 + $0xa8] sm:$0xff]  ;;  %v675_v25 = vpack.c.bf16 %v428_v23, %v428_v23  ;;  %397 = vst.msk [vmem:[#allocation2 + $0x48] sm:$0xff] %vm16_vm0, %v364_v19  ;;  %413 = vst.msk [vmem:[#allocation2 + $0xc8] sm:$0xff] %vm16_vm0, %v380_v20  ;;  %v754_v32 = vpop.f32.mrb[12].mxu1  ;;  %v369_v35 = vadd.f32 %v738_v31, %v63_v27  ;;  %v276_v37 = vpop.f32.mrb[13].mxu0 }
  0xf7   :  { %v691_v26 = vpack.c.bf16 %v444_v24, %v444_v24  ;;  %591 = vst.msk [vmem:[%s1091_s2 + $0x1c] sm:$0xf] %vm583_vm2, %v677_v21  ;;  %607 = vst.msk [vmem:[%s1091_s2 + $0x5c] sm:$0xf] %vm583_vm2, %v693_v22  ;;  %v385_v36 = vadd.f32 %v754_v32, %v79_v28  ;;  %v340_v38 = vpop.f32.mrb[13].mxu1  ;;  %v367_v43 = vadd.f32 %v276_v37, %v61_v29  ;;  %v739_v45 = vpop.f32.mrb[14].mxu0 }
  0xf8   :  { %589 = vst.msk [vmem:[%s1091_s2 + $0x14] sm:$0xf] %vm583_vm2, %v675_v25  ;;  %v433_v41 = vld [vmem:[#allocation2 + $0x50] sm:$0xff]  ;;  %v383_v44 = vadd.f32 %v340_v38, %v77_v30  ;;  %v755_v46 = vpop.f32.mrb[14].mxu1  ;;  %v370_v51 = vadd.f32 %v739_v45, %v64_v33  ;;  %v279_v53 = vpop.f32.mrb[15].mxu0 }
  0xf9   :  { %605 = vst.msk [vmem:[%s1091_s2 + $0x54] sm:$0xf] %vm583_vm2, %v691_v26  ;;  %v449_v42 = vld [vmem:[#allocation2 + $0xd0] sm:$0xff]  ;;  %v680_v47 = vpack.c.bf16 %v433_v41, %v433_v41  ;;  %v431_v49 = vld [vmem:[#allocation2 + $0x40] sm:$0xff]  ;;  %v386_v52 = vadd.f32 %v755_v46, %v80_v34  ;;  %v343_v54 = vpop.f32.mrb[15].mxu1  ;;  %v368_v59 = vadd.f32 %v279_v53, %v62_v39 }
  0xfa   :  { %v696_v48 = vpack.c.bf16 %v449_v42, %v449_v42  ;;  %v447_v50 = vld [vmem:[#allocation2 + $0xc0] sm:$0xff]  ;;  %402 = vst.msk [vmem:[#allocation2 + $0x70] sm:$0xff] %vm16_vm0, %v369_v35  ;;  %418 = vst.msk [vmem:[#allocation2 + $0xf0] sm:$0xff] %vm16_vm0, %v385_v36  ;;  %v678_v55 = vpack.c.bf16 %v431_v49, %v431_v49  ;;  %v384_v60 = vadd.f32 %v343_v54, %v78_v40 }
  0xfb   :  { %v694_v56 = vpack.c.bf16 %v447_v50, %v447_v50  ;;  %v434_v57 = vld [vmem:[#allocation2 + $0x58] sm:$0xff]  ;;  %400 = vst.msk [vmem:[#allocation2 + $0x60] sm:$0xff] %vm16_vm0, %v367_v43  ;;  %416 = vst.msk [vmem:[#allocation2 + $0xe0] sm:$0xff] %vm16_vm0, %v383_v44 }
  0xfc   :  { %v450_v58 = vld [vmem:[#allocation2 + $0xd8] sm:$0xff]  ;;  %594 = vst.msk [vmem:[%s1091_s2 + $0x28] sm:$0xf] %vm583_vm2, %v680_v47  ;;  %610 = vst.msk [vmem:[%s1091_s2 + $0x68] sm:$0xf] %vm583_vm2, %v696_v48  ;;  %v681_v61 = vpack.c.bf16 %v434_v57, %v434_v57 }
  0xfd   :  { %v697_v62 = vpack.c.bf16 %v450_v58, %v450_v58  ;;  %v432_v63 = vld [vmem:[#allocation2 + $0x48] sm:$0xff]  ;;  %403 = vst.msk [vmem:[#allocation2 + $0x78] sm:$0xff] %vm16_vm0, %v370_v51  ;;  %419 = vst.msk [vmem:[#allocation2 + $0xf8] sm:$0xff] %vm16_vm0, %v386_v52 }
  0xfe   :  { %v448_v0 = vld [vmem:[#allocation2 + $0xc8] sm:$0xff]  ;;  %592 = vst.msk [vmem:[%s1091_s2 + $0x20] sm:$0xf] %vm583_vm2, %v678_v55  ;;  %608 = vst.msk [vmem:[%s1091_s2 + $0x60] sm:$0xf] %vm583_vm2, %v694_v56  ;;  %v679_v1 = vpack.c.bf16 %v432_v63, %v432_v63 }
  0xff   :  { %v695_v2 = vpack.c.bf16 %v448_v0, %v448_v0  ;;  %401 = vst.msk [vmem:[#allocation2 + $0x68] sm:$0xff] %vm16_vm0, %v368_v59  ;;  %417 = vst.msk [vmem:[#allocation2 + $0xe8] sm:$0xff] %vm16_vm0, %v384_v60 }
 0x100   :  { %595 = vst.msk [vmem:[%s1091_s2 + $0x2c] sm:$0xf] %vm583_vm2, %v681_v61  ;;  %611 = vst.msk [vmem:[%s1091_s2 + $0x6c] sm:$0xf] %vm583_vm2, %v697_v62 }
 0x101   :  { %593 = vst.msk [vmem:[%s1091_s2 + $0x24] sm:$0xf] %vm583_vm2, %v679_v1  ;;  %609 = vst.msk [vmem:[%s1091_s2 + $0x64] sm:$0xf] %vm583_vm2, %v695_v2  ;;  %v437_v3 = vld [vmem:[#allocation2 + $0x70] sm:$0xff] }
 0x102   :  { %v453_v4 = vld [vmem:[#allocation2 + $0xf0] sm:$0xff]  ;;  %v684_v5 = vpack.c.bf16 %v437_v3, %v437_v3  ;;  %v435_v7 = vld [vmem:[#allocation2 + $0x60] sm:$0xff] }
 0x103   :  { %v700_v6 = vpack.c.bf16 %v453_v4, %v453_v4  ;;  %v451_v8 = vld [vmem:[#allocation2 + $0xe0] sm:$0xff]  ;;  %v682_v9 = vpack.c.bf16 %v435_v7, %v435_v7 }
 0x104   :  { %v698_v10 = vpack.c.bf16 %v451_v8, %v451_v8  ;;  %v438_v11 = vld [vmem:[#allocation2 + $0x78] sm:$0xff]  ;;  %598 = vst.msk [vmem:[%s1091_s2 + $0x38] sm:$0xf] %vm583_vm2, %v684_v5 }
 0x105   :  { %v454_v12 = vld [vmem:[#allocation2 + $0xf8] sm:$0xff]  ;;  %614 = vst.msk [vmem:[%s1091_s2 + $0x78] sm:$0xf] %vm583_vm2, %v700_v6  ;;  %v685_v13 = vpack.c.bf16 %v438_v11, %v438_v11  ;;  %596 = vst.msk [vmem:[%s1091_s2 + $0x30] sm:$0xf] %vm583_vm2, %v682_v9 }
 0x106   :  { %v701_v14 = vpack.c.bf16 %v454_v12, %v454_v12  ;;  %v436_v15 = vld [vmem:[#allocation2 + $0x68] sm:$0xff]  ;;  %612 = vst.msk [vmem:[%s1091_s2 + $0x70] sm:$0xf] %vm583_vm2, %v698_v10 }
 0x107   :  { %v452_v16 = vld [vmem:[#allocation2 + $0xe8] sm:$0xff]  ;;  %v683_v17 = vpack.c.bf16 %v436_v15, %v436_v15  ;;  %599 = vst.msk [vmem:[%s1091_s2 + $0x3c] sm:$0xf] %vm583_vm2, %v685_v13 }
 0x108   :  { %v699_v18 = vpack.c.bf16 %v452_v16, %v452_v16  ;;  %615 = vst.msk [vmem:[%s1091_s2 + $0x7c] sm:$0xf] %vm583_vm2, %v701_v14 }
 0x109   :  { %597 = vst.msk [vmem:[%s1091_s2 + $0x34] sm:$0xf] %vm583_vm2, %v683_v17 }
 0x10a   :  { %613 = vst.msk [vmem:[%s1091_s2 + $0x74] sm:$0xf] %vm583_vm2, %v699_v18 }

// kernel: transformer_xl_encoder.7
= control target key start
LH: loop header
LB: loop body
LE: loop exit
PB: predicated region body
PF: predicated region fallthrough
CT: control target
= control target key end

     0   :  { %s2424_s18 = smov 0   ;;  %s2426_s19 = smov 0   ;;  %s3168_s0 = inlined_call_operand.vmem [shape: bf16[3,2,4,128,8], index: 0, kind: input, shape index: {}]   ;;  %s3169_s1 = inlined_call_operand.vmem [shape: bf16[4,128,8], index: 1, kind: input, shape index: {}]   ;;  %s3170_s2 = inlined_call_operand.vmem [shape: f32[4,1,8], index: 2, kind: input, shape index: {}]   ;;  %s3171_s3 = inlined_call_operand.vmem [shape: f32[4,1,8], index: 3, kind: input, shape index: {}]   ;;  %s3172_s4 = inlined_call_operand.vmem [shape: f32[2,1,128], index: 4, kind: input, shape index: {}]   ;;  %s3173_s5 = inlined_call_operand.vmem [shape: bf16[2,4,128,8], index: 5, kind: output, shape index: {}]  }
   0x1   :  { %s2428_s20 = smov 0   ;;  %s2430_s21 = smov 0  }
   0x2   :  { %s2432_s22 = smov 0   ;;  %s2434_s23 = smov 0  }
   0x3   :  { %s2436_s24 = smov 0  }
   0x4 LB: > { %s24_s25 = sadd.s32 1, %s2368_s22  ;;  %s27_s26 = sadd.s32 1, %s2372_s23  ;;  %s2376_s24 = sphi %s2436_s24, %s15_s24   ;;  %s2372_s23 = sphi %s2434_s23, %s3181_s23   ;;  %s2368_s22 = sphi %s2432_s22, %s3180_s22   ;;  %s2364_s21 = sphi %s2430_s21, %s3179_s21   ;;  %s2360_s20 = sphi %s2428_s20, %s3178_s20   ;;  %s2356_s19 = sphi %s2426_s19, %s3177_s19   ;;  %s2352_s18 = sphi %s2424_s18, %s3176_s18  }
   0x5   : > { %p25_p0 = scmp.ge.s32.totalorder %s24_s25, 4  ;;  %p43_p1 = scmp.ne.s32.totalorder %s2356_s19, %s2352_s18 }
   0x6   : > { %p44_p2 = scmp.eq.s32.totalorder %s2376_s24, 0  ;;  %s36_s30 = sadd.s32 1, %s2356_s19 }
   0x7   : > { %s3183_s25 = smov (%p25_p0, %s24_s25), 0  ;;  %s3185_s26 = smov (!%p25_p0, %s27_s26), %s2372_s23 }
   0x8   : > { %p45_p3 = por %p44_p2, %p43_p1  ;;  %p29_p4 = scmp.ge.s32.totalorder %s3185_s26, 2 }
   0x9   : > { %s32_s27 = ssub.s32 %s2368_s22, %s3183_s25  ;;  %p1825_p6 = scmp.ge.s32.totalorder %s2376_s24, 8 }
   0xa   : > { %s3187_s26 = smov (%p29_p4, %s3185_s26), 0 }
   0xb   : > { %s31_s28 = ssub.s32 %s2372_s23, %s3187_s26  ;;  %201 = sbr.rel (%p1825_p6) target bundleno = 37 (0x25), region = 16 }
   0xc   : > { %s33_s29 = sor.u32 %s32_s27, %s31_s28 }
   0xd   : > { %p34_p5 = scmp.eq.s32.totalorder %s33_s29, 0 }
   0xf   : > { %s2475_s6 = scalar_select %p34_p5, %s2356_s19, %s36_s30  }
  0x12   : > { %204 = sbr.rel (!%p45_p3) target bundleno = 37 (0x25), region = 20  ;;  %s206_s7 = sand.u32 (%p45_p3), 1, %s2356_s19  }
  0x13   : > { %s1826_s8 = sshll.u32 (%p45_p3), %s2368_s22, 4  ;;  %s2160_s9 = smul.u32 (%p45_p3), 192, %s206_s7 }
  0x14   : > { %s1827_s10 = sshll.u32 (%p45_p3), %s2372_s23, 6 }
  0x15   : > { %s211_s11 = sadd.s32 (%p45_p3), %s1827_s10, %s1826_s8  ;;  %s2489_s16 = scalar_lea.vmem (%p45_p3), [#allocation2], %s2160_s9 }
  0x16   : > { %s1828_s12 = sshll.u32 (%p45_p3), %s211_s11, 2 }
  0x17   : > { %s2484_s15 = scalar_lea.vmem (%p45_p3), %s3168_s0, %s1828_s12 }
  0x18   : > { %v229_v0 = vld [vmem:[%s2484_s15] sm:$0xff] (%p45_p3)   ;;  %v233_v1 = vld [vmem:[%s2484_s15 + $0x8] sm:$0xff] (%p45_p3)   ;;  %v237_v2 = vld [vmem:[%s2484_s15 + $0x10] sm:$0xff] (%p45_p3)  }
  0x19   : > { %230 = vst [vmem:[%s2489_s16] sm:$0xff] %v229_v0   ;;  %234 = vst [vmem:[%s2489_s16 + $0x8] sm:$0xff] %v233_v1   ;;  %v241_v3 = vld [vmem:[%s2484_s15 + $0x18] sm:$0xff]   ;;  %v245_v4 = vld [vmem:[%s2484_s15 + $0x20] sm:$0xff]  }
  0x1a   : > { %238 = vst [vmem:[%s2489_s16 + $0x10] sm:$0xff] %v237_v2   ;;  %v249_v5 = vld [vmem:[%s2484_s15 + $0x28] sm:$0xff]   ;;  %242 = vst [vmem:[%s2489_s16 + $0x18] sm:$0xff] %v241_v3   ;;  %v253_v6 = vld [vmem:[%s2484_s15 + $0x30] sm:$0xff]  }
  0x1b   : > { %246 = vst [vmem:[%s2489_s16 + $0x20] sm:$0xff] %v245_v4   ;;  %250 = vst [vmem:[%s2489_s16 + $0x28] sm:$0xff] %v249_v5   ;;  %v257_v7 = vld [vmem:[%s2484_s15 + $0x38] sm:$0xff]   ;;  %v261_v8 = vld [vmem:[%s2484_s15 + $0x200] sm:$0xff]  }
  0x1c   : > { %254 = vst [vmem:[%s2489_s16 + $0x30] sm:$0xff] %v253_v6   ;;  %258 = vst [vmem:[%s2489_s16 + $0x38] sm:$0xff] %v257_v7   ;;  %v265_v9 = vld [vmem:[%s2484_s15 + $0x208] sm:$0xff]   ;;  %v269_v10 = vld [vmem:[%s2484_s15 + $0x210] sm:$0xff]  }
  0x1d   : > { %262 = vst [vmem:[%s2489_s16 + $0x40] sm:$0xff] %v261_v8   ;;  %v273_v11 = vld [vmem:[%s2484_s15 + $0x218] sm:$0xff]   ;;  %266 = vst [vmem:[%s2489_s16 + $0x48] sm:$0xff] %v265_v9   ;;  %v277_v12 = vld [vmem:[%s2484_s15 + $0x220] sm:$0xff]  }
  0x1e   : > { %270 = vst [vmem:[%s2489_s16 + $0x50] sm:$0xff] %v269_v10   ;;  %274 = vst [vmem:[%s2489_s16 + $0x58] sm:$0xff] %v273_v11   ;;  %v281_v13 = vld [vmem:[%s2484_s15 + $0x228] sm:$0xff]   ;;  %v285_v14 = vld [vmem:[%s2484_s15 + $0x230] sm:$0xff]  }
  0x1f   : > { %278 = vst [vmem:[%s2489_s16 + $0x60] sm:$0xff] %v277_v12   ;;  %282 = vst [vmem:[%s2489_s16 + $0x68] sm:$0xff] %v281_v13   ;;  %v289_v15 = vld [vmem:[%s2484_s15 + $0x238] sm:$0xff]   ;;  %v293_v16 = vld [vmem:[%s2484_s15 + $0x400] sm:$0xff]  }
  0x20   : > { %286 = vst [vmem:[%s2489_s16 + $0x70] sm:$0xff] %v285_v14   ;;  %v297_v17 = vld [vmem:[%s2484_s15 + $0x408] sm:$0xff]   ;;  %290 = vst [vmem:[%s2489_s16 + $0x78] sm:$0xff] %v289_v15   ;;  %v301_v18 = vld [vmem:[%s2484_s15 + $0x410] sm:$0xff]  }
  0x21   : > { %294 = vst [vmem:[%s2489_s16 + $0x80] sm:$0xff] %v293_v16   ;;  %298 = vst [vmem:[%s2489_s16 + $0x88] sm:$0xff] %v297_v17   ;;  %v305_v19 = vld [vmem:[%s2484_s15 + $0x418] sm:$0xff]   ;;  %v309_v20 = vld [vmem:[%s2484_s15 + $0x420] sm:$0xff]  }
  0x22   : > { %302 = vst [vmem:[%s2489_s16 + $0x90] sm:$0xff] %v301_v18   ;;  %306 = vst [vmem:[%s2489_s16 + $0x98] sm:$0xff] %v305_v19   ;;  %v313_v21 = vld [vmem:[%s2484_s15 + $0x428] sm:$0xff]   ;;  %v317_v22 = vld [vmem:[%s2484_s15 + $0x430] sm:$0xff]  }
  0x23   : > { %310 = vst [vmem:[%s2489_s16 + $0xa0] sm:$0xff] %v309_v20   ;;  %v321_v23 = vld [vmem:[%s2484_s15 + $0x438] sm:$0xff]   ;;  %314 = vst [vmem:[%s2489_s16 + $0xa8] sm:$0xff] %v313_v21  }
  0x24   : > { %318 = vst [vmem:[%s2489_s16 + $0xb0] sm:$0xff] %v317_v22   ;;  %322 = vst [vmem:[%s2489_s16 + $0xb8] sm:$0xff] %v321_v23  }
  0x25 PF: > { %p1829_p7 = scmp.ge.s32.totalorder %s2376_s24, 1  ;;  %p468_p8 = scmp.lt.s32.totalorder %s2376_s24, 9 }
  0x27   : > { %p469_p9 = pnand %p1829_p7, %p468_p8 }
  0x28   : > { %p520_p10 = scmp.lt.s32.totalorder (!%p469_p9), %s2360_s20, 3  ;;  %s475_s17 = sand.u32 (!%p469_p9), 1, %s2352_s18   ;;  %vm761_vm0 = vcmask (!%p469_p9), 64512  }
  0x29   : > { %472 = sbr.rel (%p469_p9) target bundleno = 1042 (0x412), region = 77  ;;  %s2378_s14 = smov (!%p469_p9), 273  }
  0x2a   : > { %s2161_s27 = smul.u32 (!%p469_p9), 192, %s475_s17  ;;  %s2379_s15 = smov (!%p469_p9), 257  }
  0x2b   : > { %s2380_s16 = smov (!%p469_p9), 281   ;;  %s2381_s17 = smov (!%p469_p9), 265  }
  0x2c   : > { %s2548_s8 = scalar_lea.vmem (!%p469_p9), [#allocation2], %s2161_s27  ;;  %s2382_s27 = smov (!%p469_p9), 289  }
  0x2d   : > { %v1946_v24 = vld [vmem:[%s2548_s8] sm:$0xff] (!%p469_p9)   ;;  %v2243_v39 = vld [vmem:[%s2548_s8 + $0x48] sm:$0xff] (!%p469_p9)   ;;  %v2244_v44 = vld [vmem:[%s2548_s8 + $0x50] sm:$0xff] (!%p469_p9)   ;;  %s2384_s29 = smov (!%p469_p9), 345   ;;  %s2385_s30 = smov (!%p469_p9), 321  }
  0x2e   : > { %v1947_v27 = vunpack.c.l.bf16 (!%p469_p9), %v1946_v24  ;;  %v1948_v28 = vunpack.c.h.bf16 (!%p469_p9), %v1946_v24  ;;  %v2242_v38 = vld [vmem:[%s2548_s8 + $0x40] sm:$0xff] (!%p469_p9)   ;;  %v1171_v43 = vsel (!%p469_p9), %vm761_vm0, %v2243_v39, 0  ;;  %v1174_v53 = vsel (!%p469_p9), %vm761_vm0, %v2244_v44, 0  ;;  %v2245_v54 = vld [vmem:[%s2548_s8 + $0x58] sm:$0xff] (!%p469_p9)   ;;  %v2247_v62 = vld [vmem:[%s2548_s8 + $0x68] sm:$0xff] (!%p469_p9)   ;;  %s2387_s9 = smov (!%p469_p9), 305  }
  0x2f   : > { %2152 = vmatprep.subr.msk.bf16.mxu1 (!%p469_p9), %vm761_vm0, %v2242_v38  ;;  %v1168_v40 = vsel (!%p469_p9), %vm761_vm0, %v2242_v38, 0  ;;  %v1177_v57 = vsel (!%p469_p9), %vm761_vm0, %v2245_v54, 0  ;;  %v2246_v58 = vld [vmem:[%s2548_s8 + $0x60] sm:$0xff] (!%p469_p9)   ;;  %v1977_v63 = vld [vmem:[%s2548_s8 + $0x8] sm:$0xff] (!%p469_p9)   ;;  %v1978_v2 = vld [vmem:[%s2548_s8 + $0x10] sm:$0xff] (!%p469_p9)   ;;  %v1183_v7 = vsel (!%p469_p9), %vm761_vm0, %v2247_v62, 0 }
  0x30   : > { %s3189_s20 = smov (!%p520_p10, %s2360_s20), 3  ;;  %2065 = vmatpush3.bf16.xpose.msra.mxu1 %v1168_v40  ;;  %v1180_v61 = vsel %vm761_vm0, %v2246_v58, 0  ;;  %v1951_v3 = vunpack.c.l.bf16 %v1977_v63  ;;  %v1952_v4 = vunpack.c.h.bf16 %v1977_v63  ;;  %v1955_v5 = vunpack.c.l.bf16 %v1978_v2  ;;  %v2248_v8 = vld [vmem:[%s2548_s8 + $0x70] sm:$0xff]   ;;  %v2617_v11 = vld [vmem:[%s2548_s8 + $0x18] sm:$0xff]   ;;  %v2622_v14 = vld [vmem:[%s2548_s8 + $0x20] sm:$0xff]   ;;  %s2388_s10 = smov 297  }
  0x31   : > { %s1928_s28 = sshll.u32 %s3189_s20, 6  ;;  %s530_s7 = scalar_lea.vmem %s3171_s3, %s3189_s20  ;;  %2153 = vmatprep.subr.msk.bf16.mxu1 %vm761_vm0, %v2243_v39  ;;  %v1956_v6 = vunpack.c.h.bf16 %v1978_v2  ;;  %v1959_v16 = vunpack.c.l.bf16 %v2617_v11  ;;  %v1960_v19 = vunpack.c.h.bf16 %v2617_v11  ;;  %v1963_v20 = vunpack.c.l.bf16 %v2622_v14 }
  0x32   : > { %s2554_s11 = scalar_lea.vmem %s3169_s1, %s1928_s28  ;;  %v2556_v25 = vld [vmem:[%s530_s7] ss:$0 sm:$0xff]  ;;  %s527_s13 = scalar_lea.vmem %s3170_s2, %s3189_s20  ;;  %v1964_v23 = vunpack.c.h.bf16 %v2622_v14 }
  0x33   : > { %v2234_v26 = vld [vmem:[%s2554_s11] sm:$0xff]   ;;  %v2235_v29 = vld [vmem:[%s2554_s11 + $0x8] sm:$0xff]   ;;  %v681_v31 = vadd.f32 %v1947_v27, %v2556_v25  ;;  %v682_v32 = vadd.f32 %v1948_v28, %v2556_v25  ;;  %v2236_v34 = vld [vmem:[%s2554_s11 + $0x10] sm:$0xff]   ;;  %v683_v9 = vadd.f32 %v1951_v3, %v2556_v25  ;;  %v684_v10 = vadd.f32 %v1952_v4, %v2556_v25  ;;  %s2383_s28 = smov 337   ;;  %s2386_s7 = smov 329  }
  0x34   : > { %2144 = vmatprep.subr.msk.bf16.mxu0 %vm761_vm0, %v2234_v26  ;;  %v787_v30 = vsel %vm761_vm0, %v2234_v26, 0  ;;  %v790_v33 = vsel %vm761_vm0, %v2235_v29, 0  ;;  %v793_v41 = vsel %vm761_vm0, %v2236_v34, 0  ;;  %v2237_v42 = vld [vmem:[%s2554_s11 + $0x18] sm:$0xff]   ;;  %v2583_v45 = vld [vmem:[%s527_s13] ss:$0 sm:$0xff]  ;;  %v685_v12 = vadd.f32 %v1955_v5, %v2556_v25 }
  0x35   : > { %2033 = vmatpush3.bf16.xpose.msra.mxu0 %v787_v30  ;;  %v697_v35 = vmul.f32 0.35355338, %v681_v31  ;;  %v698_v36 = vmul.f32 0.35355338, %v682_v32  ;;  %v635_v46 = vadd.f32 %v1947_v27, %v2583_v45  ;;  %v636_v47 = vadd.f32 %v1948_v28, %v2583_v45  ;;  %v2238_v49 = vld [vmem:[%s2554_s11 + $0x20] sm:$0xff]   ;;  %v2239_v56 = vld [vmem:[%s2554_s11 + $0x28] sm:$0xff]  }
  0x36   : > { %2145 = vmatprep.subr.msk.bf16.mxu0 %vm761_vm0, %v2235_v29  ;;  %v796_v48 = vsel %vm761_vm0, %v2237_v42, 0  ;;  %v799_v55 = vsel %vm761_vm0, %v2238_v49, 0  ;;  %v802_v59 = vsel %vm761_vm0, %v2239_v56, 0  ;;  %v2240_v60 = vld [vmem:[%s2554_s11 + $0x30] sm:$0xff]   ;;  %v2241_v1 = vld [vmem:[%s2554_s11 + $0x38] sm:$0xff]   ;;  %v686_v13 = vadd.f32 %v1956_v6, %v2556_v25  ;;  %v2636_v31 = vld [vmem:[%s2548_s8 + $0x28] sm:$0xff]  }
  0x37   : > { %v713_v37 = vpack.c.bf16 %v698_v36, %v697_v35  ;;  %v651_v50 = vmul.f32 0.35355338, %v635_v46  ;;  %v652_v51 = vmul.f32 0.35355338, %v636_v47  ;;  %v805_v0 = vsel %vm761_vm0, %v2240_v60, 0  ;;  %v2249_v27 = vld [vmem:[%s2548_s8 + $0x78] sm:$0xff]  }
  0x38   : > { %2067 = vmatpush3.bf16.xpose.msra.mxu1 %v1171_v43  ;;  %v808_v15 = vsel %vm761_vm0, %v2241_v1, 0  ;;  %v699_v17 = vmul.f32 0.35355338, %v683_v9  ;;  %v700_v18 = vmul.f32 0.35355338, %v684_v10  ;;  %v687_v24 = vadd.f32 %v1959_v16, %v2556_v25  ;;  %s2389_s11 = smov 353  }
  0x39   : > { %2048 = vmatprep.mubr.msk.bf16.mxu0 %vm761_vm0, %v713_v37  ;;  %2154 = vmatprep.subr.msk.bf16.mxu1 %vm761_vm0, %v2244_v44  ;;  %v667_v52 = vpack.c.bf16 %v652_v51, %v651_v50  ;;  %v701_v21 = vmul.f32 0.35355338, %v685_v12  ;;  %v702_v22 = vmul.f32 0.35355338, %v686_v13  ;;  %v1186_v26 = vsel %vm761_vm0, %v2248_v8, 0  ;;  %s2390_s18 = smov 361  }
  0x3a   : > { %v714_v28 = vpack.c.bf16 %v700_v18, %v699_v17  ;;  %v688_v29 = vadd.f32 %v1960_v19, %v2556_v25  ;;  %v689_v30 = vadd.f32 %v1963_v20, %v2556_v25  ;;  %v703_v35 = vmul.f32 0.35355338, %v687_v24  ;;  %s2391_s12 = smov 369   ;;  %s2392_s13 = smov 313  }
  0x3b   : > { %2080 = vmatprep.mubr.msk.bf16.mxu1 %vm761_vm0, %v667_v52  ;;  %v715_v32 = vpack.c.bf16 %v702_v22, %v701_v21  ;;  %v1967_v36 = vunpack.c.l.bf16 %v2636_v31  ;;  %v1968_v39 = vunpack.c.h.bf16 %v2636_v31  ;;  %v637_v43 = vadd.f32 %v1951_v3, %v2583_v45  ;;  %p531_p11 = scmp.lt.s32.totalorder %s2364_s21, 1 }
  0x3c   : > { %v704_v37 = vmul.f32 0.35355338, %v688_v29  ;;  %v705_v38 = vmul.f32 0.35355338, %v689_v30  ;;  %v638_v44 = vadd.f32 %v1952_v4, %v2583_v45  ;;  %v639_v46 = vadd.f32 %v1955_v5, %v2583_v45 }
  0x3d   : > { %2035 = vmatpush3.bf16.xpose.msra.mxu0 %v790_v33  ;;  %v690_v33 = vadd.f32 %v1964_v23, %v2556_v25  ;;  %v640_v47 = vadd.f32 %v1956_v6, %v2583_v45  ;;  %v691_v50 = vadd.f32 %v1967_v36, %v2556_v25  ;;  %v692_v51 = vadd.f32 %v1968_v39, %v2556_v25  ;;  %s3191_s21 = smov (!%p531_p11, %s2364_s21), 1 }
  0x3e   : > { %2146 = vmatprep.subr.msk.bf16.mxu0 %vm761_vm0, %v2236_v34  ;;  %v2640_v34 = vld [vmem:[%s2548_s8 + $0x30] sm:$0xff]   ;;  %v641_v3 = vadd.f32 %v1959_v16, %v2583_v45  ;;  %v642_v4 = vadd.f32 %v1960_v19, %v2583_v45  ;;  %v643_v6 = vadd.f32 %v1963_v20, %v2583_v45  ;;  %v645_v19 = vadd.f32 %v1967_v36, %v2583_v45 }
  0x3f   : > { %v1971_v40 = vunpack.c.l.bf16 %v2640_v34 }
  0x40   : > { %2069 = vmatpush3.bf16.xpose.msra.mxu1 %v1174_v53  ;;  %v1983_v53 = vld [vmem:[%s2548_s8 + $0x38] sm:$0xff]   ;;  %v657_v12 = vmul.f32 0.35355338, %v641_v3  ;;  %v658_v13 = vmul.f32 0.35355338, %v642_v4  ;;  %v907_v4 = vlaneseq }
  0x41   : > { %2155 = vmatprep.subr.msk.bf16.mxu1 %vm761_vm0, %v2245_v54  ;;  %v693_v52 = vadd.f32 %v1971_v40, %v2556_v25  ;;  %v659_v14 = vmul.f32 0.35355338, %v643_v6  ;;  %v647_v21 = vadd.f32 %v1971_v40, %v2583_v45  ;;  %v661_v24 = vmul.f32 0.35355338, %v645_v19 }
  0x42   : > { %v670_v18 = vpack.c.bf16 %v658_v13, %v657_v12 }
  0x43   : > { %v709_v63 = vmul.f32 0.35355338, %v693_v52 }
  0x45   : > { %2037 = vmatpush3.bf16.xpose.msra.mxu0 %v793_v41  ;;  %v706_v41 = vmul.f32 0.35355338, %v690_v33 }
  0x46   : > { %2147 = vmatprep.subr.msk.bf16.mxu0 %vm761_vm0, %v2237_v42  ;;  %v1972_v42 = vunpack.c.h.bf16 %v2640_v34 }
  0x47   : > { %v717_v54 = vpack.c.bf16 %v706_v41, %v705_v38 }
  0x48   : > { %2071 = vmatpush3.bf16.xpose.msra.mxu1 %v1177_v57  ;;  %v654_v57 = vmul.f32 0.35355338, %v638_v44  ;;  %v648_v22 = vadd.f32 %v1972_v42, %v2583_v45 }
  0x49   : > { %2156 = vmatprep.subr.msk.bf16.mxu1 %vm761_vm0, %v2246_v58  ;;  %v655_v58 = vmul.f32 0.35355338, %v639_v46 }
  0x4d   : > { %2039 = vmatpush3.bf16.xpose.msra.mxu0 %v796_v48  ;;  %v1189_v48 = vsel %vm761_vm0, %v2249_v27, 0 }
  0x4e   : > { %2148 = vmatprep.subr.msk.bf16.mxu0 %vm761_vm0, %v2238_v49  ;;  %v716_v49 = vpack.c.bf16 %v704_v37, %v703_v35 }
  0x50   : > { %2073 = vmatpush3.bf16.xpose.msra.mxu1 %v1180_v61  ;;  %v707_v61 = vmul.f32 0.35355338, %v691_v50 }
  0x51   : > { %2157 = vmatprep.subr.msk.bf16.mxu1 %vm761_vm0, %v2247_v62  ;;  %v708_v62 = vmul.f32 0.35355338, %v692_v51 }
  0x55   : > { %2041 = vmatpush3.bf16.xpose.msra.mxu0 %v799_v55  ;;  %v694_v55 = vadd.f32 %v1972_v42, %v2556_v25 }
  0x56   : > { %2149 = vmatprep.subr.msk.bf16.mxu0 %vm761_vm0, %v2239_v56  ;;  %v653_v56 = vmul.f32 0.35355338, %v637_v43 }
  0x58   : > { %2075 = vmatpush3.bf16.xpose.msra.mxu1 %v1183_v7  ;;  %v668_v2 = vpack.c.bf16 %v654_v57, %v653_v56  ;;  %v644_v7 = vadd.f32 %v1964_v23, %v2583_v45 }
  0x59   : > { %2158 = vmatprep.subr.msk.bf16.mxu1 %vm761_vm0, %v2248_v8  ;;  %v718_v8 = vpack.c.bf16 %v708_v62, %v707_v61 }
  0x5d   : > { %2043 = vmatpush3.bf16.xpose.msra.mxu0 %v802_v59  ;;  %v656_v59 = vmul.f32 0.35355338, %v640_v47 }
  0x5e   : > { %2150 = vmatprep.subr.msk.bf16.mxu0 %vm761_vm0, %v2240_v60  ;;  %v1975_v60 = vunpack.c.l.bf16 %v1983_v53 }
  0x5f   : > { %v669_v5 = vpack.c.bf16 %v656_v59, %v655_v58 }
  0x60   : > { %2077 = vmatpush3.bf16.xpose.msra.mxu1 %v1186_v26  ;;  %v695_v9 = vadd.f32 %v1975_v60, %v2556_v25  ;;  %v649_v30 = vadd.f32 %v1975_v60, %v2583_v45 }
  0x61   : > { %2159 = vmatprep.subr.msk.bf16.mxu1 %vm761_vm0, %v2249_v27  ;;  %v663_v27 = vmul.f32 0.35355338, %v647_v21 }
  0x62   : > { %v711_v16 = vmul.f32 0.35355338, %v695_v9  ;;  %v665_v33 = vmul.f32 0.35355338, %v649_v30 }
  0x65   : > { %2045 = vmatpush3.bf16.xpose.msra.mxu0 %v805_v0  ;;  %v1976_v0 = vunpack.c.h.bf16 %v1983_v53 }
  0x66   : > { %2151 = vmatprep.subr.msk.bf16.mxu0 %vm761_vm0, %v2241_v1  ;;  %v710_v1 = vmul.f32 0.35355338, %v694_v55 }
  0x67   : > { %v696_v10 = vadd.f32 %v1976_v0, %v2556_v25  ;;  %v646_v25 = vadd.f32 %v1968_v39, %v2583_v45  ;;  %v650_v31 = vadd.f32 %v1976_v0, %v2583_v45 }
  0x68   : > { %2079 = vmatpush3.bf16.xpose.msra.mxu1 %v1189_v48  ;;  %v719_v11 = vpack.c.bf16 %v710_v1, %v709_v63 }
  0x69   : > { %v712_v17 = vmul.f32 0.35355338, %v696_v10  ;;  %v662_v26 = vmul.f32 0.35355338, %v646_v25  ;;  %v666_v34 = vmul.f32 0.35355338, %v650_v31 }
  0x6a   : > { %v2723_v10 = vand.u32 127, %v907_v4 }
  0x6b   : > { %v720_v23 = vpack.c.bf16 %v712_v17, %v711_v16  ;;  %v672_v29 = vpack.c.bf16 %v662_v26, %v661_v24  ;;  %v674_v35 = vpack.c.bf16 %v666_v34, %v665_v33 }
  0x6d   : > { %2047 = vmatpush3.bf16.xpose.msra.mxu0 %v808_v15  ;;  %v660_v15 = vmul.f32 0.35355338, %v644_v7 }
  0x6f   : > { %2081 = vmatmul.mubr.msk.bf16.vlgmr.msra.gmra.mrb[0].mxu1 %vm761_vm0, %v668_v2  ;;  %v671_v20 = vpack.c.bf16 %v660_v15, %v659_v14 }
  0x70   : > { %2084 = vmatprep.mubr.msk.bf16.mxu1 %vm761_vm0, %v669_v5  ;;  %v2715_v5 = vshrl.u32 %v907_v4, 7 }
  0x72   : > { %v910_v6 = vadd.s32 16, %v2715_v5  ;;  %v909_v9 = vadd.s32 8, %v2715_v5  ;;  %vm1006_vm1 = vcmp.lt.s32.totalorder %v2715_v5, 7  ;;  %v1039_v14 = vadd.s32 1, %v2715_v5 }
  0x73   : > { %vm1023_vm7 = vcmp.le.s32.totalorder %v2723_v10, %v2715_v5  ;;  %v2806_v4 = vadd.s32 88, %v2715_v5 }
  0x74   : > { %2049 = vmatmul.mubr.msk.bf16.vlgmr.msra.gmra.mrb[0].mxu0 %vm761_vm0, %v714_v28  ;;  %v664_v28 = vmul.f32 0.35355338, %v648_v22  ;;  %v1040_v16 = vadd.s32 1, %v909_v9  ;;  %vm1025_vm3 = vcmp.le.s32.totalorder %v2723_v10, %v910_v6  ;;  %vm1055_vm4 = vcmp.eq.s32.totalorder %v2723_v10, %v1039_v14 }
  0x75   : > { %2052 = vmatprep.mubr.msk.bf16.mxu0 %vm761_vm0, %v715_v32  ;;  %vm1024_vm9 = vcmp.le.s32.totalorder %v2723_v10, %v909_v9 }
  0x76   : > { %v673_v32 = vpack.c.bf16 %v664_v28, %v663_v27  ;;  %vm1056_vm6 = vcmp.eq.s32.totalorder %v2723_v10, %v1040_v16  ;;  %v914_v16 = vadd.s32 48, %v2715_v5 }
  0x77   : > { %2085 = vmatmul.mubr.msk.bf16.gmra.mrb[4].mxu1 %vm761_vm0, %v670_v18 }
  0x78   : > { %2088 = vmatprep.mubr.msk.bf16.mxu1 %vm761_vm0, %v671_v20 }
  0x7c   : > { %2053 = vmatmul.mubr.msk.bf16.gmra.mrb[4].mxu0 %vm761_vm0, %v716_v49 }
  0x7d   : > { %2056 = vmatprep.mubr.msk.bf16.mxu0 %vm761_vm0, %v717_v54 }
  0x7f   : > { %2089 = vmatmul.mubr.msk.bf16.gmra.mrb[8].mxu1 %vm761_vm0, %v672_v29 }
  0x80   : > { %2092 = vmatprep.mubr.msk.bf16.mxu1 %vm761_vm0, %v673_v32 }
  0x84   : > { %2057 = vmatmul.mubr.msk.bf16.gmra.mrb[8].mxu0 %vm761_vm0, %v718_v8  ;;  %v911_v8 = vadd.s32 24, %v2715_v5 }
  0x85   : > { %2060 = vmatprep.mubr.msk.bf16.mxu0 %vm761_vm0, %v719_v11  ;;  %v1041_v11 = vadd.s32 1, %v910_v6 }
  0x86   : > { %v1042_v15 = vadd.s32 1, %v911_v8  ;;  %vm1026_vm8 = vcmp.le.s32.totalorder %v2723_v10, %v911_v8  ;;  %v2812_v8 = vadd.s32 96, %v2715_v5 }
  0x87   : > { %2093 = vmatmul.mubr.msk.bf16.gmra.mrb[12].mxu1 %vm761_vm0, %v674_v35  ;;  %vm1057_vm2 = vcmp.eq.s32.totalorder %v2723_v10, %v1041_v11 }
  0x88   : > { %vm1058_vm5 = vcmp.eq.s32.totalorder %v2723_v10, %v1042_v15  ;;  %v915_v15 = vadd.s32 56, %v2715_v5 }
  0x8c   : > { %2061 = vmatmul.mubr.msk.bf16.gmra.mrb[12].mxu0 %vm761_vm0, %v720_v23 }
 0x142   : > { %v2683_v43 = vpop.f32.mrb[0].mxu1 }
 0x143   : > { %v2685_v44 = vpop.f32.mrb[1].mxu1 }
 0x144   : > { %v2687_v46 = vpop.f32.mrb[2].mxu1 }
 0x145   : > { %v2689_v48 = vpop.f32.mrb[3].mxu1 }
 0x147   : > { %v2050_v36 = vpop.f32.mrb[0].mxu0 }
 0x148   : > { %936 = vrot.lane.b32.xlu1 %v2050_v36, %s2378_s14  ;;  %v844_v37 = vpop.f32.mrb[1].mxu0  ;;  %s2393_s14 = smov 377  }
 0x149   : > { %928 = vrot.lane.b32.xlu0 %v844_v37, %s2379_s15  ;;  %v2051_v38 = vpop.f32.mrb[2].mxu0 }
 0x14a   : > { %v847_v39 = vpop.f32.mrb[3].mxu0  ;;  %v2691_v52 = vpop.f32.mrb[4].mxu1 }
 0x14b   : > { %v2693_v53 = vpop.f32.mrb[5].mxu1 }
 0x14c   : > { %v2695_v54 = vpop.f32.mrb[6].mxu1 }
 0x14d   : > { %940 = vrot.lane.b32.xlu0 %v2051_v38, %s2380_s16  ;;  %v2697_v56 = vpop.f32.mrb[7].mxu1 }
 0x14f   : > { %v2054_v45 = vpop.f32.mrb[4].mxu0 }
 0x150   : > { %v860_v40 = vpop.f32.mrb[5].mxu0 }
 0x151   : > { %932 = vrot.lane.b32.xlu0 %v847_v39, %s2381_s17  ;;  %944 = vrot.lane.b32.xlu1 %v860_v40, %s2382_s27  ;;  %v2055_v41 = vpop.f32.mrb[6].mxu0  ;;  %s533_s17 = scalar_lea.vmem %s3172_s4, %s3191_s21  ;;  %s1832_s27 = sshll.u32 %s3189_s20, 4 }
 0x152   : > { %v863_v42 = vpop.f32.mrb[7].mxu0  ;;  %v2699_v60 = vpop.f32.mrb[8].mxu1  ;;  %v2745_v27 = vld [vmem:[%s533_s17] ss:$0 sm:$0xff] }
 0x153   : > { %v2701_v61 = vpop.f32.mrb[9].mxu1 }
 0x154   : > { %v2703_v62 = vpop.f32.mrb[10].mxu1 }
 0x155   : > { %v2705_v63 = vpop.f32.mrb[11].mxu1 }
 0x157   : > { %v2058_v47 = vpop.f32.mrb[8].mxu0 }
 0x158   : > { %968 = vrot.lane.b32.xlu1 %v2058_v47, %s2383_s28  ;;  %v876_v49 = vpop.f32.mrb[9].mxu0 }
 0x159   : > { %v2059_v50 = vpop.f32.mrb[10].mxu0 }
 0x15a   : > { %972 = vrot.lane.b32.xlu0 %v2059_v50, %s2384_s29  ;;  %v879_v51 = vpop.f32.mrb[11].mxu0  ;;  %v2707_v0 = vpop.f32.mrb[12].mxu1 }
 0x15b   : > { %v2709_v1 = vpop.f32.mrb[13].mxu1 }
 0x15c   : > { %960 = vrot.lane.b32.xlu1 %v876_v49, %s2385_s30  ;;  %v2711_v2 = vpop.f32.mrb[14].mxu1  ;;  %v913_v49 = vadd.s32 40, %v2715_v5 }
 0x15d   : > { %v2713_v3 = vpop.f32.mrb[15].mxu1 }
 0x15e   : > { %964 = vrot.lane.b32.xlu0 %v879_v51, %s2386_s7  ;;  %v2794_v51 = vadd.s32 64, %v2715_v5  ;;  %vm1028_vm11 = vcmp.le.s32.totalorder %v2723_v10, %v913_v49 }
 0x15f   : > { %v2062_v55 = vpop.f32.mrb[12].mxu0 }
 0x160   : > { %952 = vrot.lane.b32.xlu1 %v2054_v45, %s2387_s9  ;;  %v892_v57 = vpop.f32.mrb[13].mxu0  ;;  %v1047_v9 = vadd.s32 1, %v2794_v51  ;;  %vm1031_vm13 = vcmp.le.s32.totalorder %v2723_v10, %v2794_v51 }
 0x161   : > { %v2063_v58 = vpop.f32.mrb[14].mxu0 }
 0x162   : > { %948 = vrot.lane.b32.xlu0 %v863_v42, %s2388_s10  ;;  %v895_v59 = vpop.f32.mrb[15].mxu0  ;;  %vm1063_vm14 = vcmp.eq.s32.totalorder %v2723_v10, %v1047_v9 }
 0x164   : > { %976 = vrot.lane.b32.xlu1 %v892_v57, %s2389_s11  ;;  %v2797_v57 = vadd.s32 72, %v2715_v5 }
 0x166   : > { %980 = vrot.lane.b32.xlu0 %v895_v59, %s2390_s18  ;;  %v2803_v59 = vadd.s32 32, %v2715_v5 }
 0x168   : > { %984 = vrot.lane.b32.xlu1 %v2062_v55, %s2391_s12  ;;  %v1044_v55 = vadd.s32 1, %v913_v49 }
 0x16a   : > { %956 = vrot.lane.b32.xlu0 %v2055_v41, %s2392_s13  ;;  %vm1060_vm10 = vcmp.eq.s32.totalorder %v2723_v10, %v1044_v55  ;;  %v2878_v55 = vadd.s32 112, %v2715_v5 }
 0x16c   : > { %988 = vrot.lane.b32.xlu1 %v2063_v58, %s2393_s14 }
 0x1ba   : > { %v937_v12 = vpop.permute.xlu1 %936 }
 0x1bb   : > { %v2719_v7 = vpop.permute.xlu0 %928  ;;  %v992_v17 = vrot.slane %v937_v12, 1 }
 0x1bc   : > { %v3174_v22 = vrot.slane %v2719_v7, 1 }
 0x1bf   : > { %v941_v13 = vpop.permute.xlu0 %940 }
 0x1c0   : > { %v993_v18 = vrot.slane %v941_v13, 1 }
 0x1c2   : > { %v1019_v19 = vsel %vm1006_vm1, %v992_v17, %v993_v18 }
 0x1c3   : > { %v933_v25 = vpop.permute.xlu0 %932  ;;  %v2738_v20 = vpop.permute.xlu1 %944  ;;  %v1073_v21 = vsel %vm1057_vm2, 0.0, %v1019_v19  ;;  %v2827_v19 = vadd.s32 1, %v2806_v4  ;;  %vm1032_vm2 = vcmp.le.s32.totalorder %v2723_v10, %v2797_v57 }
 0x1c4   : > { %v991_v23 = vrot.slane %v933_v25, 1  ;;  %v994_v24 = vrot.slane %v2738_v20, 1  ;;  %v1089_v26 = vsel %vm1025_vm3, %v937_v12, %v1073_v21  ;;  %v2817_v12 = vadd.s32 1, %v2797_v57 }
 0x1c5   : > { %v1234_v28 = vadd.f32 %v2683_v43, %v1089_v26  ;;  %v2838_v26 = vadd.s32 104, %v2715_v5  ;;  %vm1027_vm3 = vcmp.le.s32.totalorder %v2723_v10, %v2803_v59 }
 0x1c6   : > { %v1021_v29 = vsel %vm1006_vm1, %v3174_v22, %v991_v23  ;;  %v1018_v30 = vsel %vm1006_vm1, %v993_v18, %v994_v24  ;;  %v1020_v31 = vsel %vm1006_vm1, %v991_v23, %v992_v17  ;;  %v1043_v18 = vadd.s32 1, %v2803_v59 }
 0x1c7   : > { %v1071_v32 = vsel %vm1055_vm4, 0.0, %v1021_v29  ;;  %v1074_v33 = vsel %vm1058_vm5, 0.0, %v1018_v30  ;;  %v1072_v34 = vsel %vm1056_vm6, 0.0, %v1020_v31  ;;  %v2763_v35 = vadd.f32 %v2745_v27, %v1234_v28 }
 0x1c8   : > { %v1087_v36 = vsel %vm1023_vm7, %v2719_v7, %v1071_v32  ;;  %v1090_v37 = vsel %vm1026_vm8, %v941_v13, %v1074_v33  ;;  %v1088_v38 = vsel %vm1024_vm9, %v933_v25, %v1072_v34  ;;  %v2835_v23 = vadd.s32 1, %v2812_v8 }
 0x1c9   : > { %v1226_v39 = vadd.f32 %v2685_v44, %v1087_v36  ;;  %v1229_v45 = vadd.f32 %v2689_v48, %v1088_v38  ;;  %1314 = vmax.xlane.f32.xlu1 %v2763_v35  ;;  %v1237_v41 = vadd.f32 %v2687_v46, %v1090_v37  ;;  %v2786_v48 = vadd.s32 80, %v2715_v5 }
 0x1ca   : > { %v2769_v40 = vpop.permute.xlu1 %968  ;;  %vm1064_vm15 = vcmp.eq.s32.totalorder %v2723_v10, %v2817_v12  ;;  %v1046_v32 = vadd.s32 1, %v915_v15  ;;  %v1045_v33 = vadd.s32 1, %v914_v16  ;;  %vm1059_vm4 = vcmp.eq.s32.totalorder %v2723_v10, %v1043_v18 }
 0x1cb   : > { %v2773_v42 = vadd.f32 %v2745_v27, %v1229_v45  ;;  %v2776_v43 = vadd.f32 %v2745_v27, %v1226_v39  ;;  %v2789_v46 = vadd.f32 %v2745_v27, %v1237_v41  ;;  %v2809_v6 = vadd.s32 1, %v2786_v48 }
 0x1cc   : > { %v2778_v47 = vpop.permute.xlu0 %972  ;;  %vm1033_vm0 = vcmp.le.s32.totalorder %v2723_v10, %v2786_v48  ;;  %vm1067_vm5 = vcmp.eq.s32.totalorder %v2723_v10, %v2835_v23  ;;  %vm1066_vm6 = vcmp.eq.s32.totalorder %v2723_v10, %v2827_v19  ;;  %v1000_v45 = vrot.slane %v2769_v40, 1 }
 0x1cd   : > { %1312 = vmax.xlane.f32.xlu1 %v2773_v42  ;;  %1310 = vmax.xlane.f32.xlu0 %v2776_v43  ;;  %vm1065_vm12 = vcmp.eq.s32.totalorder %v2723_v10, %v2809_v6  ;;  %v1001_v34 = vrot.slane %v2778_v47, 1  ;;  %vm1030_vm7 = vcmp.le.s32.totalorder %v2723_v10, %v915_v15  ;;  %vm1062_vm8 = vcmp.eq.s32.totalorder %v2723_v10, %v1046_v32 }
 0x1ce   : > { %v2783_v44 = vpop.permute.xlu1 %960  ;;  %vm1029_vm9 = vcmp.le.s32.totalorder %v2723_v10, %v914_v16  ;;  %v923_v22 = vadd.s32 120, %v2715_v5 }
 0x1cf   : > { %v998_v30 = vrot.slane %v2783_v44, 1 }
 0x1d0   : > { %v2791_v50 = vpop.permute.xlu0 %964  ;;  %v1054_v48 = vadd.s32 1, %v923_v22 }
 0x1d1   : > { %1316 = vmax.xlane.f32.xlu0 %v2789_v46  ;;  %v999_v25 = vrot.slane %v2791_v50, 1 }
 0x1d2   : > { %v2800_v58 = vpop.permute.xlu1 %952 }
 0x1d3   : > { %v996_v13 = vrot.slane %v2800_v58, 1  ;;  %v1013_v38 = vsel %vm1006_vm1, %v998_v30, %v999_v25 }
 0x1d4   : > { %v949_v11 = vpop.permute.xlu0 %948 }
 0x1d5   : > { %v995_v14 = vrot.slane %v949_v11, 1 }
 0x1d6   : > { %v2823_v17 = vpop.permute.xlu1 %976 }
 0x1d7   : > { %v1016_v21 = vsel %vm1006_vm1, %v995_v14, %v996_v13  ;;  %v1017_v39 = vsel %vm1006_vm1, %v994_v24, %v995_v14  ;;  %v1079_v14 = vsel %vm1063_vm14, 0.0, %v1013_v38 }
 0x1d8   : > { %v1076_v28 = vsel %vm1060_vm10, 0.0, %v1016_v21  ;;  %v2847_v29 = vpop.permute.xlu0 %980  ;;  %vm1061_vm10 = vcmp.eq.s32.totalorder %v2723_v10, %v1045_v33  ;;  %v1012_v21 = vsel %vm1006_vm1, %v999_v25, %v1000_v45  ;;  %v1095_v18 = vsel %vm1031_vm13, %v2783_v44, %v1079_v14 }
 0x1d9   : > { %v1092_v31 = vsel %vm1028_vm11, %v949_v11, %v1076_v28  ;;  %v1011_v11 = vsel %vm1006_vm1, %v1000_v45, %v1001_v34  ;;  %v1075_v28 = vsel %vm1059_vm4, 0.0, %v1017_v39  ;;  %v1003_v32 = vrot.slane %v2847_v29, 1 }
 0x1da   : > { %v1245_v36 = vadd.f32 %v2697_v56, %v1092_v31  ;;  %v2856_v37 = vpop.permute.xlu1 %984  ;;  %v1052_v56 = vadd.s32 1, %v2838_v26  ;;  %v1002_v31 = vrot.slane %v2823_v17, 1  ;;  %v1053_v45 = vadd.s32 1, %v2878_v55 }
 0x1db   : > { %v1080_v44 = vsel %vm1064_vm15, 0.0, %v1012_v21  ;;  %v1004_v16 = vrot.slane %v2856_v37, 1  ;;  %v1258_v6 = vadd.f32 %v2701_v61, %v1095_v18  ;;  %vm1034_vm11 = vcmp.le.s32.totalorder %v2723_v10, %v2806_v4 }
 0x1dc   : > { %v957_v41 = vpop.permute.xlu0 %956  ;;  %v2875_v49 = vadd.f32 %v2745_v27, %v1245_v36  ;;  %vm1068_vm13 = vcmp.eq.s32.totalorder %v2723_v10, %v1052_v56  ;;  %vm1069_vm14 = vcmp.eq.s32.totalorder %v2723_v10, %v1053_v45  ;;  %vm1036_vm15 = vcmp.le.s32.totalorder %v2723_v10, %v2838_v26 }
 0x1dd   : > { %v997_v24 = vrot.slane %v957_v41, 1  ;;  %v2966_v56 = vadd.f32 %v2745_v27, %v1258_v6  ;;  %v2253_v6 = vld [vmem:[%s2548_s8 + $0x98] sm:$0xff]  }
 0x1de   : > { %1320 = vmax.xlane.f32.xlu0 %v2875_v49  ;;  %v989_v38 = vpop.permute.xlu1 %988 }
 0x1df   : > { %v1014_v33 = vsel %vm1006_vm1, %v997_v24, %v998_v30  ;;  %v1015_v36 = vsel %vm1006_vm1, %v996_v13, %v997_v24  ;;  %v1091_v13 = vsel %vm1027_vm3, %v2738_v20, %v1075_v28  ;;  %v1081_v24 = vsel %vm1065_vm12, 0.0, %v1011_v11 }
 0x1e0   : > { %v1078_v9 = vsel %vm1062_vm8, 0.0, %v1014_v33  ;;  %v1077_v25 = vsel %vm1061_vm10, 0.0, %v1015_v36  ;;  %v1009_v20 = vsel %vm1006_vm1, %v1002_v31, %v1003_v32  ;;  %v1005_v59 = vrot.slane %v989_v38, 1 }
 0x1e1   : > { %v1094_v39 = vsel %vm1030_vm7, %v957_v41, %v1078_v9  ;;  %v1093_v30 = vsel %vm1029_vm9, %v2800_v58, %v1077_v25  ;;  %v1010_v58 = vsel %vm1006_vm1, %v1001_v34, %v1002_v31  ;;  %v1096_v34 = vsel %vm1032_vm2, %v2791_v50, %v1080_v44  ;;  %v2250_v31 = vld [vmem:[%s2548_s8 + $0x80] sm:$0xff]  }
 0x1e2   : > { %v1253_v51 = vadd.f32 %v2695_v54, %v1094_v39  ;;  %v1250_v15 = vadd.f32 %v2691_v52, %v1093_v30  ;;  %v1242_v54 = vadd.f32 %v2693_v53, %v1091_v13  ;;  %v1097_v52 = vsel %vm1033_vm0, %v2769_v40, %v1081_v24  ;;  %2096 = vmatprep.subr.bf16.mxu0 %v2250_v31 }
 0x1e3   : > { %vm1035_vm12 = vcmp.le.s32.totalorder %v2723_v10, %v2812_v8  ;;  %v1083_v53 = vsel %vm1067_vm5, 0.0, %v1009_v20  ;;  %v1082_v61 = vsel %vm1066_vm6, 0.0, %v1010_v58  ;;  %v1007_v40 = vsel %vm1006_vm1, %v1004_v16, %v1005_v59  ;;  %2128 = vmatprep.subr.bf16.mxu1 %v2250_v31  ;;  %2097 = vmatpush3.bf16.msra.mxu0 %v2250_v31 }
 0x1e4   : > { %v2928_v41 = vadd.f32 %v2745_v27, %v1250_v15  ;;  %v2931_v12 = vadd.f32 %v2745_v27, %v1253_v51  ;;  %v1008_v50 = vsel %vm1006_vm1, %v1003_v32, %v1004_v16  ;;  %v1266_v57 = vadd.f32 %v2699_v60, %v1097_v52  ;;  %v2251_v32 = vld [vmem:[%s2548_s8 + $0x88] sm:$0xff]   ;;  %2136 = vmatpush3.bf16.msra.mxu1 %v2250_v31 }
 0x1e5   : > { %v1261_v8 = vadd.f32 %v2705_v63, %v1096_v34  ;;  %v2963_v23 = vadd.f32 %v2745_v27, %v1242_v54  ;;  %v1099_v19 = vsel %vm1035_vm12, %v2823_v17, %v1083_v53  ;;  %v1098_v11 = vsel %vm1034_vm11, %v2778_v47, %v1082_v61  ;;  %2098 = vmatprep.subr.bf16.mxu0 %v2251_v32  ;;  %v2254_v61 = vld [vmem:[%s2548_s8 + $0xa0] sm:$0xff]  }
 0x1e6   : > { %1322 = vmax.xlane.f32.xlu1 %v2928_v41  ;;  %1324 = vmax.xlane.f32.xlu0 %v2931_v12  ;;  %v1084_v14 = vsel %vm1068_vm13, 0.0, %v1008_v50  ;;  %vm1037_vm0 = vcmp.le.s32.totalorder %v2723_v10, %v2878_v55  ;;  %v1085_v60 = vsel %vm1069_vm14, 0.0, %v1007_v40  ;;  %v3175_v63 = vrot.slane %v2719_v7, 1 }
 0x1e7   : > { %vm1070_vm2 = vcmp.eq.s32.totalorder %v2723_v10, %v1054_v48  ;;  %v1274_v47 = vadd.f32 %v2709_v1, %v1099_v19  ;;  %v2986_v4 = vadd.f32 %v2745_v27, %v1266_v57  ;;  %v2989_v26 = vadd.f32 %v2745_v27, %v1261_v8  ;;  %2129 = vmatprep.subr.bf16.mxu1 %v2251_v32  ;;  %v2255_v19 = vld [vmem:[%s2548_s8 + $0xa8] sm:$0xff]  }
 0x1e8   : > { %v1022_v17 = vsel %vm1006_vm1, %v1005_v59, %v3175_v63  ;;  %v1269_v21 = vadd.f32 %v2703_v62, %v1098_v11  ;;  %v1100_v55 = vsel %vm1036_vm15, %v2847_v29, %v1084_v14  ;;  %v1101_v28 = vsel %vm1037_vm0, %v2856_v37, %v1085_v60  ;;  %2099 = vmatpush3.bf16.msra.mxu0 %v2251_v32 }
 0x1e9   : > { %vm1038_vm3 = vcmp.le.s32.totalorder %v2723_v10, %v923_v22  ;;  %v1086_v5 = vsel %vm1070_vm2, 0.0, %v1022_v17  ;;  %v1277_v1 = vadd.f32 %v2713_v3, %v1100_v55  ;;  %v2999_v7 = vadd.f32 %v2745_v27, %v1274_v47  ;;  %2137 = vmatpush3.bf16.msra.mxu1 %v2251_v32  ;;  %v2256_v47 = vld [vmem:[%s2548_s8 + $0xb0] sm:$0xff]  }
 0x1ea   : > { %1318 = vmax.xlane.f32.xlu1 %v2963_v23  ;;  %1326 = vmax.xlane.f32.xlu0 %v2966_v56  ;;  %v3002_v62 = vadd.f32 %v2745_v27, %v1269_v21  ;;  %v1282_v29 = vadd.f32 %v2707_v0, %v1101_v28  ;;  %v1102_v37 = vsel %vm1038_vm3, %v989_v38, %v1086_v5  ;;  %vm1671_vm1 = vcmask 60416  }
 0x1eb   : > { %v1285_v10 = vadd.f32 %v2711_v2, %v1102_v37  ;;  %v3012_v3 = vadd.f32 %v2745_v27, %v1277_v1  ;;  %v2252_v2 = vld [vmem:[%s2548_s8 + $0x90] sm:$0xff]  }
 0x1ec   : > { %v3009_v22 = vadd.f32 %v2745_v27, %v1282_v29  ;;  %2100 = vmatprep.subr.bf16.mxu0 %v2252_v2  ;;  %2130 = vmatprep.subr.bf16.mxu1 %v2252_v2 }
 0x1ed   : > { %v3017_v0 = vadd.f32 %v2745_v27, %v1285_v10  ;;  %2101 = vmatpush3.bf16.msra.mxu0 %v2252_v2  ;;  %2138 = vmatpush3.bf16.msra.mxu1 %v2252_v2 }
 0x1ee   : > { %1330 = vmax.xlane.f32.xlu1 %v2986_v4  ;;  %1328 = vmax.xlane.f32.xlu0 %v2989_v26 }
 0x1ef   : > { %2102 = vmatprep.subr.bf16.mxu0 %v2253_v6  ;;  %2131 = vmatprep.subr.bf16.mxu1 %v2253_v6 }
 0x1f1   : > { %2103 = vmatpush3.bf16.msra.mxu0 %v2253_v6  ;;  %2139 = vmatpush3.bf16.msra.mxu1 %v2253_v6 }
 0x1f2   : > { %1334 = vmax.xlane.f32.xlu1 %v2999_v7  ;;  %1332 = vmax.xlane.f32.xlu0 %v3002_v62 }
 0x1f3   : > { %2104 = vmatprep.subr.bf16.mxu0 %v2254_v61  ;;  %2132 = vmatprep.subr.bf16.mxu1 %v2254_v61 }
 0x1f5   : > { %2105 = vmatpush3.bf16.msra.mxu0 %v2254_v61  ;;  %2140 = vmatpush3.bf16.msra.mxu1 %v2254_v61 }
 0x1f6   : > { %1338 = vmax.xlane.f32.xlu1 %v3009_v22  ;;  %1336 = vmax.xlane.f32.xlu0 %v3012_v3 }
 0x1f7   : > { %2106 = vmatprep.subr.bf16.mxu0 %v2255_v19  ;;  %2133 = vmatprep.subr.bf16.mxu1 %v2255_v19 }
 0x1f9   : > { %2107 = vmatpush3.bf16.msra.mxu0 %v2255_v19  ;;  %2141 = vmatpush3.bf16.msra.mxu1 %v2255_v19 }
 0x1fa   : > { %1340 = vmax.xlane.f32.xlu0 %v3017_v0  ;;  %2108 = vmatprep.subr.bf16.mxu0 %v2256_v47 }
 0x1fb   : > { %2134 = vmatprep.subr.bf16.mxu1 %v2256_v47 }
 0x1fd   : > { %2109 = vmatpush3.bf16.msra.mxu0 %v2256_v47  ;;  %2142 = vmatpush3.bf16.msra.mxu1 %v2256_v47 }
 0x256   : > { %v1315_v33 = vpop.xlane.xlu1 %1314 }
 0x257   : > { %v1344_v27 = vsub.f32 %v2763_v35, %v1315_v33 }
 0x259   : > { %v1362_v36 = vmul.f32 1.442695, %v1344_v27 }
 0x25a   : > { %v1313_v9 = vpop.xlane.xlu1 %1312  ;;  %v1311_v38 = vpop.xlane.xlu0 %1310 }
 0x25b   : > { %2258 = vpow2.f32 %v1362_v36  ;;  %v1343_v25 = vsub.f32 %v2773_v42, %v1313_v9  ;;  %v1342_v45 = vsub.f32 %v2776_v43, %v1311_v38 }
 0x25d   : > { %v1360_v18 = vmul.f32 1.442695, %v1343_v25  ;;  %v1358_v39 = vmul.f32 1.442695, %v1342_v45 }
 0x25e   : > { %v1317_v30 = vpop.xlane.xlu0 %1316 }
 0x25f   : > { %2260 = vpow2.f32 %v1360_v18  ;;  %v1345_v13 = vsub.f32 %v2789_v46, %v1317_v30 }
 0x260   : > { %2262 = vpow2.f32 %v1358_v39 }
 0x261   : > { %v1364_v24 = vmul.f32 1.442695, %v1345_v13 }
 0x263   : > { %2264 = vpow2.f32 %v1364_v24 }
 0x265   : > { %v3027_v44 = vpop.eup %2258 }
 0x266   : > { %1394 = vadd.xlane.f32.xlu1 %v3027_v44 }
 0x269   : > { %v3030_v35 = vpop.eup %2260 }
 0x26a   : > { %v3032_v51 = vpop.eup %2262  ;;  %1392 = vadd.xlane.f32.xlu0 %v3030_v35 }
 0x26b   : > { %1390 = vadd.xlane.f32.xlu1 %v3032_v51  ;;  %v1321_v42 = vpop.xlane.xlu0 %1320 }
 0x26c   : > { %v1347_v43 = vsub.f32 %v2875_v49, %v1321_v42 }
 0x26d   : > { %v3037_v46 = vpop.eup %2264 }
 0x26e   : > { %v1368_v15 = vmul.f32 1.442695, %v1347_v43  ;;  %1396 = vadd.xlane.f32.xlu0 %v3037_v46 }
 0x270   : > { %2266 = vpow2.f32 %v1368_v15 }
 0x273   : > { %v1323_v58 = vpop.xlane.xlu1 %1322  ;;  %v1325_v16 = vpop.xlane.xlu0 %1324 }
 0x274   : > { %v1349_v20 = vsub.f32 %v2931_v12, %v1325_v16  ;;  %v1348_v60 = vsub.f32 %v2928_v41, %v1323_v58 }
 0x276   : > { %v1372_v59 = vmul.f32 1.442695, %v1349_v20  ;;  %v1370_v55 = vmul.f32 1.442695, %v1348_v60 }
 0x277   : > { %v1319_v54 = vpop.xlane.xlu1 %1318  ;;  %v1327_v52 = vpop.xlane.xlu0 %1326 }
 0x278   : > { %v1346_v34 = vsub.f32 %v2963_v23, %v1319_v54  ;;  %2268 = vpow2.f32 %v1372_v59  ;;  %v1350_v48 = vsub.f32 %v2966_v56, %v1327_v52 }
 0x27a   : > { %v3043_v49 = vpop.eup %2266  ;;  %v1366_v53 = vmul.f32 1.442695, %v1346_v34  ;;  %v1374_v63 = vmul.f32 1.442695, %v1350_v48 }
 0x27b   : > { %v1331_v40 = vpop.xlane.xlu1 %1330  ;;  %1400 = vadd.xlane.f32.xlu0 %v3043_v49  ;;  %v1329_v12 = vpop.xlane.xlu0 %1328 }
 0x27c   : > { %2270 = vpow2.f32 %v1366_v53  ;;  %v1352_v50 = vsub.f32 %v2986_v4, %v1331_v40  ;;  %v1351_v57 = vsub.f32 %v2989_v26, %v1329_v12 }
 0x27e   : > { %v1378_v8 = vmul.f32 1.442695, %v1352_v50  ;;  %v1376_v23 = vmul.f32 1.442695, %v1351_v57 }
 0x27f   : > { %v1335_v11 = vpop.xlane.xlu1 %1334  ;;  %v1333_v14 = vpop.xlane.xlu0 %1332 }
 0x280   : > { %2272 = vpow2.f32 %v1378_v8  ;;  %v1353_v56 = vsub.f32 %v3002_v62, %v1333_v14  ;;  %v1354_v26 = vsub.f32 %v2999_v7, %v1335_v11  ;;  %v2257_v62 = vld [vmem:[%s2548_s8 + $0xb8] sm:$0xff]   ;;  %s1833_s8 = sshll.u32 %s3191_s21, 6 }
 0x281   : > { %2274 = vpow2.f32 %v1376_v23  ;;  %2110 = vmatprep.subr.bf16.mxu0 %v2257_v62  ;;  %2135 = vmatprep.subr.bf16.mxu1 %v2257_v62  ;;  %s540_s28 = sadd.s32 %s1833_s8, %s1832_s27 }
 0x282   : > { %v1380_v17 = vmul.f32 1.442695, %v1353_v56  ;;  %v3054_v4 = vpop.eup %2268  ;;  %2276 = vpow2.f32 %v1374_v63  ;;  %v1382_v29 = vmul.f32 1.442695, %v1354_v26  ;;  %2111 = vmatpush3.bf16.msra.mxu0 %v2257_v62  ;;  %2143 = vmatpush3.bf16.msra.mxu1 %v2257_v62  ;;  %s1834_s29 = sshll.u32 %s540_s28, 2 }
 0x283   : > { %v1337_v21 = vpop.xlane.xlu0 %1336  ;;  %1404 = vadd.xlane.f32.xlu0 %v3054_v4  ;;  %v1339_v28 = vpop.xlane.xlu1 %1338  ;;  %s3113_s9 = scalar_lea.vmem %s3173_s5, %s1834_s29 }
 0x284   : > { %v1355_v41 = vsub.f32 %v3012_v3, %v1337_v21  ;;  %2278 = vpow2.f32 %v1380_v17  ;;  %v1356_v37 = vsub.f32 %v3009_v22, %v1339_v28 }
 0x285   : > { %2280 = vpow2.f32 %v1370_v55 }
 0x286   : > { %v3059_v5 = vpop.eup %2270  ;;  %v1384_v1 = vmul.f32 1.442695, %v1355_v41  ;;  %v1386_v2 = vmul.f32 1.442695, %v1356_v37 }
 0x287   : > { %1398 = vadd.xlane.f32.xlu1 %v3059_v5  ;;  %v1341_v7 = vpop.xlane.xlu0 %1340 }
 0x288   : > { %v1357_v10 = vsub.f32 %v3017_v0, %v1341_v7  ;;  %2282 = vpow2.f32 %v1384_v1 }
 0x289   : > { %2284 = vpow2.f32 %v1382_v29 }
 0x28a   : > { %v3065_v3 = vpop.eup %2272  ;;  %v1388_v31 = vmul.f32 1.442695, %v1357_v10 }
 0x28b   : > { %v3067_v32 = vpop.eup %2274  ;;  %1410 = vadd.xlane.f32.xlu1 %v3065_v3 }
 0x28c   : > { %2286 = vpow2.f32 %v1388_v31  ;;  %1408 = vadd.xlane.f32.xlu0 %v3067_v32  ;;  %v3071_v22 = vpop.eup %2276 }
 0x28d   : > { %2288 = vpow2.f32 %v1386_v2 }
 0x28e   : > { %v3073_v0 = vpop.eup %2278 }
 0x28f   : > { %1406 = vadd.xlane.f32.xlu1 %v3071_v22  ;;  %v3077_v33 = vpop.eup %2280 }
 0x290   : > { %1412 = vadd.xlane.f32.xlu0 %v3073_v0 }
 0x292   : > { %v3079_v27 = vpop.eup %2282 }
 0x293   : > { %1402 = vadd.xlane.f32.xlu1 %v3077_v33  ;;  %v3083_v36 = vpop.eup %2284 }
 0x294   : > { %1416 = vadd.xlane.f32.xlu0 %v3079_v27 }
 0x296   : > { %v3085_v9 = vpop.eup %2286 }
 0x297   : > { %1414 = vadd.xlane.f32.xlu1 %v3083_v36  ;;  %v3089_v38 = vpop.eup %2288 }
 0x298   : > { %1420 = vadd.xlane.f32.xlu0 %v3085_v9 }
 0x29b   : > { %1418 = vadd.xlane.f32.xlu1 %v3089_v38 }
 0x2f3   : > { %v1395_v25 = vpop.xlane.xlu1 %1394 }
 0x2f7   : > { %v1393_v45 = vpop.xlane.xlu0 %1392 }
 0x2f8   : > { %v1391_v18 = vpop.xlane.xlu1 %1390  ;;  %2290 = vrcp.f32 %v1393_v45 }
 0x2f9   : > { %2292 = vrcp.f32 %v1391_v18 }
 0x2fa   : > { %2294 = vrcp.f32 %v1395_v25 }
 0x2fb   : > { %v1397_v39 = vpop.xlane.xlu0 %1396 }
 0x2fc   : > { %2296 = vrcp.f32 %v1397_v39 }
 0x302   : > { %v2291_v30 = vpop.eup %2290 }
 0x303   : > { %v2293_v13 = vpop.eup %2292  ;;  %v1439_v24 = vmul.f32 %v2291_v30, %v3030_v35 }
 0x304   : > { %v2295_v42 = vpop.eup %2294  ;;  %v1438_v43 = vmul.f32 %v2293_v13, %v3032_v51 }
 0x305   : > { %v1440_v16 = vmul.f32 %v2295_v42, %v3027_v44 }
 0x306   : > { %v2297_v15 = vpop.eup %2296  ;;  %v1454_v58 = vpack.c.bf16 %v1439_v24, %v1438_v43 }
 0x307   : > { %v1441_v20 = vmul.f32 %v2297_v15, %v3037_v46 }
 0x308   : > { %2112 = vmatprep.mubr.bf16.mxu0 %v1454_v58  ;;  %v1401_v6 = vpop.xlane.xlu0 %1400 }
 0x309   : > { %v1455_v59 = vpack.c.bf16 %v1441_v20, %v1440_v16  ;;  %2298 = vrcp.f32 %v1401_v6 }
 0x30b   : > { %2113 = vmatmul.mubr.bf16.vlgmr.msra.gmra.mrb[16].mxu0 %v1455_v59 }
 0x310   : > { %v1405_v52 = vpop.xlane.xlu0 %1404 }
 0x313   : > { %v2299_v51 = vpop.eup %2298 }
 0x314   : > { %v1399_v54 = vpop.xlane.xlu1 %1398  ;;  %v1443_v12 = vmul.f32 %v2299_v51, %v3043_v49 }
 0x315   : > { %2300 = vrcp.f32 %v1399_v54 }
 0x318   : > { %v1411_v34 = vpop.xlane.xlu1 %1410 }
 0x319   : > { %v1409_v53 = vpop.xlane.xlu0 %1408 }
 0x31a   : > { %2302 = vrcp.f32 %v1409_v53 }
 0x31b   : > { %2304 = vrcp.f32 %v1411_v34 }
 0x31c   : > { %v1407_v35 = vpop.xlane.xlu1 %1406 }
 0x31d   : > { %2306 = vrcp.f32 %v1407_v35  ;;  %v1413_v61 = vpop.xlane.xlu0 %1412 }
 0x31e   : > { %2308 = vrcp.f32 %v1413_v61 }
 0x31f   : > { %v2301_v44 = vpop.eup %2300  ;;  %2310 = vrcp.f32 %v1405_v52 }
 0x320   : > { %v1403_v46 = vpop.xlane.xlu1 %1402  ;;  %v1442_v40 = vmul.f32 %v2301_v44, %v3059_v5 }
 0x321   : > { %2312 = vrcp.f32 %v1403_v46  ;;  %v1417_v48 = vpop.xlane.xlu0 %1416 }
 0x322   : > { %v1456_v50 = vpack.c.bf16 %v1443_v12, %v1442_v40  ;;  %2314 = vrcp.f32 %v1417_v48 }
 0x324   : > { %v1415_v57 = vpop.xlane.xlu1 %1414  ;;  %2116 = vmatprep.mubr.bf16.mxu0 %v1456_v50  ;;  %v2303_v8 = vpop.eup %2302 }
 0x325   : > { %2316 = vrcp.f32 %v1415_v57  ;;  %v1421_v23 = vpop.xlane.xlu0 %1420  ;;  %v2305_v19 = vpop.eup %2304  ;;  %v1447_v56 = vmul.f32 %v2303_v8, %v3067_v32 }
 0x326   : > { %2318 = vrcp.f32 %v1421_v23  ;;  %v1448_v49 = vmul.f32 %v2305_v19, %v3065_v3 }
 0x327   : > { %v2307_v11 = vpop.eup %2306 }
 0x328   : > { %v2309_v14 = vpop.eup %2308  ;;  %v1419_v60 = vpop.xlane.xlu1 %1418  ;;  %v1446_v63 = vmul.f32 %v2307_v11, %v3071_v22 }
 0x329   : > { %v2311_v17 = vpop.eup %2310  ;;  %v1449_v47 = vmul.f32 %v2309_v14, %v3073_v0  ;;  %2320 = vrcp.f32 %v1419_v60 }
 0x32a   : > { %v1458_v26 = vpack.c.bf16 %v1447_v56, %v1446_v63  ;;  %v1445_v28 = vmul.f32 %v2311_v17, %v3054_v4 }
 0x32b   : > { %v2313_v21 = vpop.eup %2312  ;;  %v1459_v55 = vpack.c.bf16 %v1449_v47, %v1448_v49 }
 0x32c   : > { %2120 = vmatprep.mubr.bf16.mxu1 %v1458_v26  ;;  %v1444_v41 = vmul.f32 %v2313_v21, %v3077_v33  ;;  %v2315_v5 = vpop.eup %2314 }
 0x32d   : > { %2121 = vmatmul.mubr.bf16.vlgmr.msra.gmra.mrb[16].mxu1 %v1459_v55  ;;  %v1451_v7 = vmul.f32 %v2315_v5, %v3079_v27 }
 0x32e   : > { %v1457_v1 = vpack.c.bf16 %v1445_v28, %v1444_v41 }
 0x32f   : > { %v2317_v62 = vpop.eup %2316 }
 0x330   : > { %2117 = vmatmul.mubr.bf16.gmra.mrb[20].mxu0 %v1457_v1  ;;  %v1450_v29 = vmul.f32 %v2317_v62, %v3083_v36  ;;  %v2319_v37 = vpop.eup %2318 }
 0x331   : > { %v1453_v32 = vmul.f32 %v2319_v37, %v3085_v9 }
 0x332   : > { %v1460_v10 = vpack.c.bf16 %v1451_v7, %v1450_v29 }
 0x333   : > { %v2321_v3 = vpop.eup %2320 }
 0x334   : > { %2124 = vmatprep.mubr.bf16.mxu1 %v1460_v10  ;;  %v1452_v31 = vmul.f32 %v2321_v3, %v3089_v38 }
 0x336   : > { %v1461_v4 = vpack.c.bf16 %v1453_v32, %v1452_v31 }
 0x338   : > { %2125 = vmatmul.mubr.bf16.gmra.mrb[20].mxu1 %v1461_v4 }
 0x3de   : > { %v2114_v2 = vpop.f32.mrb[16].mxu0 }
 0x3df   : > { %v1931_v22 = vpack.c.bf16 %v2114_v2, %v2114_v2  ;;  %v1544_v0 = vpop.f32.mrb[17].mxu0 }
 0x3e0   : > { %v1929_v33 = vpack.c.bf16 %v1544_v0, %v1544_v0  ;;  %v2115_v27 = vpop.f32.mrb[18].mxu0 }
 0x3e1   : > { %1674 = vst.msk [vmem:[%s3113_s9 + $0x8] sm:$0xf] %vm1671_vm1, %v1931_v22  ;;  %v1932_v36 = vpack.c.bf16 %v2115_v27, %v2115_v27  ;;  %v1547_v9 = vpop.f32.mrb[19].mxu0 }
 0x3e2   : > { %1672 = vst.msk [vmem:[%s3113_s9] sm:$0xf] %vm1671_vm1, %v1929_v33  ;;  %v1930_v38 = vpack.c.bf16 %v1547_v9, %v1547_v9 }
 0x3e3   : > { %1675 = vst.msk [vmem:[%s3113_s9 + $0xc] sm:$0xf] %vm1671_vm1, %v1932_v36 }
 0x3e4   : > { %1673 = vst.msk [vmem:[%s3113_s9 + $0x4] sm:$0xf] %vm1671_vm1, %v1930_v38 }
 0x400   : > { %v2122_v25 = vpop.f32.mrb[16].mxu1 }
 0x401   : > { %v1939_v45 = vpack.c.bf16 %v2122_v25, %v2122_v25  ;;  %v1576_v18 = vpop.f32.mrb[17].mxu1 }
 0x402   : > { %v1937_v39 = vpack.c.bf16 %v1576_v18, %v1576_v18  ;;  %v2123_v30 = vpop.f32.mrb[18].mxu1 }
 0x403   : > { %1682 = vst.msk [vmem:[%s3113_s9 + $0x28] sm:$0xf] %vm1671_vm1, %v1939_v45  ;;  %v1940_v13 = vpack.c.bf16 %v2123_v30, %v2123_v30  ;;  %v2118_v24 = vpop.f32.mrb[20].mxu0  ;;  %v1579_v42 = vpop.f32.mrb[19].mxu1 }
 0x404   : > { %1680 = vst.msk [vmem:[%s3113_s9 + $0x20] sm:$0xf] %vm1671_vm1, %v1937_v39  ;;  %v1935_v43 = vpack.c.bf16 %v2118_v24, %v2118_v24  ;;  %v1938_v15 = vpack.c.bf16 %v1579_v42, %v1579_v42  ;;  %v1560_v58 = vpop.f32.mrb[21].mxu0 }
 0x405   : > { %1683 = vst.msk [vmem:[%s3113_s9 + $0x2c] sm:$0xf] %vm1671_vm1, %v1940_v13  ;;  %v1933_v16 = vpack.c.bf16 %v1560_v58, %v1560_v58  ;;  %v2119_v20 = vpop.f32.mrb[22].mxu0 }
 0x406   : > { %1678 = vst.msk [vmem:[%s3113_s9 + $0x18] sm:$0xf] %vm1671_vm1, %v1935_v43  ;;  %1681 = vst.msk [vmem:[%s3113_s9 + $0x24] sm:$0xf] %vm1671_vm1, %v1938_v15  ;;  %v1936_v59 = vpack.c.bf16 %v2119_v20, %v2119_v20  ;;  %v1563_v6 = vpop.f32.mrb[23].mxu0 }
 0x407   : > { %1676 = vst.msk [vmem:[%s3113_s9 + $0x10] sm:$0xf] %vm1671_vm1, %v1933_v16  ;;  %v1934_v54 = vpack.c.bf16 %v1563_v6, %v1563_v6 }
 0x408   : > { %1679 = vst.msk [vmem:[%s3113_s9 + $0x1c] sm:$0xf] %vm1671_vm1, %v1936_v59 }
 0x409   : > { %1677 = vst.msk [vmem:[%s3113_s9 + $0x14] sm:$0xf] %vm1671_vm1, %v1934_v54 }
 0x40b   : > { %v2126_v52 = vpop.f32.mrb[20].mxu1 }
 0x40c   : > { %v1943_v34 = vpack.c.bf16 %v2126_v52, %v2126_v52  ;;  %v1592_v53 = vpop.f32.mrb[21].mxu1 }
 0x40d   : > { %v1941_v35 = vpack.c.bf16 %v1592_v53, %v1592_v53  ;;  %v2127_v51 = vpop.f32.mrb[22].mxu1 }
 0x40e   : > { %1686 = vst.msk [vmem:[%s3113_s9 + $0x38] sm:$0xf] %vm1671_vm1, %v1943_v34  ;;  %v1944_v61 = vpack.c.bf16 %v2127_v51, %v2127_v51  ;;  %v1595_v44 = vpop.f32.mrb[23].mxu1 }
 0x40f   : > { %1684 = vst.msk [vmem:[%s3113_s9 + $0x30] sm:$0xf] %vm1671_vm1, %v1941_v35  ;;  %v1942_v46 = vpack.c.bf16 %v1595_v44, %v1595_v44 }
 0x410   : > { %1687 = vst.msk [vmem:[%s3113_s9 + $0x3c] sm:$0xf] %vm1671_vm1, %v1944_v61 }
 0x411   : > { %1685 = vst.msk [vmem:[%s3113_s9 + $0x34] sm:$0xf] %vm1671_vm1, %v1942_v46 }
 0x412 PF: > { %s15_s24 = sadd.s32 1, %s2376_s24   ;;  %s3176_s18 = smov %s2356_s19 }
 0x413   : > { %p12_p12 = scmp.ge.s32.totalorder %s15_s24, 10   ;;  %s3177_s19 = smov %s2475_s6 }
 0x414   : > { %s3178_s20 = smov %s2368_s22  ;;  %s3179_s21 = smov %s2372_s23 }
 0x415   : > { %s3180_s22 = smov %s3183_s25  ;;  %s3181_s23 = smov %s3187_s26 }
 0x416   :  { %14 = sbr.rel (!%p12_p12) target bundleno = 4 (0x4), region = 130 }

// kernel: transformer_xl_encoder.8
= control target key start
LH: loop header
LB: loop body
LE: loop exit
PB: predicated region body
PF: predicated region fallthrough
CT: control target
= control target key end

     0   :  { %vm177_vm0 = vcmask 261120   ;;  %vm1403_vm1 = vcmask 523264   ;;  %s4353_s2 = inlined_call_operand.vmem [shape: bf16[32,32], index: 2, kind: input, shape index: {}]   ;;  %s4354_s11 = inlined_call_operand.vmem [shape: f32[1,32], index: 11, kind: input, shape index: {}]   ;;  %s4355_s12 = inlined_call_operand.vmem [shape: f32[1,32], index: 12, kind: input, shape index: {}]   ;;  %s4356_s0 = inlined_call_operand.vmem [shape: bf16[256,32], index: 0, kind: input, shape index: {}]   ;;  %s4357_s1 = inlined_call_operand.vmem [shape: f32[256,32], index: 1, kind: input, shape index: {}]   ;;  %s4358_s5 = inlined_call_operand.vmem [shape: bf16[32,64], index: 5, kind: input, shape index: {}]   ;;  %s4359_s7 = inlined_call_operand.vmem [shape: bf16[64,32], index: 7, kind: input, shape index: {}]   ;;  %s4360_s3 = inlined_call_operand.vmem [shape: f32[1,32], index: 3, kind: input, shape index: {}]   ;;  %s4361_s4 = inlined_call_operand.vmem [shape: f32[1,32], index: 4, kind: input, shape index: {}]   ;;  %s4362_s6 = inlined_call_operand.vmem [shape: f32[1,64], index: 6, kind: input, shape index: {}]   ;;  %s4363_s8 = inlined_call_operand.vmem [shape: f32[1,32], index: 8, kind: input, shape index: {}]   ;;  %s4364_s9 = inlined_call_operand.vmem [shape: f32[1,32], index: 9, kind: input, shape index: {}]   ;;  %s4365_s10 = inlined_call_operand.vmem [shape: f32[1,32], index: 10, kind: input, shape index: {}]   ;;  %s4366_s13 = inlined_call_operand.vmem [shape: f32[256,32], index: 13, kind: output, shape index: {}]  }
   0x1   :  { %v2597_v0 = vld [vmem:[%s4353_s2] sm:$0xff]   ;;  %v2598_v1 = vld [vmem:[%s4353_s2 + $0x8] sm:$0xff]   ;;  %v2601_v4 = vld [vmem:[%s4356_s0 + $0x10] sm:$0xff]  }
   0x2   :  { %2480 = vmatprep.subr.bf16.mxu0 %v2597_v0  ;;  %v2599_v2 = vld [vmem:[%s4356_s0] sm:$0xff]   ;;  %2592 = vmatprep.subr.bf16.mxu1 %v2597_v0  ;;  %v2600_v3 = vld [vmem:[%s4356_s0 + $0x8] sm:$0xff]   ;;  %v2609_v7 = vld [vmem:[%s4356_s0 + $0x50] sm:$0xff]  }
   0x3   :  { %2481 = vmatpush3.bf16.msra.mxu0 %v2597_v0  ;;  %2594 = vmatpush3.bf16.msra.mxu1 %v2597_v0  ;;  %v2607_v5 = vld [vmem:[%s4356_s0 + $0x40] sm:$0xff]   ;;  %v2608_v6 = vld [vmem:[%s4356_s0 + $0x48] sm:$0xff]   ;;  %v2602_v8 = vld [vmem:[%s4356_s0 + $0x18] sm:$0xff]  }
   0x4   :  { %2482 = vmatprep.subr.bf16.mxu0 %v2598_v1  ;;  %2484 = vmatprep.mubr.msk.bf16.mxu0 %vm177_vm0, %v2599_v2  ;;  %v2603_v9 = vld [vmem:[%s4356_s0 + $0x20] sm:$0xff]   ;;  %v2610_v10 = vld [vmem:[%s4356_s0 + $0x58] sm:$0xff]   ;;  %v2604_v12 = vld [vmem:[%s4356_s0 + $0x28] sm:$0xff]  }
   0x5   :  { %2593 = vmatprep.subr.bf16.mxu1 %v2598_v1  ;;  %2500 = vmatprep.mubr.msk.bf16.mxu1 %vm177_vm0, %v2607_v5  ;;  %v2611_v11 = vld [vmem:[%s4356_s0 + $0x60] sm:$0xff]   ;;  %v2605_v13 = vld [vmem:[%s4356_s0 + $0x30] sm:$0xff]   ;;  %v2612_v14 = vld [vmem:[%s4356_s0 + $0x68] sm:$0xff]  }
   0x6   :  { %v2613_v15 = vld [vmem:[%s4356_s0 + $0x70] sm:$0xff]   ;;  %v2606_v16 = vld [vmem:[%s4356_s0 + $0x38] sm:$0xff]   ;;  %v387_v19 = vld [vmem:[%s4357_s1] sm:$0xff] }
   0x7   :  { %2483 = vmatpush3.bf16.msra.mxu0 %v2598_v1  ;;  %2595 = vmatpush3.bf16.msra.mxu1 %v2598_v1  ;;  %v2614_v17 = vld [vmem:[%s4356_s0 + $0x78] sm:$0xff]   ;;  %v389_v18 = vld [vmem:[%s4357_s1 + $0x10] sm:$0xff]  ;;  %v388_v24 = vld [vmem:[%s4357_s1 + $0x8] sm:$0xff] }
   0x8   :  { %v390_v21 = vld [vmem:[%s4357_s1 + $0x18] sm:$0xff]  ;;  %v391_v37 = vld [vmem:[%s4357_s1 + $0x20] sm:$0xff]  ;;  %v393_v40 = vld [vmem:[%s4357_s1 + $0x30] sm:$0xff] }
   0x9   :  { %v392_v42 = vld [vmem:[%s4357_s1 + $0x28] sm:$0xff]  ;;  %v394_v45 = vld [vmem:[%s4357_s1 + $0x38] sm:$0xff]  ;;  %v395_v56 = vld [vmem:[%s4357_s1 + $0x40] sm:$0xff] }
   0xa   :  { %2485 = vmatmul.mubr.msk.bf16.vlgmr.msra.gmra.mrb[0].mxu0 %vm177_vm0, %v2600_v3  ;;  %2501 = vmatmul.mubr.msk.bf16.vlgmr.msra.gmra.mrb[0].mxu1 %vm177_vm0, %v2608_v6  ;;  %v397_v59 = vld [vmem:[%s4357_s1 + $0x50] sm:$0xff]  ;;  %v396_v61 = vld [vmem:[%s4357_s1 + $0x48] sm:$0xff]  ;;  %v398_v1 = vld [vmem:[%s4357_s1 + $0x58] sm:$0xff] }
   0xb   :  { %2488 = vmatprep.mubr.msk.bf16.mxu0 %vm177_vm0, %v2601_v4  ;;  %2504 = vmatprep.mubr.msk.bf16.mxu1 %vm177_vm0, %v2609_v7 }
  0x12   :  { %2489 = vmatmul.mubr.msk.bf16.gmra.mrb[4].mxu0 %vm177_vm0, %v2602_v8  ;;  %2505 = vmatmul.mubr.msk.bf16.gmra.mrb[4].mxu1 %vm177_vm0, %v2610_v10 }
  0x13   :  { %2492 = vmatprep.mubr.msk.bf16.mxu0 %vm177_vm0, %v2603_v9  ;;  %2508 = vmatprep.mubr.msk.bf16.mxu1 %vm177_vm0, %v2611_v11 }
  0x1a   :  { %2493 = vmatmul.mubr.msk.bf16.gmra.mrb[8].mxu0 %vm177_vm0, %v2604_v12  ;;  %2509 = vmatmul.mubr.msk.bf16.gmra.mrb[8].mxu1 %vm177_vm0, %v2612_v14  ;;  %v399_v12 = vld [vmem:[%s4357_s1 + $0x60] sm:$0xff] }
  0x1b   :  { %2496 = vmatprep.mubr.msk.bf16.mxu0 %vm177_vm0, %v2605_v13  ;;  %2512 = vmatprep.mubr.msk.bf16.mxu1 %vm177_vm0, %v2613_v15  ;;  %v401_v15 = vld [vmem:[%s4357_s1 + $0x70] sm:$0xff] }
  0x22   :  { %2497 = vmatmul.mubr.msk.bf16.gmra.mrb[12].mxu0 %vm177_vm0, %v2606_v16  ;;  %2513 = vmatmul.mubr.msk.bf16.gmra.mrb[12].mxu1 %vm177_vm0, %v2614_v17  ;;  %v400_v17 = vld [vmem:[%s4357_s1 + $0x68] sm:$0xff] }
  0xdd   :  { %v2486_v20 = vpop.f32.mrb[0].mxu0  ;;  %v2910_v30 = vpop.f32.mrb[0].mxu1 }
  0xde   :  { %v2899_v22 = vadd.f32 %v2486_v20, %v389_v18  ;;  %v260_v23 = vpop.f32.mrb[1].mxu0  ;;  %v2916_v33 = vpop.f32.mrb[1].mxu1 }
  0xdf   :  { %v2904_v25 = vadd.f32 %v387_v19, %v260_v23  ;;  %v2487_v26 = vpop.f32.mrb[2].mxu0  ;;  %v2918_v34 = vpop.f32.mrb[2].mxu1 }
  0xe0   :  { %v2906_v27 = vadd.f32 %v2487_v26, %v390_v21  ;;  %v263_v28 = vpop.f32.mrb[3].mxu0  ;;  %v459_v29 = vsel %vm177_vm0, %v2899_v22, 0.0  ;;  %v2920_v35 = vpop.f32.mrb[3].mxu1  ;;  %v402_v21 = vld [vmem:[%s4357_s1 + $0x78] sm:$0xff] }
  0xe1   :  { %v2912_v31 = vadd.f32 %v388_v24, %v263_v28  ;;  %460 = vadd.xlane.f32.xlu1 %v459_v29  ;;  %v453_v32 = vsel %vm177_vm0, %v2904_v25, 0.0  ;;  %v403_v24 = vld [vmem:[%s4357_s1 + $0x80] sm:$0xff] }
  0xe2   :  { %454 = vadd.xlane.f32.xlu0 %v453_v32  ;;  %v462_v36 = vsel %vm177_vm0, %v2906_v27, 0.0 }
  0xe3   :  { %v456_v39 = vsel %vm177_vm0, %v2912_v31, 0.0 }
  0xe5   :  { %463 = vadd.xlane.f32.xlu1 %v462_v36  ;;  %v2490_v38 = vpop.f32.mrb[4].mxu0  ;;  %v2940_v47 = vpop.f32.mrb[4].mxu1 }
  0xe6   :  { %457 = vadd.xlane.f32.xlu0 %v456_v39  ;;  %v276_v41 = vpop.f32.mrb[5].mxu0  ;;  %v2942_v48 = vadd.f32 %v2490_v38, %v393_v40  ;;  %v2948_v51 = vpop.f32.mrb[5].mxu1 }
  0xe7   :  { %v2935_v43 = vadd.f32 %v391_v37, %v276_v41  ;;  %v2491_v44 = vpop.f32.mrb[6].mxu0  ;;  %v2950_v52 = vpop.f32.mrb[6].mxu1  ;;  %v404_v37 = vld [vmem:[%s4357_s1 + $0x88] sm:$0xff]  ;;  %v3031_v41 = vadd.f32 %v403_v24, %v2916_v33 }
  0xe8   :  { %v279_v46 = vpop.f32.mrb[7].mxu0  ;;  %v2952_v53 = vadd.f32 %v2491_v44, %v394_v45  ;;  %v2956_v55 = vpop.f32.mrb[7].mxu1  ;;  %v471_v58 = vsel %vm177_vm0, %v2942_v48, 0.0  ;;  %v3036_v45 = vadd.f32 %v404_v37, %v2920_v35  ;;  %v407_v35 = vld [vmem:[%s4357_s1 + $0xa0] sm:$0xff] }
  0xe9   :  { %v2944_v49 = vadd.f32 %v392_v42, %v279_v46  ;;  %v465_v50 = vsel %vm177_vm0, %v2935_v43, 0.0  ;;  %v405_v46 = vld [vmem:[%s4357_s1 + $0x90] sm:$0xff]  ;;  %v501_v33 = vsel %vm177_vm0, %v3031_v41, 0.0 }
  0xea   :  { %466 = vadd.xlane.f32.xlu0 %v465_v50  ;;  %v474_v0 = vsel %vm177_vm0, %v2952_v53, 0.0 }
  0xeb   :  { %v468_v54 = vsel %vm177_vm0, %v2944_v49, 0.0 }
  0xec   :  { %469 = vadd.xlane.f32.xlu1 %v468_v54  ;;  %v406_v54 = vld [vmem:[%s4357_s1 + $0x98] sm:$0xff] }
  0xed   :  { %v2494_v57 = vpop.f32.mrb[8].mxu0  ;;  %v2976_v3 = vpop.f32.mrb[8].mxu1 }
  0xee   :  { %472 = vadd.xlane.f32.xlu0 %v471_v58  ;;  %v292_v60 = vpop.f32.mrb[9].mxu0  ;;  %v2978_v4 = vadd.f32 %v2494_v57, %v397_v59  ;;  %v2984_v7 = vpop.f32.mrb[9].mxu1  ;;  %v504_v57 = vsel %vm177_vm0, %v3036_v45, 0.0  ;;  %v408_v58 = vld [vmem:[%s4357_s1 + $0xa8] sm:$0xff]  ;;  %v3060_v59 = vadd.f32 %v2918_v34, %v406_v54 }
  0xef   :  { %v2969_v62 = vadd.f32 %v395_v56, %v292_v60  ;;  %v2495_v63 = vpop.f32.mrb[10].mxu0  ;;  %v2986_v8 = vpop.f32.mrb[10].mxu1  ;;  %v3052_v56 = vadd.f32 %v2910_v30, %v405_v46  ;;  %v3063_v60 = vadd.f32 %v407_v35, %v2948_v51  ;;  %v3068_v30 = vadd.f32 %v408_v58, %v2956_v55  ;;  %v410_v51 = vld [vmem:[%s4357_s1 + $0xb8] sm:$0xff]  ;;  %v411_v55 = vld [vmem:[%s4357_s1 + $0xc0] sm:$0xff] }
  0xf0   :  { %475 = vadd.xlane.f32.xlu1 %v474_v0  ;;  %v295_v2 = vpop.f32.mrb[11].mxu0  ;;  %v2988_v9 = vadd.f32 %v2495_v63, %v398_v1  ;;  %v359_v11 = vpop.f32.mrb[11].mxu1  ;;  %v483_v14 = vsel %vm177_vm0, %v2978_v4, 0.0  ;;  %v409_v63 = vld [vmem:[%s4357_s1 + $0xb0] sm:$0xff]  ;;  %v510_v0 = vsel %vm177_vm0, %v3060_v59, 0.0 }
  0xf1   :  { %v2980_v5 = vadd.f32 %v396_v61, %v295_v2  ;;  %v477_v6 = vsel %vm177_vm0, %v2969_v62, 0.0  ;;  %v507_v61 = vsel %vm177_vm0, %v3052_v56, 0.0  ;;  %v513_v34 = vsel %vm177_vm0, %v3063_v60, 0.0 }
  0xf2   :  { %478 = vadd.xlane.f32.xlu0 %v477_v6  ;;  %v486_v20 = vsel %vm177_vm0, %v2988_v9, 0.0  ;;  %v3084_v1 = vadd.f32 %v2940_v47, %v409_v63  ;;  %v516_v2 = vsel %vm177_vm0, %v3068_v30, 0.0  ;;  %v412_v6 = vld [vmem:[%s4357_s1 + $0xc8] sm:$0xff] }
  0xf3   :  { %v480_v10 = vsel %vm177_vm0, %v2980_v5, 0.0  ;;  %v3099_v47 = vadd.f32 %v412_v6, %v359_v11  ;;  %v415_v11 = vld [vmem:[%s4357_s1 + $0xe0] sm:$0xff] }
  0xf4   :  { %481 = vadd.xlane.f32.xlu1 %v480_v10  ;;  %v3092_v10 = vadd.f32 %v2950_v52, %v410_v51 }
  0xf5   :  { %v2498_v13 = vpop.f32.mrb[12].mxu0  ;;  %v3013_v26 = vpop.f32.mrb[12].mxu1 }
  0xf6   :  { %484 = vadd.xlane.f32.xlu0 %v483_v14  ;;  %v308_v16 = vpop.f32.mrb[13].mxu0  ;;  %v3015_v28 = vadd.f32 %v2498_v13, %v401_v15  ;;  %v372_v36 = vpop.f32.mrb[13].mxu1  ;;  %v519_v13 = vsel %vm177_vm0, %v3084_v1, 0.0  ;;  %v413_v14 = vld [vmem:[%s4357_s1 + $0xd0] sm:$0xff]  ;;  %v522_v15 = vsel %vm177_vm0, %v3092_v10, 0.0 }
  0xf7   :  { %v3003_v18 = vadd.f32 %v399_v12, %v308_v16  ;;  %v2499_v19 = vpop.f32.mrb[14].mxu0  ;;  %v3024_v38 = vpop.f32.mrb[14].mxu1  ;;  %v3095_v12 = vadd.f32 %v411_v55, %v2984_v7  ;;  %v414_v7 = vld [vmem:[%s4357_s1 + $0xd8] sm:$0xff]  ;;  %v3115_v16 = vadd.f32 %v2976_v3, %v413_v14  ;;  %v417_v3 = vld [vmem:[%s4357_s1 + $0xf0] sm:$0xff] }
  0xf8   :  { %487 = vadd.xlane.f32.xlu1 %v486_v20  ;;  %v311_v23 = vpop.f32.mrb[15].mxu0  ;;  %v3026_v39 = vadd.f32 %v2499_v19, %v402_v21  ;;  %v375_v42 = vpop.f32.mrb[15].mxu1  ;;  %v495_v44 = vsel %vm177_vm0, %v3015_v28, 0.0  ;;  %v416_v19 = vld [vmem:[%s4357_s1 + $0xe8] sm:$0xff]  ;;  %v3123_v20 = vadd.f32 %v2986_v8, %v414_v7  ;;  %v3125_v21 = vadd.f32 %v415_v11, %v372_v36  ;;  %v418_v36 = vld [vmem:[%s4357_s1 + $0xf8] sm:$0xff] }
  0xf9   :  { %v3017_v29 = vadd.f32 %v400_v17, %v311_v23  ;;  %v489_v32 = vsel %vm177_vm0, %v3003_v18, 0.0  ;;  %v525_v52 = vsel %vm177_vm0, %v3095_v12, 0.0  ;;  %v528_v17 = vsel %vm177_vm0, %v3099_v47, 0.0 }
  0xfa   :  { %490 = vadd.xlane.f32.xlu0 %v489_v32  ;;  %v498_v50 = vsel %vm177_vm0, %v3026_v39, 0.0  ;;  %v531_v23 = vsel %vm177_vm0, %v3115_v16, 0.0  ;;  %v3129_v24 = vadd.f32 %v416_v19, %v375_v42  ;;  %v534_v32 = vsel %vm177_vm0, %v3123_v20, 0.0 }
  0xfb   :  { %v492_v40 = vsel %vm177_vm0, %v3017_v29, 0.0  ;;  %v537_v8 = vsel %vm177_vm0, %v3125_v21, 0.0  ;;  %v3142_v37 = vadd.f32 %v3013_v26, %v417_v3  ;;  %v3147_v42 = vadd.f32 %v3024_v38, %v418_v36 }
  0xfc   :  { %493 = vadd.xlane.f32.xlu1 %v492_v40  ;;  %v540_v40 = vsel %vm177_vm0, %v3129_v24, 0.0 }
  0xfd   :  { %v546_v46 = vsel %vm177_vm0, %v3147_v42, 0.0 }
  0xfe   :  { %496 = vadd.xlane.f32.xlu0 %v495_v44  ;;  %v543_v44 = vsel %vm177_vm0, %v3142_v37, 0.0 }
 0x100   :  { %499 = vadd.xlane.f32.xlu1 %v498_v50 }
 0x102   :  { %502 = vadd.xlane.f32.xlu0 %v501_v33 }
 0x104   :  { %505 = vadd.xlane.f32.xlu1 %v504_v57 }
 0x106   :  { %508 = vadd.xlane.f32.xlu0 %v507_v61 }
 0x108   :  { %511 = vadd.xlane.f32.xlu1 %v510_v0 }
 0x10a   :  { %514 = vadd.xlane.f32.xlu0 %v513_v34 }
 0x10c   :  { %517 = vadd.xlane.f32.xlu1 %v516_v2 }
 0x10e   :  { %520 = vadd.xlane.f32.xlu0 %v519_v13 }
 0x110   :  { %523 = vadd.xlane.f32.xlu1 %v522_v15 }
 0x112   :  { %526 = vadd.xlane.f32.xlu0 %v525_v52 }
 0x114   :  { %529 = vadd.xlane.f32.xlu1 %v528_v17 }
 0x116   :  { %532 = vadd.xlane.f32.xlu0 %v531_v23 }
 0x118   :  { %535 = vadd.xlane.f32.xlu1 %v534_v32 }
 0x11a   :  { %538 = vadd.xlane.f32.xlu0 %v537_v8 }
 0x11c   :  { %541 = vadd.xlane.f32.xlu1 %v540_v40 }
 0x11e   :  { %544 = vadd.xlane.f32.xlu0 %v543_v44 }
 0x120   :  { %547 = vadd.xlane.f32.xlu1 %v546_v46 }
 0x16e   :  { %v461_v50 = vpop.xlane.xlu1 %460 }
 0x16f   :  { %v552_v33 = vmul.f32 0.03125, %v461_v50  ;;  %v455_v26 = vpop.xlane.xlu0 %454 }
 0x170   :  { %v550_v54 = vmul.f32 0.03125, %v455_v26 }
 0x171   :  { %v3154_v35 = vsub.f32 %v2899_v22, %v552_v33 }
 0x172   :  { %v3157_v57 = vsub.f32 %v2904_v25, %v550_v54  ;;  %v464_v38 = vpop.xlane.xlu1 %463 }
 0x173   :  { %v553_v58 = vmul.f32 0.03125, %v464_v38  ;;  %v458_v61 = vpop.xlane.xlu0 %457  ;;  %v616_v22 = vmul.f32 %v3154_v35, %v3154_v35 }
 0x174   :  { %v551_v63 = vmul.f32 0.03125, %v458_v61  ;;  %v614_v0 = vmul.f32 %v3157_v57, %v3157_v57 }
 0x175   :  { %v3162_v34 = vsub.f32 %v2906_v27, %v553_v58  ;;  %v652_v15 = vsel %vm177_vm0, %v616_v22, 0.0 }
 0x176   :  { %v3165_v51 = vsub.f32 %v2912_v31, %v551_v63  ;;  %v646_v55 = vsel %vm177_vm0, %v614_v0, 0.0 }
 0x177   :  { %v467_v25 = vpop.xlane.xlu0 %466  ;;  %647 = vadd.xlane.f32.xlu0 %v646_v55  ;;  %v617_v14 = vmul.f32 %v3162_v34, %v3162_v34 }
 0x178   :  { %v554_v2 = vmul.f32 0.03125, %v467_v25  ;;  %v615_v6 = vmul.f32 %v3165_v51, %v3165_v51 }
 0x179   :  { %v470_v13 = vpop.xlane.xlu1 %469  ;;  %v655_v3 = vsel %vm177_vm0, %v617_v14, 0.0 }
 0x17a   :  { %v3175_v27 = vsub.f32 %v2935_v43, %v554_v2  ;;  %v555_v31 = vmul.f32 0.03125, %v470_v13  ;;  %v649_v52 = vsel %vm177_vm0, %v615_v6, 0.0 }
 0x17b   :  { %v473_v7 = vpop.xlane.xlu0 %472  ;;  %653 = vadd.xlane.f32.xlu0 %v652_v15  ;;  %650 = vadd.xlane.f32.xlu1 %v649_v52 }
 0x17c   :  { %v3180_v11 = vsub.f32 %v2944_v49, %v555_v31  ;;  %v556_v17 = vmul.f32 0.03125, %v473_v7  ;;  %v618_v19 = vmul.f32 %v3175_v27, %v3175_v27 }
 0x17d   :  { %v476_v23 = vpop.xlane.xlu1 %475 }
 0x17e   :  { %v3186_v43 = vsub.f32 %v2942_v48, %v556_v17  ;;  %v557_v32 = vmul.f32 0.03125, %v476_v23  ;;  %v658_v8 = vsel %vm177_vm0, %v618_v19, 0.0  ;;  %v619_v36 = vmul.f32 %v3180_v11, %v3180_v11 }
 0x17f   :  { %v479_v40 = vpop.xlane.xlu0 %478  ;;  %659 = vadd.xlane.f32.xlu0 %v658_v8  ;;  %656 = vadd.xlane.f32.xlu1 %v655_v3 }
 0x180   :  { %v3192_v49 = vsub.f32 %v2952_v53, %v557_v32  ;;  %v558_v44 = vmul.f32 0.03125, %v479_v40  ;;  %v620_v46 = vmul.f32 %v3186_v43, %v3186_v43  ;;  %v661_v48 = vsel %vm177_vm0, %v619_v36, 0.0 }
 0x181   :  { %v482_v50 = vpop.xlane.xlu1 %481 }
 0x182   :  { %v3198_v33 = vsub.f32 %v2969_v62, %v558_v44  ;;  %v559_v26 = vmul.f32 0.03125, %v482_v50  ;;  %v664_v54 = vsel %vm177_vm0, %v620_v46, 0.0  ;;  %v621_v38 = vmul.f32 %v3192_v49, %v3192_v49 }
 0x183   :  { %v485_v58 = vpop.xlane.xlu0 %484  ;;  %665 = vadd.xlane.f32.xlu0 %v664_v54  ;;  %662 = vadd.xlane.f32.xlu1 %v661_v48 }
 0x184   :  { %v3204_v53 = vsub.f32 %v2980_v5, %v559_v26  ;;  %v560_v61 = vmul.f32 0.03125, %v485_v58  ;;  %v622_v63 = vmul.f32 %v3198_v33, %v3198_v33  ;;  %v667_v62 = vsel %vm177_vm0, %v621_v38, 0.0 }
 0x185   :  { %v488_v0 = vpop.xlane.xlu1 %487 }
 0x186   :  { %v3210_v55 = vsub.f32 %v2978_v4, %v560_v61  ;;  %v561_v22 = vmul.f32 0.03125, %v488_v0  ;;  %v670_v25 = vsel %vm177_vm0, %v622_v63, 0.0  ;;  %v623_v2 = vmul.f32 %v3204_v53, %v3204_v53 }
 0x187   :  { %671 = vadd.xlane.f32.xlu0 %v670_v25  ;;  %v491_v6 = vpop.xlane.xlu0 %490  ;;  %668 = vadd.xlane.f32.xlu1 %v667_v62 }
 0x188   :  { %v3216_v5 = vsub.f32 %v2988_v9, %v561_v22  ;;  %v562_v13 = vmul.f32 0.03125, %v491_v6  ;;  %v624_v14 = vmul.f32 %v3210_v55, %v3210_v55  ;;  %v673_v4 = vsel %vm177_vm0, %v623_v2, 0.0 }
 0x189   :  { %v494_v31 = vpop.xlane.xlu1 %493 }
 0x18a   :  { %v3222_v15 = vsub.f32 %v3003_v18, %v562_v13  ;;  %v563_v52 = vmul.f32 0.03125, %v494_v31  ;;  %v676_v7 = vsel %vm177_vm0, %v624_v14, 0.0  ;;  %v625_v17 = vmul.f32 %v3216_v5, %v3216_v5 }
 0x18b   :  { %677 = vadd.xlane.f32.xlu0 %v676_v7  ;;  %v497_v19 = vpop.xlane.xlu0 %496  ;;  %674 = vadd.xlane.f32.xlu1 %v673_v4 }
 0x18c   :  { %v3228_v9 = vsub.f32 %v3017_v29, %v563_v52  ;;  %v564_v23 = vmul.f32 0.03125, %v497_v19  ;;  %v626_v3 = vmul.f32 %v3222_v15, %v3222_v15  ;;  %v679_v18 = vsel %vm177_vm0, %v625_v17, 0.0 }
 0x18d   :  { %v500_v32 = vpop.xlane.xlu1 %499 }
 0x18e   :  { %v3234_v8 = vsub.f32 %v3015_v28, %v564_v23  ;;  %v565_v36 = vmul.f32 0.03125, %v500_v32  ;;  %v682_v40 = vsel %vm177_vm0, %v626_v3, 0.0  ;;  %v627_v44 = vmul.f32 %v3228_v9, %v3228_v9 }
 0x18f   :  { %683 = vadd.xlane.f32.xlu0 %v682_v40  ;;  %v503_v46 = vpop.xlane.xlu0 %502  ;;  %680 = vadd.xlane.f32.xlu1 %v679_v18 }
 0x190   :  { %v3240_v29 = vsub.f32 %v3026_v39, %v565_v36  ;;  %v566_v50 = vmul.f32 0.03125, %v503_v46  ;;  %v628_v48 = vmul.f32 %v3234_v8, %v3234_v8  ;;  %v685_v28 = vsel %vm177_vm0, %v627_v44, 0.0 }
 0x191   :  { %v506_v26 = vpop.xlane.xlu1 %505 }
 0x192   :  { %v3246_v54 = vsub.f32 %v3031_v41, %v566_v50  ;;  %v567_v38 = vmul.f32 0.03125, %v506_v26  ;;  %v688_v58 = vsel %vm177_vm0, %v628_v48, 0.0  ;;  %v629_v61 = vmul.f32 %v3240_v29, %v3240_v29 }
 0x193   :  { %689 = vadd.xlane.f32.xlu0 %v688_v58  ;;  %v509_v63 = vpop.xlane.xlu0 %508  ;;  %686 = vadd.xlane.f32.xlu1 %v685_v28  ;;  %v2615_v58 = vld [vmem:[%s4358_s5] sm:$0xff]  }
 0x194   :  { %v3252_v39 = vsub.f32 %v3036_v45, %v567_v38  ;;  %v568_v0 = vmul.f32 0.03125, %v509_v63  ;;  %v630_v62 = vmul.f32 %v3246_v54, %v3246_v54  ;;  %v691_v41 = vsel %vm177_vm0, %v629_v61, 0.0  ;;  %2516 = vmatprep.subr.bf16.mxu1 %v2615_v58 }
 0x195   :  { %v512_v22 = vpop.xlane.xlu1 %511  ;;  %2517 = vmatpush3.bf16.msra.mxu1 %v2615_v58 }
 0x196   :  { %v3258_v25 = vsub.f32 %v3052_v56, %v568_v0  ;;  %v569_v2 = vmul.f32 0.03125, %v512_v22  ;;  %v694_v6 = vsel %vm177_vm0, %v630_v62, 0.0  ;;  %v631_v13 = vmul.f32 %v3252_v39, %v3252_v39 }
 0x197   :  { %695 = vadd.xlane.f32.xlu0 %v694_v6  ;;  %v515_v14 = vpop.xlane.xlu0 %514  ;;  %692 = vadd.xlane.f32.xlu1 %v691_v41 }
 0x198   :  { %v3264_v45 = vsub.f32 %v3060_v59, %v569_v2  ;;  %v570_v31 = vmul.f32 0.03125, %v515_v14  ;;  %v632_v4 = vmul.f32 %v3258_v25, %v3258_v25  ;;  %v697_v56 = vsel %vm177_vm0, %v631_v13, 0.0 }
 0x199   :  { %v518_v52 = vpop.xlane.xlu1 %517 }
 0x19a   :  { %v3270_v7 = vsub.f32 %v3063_v60, %v570_v31  ;;  %v571_v17 = vmul.f32 0.03125, %v518_v52  ;;  %v700_v19 = vsel %vm177_vm0, %v632_v4, 0.0  ;;  %v633_v23 = vmul.f32 %v3264_v45, %v3264_v45  ;;  %v2616_v52 = vld [vmem:[%s4358_s5 + $0x8] sm:$0xff]  }
 0x19b   :  { %701 = vadd.xlane.f32.xlu0 %v700_v19  ;;  %v521_v3 = vpop.xlane.xlu0 %520  ;;  %698 = vadd.xlane.f32.xlu1 %v697_v56 }
 0x19c   :  { %v3276_v59 = vsub.f32 %v3068_v30, %v571_v17  ;;  %v572_v32 = vmul.f32 0.03125, %v521_v3  ;;  %v634_v18 = vmul.f32 %v3270_v7, %v3270_v7  ;;  %v703_v60 = vsel %vm177_vm0, %v633_v23, 0.0  ;;  %2518 = vmatprep.subr.bf16.mxu1 %v2616_v52 }
 0x19d   :  { %v524_v36 = vpop.xlane.xlu1 %523  ;;  %2519 = vmatpush3.bf16.msra.mxu1 %v2616_v52 }
 0x19e   :  { %v3282_v40 = vsub.f32 %v3084_v1, %v572_v32  ;;  %v573_v44 = vmul.f32 0.03125, %v524_v36  ;;  %v706_v46 = vsel %vm177_vm0, %v634_v18, 0.0  ;;  %v635_v50 = vmul.f32 %v3276_v59, %v3276_v59 }
 0x19f   :  { %707 = vadd.xlane.f32.xlu0 %v706_v46  ;;  %v527_v48 = vpop.xlane.xlu0 %526  ;;  %704 = vadd.xlane.f32.xlu1 %v703_v60 }
 0x1a0   :  { %v3288_v30 = vsub.f32 %v3092_v10, %v573_v44  ;;  %v574_v26 = vmul.f32 0.03125, %v527_v48  ;;  %v636_v28 = vmul.f32 %v3282_v40, %v3282_v40  ;;  %v709_v1 = vsel %vm177_vm0, %v635_v50, 0.0 }
 0x1a1   :  { %v530_v38 = vpop.xlane.xlu1 %529 }
 0x1a2   :  { %v3297_v61 = vsub.f32 %v3095_v12, %v574_v26  ;;  %v575_v63 = vmul.f32 0.03125, %v530_v38  ;;  %v712_v0 = vsel %vm177_vm0, %v636_v28, 0.0  ;;  %v637_v10 = vmul.f32 %v3288_v30, %v3288_v30 }
 0x1a3   :  { %713 = vadd.xlane.f32.xlu0 %v712_v0  ;;  %v533_v62 = vpop.xlane.xlu0 %532  ;;  %710 = vadd.xlane.f32.xlu1 %v709_v1 }
 0x1a4   :  { %v3303_v22 = vsub.f32 %v3099_v47, %v575_v63  ;;  %v576_v41 = vmul.f32 0.03125, %v533_v62  ;;  %v638_v2 = vmul.f32 %v3297_v61, %v3297_v61  ;;  %v715_v12 = vsel %vm177_vm0, %v637_v10, 0.0  ;;  %v2618_v10 = vld [vmem:[%s4359_s7 + $0x8] sm:$0xff]   ;;  %v2619_v62 = vld [vmem:[%s4359_s7 + $0x10] sm:$0xff]  }
 0x1a5   :  { %v536_v6 = vpop.xlane.xlu1 %535 }
 0x1a6   :  { %v3309_v13 = vsub.f32 %v3115_v16, %v576_v41  ;;  %v577_v14 = vmul.f32 0.03125, %v536_v6  ;;  %v718_v31 = vsel %vm177_vm0, %v638_v2, 0.0  ;;  %v639_v4 = vmul.f32 %v3303_v22, %v3303_v22 }
 0x1a7   :  { %719 = vadd.xlane.f32.xlu0 %v718_v31  ;;  %v539_v47 = vpop.xlane.xlu0 %538  ;;  %716 = vadd.xlane.f32.xlu1 %v715_v12 }
 0x1a8   :  { %v3318_v56 = vsub.f32 %v3123_v20, %v577_v14  ;;  %v578_v17 = vmul.f32 0.03125, %v539_v47  ;;  %v640_v16 = vmul.f32 %v3309_v13, %v3309_v13  ;;  %v721_v23 = vsel %vm177_vm0, %v639_v4, 0.0 }
 0x1a9   :  { %v542_v19 = vpop.xlane.xlu1 %541 }
 0x1aa   :  { %v3324_v3 = vsub.f32 %v3125_v21, %v578_v17  ;;  %v579_v32 = vmul.f32 0.03125, %v542_v19  ;;  %v724_v18 = vsel %vm177_vm0, %v640_v16, 0.0  ;;  %v641_v36 = vmul.f32 %v3318_v56, %v3318_v56 }
 0x1ab   :  { %725 = vadd.xlane.f32.xlu0 %v724_v18  ;;  %v545_v20 = vpop.xlane.xlu0 %544  ;;  %722 = vadd.xlane.f32.xlu1 %v721_v23 }
 0x1ac   :  { %v3330_v60 = vsub.f32 %v3129_v24, %v579_v32  ;;  %v580_v44 = vmul.f32 0.03125, %v545_v20  ;;  %v642_v46 = vmul.f32 %v3324_v3, %v3324_v3  ;;  %v727_v21 = vsel %vm177_vm0, %v641_v36, 0.0 }
 0x1ad   :  { %v548_v50 = vpop.xlane.xlu1 %547 }
 0x1ae   :  { %v3336_v48 = vsub.f32 %v3142_v37, %v580_v44  ;;  %v581_v26 = vmul.f32 0.03125, %v548_v50  ;;  %v730_v28 = vsel %vm177_vm0, %v642_v46, 0.0  ;;  %v643_v38 = vmul.f32 %v3330_v60, %v3330_v60 }
 0x1af   :  { %731 = vadd.xlane.f32.xlu0 %v730_v28  ;;  %728 = vadd.xlane.f32.xlu1 %v727_v21  ;;  %v3363_v21 = vld [vmem:[%s4360_s3] ss:$0 sm:$0xff] }
 0x1b0   :  { %v3342_v24 = vsub.f32 %v3147_v42, %v581_v26  ;;  %v644_v1 = vmul.f32 %v3336_v48, %v3336_v48  ;;  %v733_v63 = vsel %vm177_vm0, %v643_v38, 0.0  ;;  %v2617_v42 = vld [vmem:[%s4359_s7] sm:$0xff]  }
 0x1b1   :  { %2552 = vmatprep.subr.bf16.mxu0 %v2617_v42 }
 0x1b2   :  { %v736_v58 = vsel %vm177_vm0, %v644_v1, 0.0  ;;  %v645_v37 = vmul.f32 %v3342_v24, %v3342_v24  ;;  %2553 = vmatpush3.bf16.msra.mxu0 %v2617_v42 }
 0x1b3   :  { %737 = vadd.xlane.f32.xlu0 %v736_v58  ;;  %734 = vadd.xlane.f32.xlu1 %v733_v63  ;;  %v3369_v63 = vld [vmem:[%s4361_s4] ss:$0 sm:$0xff] }
 0x1b4   :  { %v739_v0 = vsel %vm177_vm0, %v645_v37, 0.0  ;;  %2554 = vmatprep.subr.bf16.mxu0 %v2618_v10 }
 0x1b6   :  { %2555 = vmatpush3.bf16.msra.mxu0 %v2618_v10 }
 0x1b7   :  { %740 = vadd.xlane.f32.xlu1 %v739_v0  ;;  %2556 = vmatprep.subr.bf16.mxu0 %v2619_v62 }
 0x1ba   :  { %2557 = vmatpush3.bf16.msra.mxu0 %v2619_v62 }
 0x204   :  { %v648_v41 = vpop.xlane.xlu0 %647 }
 0x205   :  { %v742_v2 = vmul.f32 0.03125, %v648_v41 }
 0x207   :  { %v774_v6 = vadd.f32 1e-05, %v742_v2 }
 0x208   :  { %v654_v12 = vpop.xlane.xlu0 %653  ;;  %v651_v14 = vpop.xlane.xlu1 %650 }
 0x209   :  { %2621 = vrsqrt.f32 %v774_v6  ;;  %v744_v31 = vmul.f32 0.03125, %v654_v12  ;;  %v743_v4 = vmul.f32 0.03125, %v651_v14 }
 0x20b   :  { %v776_v47 = vadd.f32 1e-05, %v744_v31  ;;  %v775_v52 = vadd.f32 1e-05, %v743_v4 }
 0x20c   :  { %v660_v17 = vpop.xlane.xlu0 %659  ;;  %v657_v16 = vpop.xlane.xlu1 %656 }
 0x20d   :  { %2623 = vrsqrt.f32 %v776_v47  ;;  %v746_v19 = vmul.f32 0.03125, %v660_v17  ;;  %v745_v23 = vmul.f32 0.03125, %v657_v16 }
 0x20e   :  { %2625 = vrsqrt.f32 %v775_v52 }
 0x20f   :  { %v778_v32 = vadd.f32 1e-05, %v746_v19  ;;  %v777_v18 = vadd.f32 1e-05, %v745_v23 }
 0x210   :  { %v666_v36 = vpop.xlane.xlu0 %665  ;;  %v663_v20 = vpop.xlane.xlu1 %662 }
 0x211   :  { %2627 = vrsqrt.f32 %v778_v32  ;;  %v748_v44 = vmul.f32 0.03125, %v666_v36  ;;  %v747_v46 = vmul.f32 0.03125, %v663_v20 }
 0x212   :  { %2629 = vrsqrt.f32 %v777_v18 }
 0x213   :  { %v2622_v50 = vpop.eup %2621  ;;  %v780_v26 = vadd.f32 1e-05, %v748_v44  ;;  %v779_v28 = vadd.f32 1e-05, %v747_v46 }
 0x214   :  { %v838_v38 = vmul.f32 %v2622_v50, %v3157_v57  ;;  %v672_v1 = vpop.xlane.xlu0 %671  ;;  %v669_v58 = vpop.xlane.xlu1 %668 }
 0x215   :  { %2631 = vrsqrt.f32 %v780_v26  ;;  %v750_v37 = vmul.f32 0.03125, %v672_v1  ;;  %v749_v0 = vmul.f32 0.03125, %v669_v58 }
 0x216   :  { %v876_v42 = vmul.f32 %v3363_v21, %v838_v38  ;;  %2633 = vrsqrt.f32 %v779_v28 }
 0x217   :  { %v2624_v10 = vpop.eup %2623  ;;  %v782_v62 = vadd.f32 1e-05, %v750_v37  ;;  %v781_v41 = vadd.f32 1e-05, %v749_v0 }
 0x218   :  { %v2626_v2 = vpop.eup %2625  ;;  %v914_v6 = vadd.f32 %v3369_v63, %v876_v42  ;;  %v840_v57 = vmul.f32 %v2624_v10, %v3154_v35  ;;  %v678_v12 = vpop.xlane.xlu0 %677 }
 0x219   :  { %v675_v14 = vpop.xlane.xlu1 %674  ;;  %v839_v31 = vmul.f32 %v2626_v2, %v3165_v51  ;;  %2635 = vrsqrt.f32 %v782_v62  ;;  %v752_v4 = vmul.f32 0.03125, %v678_v12 }
 0x21a   :  { %v751_v47 = vmul.f32 0.03125, %v675_v14  ;;  %946 = vst.msk [vmem:[#allocation2] sm:$0xff] %vm177_vm0, %v914_v6  ;;  %v878_v52 = vmul.f32 %v3363_v21, %v840_v57  ;;  %2637 = vrsqrt.f32 %v781_v41 }
 0x21b   :  { %v2628_v17 = vpop.eup %2627  ;;  %v877_v16 = vmul.f32 %v3363_v21, %v839_v31  ;;  %v784_v19 = vadd.f32 1e-05, %v752_v4 }
 0x21c   :  { %v783_v23 = vadd.f32 1e-05, %v751_v47  ;;  %v2630_v32 = vpop.eup %2629  ;;  %v916_v35 = vadd.f32 %v3369_v63, %v878_v52  ;;  %v842_v18 = vmul.f32 %v2628_v17, %v3175_v27  ;;  %v684_v36 = vpop.xlane.xlu0 %683 }
 0x21d   :  { %v681_v51 = vpop.xlane.xlu1 %680  ;;  %v915_v20 = vadd.f32 %v3369_v63, %v877_v16  ;;  %v841_v44 = vmul.f32 %v2630_v32, %v3162_v34  ;;  %2639 = vrsqrt.f32 %v784_v19  ;;  %v754_v46 = vmul.f32 0.03125, %v684_v36 }
 0x21e   :  { %948 = vst.msk [vmem:[#allocation2 + $0x10] sm:$0xff] %vm177_vm0, %v916_v35  ;;  %v880_v50 = vmul.f32 %v3363_v21, %v842_v18  ;;  %2641 = vrsqrt.f32 %v783_v23  ;;  %v753_v26 = vmul.f32 0.03125, %v681_v51 }
 0x21f   :  { %v2632_v28 = vpop.eup %2631  ;;  %947 = vst.msk [vmem:[#allocation2 + $0x8] sm:$0xff] %vm177_vm0, %v915_v20  ;;  %v879_v38 = vmul.f32 %v3363_v21, %v841_v44  ;;  %v786_v27 = vadd.f32 1e-05, %v754_v46 }
 0x220   :  { %v2634_v1 = vpop.eup %2633  ;;  %v918_v58 = vadd.f32 %v3369_v63, %v880_v50  ;;  %v844_v37 = vmul.f32 %v2632_v28, %v3186_v43  ;;  %v785_v34 = vadd.f32 1e-05, %v753_v26  ;;  %v690_v0 = vpop.xlane.xlu0 %689 }
 0x221   :  { %v687_v42 = vpop.xlane.xlu1 %686  ;;  %v917_v10 = vadd.f32 %v3369_v63, %v879_v38  ;;  %v843_v62 = vmul.f32 %v2634_v1, %v3180_v11  ;;  %2643 = vrsqrt.f32 %v786_v27  ;;  %v756_v41 = vmul.f32 0.03125, %v690_v0  ;;  %v3400_v35 = vld [vmem:[#allocation2] sm:$0xff] }
 0x222   :  { %950 = vst.msk [vmem:[#allocation2 + $0x20] sm:$0xff] %vm177_vm0, %v918_v58  ;;  %v882_v2 = vmul.f32 %v3363_v21, %v844_v37  ;;  %2645 = vrsqrt.f32 %v785_v34  ;;  %v755_v6 = vmul.f32 0.03125, %v687_v42 }
 0x223   :  { %v2636_v57 = vpop.eup %2635  ;;  %949 = vst.msk [vmem:[#allocation2 + $0x18] sm:$0xff] %vm177_vm0, %v917_v10  ;;  %v881_v43 = vmul.f32 %v3363_v21, %v843_v62  ;;  %v788_v12 = vadd.f32 1e-05, %v756_v41 }
 0x224   :  { %v2638_v14 = vpop.eup %2637  ;;  %v920_v31 = vadd.f32 %v3369_v63, %v882_v2  ;;  %v846_v4 = vmul.f32 %v2636_v57, %v3198_v33  ;;  %v787_v11 = vadd.f32 1e-05, %v755_v6  ;;  %v696_v47 = vpop.xlane.xlu0 %695 }
 0x225   :  { %v693_v52 = vpop.xlane.xlu1 %692  ;;  %v919_v17 = vadd.f32 %v3369_v63, %v881_v43  ;;  %v845_v16 = vmul.f32 %v2638_v14, %v3192_v49  ;;  %2647 = vrsqrt.f32 %v788_v12  ;;  %v758_v19 = vmul.f32 0.03125, %v696_v47  ;;  %v3415_v34 = vld [vmem:[#allocation2 + $0x10] sm:$0xff] }
 0x226   :  { %952 = vst.msk [vmem:[#allocation2 + $0x30] sm:$0xff] %vm177_vm0, %v920_v31  ;;  %v884_v23 = vmul.f32 %v3363_v21, %v846_v4  ;;  %2649 = vrsqrt.f32 %v787_v11  ;;  %v757_v32 = vmul.f32 0.03125, %v693_v52  ;;  %v3402_v18 = vld [vmem:[#allocation2 + $0x8] sm:$0xff] }
 0x227   :  { %v2640_v33 = vpop.eup %2639  ;;  %951 = vst.msk [vmem:[#allocation2 + $0x28] sm:$0xff] %vm177_vm0, %v919_v17  ;;  %v883_v36 = vmul.f32 %v3363_v21, %v845_v16  ;;  %v790_v51 = vadd.f32 1e-05, %v758_v19  ;;  %v1042_v49 = vpack.c.bf16 %v3402_v18, %v3400_v35 }
 0x228   :  { %v2642_v20 = vpop.eup %2641  ;;  %v922_v44 = vadd.f32 %v3369_v63, %v884_v23  ;;  %v848_v46 = vmul.f32 %v2640_v33, %v3210_v55  ;;  %v789_v50 = vadd.f32 1e-05, %v757_v32  ;;  %v702_v26 = vpop.xlane.xlu0 %701 }
 0x229   :  { %v699_v28 = vpop.xlane.xlu1 %698  ;;  %v921_v38 = vadd.f32 %v3369_v63, %v883_v36  ;;  %v847_v27 = vmul.f32 %v2642_v20, %v3204_v53  ;;  %2651 = vrsqrt.f32 %v790_v51  ;;  %v760_v1 = vmul.f32 0.03125, %v702_v26  ;;  %2520 = vmatprep.mubr.msk.bf16.mxu1 %vm177_vm0, %v1042_v49  ;;  %v3430_v47 = vld [vmem:[#allocation2 + $0x20] sm:$0xff] }
 0x22a   :  { %954 = vst.msk [vmem:[#allocation2 + $0x40] sm:$0xff] %vm177_vm0, %v922_v44  ;;  %v886_v58 = vmul.f32 %v3363_v21, %v848_v46  ;;  %2653 = vrsqrt.f32 %v789_v50  ;;  %v759_v37 = vmul.f32 0.03125, %v699_v28  ;;  %v3417_v55 = vld [vmem:[#allocation2 + $0x18] sm:$0xff] }
 0x22b   :  { %v2644_v0 = vpop.eup %2643  ;;  %953 = vst.msk [vmem:[#allocation2 + $0x38] sm:$0xff] %vm177_vm0, %v921_v38  ;;  %v885_v42 = vmul.f32 %v3363_v21, %v847_v27  ;;  %v792_v53 = vadd.f32 1e-05, %v760_v1  ;;  %v1043_v10 = vpack.c.bf16 %v3417_v55, %v3415_v34 }
 0x22c   :  { %v2646_v62 = vpop.eup %2645  ;;  %v924_v41 = vadd.f32 %v3369_v63, %v886_v58  ;;  %v850_v2 = vmul.f32 %v2644_v0, %v3222_v15  ;;  %v791_v6 = vadd.f32 1e-05, %v759_v37  ;;  %v708_v57 = vpop.xlane.xlu0 %707 }
 0x22d   :  { %v705_v43 = vpop.xlane.xlu1 %704  ;;  %v923_v12 = vadd.f32 %v3369_v63, %v885_v42  ;;  %v849_v14 = vmul.f32 %v2646_v62, %v3216_v5  ;;  %2655 = vrsqrt.f32 %v792_v53  ;;  %v762_v31 = vmul.f32 0.03125, %v708_v57  ;;  %2521 = vmatmul.mubr.msk.bf16.vlgmr.msra.gmra.mrb[16].mxu1 %vm177_vm0, %v1043_v10  ;;  %v3445_v26 = vld [vmem:[#allocation2 + $0x30] sm:$0xff] }
 0x22e   :  { %956 = vst.msk [vmem:[#allocation2 + $0x50] sm:$0xff] %vm177_vm0, %v924_v41  ;;  %v888_v4 = vmul.f32 %v3363_v21, %v850_v2  ;;  %2657 = vrsqrt.f32 %v791_v6  ;;  %v761_v11 = vmul.f32 0.03125, %v705_v43  ;;  %v3432_v15 = vld [vmem:[#allocation2 + $0x28] sm:$0xff] }
 0x22f   :  { %v2648_v52 = vpop.eup %2647  ;;  %955 = vst.msk [vmem:[#allocation2 + $0x48] sm:$0xff] %vm177_vm0, %v923_v12  ;;  %v887_v17 = vmul.f32 %v3363_v21, %v849_v14  ;;  %v794_v5 = vadd.f32 1e-05, %v762_v31  ;;  %v1044_v16 = vpack.c.bf16 %v3432_v15, %v3430_v47 }
 0x230   :  { %v2650_v19 = vpop.eup %2649  ;;  %v926_v23 = vadd.f32 %v3369_v63, %v888_v4  ;;  %v852_v32 = vmul.f32 %v2648_v52, %v3234_v8  ;;  %v793_v33 = vadd.f32 1e-05, %v761_v11  ;;  %v714_v36 = vpop.xlane.xlu0 %713 }
 0x231   :  { %v711_v51 = vpop.xlane.xlu1 %710  ;;  %v925_v49 = vadd.f32 %v3369_v63, %v887_v17  ;;  %v851_v20 = vmul.f32 %v2650_v19, %v3228_v9  ;;  %2659 = vrsqrt.f32 %v794_v5  ;;  %v764_v44 = vmul.f32 0.03125, %v714_v36  ;;  %2524 = vmatprep.mubr.msk.bf16.mxu1 %vm177_vm0, %v1044_v16  ;;  %v3460_v57 = vld [vmem:[#allocation2 + $0x40] sm:$0xff] }
 0x232   :  { %958 = vst.msk [vmem:[#allocation2 + $0x60] sm:$0xff] %vm177_vm0, %v926_v23  ;;  %v890_v46 = vmul.f32 %v3363_v21, %v852_v32  ;;  %2661 = vrsqrt.f32 %v793_v33  ;;  %v763_v50 = vmul.f32 0.03125, %v711_v51  ;;  %v3447_v8 = vld [vmem:[#allocation2 + $0x38] sm:$0xff] }
 0x233   :  { %v2652_v28 = vpop.eup %2651  ;;  %957 = vst.msk [vmem:[#allocation2 + $0x58] sm:$0xff] %vm177_vm0, %v925_v49  ;;  %v889_v38 = vmul.f32 %v3363_v21, %v851_v20  ;;  %v796_v9 = vadd.f32 1e-05, %v764_v44  ;;  %v1045_v27 = vpack.c.bf16 %v3447_v8, %v3445_v26 }
 0x234   :  { %v2654_v1 = vpop.eup %2653  ;;  %v928_v58 = vadd.f32 %v3369_v63, %v890_v46  ;;  %v854_v37 = vmul.f32 %v2652_v28, %v3246_v54  ;;  %v795_v0 = vadd.f32 1e-05, %v763_v50  ;;  %v720_v42 = vpop.xlane.xlu0 %719 }
 0x235   :  { %v717_v53 = vpop.xlane.xlu1 %716  ;;  %v927_v10 = vadd.f32 %v3369_v63, %v889_v38  ;;  %v853_v62 = vmul.f32 %v2654_v1, %v3240_v29  ;;  %2663 = vrsqrt.f32 %v796_v9  ;;  %v766_v41 = vmul.f32 0.03125, %v720_v42  ;;  %2525 = vmatmul.mubr.msk.bf16.gmra.mrb[20].mxu1 %vm177_vm0, %v1045_v27  ;;  %v3475_v36 = vld [vmem:[#allocation2 + $0x50] sm:$0xff] }
 0x236   :  { %960 = vst.msk [vmem:[#allocation2 + $0x70] sm:$0xff] %vm177_vm0, %v928_v58  ;;  %v892_v2 = vmul.f32 %v3363_v21, %v854_v37  ;;  %2665 = vrsqrt.f32 %v795_v0  ;;  %v765_v6 = vmul.f32 0.03125, %v717_v53  ;;  %v3462_v54 = vld [vmem:[#allocation2 + $0x48] sm:$0xff] }
 0x237   :  { %v2656_v43 = vpop.eup %2655  ;;  %959 = vst.msk [vmem:[#allocation2 + $0x68] sm:$0xff] %vm177_vm0, %v927_v10  ;;  %v891_v12 = vmul.f32 %v3363_v21, %v853_v62  ;;  %v798_v29 = vadd.f32 1e-05, %v766_v41  ;;  %v1046_v14 = vpack.c.bf16 %v3462_v54, %v3460_v57 }
 0x238   :  { %v2658_v31 = vpop.eup %2657  ;;  %v930_v4 = vadd.f32 %v3369_v63, %v892_v2  ;;  %v856_v11 = vmul.f32 %v2656_v43, %v3258_v25  ;;  %v797_v52 = vadd.f32 1e-05, %v765_v6  ;;  %v726_v17 = vpop.xlane.xlu0 %725 }
 0x239   :  { %v723_v5 = vpop.xlane.xlu1 %722  ;;  %v929_v16 = vadd.f32 %v3369_v63, %v891_v12  ;;  %v855_v19 = vmul.f32 %v2658_v31, %v3252_v39  ;;  %2667 = vrsqrt.f32 %v798_v29  ;;  %v768_v23 = vmul.f32 0.03125, %v726_v17  ;;  %2528 = vmatprep.mubr.msk.bf16.mxu1 %vm177_vm0, %v1046_v14  ;;  %v3490_v42 = vld [vmem:[#allocation2 + $0x60] sm:$0xff] }
 0x23a   :  { %962 = vst.msk [vmem:[#allocation2 + $0x80] sm:$0xff] %vm177_vm0, %v930_v4  ;;  %v894_v32 = vmul.f32 %v3363_v21, %v856_v11  ;;  %2669 = vrsqrt.f32 %v797_v52  ;;  %v767_v33 = vmul.f32 0.03125, %v723_v5  ;;  %v3477_v25 = vld [vmem:[#allocation2 + $0x58] sm:$0xff] }
 0x23b   :  { %v2660_v51 = vpop.eup %2659  ;;  %961 = vst.msk [vmem:[#allocation2 + $0x78] sm:$0xff] %vm177_vm0, %v929_v16  ;;  %v893_v49 = vmul.f32 %v3363_v21, %v855_v19  ;;  %v800_v39 = vadd.f32 1e-05, %v768_v23  ;;  %v1047_v20 = vpack.c.bf16 %v3477_v25, %v3475_v36 }
 0x23c   :  { %v2662_v44 = vpop.eup %2661  ;;  %v932_v46 = vadd.f32 %v3369_v63, %v894_v32  ;;  %v858_v50 = vmul.f32 %v2660_v51, %v3270_v7  ;;  %v799_v28 = vadd.f32 1e-05, %v767_v33  ;;  %v732_v38 = vpop.xlane.xlu0 %731 }
 0x23d   :  { %v729_v9 = vpop.xlane.xlu1 %728  ;;  %v931_v27 = vadd.f32 %v3369_v63, %v893_v49  ;;  %v857_v1 = vmul.f32 %v2662_v44, %v3264_v45  ;;  %2671 = vrsqrt.f32 %v800_v39  ;;  %v770_v58 = vmul.f32 0.03125, %v732_v38  ;;  %2529 = vmatmul.mubr.msk.bf16.gmra.mrb[24].mxu1 %vm177_vm0, %v1047_v20  ;;  %v3505_v17 = vld [vmem:[#allocation2 + $0x70] sm:$0xff] }
 0x23e   :  { %964 = vst.msk [vmem:[#allocation2 + $0x90] sm:$0xff] %vm177_vm0, %v932_v46  ;;  %v896_v37 = vmul.f32 %v3363_v21, %v858_v50  ;;  %2673 = vrsqrt.f32 %v799_v28  ;;  %v769_v0 = vmul.f32 0.03125, %v729_v9  ;;  %v3492_v7 = vld [vmem:[#allocation2 + $0x68] sm:$0xff] }
 0x23f   :  { %v2664_v53 = vpop.eup %2663  ;;  %963 = vst.msk [vmem:[#allocation2 + $0x88] sm:$0xff] %vm177_vm0, %v931_v27  ;;  %v895_v10 = vmul.f32 %v3363_v21, %v857_v1  ;;  %v802_v45 = vadd.f32 1e-05, %v770_v58  ;;  %v1048_v62 = vpack.c.bf16 %v3492_v7, %v3490_v42 }
 0x240   :  { %v2666_v41 = vpop.eup %2665  ;;  %v934_v2 = vadd.f32 %v3369_v63, %v896_v37  ;;  %v860_v6 = vmul.f32 %v2664_v53, %v3282_v40  ;;  %v801_v43 = vadd.f32 1e-05, %v769_v0  ;;  %v738_v12 = vpop.xlane.xlu0 %737 }
 0x241   :  { %v735_v29 = vpop.xlane.xlu1 %734  ;;  %v933_v14 = vadd.f32 %v3369_v63, %v895_v10  ;;  %v859_v31 = vmul.f32 %v2666_v41, %v3276_v59  ;;  %2675 = vrsqrt.f32 %v802_v45  ;;  %v772_v4 = vmul.f32 0.03125, %v738_v12  ;;  %2532 = vmatprep.mubr.msk.bf16.mxu1 %vm177_vm0, %v1048_v62  ;;  %v3520_v50 = vld [vmem:[#allocation2 + $0x80] sm:$0xff] }
 0x242   :  { %966 = vst.msk [vmem:[#allocation2 + $0xa0] sm:$0xff] %vm177_vm0, %v934_v2  ;;  %v898_v11 = vmul.f32 %v3363_v21, %v860_v6  ;;  %2677 = vrsqrt.f32 %v801_v43  ;;  %v771_v52 = vmul.f32 0.03125, %v735_v29  ;;  %v3507_v40 = vld [vmem:[#allocation2 + $0x78] sm:$0xff] }
 0x243   :  { %v2668_v5 = vpop.eup %2667  ;;  %965 = vst.msk [vmem:[#allocation2 + $0x98] sm:$0xff] %vm177_vm0, %v933_v14  ;;  %v897_v16 = vmul.f32 %v3363_v21, %v859_v31  ;;  %v804_v59 = vadd.f32 1e-05, %v772_v4  ;;  %v1049_v19 = vpack.c.bf16 %v3507_v40, %v3505_v17 }
 0x244   :  { %v2670_v23 = vpop.eup %2669  ;;  %v936_v32 = vadd.f32 %v3369_v63, %v898_v11  ;;  %v862_v33 = vmul.f32 %v2668_v5, %v3297_v61  ;;  %v803_v51 = vadd.f32 1e-05, %v771_v52 }
 0x245   :  { %v741_v49 = vpop.xlane.xlu1 %740  ;;  %v935_v39 = vadd.f32 %v3369_v63, %v897_v16  ;;  %v861_v20 = vmul.f32 %v2670_v23, %v3288_v30  ;;  %2679 = vrsqrt.f32 %v804_v59  ;;  %2533 = vmatmul.mubr.msk.bf16.gmra.mrb[28].mxu1 %vm177_vm0, %v1049_v19  ;;  %v3535_v10 = vld [vmem:[#allocation2 + $0x90] sm:$0xff] }
 0x246   :  { %v773_v44 = vmul.f32 0.03125, %v741_v49  ;;  %968 = vst.msk [vmem:[#allocation2 + $0xb0] sm:$0xff] %vm177_vm0, %v936_v32  ;;  %v900_v46 = vmul.f32 %v3363_v21, %v862_v33  ;;  %2681 = vrsqrt.f32 %v803_v51  ;;  %v3522_v28 = vld [vmem:[#allocation2 + $0x88] sm:$0xff] }
 0x247   :  { %v2672_v61 = vpop.eup %2671  ;;  %967 = vst.msk [vmem:[#allocation2 + $0xa8] sm:$0xff] %vm177_vm0, %v935_v39  ;;  %v899_v38 = vmul.f32 %v3363_v21, %v861_v20  ;;  %v1050_v30 = vpack.c.bf16 %v3522_v28, %v3520_v50 }
 0x248   :  { %v805_v9 = vadd.f32 1e-05, %v773_v44  ;;  %v2674_v27 = vpop.eup %2673  ;;  %v938_v1 = vadd.f32 %v3369_v63, %v900_v46  ;;  %v864_v58 = vmul.f32 %v2672_v61, %v3309_v13 }
 0x249   :  { %v937_v37 = vadd.f32 %v3369_v63, %v899_v38  ;;  %v863_v0 = vmul.f32 %v2674_v27, %v3303_v22  ;;  %2536 = vmatprep.mubr.msk.bf16.mxu1 %vm177_vm0, %v1050_v30  ;;  %v3550_v14 = vld [vmem:[#allocation2 + $0xa0] sm:$0xff] }
 0x24a   :  { %2683 = vrsqrt.f32 %v805_v9  ;;  %970 = vst.msk [vmem:[#allocation2 + $0xc0] sm:$0xff] %vm177_vm0, %v938_v1  ;;  %v902_v53 = vmul.f32 %v3363_v21, %v864_v58  ;;  %v3537_v45 = vld [vmem:[#allocation2 + $0x98] sm:$0xff] }
 0x24b   :  { %v2676_v62 = vpop.eup %2675  ;;  %969 = vst.msk [vmem:[#allocation2 + $0xb8] sm:$0xff] %vm177_vm0, %v937_v37  ;;  %v901_v13 = vmul.f32 %v3363_v21, %v863_v0  ;;  %v1051_v41 = vpack.c.bf16 %v3537_v45, %v3535_v10  ;;  %v2620_v0 = vld [vmem:[%s4359_s7 + $0x18] sm:$0xff]  }
 0x24c   :  { %v2678_v22 = vpop.eup %2677  ;;  %v940_v2 = vadd.f32 %v3369_v63, %v902_v53  ;;  %v866_v6 = vmul.f32 %v2676_v62, %v3324_v3  ;;  %2558 = vmatprep.subr.bf16.mxu0 %v2620_v0  ;;  %v2749_v53 = vmov 0.0   ;;  %v3648_v62 = vld [vmem:[%s4362_s6] ss:$0 sm:$0xff] }
 0x24d   :  { %v939_v43 = vadd.f32 %v3369_v63, %v901_v13  ;;  %v865_v12 = vmul.f32 %v2678_v22, %v3318_v56  ;;  %2537 = vmatmul.mubr.msk.bf16.gmra.mrb[32].mxu1 %vm177_vm0, %v1051_v41  ;;  %v3565_v23 = vld [vmem:[#allocation2 + $0xb0] sm:$0xff]  ;;  %2559 = vmatpush3.bf16.msra.mxu0 %v2620_v0  ;;  %980 = vst.msk [vmem:[#allocation3 + $0x10] sm:$0xff] %vm177_vm0, %v2749_v53  ;;  %978 = vst.msk [vmem:[#allocation3] sm:$0xff] %vm177_vm0, %v2749_v53 }
 0x24e   :  { %972 = vst.msk [vmem:[#allocation2 + $0xd0] sm:$0xff] %vm177_vm0, %v940_v2  ;;  %v904_v29 = vmul.f32 %v3363_v21, %v866_v6  ;;  %v3552_v31 = vld [vmem:[#allocation2 + $0xa8] sm:$0xff]  ;;  %979 = vst.msk [vmem:[#allocation3 + $0x8] sm:$0xff] %vm177_vm0, %v2749_v53 }
 0x24f   :  { %v2680_v4 = vpop.eup %2679  ;;  %971 = vst.msk [vmem:[#allocation2 + $0xc8] sm:$0xff] %vm177_vm0, %v939_v43  ;;  %v903_v11 = vmul.f32 %v3363_v21, %v865_v12  ;;  %v1052_v3 = vpack.c.bf16 %v3552_v31, %v3550_v14  ;;  %981 = vst.msk [vmem:[#allocation3 + $0x18] sm:$0xff] %vm177_vm0, %v2749_v53 }
 0x250   :  { %v2682_v52 = vpop.eup %2681  ;;  %v942_v56 = vadd.f32 %v3369_v63, %v904_v29  ;;  %v868_v5 = vmul.f32 %v2680_v4, %v3336_v48  ;;  %982 = vst.msk [vmem:[#allocation3 + $0x20] sm:$0xff] %vm177_vm0, %v2749_v53  ;;  %983 = vst.msk [vmem:[#allocation3 + $0x28] sm:$0xff] %vm177_vm0, %v2749_v53 }
 0x251   :  { %v941_v16 = vadd.f32 %v3369_v63, %v903_v11  ;;  %v867_v59 = vmul.f32 %v2682_v52, %v3330_v60  ;;  %2540 = vmatprep.mubr.msk.bf16.mxu1 %vm177_vm0, %v1052_v3  ;;  %v3579_v44 = vld [vmem:[#allocation2 + $0xc0] sm:$0xff]  ;;  %984 = vst.msk [vmem:[#allocation3 + $0x30] sm:$0xff] %vm177_vm0, %v2749_v53  ;;  %985 = vst.msk [vmem:[#allocation3 + $0x38] sm:$0xff] %vm177_vm0, %v2749_v53 }
 0x252   :  { %974 = vst.msk [vmem:[#allocation2 + $0xe0] sm:$0xff] %vm177_vm0, %v942_v56  ;;  %v906_v19 = vmul.f32 %v3363_v21, %v868_v5  ;;  %v3567_v32 = vld [vmem:[#allocation2 + $0xb8] sm:$0xff]  ;;  %986 = vst.msk [vmem:[#allocation3 + $0x40] sm:$0xff] %vm177_vm0, %v2749_v53 }
 0x253   :  { %973 = vst.msk [vmem:[#allocation2 + $0xd8] sm:$0xff] %vm177_vm0, %v941_v16  ;;  %v905_v51 = vmul.f32 %v3363_v21, %v867_v59  ;;  %v1053_v48 = vpack.c.bf16 %v3567_v32, %v3565_v23  ;;  %987 = vst.msk [vmem:[#allocation3 + $0x48] sm:$0xff] %vm177_vm0, %v2749_v53 }
 0x254   :  { %v2684_v33 = vpop.eup %2683  ;;  %v944_v60 = vadd.f32 %v3369_v63, %v906_v19  ;;  %988 = vst.msk [vmem:[#allocation3 + $0x50] sm:$0xff] %vm177_vm0, %v2749_v53  ;;  %989 = vst.msk [vmem:[#allocation3 + $0x58] sm:$0xff] %vm177_vm0, %v2749_v53 }
 0x255   :  { %v869_v49 = vmul.f32 %v2684_v33, %v3342_v24  ;;  %v943_v39 = vadd.f32 %v3369_v63, %v905_v51  ;;  %2541 = vmatmul.mubr.msk.bf16.gmra.mrb[36].mxu1 %vm177_vm0, %v1053_v48  ;;  %v3589_v24 = vld [vmem:[#allocation2 + $0xd0] sm:$0xff]  ;;  %990 = vst.msk [vmem:[#allocation3 + $0x60] sm:$0xff] %vm177_vm0, %v2749_v53  ;;  %991 = vst.msk [vmem:[#allocation3 + $0x68] sm:$0xff] %vm177_vm0, %v2749_v53 }
 0x256   :  { %976 = vst.msk [vmem:[#allocation2 + $0xf0] sm:$0xff] %vm177_vm0, %v944_v60  ;;  %v3581_v46 = vld [vmem:[#allocation2 + $0xc8] sm:$0xff]  ;;  %992 = vst.msk [vmem:[#allocation3 + $0x70] sm:$0xff] %vm177_vm0, %v2749_v53 }
 0x257   :  { %v907_v20 = vmul.f32 %v3363_v21, %v869_v49  ;;  %975 = vst.msk [vmem:[#allocation2 + $0xe8] sm:$0xff] %vm177_vm0, %v943_v39  ;;  %v1054_v61 = vpack.c.bf16 %v3581_v46, %v3579_v44  ;;  %993 = vst.msk [vmem:[#allocation3 + $0x78] sm:$0xff] %vm177_vm0, %v2749_v53 }
 0x258   :  { %994 = vst.msk [vmem:[#allocation3 + $0x80] sm:$0xff] %vm177_vm0, %v2749_v53  ;;  %995 = vst.msk [vmem:[#allocation3 + $0x88] sm:$0xff] %vm177_vm0, %v2749_v53 }
 0x259   :  { %v945_v38 = vadd.f32 %v3369_v63, %v907_v20  ;;  %2544 = vmatprep.mubr.msk.bf16.mxu1 %vm177_vm0, %v1054_v61  ;;  %v3596_v30 = vld [vmem:[#allocation2 + $0xe0] sm:$0xff]  ;;  %996 = vst.msk [vmem:[#allocation3 + $0x90] sm:$0xff] %vm177_vm0, %v2749_v53  ;;  %997 = vst.msk [vmem:[#allocation3 + $0x98] sm:$0xff] %vm177_vm0, %v2749_v53 }
 0x25a   :  { %v3591_v9 = vld [vmem:[#allocation2 + $0xd8] sm:$0xff]  ;;  %998 = vst.msk [vmem:[#allocation3 + $0xa0] sm:$0xff] %vm177_vm0, %v2749_v53  ;;  %999 = vst.msk [vmem:[#allocation3 + $0xa8] sm:$0xff] %vm177_vm0, %v2749_v53 }
 0x25b   :  { %977 = vst.msk [vmem:[#allocation2 + $0xf8] sm:$0xff] %vm177_vm0, %v945_v38  ;;  %v1055_v21 = vpack.c.bf16 %v3591_v9, %v3589_v24  ;;  %1000 = vst.msk [vmem:[#allocation3 + $0xb0] sm:$0xff] %vm177_vm0, %v2749_v53 }
 0x25c   :  { %1001 = vst.msk [vmem:[#allocation3 + $0xb8] sm:$0xff] %vm177_vm0, %v2749_v53  ;;  %1002 = vst.msk [vmem:[#allocation3 + $0xc0] sm:$0xff] %vm177_vm0, %v2749_v53 }
 0x25d   :  { %2545 = vmatmul.mubr.msk.bf16.gmra.mrb[40].mxu1 %vm177_vm0, %v1055_v21  ;;  %v3603_v1 = vld [vmem:[#allocation2 + $0xf0] sm:$0xff]  ;;  %1003 = vst.msk [vmem:[#allocation3 + $0xc8] sm:$0xff] %vm177_vm0, %v2749_v53  ;;  %1004 = vst.msk [vmem:[#allocation3 + $0xd0] sm:$0xff] %vm177_vm0, %v2749_v53 }
 0x25e   :  { %v3598_v27 = vld [vmem:[#allocation2 + $0xe8] sm:$0xff]  ;;  %1005 = vst.msk [vmem:[#allocation3 + $0xd8] sm:$0xff] %vm177_vm0, %v2749_v53  ;;  %1006 = vst.msk [vmem:[#allocation3 + $0xe0] sm:$0xff] %vm177_vm0, %v2749_v53 }
 0x25f   :  { %v1056_v63 = vpack.c.bf16 %v3598_v27, %v3596_v30  ;;  %1007 = vst.msk [vmem:[#allocation3 + $0xe8] sm:$0xff] %vm177_vm0, %v2749_v53  ;;  %1008 = vst.msk [vmem:[#allocation3 + $0xf0] sm:$0xff] %vm177_vm0, %v2749_v53 }
 0x260   :  { %1009 = vst.msk [vmem:[#allocation3 + $0xf8] sm:$0xff] %vm177_vm0, %v2749_v53 }
 0x261   :  { %2548 = vmatprep.mubr.msk.bf16.mxu1 %vm177_vm0, %v1056_v63 }
 0x262   :  { %v3605_v58 = vld [vmem:[#allocation2 + $0xf8] sm:$0xff] }
 0x263   :  { %v1057_v37 = vpack.c.bf16 %v3605_v58, %v3603_v1 }
 0x265   :  { %2549 = vmatmul.mubr.msk.bf16.gmra.mrb[44].mxu1 %vm177_vm0, %v1057_v37 }
 0x300   :  { %v2522_v13 = vpop.f32.mrb[16].mxu1 }
 0x301   :  { %v1173_v41 = vadd.f32 %v2522_v13, %v3648_v62  ;;  %v1164_v22 = vpop.f32.mrb[17].mxu1 }
 0x302   :  { %v1165_v2 = vadd.f32 %v3648_v62, %v1164_v22  ;;  %v2523_v6 = vpop.f32.mrb[18].mxu1 }
 0x303   :  { %v1176_v43 = vadd.f32 %v2523_v6, %v3648_v62  ;;  %v1167_v12 = vpop.f32.mrb[19].mxu1  ;;  %v1293_v4 = vmax.f32 %v1173_v41, 0.0 }
 0x304   :  { %v1168_v29 = vadd.f32 %v3648_v62, %v1167_v12  ;;  %v1291_v3 = vmax.f32 %v1165_v2, 0.0 }
 0x305   :  { %v1294_v11 = vmax.f32 %v1176_v43, 0.0 }
 0x306   :  { %v1292_v52 = vmax.f32 %v1168_v29, 0.0 }
 0x307   :  { %v1356_v56 = vpack.c.bf16 %v1294_v11, %v1293_v4 }
 0x308   :  { %v1355_v5 = vpack.c.bf16 %v1292_v52, %v1291_v3  ;;  %v2526_v16 = vpop.f32.mrb[20].mxu1 }
 0x309   :  { %v1189_v59 = vadd.f32 %v2526_v16, %v3648_v62  ;;  %v1180_v19 = vpop.f32.mrb[21].mxu1 }
 0x30a   :  { %v1181_v33 = vadd.f32 %v3648_v62, %v1180_v19  ;;  %v2527_v51 = vpop.f32.mrb[22].mxu1  ;;  %2560 = vmatprep.mubr.msk.bf16.mxu0 %vm1403_vm1, %v1355_v5 }
 0x30b   :  { %v1192_v48 = vadd.f32 %v2527_v51, %v3648_v62  ;;  %v1183_v60 = vpop.f32.mrb[23].mxu1  ;;  %2561 = vmatmul.mubr.msk.bf16.vlgmr.msra.gmra.mrb[16].mxu0 %vm1403_vm1, %v1356_v56  ;;  %v1297_v39 = vmax.f32 %v1189_v59, 0.0 }
 0x30c   :  { %v1184_v49 = vadd.f32 %v3648_v62, %v1183_v60  ;;  %v1295_v61 = vmax.f32 %v1181_v33, 0.0 }
 0x30d   :  { %v1298_v20 = vmax.f32 %v1192_v48, 0.0 }
 0x30e   :  { %v1296_v38 = vmax.f32 %v1184_v49, 0.0 }
 0x30f   :  { %v1358_v21 = vpack.c.bf16 %v1298_v20, %v1297_v39 }
 0x310   :  { %v1357_v63 = vpack.c.bf16 %v1296_v38, %v1295_v61  ;;  %v2530_v37 = vpop.f32.mrb[24].mxu1 }
 0x311   :  { %v1205_v0 = vadd.f32 %v2530_v37, %v3648_v62  ;;  %v1196_v53 = vpop.f32.mrb[25].mxu1 }
 0x312   :  { %v1197_v13 = vadd.f32 %v3648_v62, %v1196_v53  ;;  %v2531_v41 = vpop.f32.mrb[26].mxu1  ;;  %2564 = vmatprep.mubr.msk.bf16.mxu0 %vm1403_vm1, %v1357_v63 }
 0x313   :  { %v1208_v22 = vadd.f32 %v2531_v41, %v3648_v62  ;;  %v1199_v2 = vpop.f32.mrb[27].mxu1  ;;  %2565 = vmatmul.mubr.msk.bf16.gmra.mrb[20].mxu0 %vm1403_vm1, %v1358_v21  ;;  %v1301_v43 = vmax.f32 %v1205_v0, 0.0 }
 0x314   :  { %v1200_v6 = vadd.f32 %v3648_v62, %v1199_v2  ;;  %v1299_v29 = vmax.f32 %v1197_v13, 0.0 }
 0x315   :  { %v1302_v12 = vmax.f32 %v1208_v22, 0.0 }
 0x316   :  { %v1300_v4 = vmax.f32 %v1200_v6, 0.0 }
 0x317   :  { %v1360_v11 = vpack.c.bf16 %v1302_v12, %v1301_v43 }
 0x318   :  { %v1359_v3 = vpack.c.bf16 %v1300_v4, %v1299_v29  ;;  %v2534_v52 = vpop.f32.mrb[28].mxu1 }
 0x319   :  { %v1221_v56 = vadd.f32 %v2534_v52, %v3648_v62  ;;  %v1212_v5 = vpop.f32.mrb[29].mxu1 }
 0x31a   :  { %v1213_v16 = vadd.f32 %v3648_v62, %v1212_v5  ;;  %v2535_v59 = vpop.f32.mrb[30].mxu1  ;;  %2568 = vmatprep.mubr.msk.bf16.mxu0 %vm1403_vm1, %v1359_v3 }
 0x31b   :  { %v1224_v19 = vadd.f32 %v2535_v59, %v3648_v62  ;;  %v1215_v33 = vpop.f32.mrb[31].mxu1  ;;  %2569 = vmatmul.mubr.msk.bf16.gmra.mrb[24].mxu0 %vm1403_vm1, %v1360_v11  ;;  %v1305_v48 = vmax.f32 %v1221_v56, 0.0 }
 0x31c   :  { %v1216_v51 = vadd.f32 %v3648_v62, %v1215_v33  ;;  %v1303_v49 = vmax.f32 %v1213_v16, 0.0 }
 0x31d   :  { %v1306_v60 = vmax.f32 %v1224_v19, 0.0 }
 0x31e   :  { %v1304_v39 = vmax.f32 %v1216_v51, 0.0 }
 0x31f   :  { %v1362_v20 = vpack.c.bf16 %v1306_v60, %v1305_v48 }
 0x320   :  { %v1361_v61 = vpack.c.bf16 %v1304_v39, %v1303_v49  ;;  %v2538_v38 = vpop.f32.mrb[32].mxu1 }
 0x321   :  { %v1237_v21 = vadd.f32 %v2538_v38, %v3648_v62  ;;  %v1228_v63 = vpop.f32.mrb[33].mxu1 }
 0x322   :  { %v1229_v37 = vadd.f32 %v3648_v62, %v1228_v63  ;;  %v2539_v0 = vpop.f32.mrb[34].mxu1  ;;  %2572 = vmatprep.mubr.msk.bf16.mxu0 %vm1403_vm1, %v1361_v61 }
 0x323   :  { %v1240_v53 = vadd.f32 %v2539_v0, %v3648_v62  ;;  %v1231_v13 = vpop.f32.mrb[35].mxu1  ;;  %2573 = vmatmul.mubr.msk.bf16.gmra.mrb[28].mxu0 %vm1403_vm1, %v1362_v20  ;;  %v1309_v22 = vmax.f32 %v1237_v21, 0.0 }
 0x324   :  { %v1232_v41 = vadd.f32 %v3648_v62, %v1231_v13  ;;  %v1307_v6 = vmax.f32 %v1229_v37, 0.0 }
 0x325   :  { %v1310_v2 = vmax.f32 %v1240_v53, 0.0 }
 0x326   :  { %v1308_v43 = vmax.f32 %v1232_v41, 0.0 }
 0x327   :  { %v1364_v12 = vpack.c.bf16 %v1310_v2, %v1309_v22 }
 0x328   :  { %v1363_v29 = vpack.c.bf16 %v1308_v43, %v1307_v6  ;;  %v2542_v4 = vpop.f32.mrb[36].mxu1 }
 0x329   :  { %v1253_v11 = vadd.f32 %v2542_v4, %v3648_v62  ;;  %v1244_v3 = vpop.f32.mrb[37].mxu1 }
 0x32a   :  { %v1245_v52 = vadd.f32 %v3648_v62, %v1244_v3  ;;  %v2543_v56 = vpop.f32.mrb[38].mxu1  ;;  %2576 = vmatprep.mubr.msk.bf16.mxu0 %vm1403_vm1, %v1363_v29 }
 0x32b   :  { %v1256_v5 = vadd.f32 %v2543_v56, %v3648_v62  ;;  %v1247_v16 = vpop.f32.mrb[39].mxu1  ;;  %2577 = vmatmul.mubr.msk.bf16.gmra.mrb[32].mxu0 %vm1403_vm1, %v1364_v12  ;;  %v1313_v19 = vmax.f32 %v1253_v11, 0.0 }
 0x32c   :  { %v1248_v59 = vadd.f32 %v3648_v62, %v1247_v16  ;;  %v1311_v51 = vmax.f32 %v1245_v52, 0.0 }
 0x32d   :  { %v1314_v33 = vmax.f32 %v1256_v5, 0.0 }
 0x32e   :  { %v1312_v48 = vmax.f32 %v1248_v59, 0.0 }
 0x32f   :  { %v1366_v60 = vpack.c.bf16 %v1314_v33, %v1313_v19 }
 0x330   :  { %v1365_v49 = vpack.c.bf16 %v1312_v48, %v1311_v51  ;;  %v2546_v39 = vpop.f32.mrb[40].mxu1  ;;  %v1325_v48 = vld [vmem:[#allocation3 + $0x10] sm:$0xff] }
 0x331   :  { %v1269_v20 = vadd.f32 %v2546_v39, %v3648_v62  ;;  %v1260_v61 = vpop.f32.mrb[41].mxu1  ;;  %v1326_v39 = vld [vmem:[#allocation3 + $0x18] sm:$0xff] }
 0x332   :  { %v1261_v38 = vadd.f32 %v3648_v62, %v1260_v61  ;;  %v2547_v21 = vpop.f32.mrb[42].mxu1  ;;  %2580 = vmatprep.mubr.msk.bf16.mxu0 %vm1403_vm1, %v1365_v49 }
 0x333   :  { %v1272_v63 = vadd.f32 %v2547_v21, %v3648_v62  ;;  %v1263_v37 = vpop.f32.mrb[43].mxu1  ;;  %2581 = vmatmul.mubr.msk.bf16.gmra.mrb[36].mxu0 %vm1403_vm1, %v1366_v60  ;;  %v1317_v53 = vmax.f32 %v1269_v20, 0.0  ;;  %v1323_v60 = vld [vmem:[#allocation3] sm:$0xff] }
 0x334   :  { %v1264_v0 = vadd.f32 %v3648_v62, %v1263_v37  ;;  %v1315_v41 = vmax.f32 %v1261_v38, 0.0  ;;  %v1324_v38 = vld [vmem:[#allocation3 + $0x8] sm:$0xff] }
 0x335   :  { %v1318_v13 = vmax.f32 %v1272_v63, 0.0 }
 0x336   :  { %v1316_v22 = vmax.f32 %v1264_v0, 0.0 }
 0x337   :  { %v1368_v2 = vpack.c.bf16 %v1318_v13, %v1317_v53  ;;  %v1329_v53 = vld [vmem:[#allocation3 + $0x30] sm:$0xff]  ;;  %v1327_v13 = vld [vmem:[#allocation3 + $0x20] sm:$0xff] }
 0x338   :  { %v1367_v6 = vpack.c.bf16 %v1316_v22, %v1315_v41  ;;  %v2550_v43 = vpop.f32.mrb[44].mxu1  ;;  %v1330_v22 = vld [vmem:[#allocation3 + $0x38] sm:$0xff] }
 0x339   :  { %v1285_v12 = vadd.f32 %v2550_v43, %v3648_v62  ;;  %v1276_v29 = vpop.f32.mrb[45].mxu1  ;;  %v1328_v43 = vld [vmem:[#allocation3 + $0x28] sm:$0xff] }
 0x33a   :  { %v1277_v4 = vadd.f32 %v3648_v62, %v1276_v29  ;;  %v2551_v11 = vpop.f32.mrb[46].mxu1  ;;  %2584 = vmatprep.mubr.msk.bf16.mxu0 %vm1403_vm1, %v1367_v6 }
 0x33b   :  { %v1288_v3 = vadd.f32 %v2551_v11, %v3648_v62  ;;  %v1279_v52 = vpop.f32.mrb[47].mxu1  ;;  %2585 = vmatmul.mubr.msk.bf16.gmra.mrb[40].mxu0 %vm1403_vm1, %v1368_v2  ;;  %v1321_v5 = vmax.f32 %v1285_v12, 0.0  ;;  %v3705_v11 = vld [vmem:[%s4363_s8] ss:$0 sm:$0xff] }
 0x33c   :  { %v1280_v56 = vadd.f32 %v3648_v62, %v1279_v52  ;;  %v1319_v59 = vmax.f32 %v1277_v4, 0.0 }
 0x33d   :  { %v1322_v16 = vmax.f32 %v1288_v3, 0.0 }
 0x33e   :  { %v1320_v19 = vmax.f32 %v1280_v56, 0.0 }
 0x33f   :  { %v1370_v33 = vpack.c.bf16 %v1322_v16, %v1321_v5 }
 0x340   :  { %v1369_v51 = vpack.c.bf16 %v1320_v19, %v1319_v59 }
 0x342   :  { %2588 = vmatprep.mubr.msk.bf16.mxu0 %vm1403_vm1, %v1369_v51 }
 0x343   :  { %2589 = vmatmul.mubr.msk.bf16.gmra.mrb[44].mxu0 %vm1403_vm1, %v1370_v33 }
 0x3de   :  { %v2562_v49 = vpop.f32.mrb[16].mxu0 }
 0x3df   :  { %v1615_v20 = vadd.f32 %v2562_v49, %v1325_v48  ;;  %v1486_v61 = vpop.f32.mrb[17].mxu0 }
 0x3e0   :  { %v1613_v21 = vadd.f32 %v1486_v61, %v1323_v60  ;;  %v2563_v63 = vpop.f32.mrb[18].mxu0  ;;  %v1333_v60 = vld [vmem:[#allocation3 + $0x50] sm:$0xff] }
 0x3e1   :  { %1647 = vst.msk [vmem:[#allocation3 + $0x10] sm:$0xff] %vm177_vm0, %v1615_v20  ;;  %v1616_v62 = vadd.f32 %v2563_v63, %v1326_v39  ;;  %v1489_v37 = vpop.f32.mrb[19].mxu0  ;;  %v1331_v39 = vld [vmem:[#allocation3 + $0x40] sm:$0xff] }
 0x3e2   :  { %1645 = vst.msk [vmem:[#allocation3] sm:$0xff] %vm177_vm0, %v1613_v21  ;;  %v1614_v0 = vadd.f32 %v1489_v37, %v1324_v38  ;;  %v1334_v38 = vld [vmem:[#allocation3 + $0x58] sm:$0xff] }
 0x3e3   :  { %1648 = vst.msk [vmem:[#allocation3 + $0x18] sm:$0xff] %vm177_vm0, %v1616_v62  ;;  %v1332_v62 = vld [vmem:[#allocation3 + $0x48] sm:$0xff] }
 0x3e4   :  { %1646 = vst.msk [vmem:[#allocation3 + $0x8] sm:$0xff] %vm177_vm0, %v1614_v0 }
 0x3e6   :  { %v2566_v41 = vpop.f32.mrb[20].mxu0 }
 0x3e7   :  { %v1619_v2 = vadd.f32 %v2566_v41, %v1329_v53  ;;  %v1502_v6 = vpop.f32.mrb[21].mxu0 }
 0x3e8   :  { %v1617_v12 = vadd.f32 %v1502_v6, %v1327_v13  ;;  %v2567_v29 = vpop.f32.mrb[22].mxu0  ;;  %v1714_v4 = vld [vmem:[#allocation3 + $0x10] sm:$0xff] }
 0x3e9   :  { %1651 = vst.msk [vmem:[#allocation3 + $0x30] sm:$0xff] %vm177_vm0, %v1619_v2  ;;  %v1620_v3 = vadd.f32 %v2567_v29, %v1330_v22  ;;  %v1505_v52 = vpop.f32.mrb[23].mxu0  ;;  %v1746_v56 = vadd.f32 %v1714_v4, %v3415_v34  ;;  %v1712_v5 = vld [vmem:[#allocation3] sm:$0xff] }
 0x3ea   :  { %1649 = vst.msk [vmem:[#allocation3 + $0x20] sm:$0xff] %vm177_vm0, %v1617_v12  ;;  %v1618_v16 = vadd.f32 %v1505_v52, %v1328_v43  ;;  %v1715_v59 = vld [vmem:[#allocation3 + $0x18] sm:$0xff]  ;;  %v1744_v19 = vadd.f32 %v1712_v5, %v3400_v35 }
 0x3eb   :  { %1652 = vst.msk [vmem:[#allocation3 + $0x38] sm:$0xff] %vm177_vm0, %v1620_v3  ;;  %v3713_v33 = vadd.f32 %v3705_v11, %v1746_v56  ;;  %v1747_v51 = vadd.f32 %v1715_v59, %v3417_v55  ;;  %v1713_v48 = vld [vmem:[#allocation3 + $0x8] sm:$0xff] }
 0x3ec   :  { %1650 = vst.msk [vmem:[#allocation3 + $0x28] sm:$0xff] %vm177_vm0, %v1618_v16  ;;  %v1745_v34 = vadd.f32 %v1713_v48, %v3402_v18  ;;  %v3724_v35 = vadd.f32 %v3705_v11, %v1744_v19  ;;  %v1335_v16 = vld [vmem:[#allocation3 + $0x60] sm:$0xff] }
 0x3ed   :  { %v1823_v49 = vsel %vm177_vm0, %v3713_v33, 0.0  ;;  %v3721_v20 = vadd.f32 %v3705_v11, %v1747_v51 }
 0x3ee   :  { %1824 = vadd.xlane.f32.xlu0 %v1823_v49  ;;  %v2570_v61 = vpop.f32.mrb[24].mxu0  ;;  %v3729_v18 = vadd.f32 %v3705_v11, %v1745_v34  ;;  %v1817_v22 = vsel %vm177_vm0, %v3724_v35, 0.0  ;;  %v1336_v49 = vld [vmem:[#allocation3 + $0x68] sm:$0xff] }
 0x3ef   :  { %v1623_v55 = vadd.f32 %v2570_v61, %v1333_v60  ;;  %v1518_v21 = vpop.f32.mrb[25].mxu0  ;;  %v1826_v63 = vsel %vm177_vm0, %v3721_v20, 0.0 }
 0x3f0   :  { %v1621_v37 = vadd.f32 %v1518_v21, %v1331_v39  ;;  %1827 = vadd.xlane.f32.xlu1 %v1826_v63  ;;  %v2571_v0 = vpop.f32.mrb[26].mxu0  ;;  %v1718_v53 = vld [vmem:[#allocation3 + $0x30] sm:$0xff]  ;;  %v1820_v4 = vsel %vm177_vm0, %v3729_v18, 0.0 }
 0x3f1   :  { %1655 = vst.msk [vmem:[#allocation3 + $0x50] sm:$0xff] %vm177_vm0, %v1623_v55  ;;  %v1624_v13 = vadd.f32 %v2571_v0, %v1334_v38  ;;  %v1521_v41 = vpop.f32.mrb[27].mxu0  ;;  %v1750_v2 = vadd.f32 %v1718_v53, %v3445_v26  ;;  %v1716_v6 = vld [vmem:[#allocation3 + $0x20] sm:$0xff]  ;;  %v1337_v26 = vld [vmem:[#allocation3 + $0x70] sm:$0xff] }
 0x3f2   :  { %1653 = vst.msk [vmem:[#allocation3 + $0x40] sm:$0xff] %vm177_vm0, %v1621_v37  ;;  %v1622_v43 = vadd.f32 %v1521_v41, %v1332_v62  ;;  %1818 = vadd.xlane.f32.xlu0 %v1817_v22  ;;  %v1719_v12 = vld [vmem:[#allocation3 + $0x38] sm:$0xff]  ;;  %v1748_v29 = vadd.f32 %v1716_v6, %v3430_v47 }
 0x3f3   :  { %1656 = vst.msk [vmem:[#allocation3 + $0x58] sm:$0xff] %vm177_vm0, %v1624_v13  ;;  %v3741_v3 = vadd.f32 %v3705_v11, %v1750_v2  ;;  %v1751_v52 = vadd.f32 %v1719_v12, %v3447_v8  ;;  %v1717_v56 = vld [vmem:[#allocation3 + $0x28] sm:$0xff]  ;;  %v1338_v8 = vld [vmem:[#allocation3 + $0x78] sm:$0xff]  ;;  %v1339_v12 = vld [vmem:[#allocation3 + $0x80] sm:$0xff] }
 0x3f4   :  { %1654 = vst.msk [vmem:[#allocation3 + $0x48] sm:$0xff] %vm177_vm0, %v1622_v43  ;;  %1821 = vadd.xlane.f32.xlu1 %v1820_v4  ;;  %v1749_v5 = vadd.f32 %v1717_v56, %v3432_v15  ;;  %v3752_v19 = vadd.f32 %v3705_v11, %v1748_v29 }
 0x3f5   :  { %v1835_v47 = vsel %vm177_vm0, %v3741_v3, 0.0  ;;  %v3749_v59 = vadd.f32 %v3705_v11, %v1751_v52 }
 0x3f6   :  { %1836 = vadd.xlane.f32.xlu0 %v1835_v47  ;;  %v2574_v51 = vpop.f32.mrb[28].mxu0  ;;  %v3757_v15 = vadd.f32 %v3705_v11, %v1749_v5  ;;  %v1829_v63 = vsel %vm177_vm0, %v3752_v19, 0.0  ;;  %v1340_v47 = vld [vmem:[#allocation3 + $0x88] sm:$0xff] }
 0x3f7   :  { %v1627_v48 = vadd.f32 %v2574_v51, %v1337_v26  ;;  %v1534_v60 = vpop.f32.mrb[29].mxu0  ;;  %v1838_v34 = vsel %vm177_vm0, %v3749_v59, 0.0 }
 0x3f8   :  { %v1625_v39 = vadd.f32 %v1534_v60, %v1335_v16  ;;  %1839 = vadd.xlane.f32.xlu1 %v1838_v34  ;;  %v2575_v61 = vpop.f32.mrb[30].mxu0  ;;  %v1722_v38 = vld [vmem:[#allocation3 + $0x50] sm:$0xff]  ;;  %v1832_v41 = vsel %vm177_vm0, %v3757_v15, 0.0 }
 0x3f9   :  { %1659 = vst.msk [vmem:[#allocation3 + $0x70] sm:$0xff] %vm177_vm0, %v1627_v48  ;;  %v1628_v55 = vadd.f32 %v2575_v61, %v1338_v8  ;;  %v1537_v21 = vpop.f32.mrb[31].mxu0  ;;  %v1754_v62 = vadd.f32 %v1722_v38, %v3475_v36  ;;  %v1720_v37 = vld [vmem:[#allocation3 + $0x40] sm:$0xff]  ;;  %v1341_v36 = vld [vmem:[#allocation3 + $0x90] sm:$0xff] }
 0x3fa   :  { %1657 = vst.msk [vmem:[#allocation3 + $0x60] sm:$0xff] %vm177_vm0, %v1625_v39  ;;  %v1626_v0 = vadd.f32 %v1537_v21, %v1336_v49  ;;  %1830 = vadd.xlane.f32.xlu0 %v1829_v63  ;;  %v1723_v53 = vld [vmem:[#allocation3 + $0x58] sm:$0xff]  ;;  %v1752_v13 = vadd.f32 %v1720_v37, %v3460_v57 }
 0x3fb   :  { %1660 = vst.msk [vmem:[#allocation3 + $0x78] sm:$0xff] %vm177_vm0, %v1628_v55  ;;  %v3769_v22 = vadd.f32 %v3705_v11, %v1754_v62  ;;  %v1755_v2 = vadd.f32 %v1723_v53, %v3477_v25  ;;  %v1721_v6 = vld [vmem:[#allocation3 + $0x48] sm:$0xff]  ;;  %v1342_v25 = vld [vmem:[#allocation3 + $0x98] sm:$0xff]  ;;  %v1343_v53 = vld [vmem:[#allocation3 + $0xa0] sm:$0xff] }
 0x3fc   :  { %1658 = vst.msk [vmem:[#allocation3 + $0x68] sm:$0xff] %vm177_vm0, %v1626_v0  ;;  %1833 = vadd.xlane.f32.xlu1 %v1832_v41  ;;  %v1753_v43 = vadd.f32 %v1721_v6, %v3462_v54  ;;  %v3780_v4 = vadd.f32 %v3705_v11, %v1752_v13 }
 0x3fd   :  { %v1847_v57 = vsel %vm177_vm0, %v3769_v22, 0.0  ;;  %v3777_v29 = vadd.f32 %v3705_v11, %v1755_v2 }
 0x3fe   :  { %1848 = vadd.xlane.f32.xlu0 %v1847_v57  ;;  %v2578_v52 = vpop.f32.mrb[32].mxu0  ;;  %v3785_v54 = vadd.f32 %v3705_v11, %v1753_v43  ;;  %v1841_v34 = vsel %vm177_vm0, %v3780_v4, 0.0  ;;  %v1344_v57 = vld [vmem:[#allocation3 + $0xa8] sm:$0xff] }
 0x3ff   :  { %v1631_v56 = vadd.f32 %v2578_v52, %v1341_v36  ;;  %v1550_v26 = vpop.f32.mrb[33].mxu0  ;;  %v1850_v5 = vsel %vm177_vm0, %v3777_v29, 0.0 }
 0x400   :  { %v1629_v16 = vadd.f32 %v1550_v26, %v1339_v12  ;;  %1851 = vadd.xlane.f32.xlu1 %v1850_v5  ;;  %v2579_v51 = vpop.f32.mrb[34].mxu0  ;;  %v1726_v8 = vld [vmem:[#allocation3 + $0x70] sm:$0xff]  ;;  %v1844_v21 = vsel %vm177_vm0, %v3785_v54, 0.0 }
 0x401   :  { %1663 = vst.msk [vmem:[#allocation3 + $0x90] sm:$0xff] %vm177_vm0, %v1631_v56  ;;  %v1632_v48 = vadd.f32 %v2579_v51, %v1342_v25  ;;  %v1553_v60 = vpop.f32.mrb[35].mxu0  ;;  %v1758_v49 = vadd.f32 %v1726_v8, %v3505_v17  ;;  %v1724_v39 = vld [vmem:[#allocation3 + $0x60] sm:$0xff]  ;;  %v1345_v17 = vld [vmem:[#allocation3 + $0xb0] sm:$0xff] }
 0x402   :  { %1661 = vst.msk [vmem:[#allocation3 + $0x80] sm:$0xff] %vm177_vm0, %v1629_v16  ;;  %v1630_v61 = vadd.f32 %v1553_v60, %v1340_v47  ;;  %1842 = vadd.xlane.f32.xlu0 %v1841_v34  ;;  %v1727_v38 = vld [vmem:[#allocation3 + $0x78] sm:$0xff]  ;;  %v1756_v55 = vadd.f32 %v1724_v39, %v3490_v42 }
 0x403   :  { %1664 = vst.msk [vmem:[#allocation3 + $0x98] sm:$0xff] %vm177_vm0, %v1632_v48  ;;  %v3797_v63 = vadd.f32 %v3705_v11, %v1758_v49  ;;  %v1759_v62 = vadd.f32 %v1727_v38, %v3507_v40  ;;  %v1725_v37 = vld [vmem:[#allocation3 + $0x68] sm:$0xff]  ;;  %v1346_v40 = vld [vmem:[#allocation3 + $0xb8] sm:$0xff]  ;;  %v1347_v38 = vld [vmem:[#allocation3 + $0xc0] sm:$0xff] }
 0x404   :  { %1662 = vst.msk [vmem:[#allocation3 + $0x88] sm:$0xff] %vm177_vm0, %v1630_v61  ;;  %1845 = vadd.xlane.f32.xlu1 %v1844_v21  ;;  %v1757_v0 = vadd.f32 %v1725_v37, %v3492_v7  ;;  %v3808_v41 = vadd.f32 %v3705_v11, %v1756_v55 }
 0x405   :  { %v1859_v42 = vsel %vm177_vm0, %v3797_v63, 0.0  ;;  %v3805_v13 = vadd.f32 %v3705_v11, %v1759_v62 }
 0x406   :  { %1860 = vadd.xlane.f32.xlu0 %v1859_v42  ;;  %v2582_v2 = vpop.f32.mrb[36].mxu0  ;;  %v3813_v7 = vadd.f32 %v3705_v11, %v1757_v0  ;;  %v1853_v5 = vsel %vm177_vm0, %v3808_v41, 0.0  ;;  %v1348_v42 = vld [vmem:[#allocation3 + $0xc8] sm:$0xff] }
 0x407   :  { %v1635_v6 = vadd.f32 %v2582_v2, %v1345_v17  ;;  %v1566_v36 = vpop.f32.mrb[37].mxu0  ;;  %v1862_v43 = vsel %vm177_vm0, %v3805_v13, 0.0 }
 0x408   :  { %v1633_v12 = vadd.f32 %v1566_v36, %v1343_v53  ;;  %1863 = vadd.xlane.f32.xlu1 %v1862_v43  ;;  %v2583_v52 = vpop.f32.mrb[38].mxu0  ;;  %v1730_v25 = vld [vmem:[#allocation3 + $0x90] sm:$0xff]  ;;  %v1856_v60 = vsel %vm177_vm0, %v3813_v7, 0.0 }
 0x409   :  { %1667 = vst.msk [vmem:[#allocation3 + $0xb0] sm:$0xff] %vm177_vm0, %v1635_v6  ;;  %v1636_v56 = vadd.f32 %v2583_v52, %v1346_v40  ;;  %v1569_v26 = vpop.f32.mrb[39].mxu0  ;;  %v1762_v47 = vadd.f32 %v1730_v25, %v3535_v10  ;;  %v1728_v16 = vld [vmem:[#allocation3 + $0x80] sm:$0xff]  ;;  %v1349_v10 = vld [vmem:[#allocation3 + $0xd0] sm:$0xff] }
 0x40a   :  { %1665 = vst.msk [vmem:[#allocation3 + $0xa0] sm:$0xff] %vm177_vm0, %v1633_v12  ;;  %v1634_v51 = vadd.f32 %v1569_v26, %v1344_v57  ;;  %1854 = vadd.xlane.f32.xlu0 %v1853_v5  ;;  %v1731_v8 = vld [vmem:[#allocation3 + $0x98] sm:$0xff]  ;;  %v1760_v48 = vadd.f32 %v1728_v16, %v3520_v50 }
 0x40b   :  { %1668 = vst.msk [vmem:[#allocation3 + $0xb8] sm:$0xff] %vm177_vm0, %v1636_v56  ;;  %v3825_v34 = vadd.f32 %v3705_v11, %v1762_v47  ;;  %v1763_v49 = vadd.f32 %v1731_v8, %v3537_v45  ;;  %v1729_v39 = vld [vmem:[#allocation3 + $0x88] sm:$0xff]  ;;  %v1350_v45 = vld [vmem:[#allocation3 + $0xd8] sm:$0xff]  ;;  %v1351_v8 = vld [vmem:[#allocation3 + $0xe0] sm:$0xff] }
 0x40c   :  { %1666 = vst.msk [vmem:[#allocation3 + $0xa8] sm:$0xff] %vm177_vm0, %v1634_v51  ;;  %1857 = vadd.xlane.f32.xlu1 %v1856_v60  ;;  %v1761_v61 = vadd.f32 %v1729_v39, %v3522_v28  ;;  %v3836_v21 = vadd.f32 %v3705_v11, %v1760_v48 }
 0x40d   :  { %v1871_v50 = vsel %vm177_vm0, %v3825_v34, 0.0  ;;  %v3833_v55 = vadd.f32 %v3705_v11, %v1763_v49 }
 0x40e   :  { %1872 = vadd.xlane.f32.xlu0 %v1871_v50  ;;  %v2586_v62 = vpop.f32.mrb[40].mxu0  ;;  %v3841_v28 = vadd.f32 %v3705_v11, %v1761_v61  ;;  %v1865_v43 = vsel %vm177_vm0, %v3836_v21, 0.0  ;;  %v1352_v50 = vld [vmem:[#allocation3 + $0xe8] sm:$0xff] }
 0x40f   :  { %v1639_v37 = vadd.f32 %v2586_v62, %v1349_v10  ;;  %v1582_v17 = vpop.f32.mrb[41].mxu0  ;;  %v1874_v0 = vsel %vm177_vm0, %v3833_v55, 0.0 }
 0x410   :  { %v1637_v53 = vadd.f32 %v1582_v17, %v1347_v38  ;;  %1875 = vadd.xlane.f32.xlu1 %v1874_v0  ;;  %v2587_v2 = vpop.f32.mrb[42].mxu0  ;;  %v1734_v40 = vld [vmem:[#allocation3 + $0xb0] sm:$0xff]  ;;  %v1868_v26 = vsel %vm177_vm0, %v3841_v28, 0.0 }
 0x411   :  { %1671 = vst.msk [vmem:[#allocation3 + $0xd0] sm:$0xff] %vm177_vm0, %v1639_v37  ;;  %v1640_v6 = vadd.f32 %v2587_v2, %v1350_v45  ;;  %v1585_v36 = vpop.f32.mrb[43].mxu0  ;;  %v1766_v57 = vadd.f32 %v1734_v40, %v3565_v23  ;;  %v1732_v12 = vld [vmem:[#allocation3 + $0xa0] sm:$0xff]  ;;  %v1353_v23 = vld [vmem:[#allocation3 + $0xf0] sm:$0xff] }
 0x412   :  { %1669 = vst.msk [vmem:[#allocation3 + $0xc0] sm:$0xff] %vm177_vm0, %v1637_v53  ;;  %v1638_v52 = vadd.f32 %v1585_v36, %v1348_v42  ;;  %1866 = vadd.xlane.f32.xlu0 %v1865_v43  ;;  %v1735_v25 = vld [vmem:[#allocation3 + $0xb8] sm:$0xff]  ;;  %v1764_v56 = vadd.f32 %v1732_v12, %v3550_v14 }
 0x413   :  { %1672 = vst.msk [vmem:[#allocation3 + $0xd8] sm:$0xff] %vm177_vm0, %v1640_v6  ;;  %v3853_v5 = vadd.f32 %v3705_v11, %v1766_v57  ;;  %v1767_v47 = vadd.f32 %v1735_v25, %v3567_v32  ;;  %v1733_v16 = vld [vmem:[#allocation3 + $0xa8] sm:$0xff]  ;;  %v1354_v32 = vld [vmem:[#allocation3 + $0xf8] sm:$0xff] }
 0x414   :  { %1670 = vst.msk [vmem:[#allocation3 + $0xc8] sm:$0xff] %vm177_vm0, %v1638_v52  ;;  %1869 = vadd.xlane.f32.xlu1 %v1868_v26  ;;  %v1765_v51 = vadd.f32 %v1733_v16, %v3552_v31  ;;  %v3864_v60 = vadd.f32 %v3705_v11, %v1764_v56 }
 0x415   :  { %v1883_v14 = vsel %vm177_vm0, %v3853_v5, 0.0  ;;  %v3861_v48 = vadd.f32 %v3705_v11, %v1767_v47 }
 0x416   :  { %1884 = vadd.xlane.f32.xlu0 %v1883_v14  ;;  %v2590_v49 = vpop.f32.mrb[44].mxu0  ;;  %v3869_v31 = vadd.f32 %v3705_v11, %v1765_v51  ;;  %v1877_v0 = vsel %vm177_vm0, %v3864_v60, 0.0 }
 0x417   :  { %v1643_v39 = vadd.f32 %v2590_v49, %v1353_v23  ;;  %v1598_v10 = vpop.f32.mrb[45].mxu0  ;;  %v1886_v61 = vsel %vm177_vm0, %v3861_v48, 0.0 }
 0x418   :  { %v1641_v38 = vadd.f32 %v1598_v10, %v1351_v8  ;;  %1887 = vadd.xlane.f32.xlu1 %v1886_v61  ;;  %v2591_v62 = vpop.f32.mrb[46].mxu0  ;;  %v1738_v45 = vld [vmem:[#allocation3 + $0xd0] sm:$0xff]  ;;  %v1880_v36 = vsel %vm177_vm0, %v3869_v31, 0.0 }
 0x419   :  { %1675 = vst.msk [vmem:[#allocation3 + $0xf0] sm:$0xff] %vm177_vm0, %v1643_v39  ;;  %v1644_v37 = vadd.f32 %v2591_v62, %v1354_v32  ;;  %v1601_v17 = vpop.f32.mrb[47].mxu0  ;;  %v1770_v42 = vadd.f32 %v1738_v45, %v3589_v24  ;;  %v1736_v53 = vld [vmem:[#allocation3 + $0xc0] sm:$0xff] }
 0x41a   :  { %1673 = vst.msk [vmem:[#allocation3 + $0xe0] sm:$0xff] %vm177_vm0, %v1641_v38  ;;  %v1642_v2 = vadd.f32 %v1601_v17, %v1352_v50  ;;  %1878 = vadd.xlane.f32.xlu0 %v1877_v0  ;;  %v1739_v40 = vld [vmem:[#allocation3 + $0xd8] sm:$0xff]  ;;  %v1768_v6 = vadd.f32 %v1736_v53, %v3579_v44 }
 0x41b   :  { %1676 = vst.msk [vmem:[#allocation3 + $0xf8] sm:$0xff] %vm177_vm0, %v1644_v37  ;;  %v3881_v43 = vadd.f32 %v3705_v11, %v1770_v42  ;;  %v1771_v57 = vadd.f32 %v1739_v40, %v3591_v9  ;;  %v1737_v12 = vld [vmem:[#allocation3 + $0xc8] sm:$0xff] }
 0x41c   :  { %1674 = vst.msk [vmem:[#allocation3 + $0xe8] sm:$0xff] %vm177_vm0, %v1642_v2  ;;  %1881 = vadd.xlane.f32.xlu1 %v1880_v36  ;;  %v1769_v24 = vadd.f32 %v1737_v12, %v3581_v46  ;;  %v3892_v25 = vadd.f32 %v3705_v11, %v1768_v6 }
 0x41d   :  { %v1895_v52 = vsel %vm177_vm0, %v3881_v43, 0.0  ;;  %v3889_v44 = vadd.f32 %v3705_v11, %v1771_v57 }
 0x41e   :  { %1896 = vadd.xlane.f32.xlu0 %v1895_v52  ;;  %v3897_v9 = vadd.f32 %v3705_v11, %v1769_v24  ;;  %v1889_v46 = vsel %vm177_vm0, %v3892_v25, 0.0 }
 0x41f   :  { %v1898_v56 = vsel %vm177_vm0, %v3889_v44, 0.0 }
 0x420   :  { %1899 = vadd.xlane.f32.xlu1 %v1898_v56  ;;  %v1742_v26 = vld [vmem:[#allocation3 + $0xf0] sm:$0xff]  ;;  %v1892_v14 = vsel %vm177_vm0, %v3897_v9, 0.0 }
 0x421   :  { %v1740_v47 = vld [vmem:[#allocation3 + $0xe0] sm:$0xff]  ;;  %v1774_v23 = vadd.f32 %v1742_v26, %v3603_v1 }
 0x422   :  { %1890 = vadd.xlane.f32.xlu0 %v1889_v46  ;;  %v1772_v16 = vadd.f32 %v1740_v47, %v3596_v30  ;;  %v1743_v51 = vld [vmem:[#allocation3 + $0xf8] sm:$0xff] }
 0x423   :  { %v1741_v8 = vld [vmem:[#allocation3 + $0xe8] sm:$0xff]  ;;  %v1775_v39 = vadd.f32 %v1743_v51, %v3605_v58  ;;  %v3916_v1 = vadd.f32 %v3705_v11, %v1774_v23 }
 0x424   :  { %1893 = vadd.xlane.f32.xlu1 %v1892_v14  ;;  %v3906_v49 = vadd.f32 %v3705_v11, %v1772_v16  ;;  %v1773_v32 = vadd.f32 %v1741_v8, %v3598_v27 }
 0x425   :  { %v3921_v50 = vadd.f32 %v3705_v11, %v1775_v39  ;;  %v1907_v27 = vsel %vm177_vm0, %v3916_v1, 0.0 }
 0x426   :  { %v1901_v10 = vsel %vm177_vm0, %v3906_v49, 0.0  ;;  %v3913_v30 = vadd.f32 %v3705_v11, %v1773_v32 }
 0x427   :  { %1902 = vadd.xlane.f32.xlu0 %v1901_v10  ;;  %v1910_v58 = vsel %vm177_vm0, %v3921_v50, 0.0 }
 0x428   :  { %v1904_v61 = vsel %vm177_vm0, %v3913_v30, 0.0 }
 0x429   :  { %1905 = vadd.xlane.f32.xlu1 %v1904_v61 }
 0x42b   :  { %1908 = vadd.xlane.f32.xlu0 %v1907_v27 }
 0x42d   :  { %1911 = vadd.xlane.f32.xlu1 %v1910_v58 }
 0x47b   :  { %v1825_v38 = vpop.xlane.xlu0 %1824 }
 0x47c   :  { %v1916_v62 = vmul.f32 0.03125, %v1825_v38 }
 0x47d   :  { %v1828_v45 = vpop.xlane.xlu1 %1827 }
 0x47e   :  { %v3928_v37 = vsub.f32 %v3713_v33, %v1916_v62  ;;  %v1917_v17 = vmul.f32 0.03125, %v1828_v45 }
 0x47f   :  { %v1819_v0 = vpop.xlane.xlu0 %1818 }
 0x480   :  { %v3931_v11 = vsub.f32 %v3721_v20, %v1917_v17  ;;  %v1914_v42 = vmul.f32 0.03125, %v1819_v0  ;;  %v1980_v53 = vmul.f32 %v3928_v37, %v3928_v37 }
 0x481   :  { %v1822_v2 = vpop.xlane.xlu1 %1821 }
 0x482   :  { %v3936_v40 = vsub.f32 %v3724_v35, %v1914_v42  ;;  %v1915_v6 = vmul.f32 0.03125, %v1822_v2  ;;  %v2016_v36 = vsel %vm177_vm0, %v1980_v53, 0.0  ;;  %v1981_v33 = vmul.f32 %v3931_v11, %v3931_v11 }
 0x483   :  { %v1837_v57 = vpop.xlane.xlu0 %1836  ;;  %2017 = vadd.xlane.f32.xlu0 %v2016_v36 }
 0x484   :  { %v3942_v12 = vsub.f32 %v3729_v18, %v1915_v6  ;;  %v1920_v20 = vmul.f32 0.03125, %v1837_v57  ;;  %v2019_v24 = vsel %vm177_vm0, %v1981_v33, 0.0  ;;  %v1978_v52 = vmul.f32 %v3936_v40, %v3936_v40 }
 0x485   :  { %2020 = vadd.xlane.f32.xlu1 %v2019_v24  ;;  %v1840_v35 = vpop.xlane.xlu1 %1839 }
 0x486   :  { %v3948_v56 = vsub.f32 %v3741_v3, %v1920_v20  ;;  %v1921_v26 = vmul.f32 0.03125, %v1840_v35  ;;  %v2010_v46 = vsel %vm177_vm0, %v1978_v52, 0.0  ;;  %v1979_v47 = vmul.f32 %v3942_v12, %v3942_v12 }
 0x487   :  { %v1831_v16 = vpop.xlane.xlu0 %1830  ;;  %2011 = vadd.xlane.f32.xlu0 %v2010_v46 }
 0x488   :  { %v3954_v18 = vsub.f32 %v3749_v59, %v1921_v26  ;;  %v1918_v23 = vmul.f32 0.03125, %v1831_v16  ;;  %v2013_v51 = vsel %vm177_vm0, %v1979_v47, 0.0  ;;  %v1984_v14 = vmul.f32 %v3948_v56, %v3948_v56 }
 0x489   :  { %2014 = vadd.xlane.f32.xlu1 %v2013_v51  ;;  %v1834_v3 = vpop.xlane.xlu1 %1833 }
 0x48a   :  { %v3960_v8 = vsub.f32 %v3752_v19, %v1918_v23  ;;  %v1919_v32 = vmul.f32 0.03125, %v1834_v3  ;;  %v2028_v39 = vsel %vm177_vm0, %v1984_v14, 0.0  ;;  %v1985_v10 = vmul.f32 %v3954_v18, %v3954_v18 }
 0x48b   :  { %v1849_v61 = vpop.xlane.xlu0 %1848  ;;  %2029 = vadd.xlane.f32.xlu0 %v2028_v39 }
 0x48c   :  { %v3966_v59 = vsub.f32 %v3757_v15, %v1919_v32  ;;  %v1924_v27 = vmul.f32 0.03125, %v1849_v61  ;;  %v2031_v58 = vsel %vm177_vm0, %v1985_v10, 0.0  ;;  %v1982_v38 = vmul.f32 %v3960_v8, %v3960_v8 }
 0x48d   :  { %2032 = vadd.xlane.f32.xlu1 %v2031_v58  ;;  %v1852_v19 = vpop.xlane.xlu1 %1851 }
 0x48e   :  { %v3972_v62 = vsub.f32 %v3769_v22, %v1924_v27  ;;  %v1925_v45 = vmul.f32 0.03125, %v1852_v19  ;;  %v2022_v17 = vsel %vm177_vm0, %v1982_v38, 0.0  ;;  %v1983_v0 = vmul.f32 %v3966_v59, %v3966_v59 }
 0x48f   :  { %v1843_v42 = vpop.xlane.xlu0 %1842  ;;  %2023 = vadd.xlane.f32.xlu0 %v2022_v17 }
 0x490   :  { %v3978_v15 = vsub.f32 %v3777_v29, %v1925_v45  ;;  %v1922_v53 = vmul.f32 0.03125, %v1843_v42  ;;  %v2025_v2 = vsel %vm177_vm0, %v1983_v0, 0.0  ;;  %v1988_v6 = vmul.f32 %v3972_v62, %v3972_v62 }
 0x491   :  { %2026 = vadd.xlane.f32.xlu1 %v2025_v2  ;;  %v1846_v22 = vpop.xlane.xlu1 %1845 }
 0x492   :  { %v3984_v36 = vsub.f32 %v3780_v4, %v1922_v53  ;;  %v1923_v33 = vmul.f32 0.03125, %v1846_v22  ;;  %v2040_v57 = vsel %vm177_vm0, %v1988_v6, 0.0  ;;  %v1989_v20 = vmul.f32 %v3978_v15, %v3978_v15 }
 0x493   :  { %v1861_v24 = vpop.xlane.xlu0 %1860  ;;  %2041 = vadd.xlane.f32.xlu0 %v2040_v57 }
 0x494   :  { %v3990_v29 = vsub.f32 %v3785_v54, %v1923_v33  ;;  %v1928_v52 = vmul.f32 0.03125, %v1861_v24  ;;  %v2043_v35 = vsel %vm177_vm0, %v1989_v20, 0.0  ;;  %v1986_v26 = vmul.f32 %v3984_v36, %v3984_v36 }
 0x495   :  { %2044 = vadd.xlane.f32.xlu1 %v2043_v35  ;;  %v1864_v4 = vpop.xlane.xlu1 %1863 }
 0x496   :  { %v3996_v46 = vsub.f32 %v3797_v63, %v1928_v52  ;;  %v1929_v47 = vmul.f32 0.03125, %v1864_v4  ;;  %v2034_v16 = vsel %vm177_vm0, %v1986_v26, 0.0  ;;  %v1987_v23 = vmul.f32 %v3990_v29, %v3990_v29 }
 0x497   :  { %v1855_v51 = vpop.xlane.xlu0 %1854  ;;  %2035 = vadd.xlane.f32.xlu0 %v2034_v16 }
 0x498   :  { %v4002_v54 = vsub.f32 %v3805_v13, %v1929_v47  ;;  %v1926_v14 = vmul.f32 0.03125, %v1855_v51  ;;  %v2037_v3 = vsel %vm177_vm0, %v1987_v23, 0.0  ;;  %v1992_v32 = vmul.f32 %v3996_v46, %v3996_v46 }
 0x499   :  { %2038 = vadd.xlane.f32.xlu1 %v2037_v3  ;;  %v1858_v63 = vpop.xlane.xlu1 %1857 }
 0x49a   :  { %v4008_v39 = vsub.f32 %v3808_v41, %v1926_v14  ;;  %v1927_v10 = vmul.f32 0.03125, %v1858_v63  ;;  %v2052_v61 = vsel %vm177_vm0, %v1992_v32, 0.0  ;;  %v1993_v27 = vmul.f32 %v4002_v54, %v4002_v54 }
 0x49b   :  { %v1873_v58 = vpop.xlane.xlu0 %1872  ;;  %2053 = vadd.xlane.f32.xlu0 %v2052_v61 }
 0x49c   :  { %v4014_v13 = vsub.f32 %v3813_v7, %v1927_v10  ;;  %v1932_v38 = vmul.f32 0.03125, %v1873_v58  ;;  %v2055_v19 = vsel %vm177_vm0, %v1993_v27, 0.0  ;;  %v1990_v45 = vmul.f32 %v4008_v39, %v4008_v39 }
 0x49d   :  { %2056 = vadd.xlane.f32.xlu1 %v2055_v19  ;;  %v1876_v41 = vpop.xlane.xlu1 %1875 }
 0x49e   :  { %v4020_v17 = vsub.f32 %v3825_v34, %v1932_v38  ;;  %v1933_v0 = vmul.f32 0.03125, %v1876_v41  ;;  %v2046_v42 = vsel %vm177_vm0, %v1990_v45, 0.0  ;;  %v1991_v53 = vmul.f32 %v4014_v13, %v4014_v13 }
 0x49f   :  { %v1867_v2 = vpop.xlane.xlu0 %1866  ;;  %2047 = vadd.xlane.f32.xlu0 %v2046_v42 }
 0x4a0   :  { %v4026_v7 = vsub.f32 %v3833_v55, %v1933_v0  ;;  %v1930_v6 = vmul.f32 0.03125, %v1867_v2  ;;  %v2049_v22 = vsel %vm177_vm0, %v1991_v53, 0.0  ;;  %v1996_v33 = vmul.f32 %v4020_v17, %v4020_v17 }
 0x4a1   :  { %2050 = vadd.xlane.f32.xlu1 %v2049_v22  ;;  %v1870_v34 = vpop.xlane.xlu1 %1869 }
 0x4a2   :  { %v4032_v57 = vsub.f32 %v3836_v21, %v1930_v6  ;;  %v1931_v20 = vmul.f32 0.03125, %v1870_v34  ;;  %v2064_v24 = vsel %vm177_vm0, %v1996_v33, 0.0  ;;  %v1997_v52 = vmul.f32 %v4026_v7, %v4026_v7 }
 0x4a3   :  { %v1885_v35 = vpop.xlane.xlu0 %1884  ;;  %2065 = vadd.xlane.f32.xlu0 %v2064_v24 }
 0x4a4   :  { %v4038_v55 = vsub.f32 %v3841_v28, %v1931_v20  ;;  %v1936_v26 = vmul.f32 0.03125, %v1885_v35  ;;  %v2067_v4 = vsel %vm177_vm0, %v1997_v52, 0.0  ;;  %v1994_v47 = vmul.f32 %v4032_v57, %v4032_v57 }
 0x4a5   :  { %2068 = vadd.xlane.f32.xlu1 %v2067_v4  ;;  %v1888_v21 = vpop.xlane.xlu1 %1887 }
 0x4a6   :  { %v4044_v16 = vsub.f32 %v3853_v5, %v1936_v26  ;;  %v1937_v23 = vmul.f32 0.03125, %v1888_v21  ;;  %v2058_v51 = vsel %vm177_vm0, %v1994_v47, 0.0  ;;  %v1995_v14 = vmul.f32 %v4038_v55, %v4038_v55 }
 0x4a7   :  { %v1879_v3 = vpop.xlane.xlu0 %1878  ;;  %2059 = vadd.xlane.f32.xlu0 %v2058_v51 }
 0x4a8   :  { %v4050_v28 = vsub.f32 %v3861_v48, %v1937_v23  ;;  %v1934_v32 = vmul.f32 0.03125, %v1879_v3  ;;  %v2061_v63 = vsel %vm177_vm0, %v1995_v14, 0.0  ;;  %v2000_v10 = vmul.f32 %v4044_v16, %v4044_v16 }
 0x4a9   :  { %2062 = vadd.xlane.f32.xlu1 %v2061_v63  ;;  %v1882_v5 = vpop.xlane.xlu1 %1881 }
 0x4aa   :  { %v4056_v61 = vsub.f32 %v3864_v60, %v1934_v32  ;;  %v1935_v27 = vmul.f32 0.03125, %v1882_v5  ;;  %v2076_v58 = vsel %vm177_vm0, %v2000_v10, 0.0  ;;  %v2001_v38 = vmul.f32 %v4050_v28, %v4050_v28 }
 0x4ab   :  { %v1897_v19 = vpop.xlane.xlu0 %1896  ;;  %2077 = vadd.xlane.f32.xlu0 %v2076_v58 }
 0x4ac   :  { %v4062_v48 = vsub.f32 %v3869_v31, %v1935_v27  ;;  %v1940_v45 = vmul.f32 0.03125, %v1897_v19  ;;  %v2079_v41 = vsel %vm177_vm0, %v2001_v38, 0.0  ;;  %v1998_v0 = vmul.f32 %v4056_v61, %v4056_v61 }
 0x4ad   :  { %2080 = vadd.xlane.f32.xlu1 %v2079_v41  ;;  %v1900_v60 = vpop.xlane.xlu1 %1899 }
 0x4ae   :  { %v4068_v42 = vsub.f32 %v3881_v43, %v1940_v45  ;;  %v1941_v53 = vmul.f32 0.03125, %v1900_v60  ;;  %v2070_v2 = vsel %vm177_vm0, %v1998_v0, 0.0  ;;  %v1999_v6 = vmul.f32 %v4062_v48, %v4062_v48 }
 0x4af   :  { %v1891_v22 = vpop.xlane.xlu0 %1890  ;;  %2071 = vadd.xlane.f32.xlu0 %v2070_v2 }
 0x4b0   :  { %v4074_v31 = vsub.f32 %v3889_v44, %v1941_v53  ;;  %v1938_v33 = vmul.f32 0.03125, %v1891_v22  ;;  %v2073_v34 = vsel %vm177_vm0, %v1999_v6, 0.0  ;;  %v2004_v20 = vmul.f32 %v4068_v42, %v4068_v42 }
 0x4b1   :  { %2074 = vadd.xlane.f32.xlu1 %v2073_v34  ;;  %v1894_v43 = vpop.xlane.xlu1 %1893 }
 0x4b2   :  { %v4080_v24 = vsub.f32 %v3892_v25, %v1938_v33  ;;  %v1939_v52 = vmul.f32 0.03125, %v1894_v43  ;;  %v2088_v35 = vsel %vm177_vm0, %v2004_v20, 0.0  ;;  %v2005_v26 = vmul.f32 %v4074_v31, %v4074_v31 }
 0x4b3   :  { %2089 = vadd.xlane.f32.xlu0 %v2088_v35 }
 0x4b4   :  { %v4086_v44 = vsub.f32 %v3897_v9, %v1939_v52  ;;  %v1903_v4 = vpop.xlane.xlu0 %1902  ;;  %v2091_v47 = vsel %vm177_vm0, %v2005_v26, 0.0  ;;  %v2002_v21 = vmul.f32 %v4080_v24, %v4080_v24 }
 0x4b5   :  { %v1942_v23 = vmul.f32 0.03125, %v1903_v4  ;;  %2092 = vadd.xlane.f32.xlu1 %v2091_v47 }
 0x4b6   :  { %v1906_v25 = vpop.xlane.xlu1 %1905  ;;  %v2082_v51 = vsel %vm177_vm0, %v2002_v21, 0.0  ;;  %v2003_v14 = vmul.f32 %v4086_v44, %v4086_v44 }
 0x4b7   :  { %v4095_v3 = vsub.f32 %v3906_v49, %v1942_v23  ;;  %v1943_v32 = vmul.f32 0.03125, %v1906_v25  ;;  %2083 = vadd.xlane.f32.xlu0 %v2082_v51 }
 0x4b8   :  { %v1909_v9 = vpop.xlane.xlu0 %1908  ;;  %v2085_v63 = vsel %vm177_vm0, %v2003_v14, 0.0 }
 0x4b9   :  { %v4099_v10 = vsub.f32 %v3913_v30, %v1943_v32  ;;  %v1944_v5 = vmul.f32 0.03125, %v1909_v9  ;;  %2086 = vadd.xlane.f32.xlu1 %v2085_v63  ;;  %v2006_v27 = vmul.f32 %v4095_v3, %v4095_v3 }
 0x4ba   :  { %v1912_v58 = vpop.xlane.xlu1 %1911 }
 0x4bb   :  { %v4104_v38 = vsub.f32 %v3916_v1, %v1944_v5  ;;  %v1945_v19 = vmul.f32 0.03125, %v1912_v58  ;;  %v2094_v49 = vsel %vm177_vm0, %v2006_v27, 0.0  ;;  %v2007_v45 = vmul.f32 %v4099_v10, %v4099_v10  ;;  %v4122_v27 = vld [vmem:[%s4364_s9] ss:$0 sm:$0xff] }
 0x4bc   :  { %2095 = vadd.xlane.f32.xlu0 %v2094_v49 }
 0x4bd   :  { %v4110_v41 = vsub.f32 %v3921_v50, %v1945_v19  ;;  %v2097_v30 = vsel %vm177_vm0, %v2007_v45, 0.0  ;;  %v2008_v0 = vmul.f32 %v4104_v38, %v4104_v38 }
 0x4be   :  { %2098 = vadd.xlane.f32.xlu1 %v2097_v30 }
 0x4bf   :  { %v2100_v60 = vsel %vm177_vm0, %v2008_v0, 0.0  ;;  %v2009_v1 = vmul.f32 %v4110_v41, %v4110_v41  ;;  %v4128_v0 = vld [vmem:[%s4365_s10] ss:$0 sm:$0xff] }
 0x4c0   :  { %2101 = vadd.xlane.f32.xlu0 %v2100_v60 }
 0x4c1   :  { %v2103_v53 = vsel %vm177_vm0, %v2009_v1, 0.0 }
 0x4c2   :  { %2104 = vadd.xlane.f32.xlu1 %v2103_v53 }
 0x510   :  { %v2018_v2 = vpop.xlane.xlu0 %2017 }
 0x511   :  { %v2108_v6 = vmul.f32 0.03125, %v2018_v2 }
 0x512   :  { %v2021_v22 = vpop.xlane.xlu1 %2020 }
 0x513   :  { %v2140_v50 = vadd.f32 1e-05, %v2108_v6  ;;  %v2109_v33 = vmul.f32 0.03125, %v2021_v22 }
 0x514   :  { %v2012_v34 = vpop.xlane.xlu0 %2011 }
 0x515   :  { %2685 = vrsqrt.f32 %v2140_v50  ;;  %v2141_v20 = vadd.f32 1e-05, %v2109_v33  ;;  %v2106_v43 = vmul.f32 0.03125, %v2012_v34 }
 0x516   :  { %v2015_v52 = vpop.xlane.xlu1 %2014 }
 0x517   :  { %2687 = vrsqrt.f32 %v2141_v20  ;;  %v2138_v35 = vadd.f32 1e-05, %v2106_v43  ;;  %v2107_v26 = vmul.f32 0.03125, %v2015_v52 }
 0x518   :  { %v2030_v4 = vpop.xlane.xlu0 %2029 }
 0x519   :  { %2689 = vrsqrt.f32 %v2138_v35  ;;  %v2139_v47 = vadd.f32 1e-05, %v2107_v26  ;;  %v2112_v21 = vmul.f32 0.03125, %v2030_v4 }
 0x51a   :  { %v2033_v23 = vpop.xlane.xlu1 %2032 }
 0x51b   :  { %2691 = vrsqrt.f32 %v2139_v47  ;;  %v2144_v25 = vadd.f32 1e-05, %v2112_v21  ;;  %v2113_v51 = vmul.f32 0.03125, %v2033_v23 }
 0x51c   :  { %v2024_v14 = vpop.xlane.xlu0 %2023 }
 0x51d   :  { %2693 = vrsqrt.f32 %v2144_v25  ;;  %v2145_v32 = vadd.f32 1e-05, %v2113_v51  ;;  %v2110_v9 = vmul.f32 0.03125, %v2024_v14 }
 0x51e   :  { %v2027_v63 = vpop.xlane.xlu1 %2026 }
 0x51f   :  { %v2686_v5 = vpop.eup %2685  ;;  %2695 = vrsqrt.f32 %v2145_v32  ;;  %v2142_v58 = vadd.f32 1e-05, %v2110_v9  ;;  %v2111_v19 = vmul.f32 0.03125, %v2027_v63 }
 0x520   :  { %v2204_v49 = vmul.f32 %v2686_v5, %v3928_v37  ;;  %v2042_v45 = vpop.xlane.xlu0 %2041 }
 0x521   :  { %v2688_v30 = vpop.eup %2687  ;;  %2697 = vrsqrt.f32 %v2142_v58  ;;  %v2143_v60 = vadd.f32 1e-05, %v2111_v19  ;;  %v2116_v1 = vmul.f32 0.03125, %v2042_v45 }
 0x522   :  { %v2242_v53 = vmul.f32 %v4122_v27, %v2204_v49  ;;  %v2205_v2 = vmul.f32 %v2688_v30, %v3931_v11  ;;  %v2045_v6 = vpop.xlane.xlu1 %2044 }
 0x523   :  { %v2690_v22 = vpop.eup %2689  ;;  %2699 = vrsqrt.f32 %v2143_v60  ;;  %v2148_v50 = vadd.f32 1e-05, %v2116_v1  ;;  %v2117_v33 = vmul.f32 0.03125, %v2045_v6 }
 0x524   :  { %v2280_v37 = vadd.f32 %v4128_v0, %v2242_v53  ;;  %v2243_v34 = vmul.f32 %v4122_v27, %v2205_v2  ;;  %v2202_v20 = vmul.f32 %v2690_v22, %v3936_v40  ;;  %v2036_v43 = vpop.xlane.xlu0 %2035 }
 0x525   :  { %v2692_v52 = vpop.eup %2691  ;;  %2701 = vrsqrt.f32 %v2148_v50  ;;  %v2149_v35 = vadd.f32 1e-05, %v2117_v33  ;;  %v2114_v26 = vmul.f32 0.03125, %v2036_v43 }
 0x526   :  { %2312 = vst.msk [vmem:[%s4366_s13 + $0x10] sm:$0xff] %vm177_vm0, %v2280_v37  ;;  %v2281_v11 = vadd.f32 %v4128_v0, %v2243_v34  ;;  %v2240_v4 = vmul.f32 %v4122_v27, %v2202_v20  ;;  %v2203_v47 = vmul.f32 %v2692_v52, %v3942_v12  ;;  %v2039_v21 = vpop.xlane.xlu1 %2038 }
 0x527   :  { %v2694_v23 = vpop.eup %2693  ;;  %2703 = vrsqrt.f32 %v2149_v35  ;;  %v2146_v40 = vadd.f32 1e-05, %v2114_v26  ;;  %v2115_v25 = vmul.f32 0.03125, %v2039_v21 }
 0x528   :  { %2313 = vst.msk [vmem:[%s4366_s13 + $0x18] sm:$0xff] %vm177_vm0, %v2281_v11  ;;  %v2278_v51 = vadd.f32 %v4128_v0, %v2240_v4  ;;  %v2241_v14 = vmul.f32 %v4122_v27, %v2203_v47  ;;  %v2208_v32 = vmul.f32 %v2694_v23, %v3948_v56  ;;  %v2054_v9 = vpop.xlane.xlu0 %2053 }
 0x529   :  { %v2696_v63 = vpop.eup %2695  ;;  %2705 = vrsqrt.f32 %v2146_v40  ;;  %v2147_v12 = vadd.f32 1e-05, %v2115_v25  ;;  %v2120_v5 = vmul.f32 0.03125, %v2054_v9 }
 0x52a   :  { %2310 = vst.msk [vmem:[%s4366_s13] sm:$0xff] %vm177_vm0, %v2278_v51  ;;  %v2279_v58 = vadd.f32 %v4128_v0, %v2241_v14  ;;  %v2246_v19 = vmul.f32 %v4122_v27, %v2208_v32  ;;  %v2209_v49 = vmul.f32 %v2696_v63, %v3954_v18  ;;  %v2057_v45 = vpop.xlane.xlu1 %2056 }
 0x52b   :  { %v2698_v30 = vpop.eup %2697  ;;  %2707 = vrsqrt.f32 %v2147_v12  ;;  %v2152_v56 = vadd.f32 1e-05, %v2120_v5  ;;  %v2121_v60 = vmul.f32 0.03125, %v2057_v45 }
 0x52c   :  { %2311 = vst.msk [vmem:[%s4366_s13 + $0x8] sm:$0xff] %vm177_vm0, %v2279_v58  ;;  %v2284_v1 = vadd.f32 %v4128_v0, %v2246_v19  ;;  %v2247_v53 = vmul.f32 %v4122_v27, %v2209_v49  ;;  %v2206_v2 = vmul.f32 %v2698_v30, %v3960_v8  ;;  %v2048_v6 = vpop.xlane.xlu0 %2047 }
 0x52d   :  { %v2700_v22 = vpop.eup %2699  ;;  %2709 = vrsqrt.f32 %v2152_v56  ;;  %v2153_v18 = vadd.f32 1e-05, %v2121_v60  ;;  %v2118_v50 = vmul.f32 0.03125, %v2048_v6 }
 0x52e   :  { %2316 = vst.msk [vmem:[%s4366_s13 + $0x30] sm:$0xff] %vm177_vm0, %v2284_v1  ;;  %v2285_v33 = vadd.f32 %v4128_v0, %v2247_v53  ;;  %v2244_v37 = vmul.f32 %v4122_v27, %v2206_v2  ;;  %v2207_v34 = vmul.f32 %v2700_v22, %v3966_v59  ;;  %v2051_v20 = vpop.xlane.xlu1 %2050 }
 0x52f   :  { %v2702_v43 = vpop.eup %2701  ;;  %2711 = vrsqrt.f32 %v2153_v18  ;;  %v2150_v8 = vadd.f32 1e-05, %v2118_v50  ;;  %v2119_v52 = vmul.f32 0.03125, %v2051_v20 }
 0x530   :  { %2317 = vst.msk [vmem:[%s4366_s13 + $0x38] sm:$0xff] %vm177_vm0, %v2285_v33  ;;  %v2282_v35 = vadd.f32 %v4128_v0, %v2244_v37  ;;  %v2245_v26 = vmul.f32 %v4122_v27, %v2207_v34  ;;  %v2212_v11 = vmul.f32 %v2702_v43, %v3972_v62  ;;  %v2066_v4 = vpop.xlane.xlu0 %2065 }
 0x531   :  { %v2704_v47 = vpop.eup %2703  ;;  %2713 = vrsqrt.f32 %v2150_v8  ;;  %v2151_v59 = vadd.f32 1e-05, %v2119_v52  ;;  %v2124_v21 = vmul.f32 0.03125, %v2066_v4 }
 0x532   :  { %2314 = vst.msk [vmem:[%s4366_s13 + $0x20] sm:$0xff] %vm177_vm0, %v2282_v35  ;;  %v2283_v23 = vadd.f32 %v4128_v0, %v2245_v26  ;;  %v2250_v40 = vmul.f32 %v4122_v27, %v2212_v11  ;;  %v2213_v25 = vmul.f32 %v2704_v47, %v3978_v15  ;;  %v2069_v51 = vpop.xlane.xlu1 %2068 }
 0x533   :  { %v2706_v14 = vpop.eup %2705  ;;  %2715 = vrsqrt.f32 %v2151_v59  ;;  %v2156_v62 = vadd.f32 1e-05, %v2124_v21  ;;  %v2125_v32 = vmul.f32 0.03125, %v2069_v51 }
 0x534   :  { %2315 = vst.msk [vmem:[%s4366_s13 + $0x28] sm:$0xff] %vm177_vm0, %v2283_v23  ;;  %v2288_v9 = vadd.f32 %v4128_v0, %v2250_v40  ;;  %v2251_v63 = vmul.f32 %v4122_v27, %v2213_v25  ;;  %v2210_v12 = vmul.f32 %v2706_v14, %v3984_v36  ;;  %v2060_v5 = vpop.xlane.xlu0 %2059 }
 0x535   :  { %v2708_v58 = vpop.eup %2707  ;;  %2717 = vrsqrt.f32 %v2156_v62  ;;  %v2157_v15 = vadd.f32 1e-05, %v2125_v32  ;;  %v2122_v19 = vmul.f32 0.03125, %v2060_v5 }
 0x536   :  { %2320 = vst.msk [vmem:[%s4366_s13 + $0x50] sm:$0xff] %vm177_vm0, %v2288_v9  ;;  %v2289_v49 = vadd.f32 %v4128_v0, %v2251_v63  ;;  %v2248_v45 = vmul.f32 %v4122_v27, %v2210_v12  ;;  %v2211_v30 = vmul.f32 %v2708_v58, %v3990_v29  ;;  %v2063_v56 = vpop.xlane.xlu1 %2062 }
 0x537   :  { %v2710_v60 = vpop.eup %2709  ;;  %2719 = vrsqrt.f32 %v2157_v15  ;;  %v2154_v36 = vadd.f32 1e-05, %v2122_v19  ;;  %v2123_v1 = vmul.f32 0.03125, %v2063_v56 }
 0x538   :  { %2321 = vst.msk [vmem:[%s4366_s13 + $0x58] sm:$0xff] %vm177_vm0, %v2289_v49  ;;  %v2286_v53 = vadd.f32 %v4128_v0, %v2248_v45  ;;  %v2249_v2 = vmul.f32 %v4122_v27, %v2211_v30  ;;  %v2216_v6 = vmul.f32 %v2710_v60, %v3996_v46  ;;  %v2078_v22 = vpop.xlane.xlu0 %2077 }
 0x539   :  { %v2712_v18 = vpop.eup %2711  ;;  %2721 = vrsqrt.f32 %v2154_v36  ;;  %v2155_v29 = vadd.f32 1e-05, %v2123_v1  ;;  %v2128_v50 = vmul.f32 0.03125, %v2078_v22 }
 0x53a   :  { %2318 = vst.msk [vmem:[%s4366_s13 + $0x40] sm:$0xff] %vm177_vm0, %v2286_v53  ;;  %v2287_v33 = vadd.f32 %v4128_v0, %v2249_v2  ;;  %v2254_v37 = vmul.f32 %v4122_v27, %v2216_v6  ;;  %v2217_v34 = vmul.f32 %v2712_v18, %v4002_v54  ;;  %v2081_v20 = vpop.xlane.xlu1 %2080 }
 0x53b   :  { %v2714_v43 = vpop.eup %2713  ;;  %2723 = vrsqrt.f32 %v2155_v29  ;;  %v2160_v46 = vadd.f32 1e-05, %v2128_v50  ;;  %v2129_v8 = vmul.f32 0.03125, %v2081_v20 }
 0x53c   :  { %2319 = vst.msk [vmem:[%s4366_s13 + $0x48] sm:$0xff] %vm177_vm0, %v2287_v33  ;;  %v2292_v52 = vadd.f32 %v4128_v0, %v2254_v37  ;;  %v2255_v35 = vmul.f32 %v4122_v27, %v2217_v34  ;;  %v2214_v26 = vmul.f32 %v2714_v43, %v4008_v39  ;;  %v2072_v11 = vpop.xlane.xlu0 %2071 }
 0x53d   :  { %v2716_v4 = vpop.eup %2715  ;;  %2725 = vrsqrt.f32 %v2160_v46  ;;  %v2161_v54 = vadd.f32 1e-05, %v2129_v8  ;;  %v2126_v47 = vmul.f32 0.03125, %v2072_v11 }
 0x53e   :  { %2324 = vst.msk [vmem:[%s4366_s13 + $0x70] sm:$0xff] %vm177_vm0, %v2292_v52  ;;  %v2293_v59 = vadd.f32 %v4128_v0, %v2255_v35  ;;  %v2252_v21 = vmul.f32 %v4122_v27, %v2214_v26  ;;  %v2215_v23 = vmul.f32 %v2716_v4, %v4014_v13  ;;  %v2075_v40 = vpop.xlane.xlu1 %2074 }
 0x53f   :  { %v2718_v25 = vpop.eup %2717  ;;  %2727 = vrsqrt.f32 %v2161_v54  ;;  %v2158_v39 = vadd.f32 1e-05, %v2126_v47  ;;  %v2127_v51 = vmul.f32 0.03125, %v2075_v40 }
 0x540   :  { %2325 = vst.msk [vmem:[%s4366_s13 + $0x78] sm:$0xff] %vm177_vm0, %v2293_v59  ;;  %v2290_v14 = vadd.f32 %v4128_v0, %v2252_v21  ;;  %v2253_v62 = vmul.f32 %v4122_v27, %v2215_v23  ;;  %v2220_v32 = vmul.f32 %v2718_v25, %v4020_v17  ;;  %v2090_v9 = vpop.xlane.xlu0 %2089 }
 0x541   :  { %v2720_v63 = vpop.eup %2719  ;;  %2729 = vrsqrt.f32 %v2158_v39  ;;  %v2159_v13 = vadd.f32 1e-05, %v2127_v51  ;;  %v2132_v12 = vmul.f32 0.03125, %v2090_v9 }
 0x542   :  { %2322 = vst.msk [vmem:[%s4366_s13 + $0x60] sm:$0xff] %vm177_vm0, %v2290_v14  ;;  %v2291_v5 = vadd.f32 %v4128_v0, %v2253_v62  ;;  %v2258_v58 = vmul.f32 %v4122_v27, %v2220_v32  ;;  %v2221_v15 = vmul.f32 %v2720_v63, %v4026_v7  ;;  %v2093_v19 = vpop.xlane.xlu1 %2092 }
 0x543   :  { %v2722_v49 = vpop.eup %2721  ;;  %2731 = vrsqrt.f32 %v2159_v13  ;;  %v2164_v17 = vadd.f32 1e-05, %v2132_v12  ;;  %v2133_v45 = vmul.f32 0.03125, %v2093_v19 }
 0x544   :  { %2323 = vst.msk [vmem:[%s4366_s13 + $0x68] sm:$0xff] %vm177_vm0, %v2291_v5  ;;  %v2296_v30 = vadd.f32 %v4128_v0, %v2258_v58  ;;  %v2259_v56 = vmul.f32 %v4122_v27, %v2221_v15  ;;  %v2218_v60 = vmul.f32 %v2722_v49, %v4032_v57  ;;  %v2084_v36 = vpop.xlane.xlu0 %2083 }
 0x545   :  { %v2724_v1 = vpop.eup %2723  ;;  %2733 = vrsqrt.f32 %v2164_v17  ;;  %v2165_v7 = vadd.f32 1e-05, %v2133_v45  ;;  %v2130_v53 = vmul.f32 0.03125, %v2084_v36 }
 0x546   :  { %2328 = vst.msk [vmem:[%s4366_s13 + $0x90] sm:$0xff] %vm177_vm0, %v2296_v30  ;;  %v2297_v2 = vadd.f32 %v4128_v0, %v2259_v56  ;;  %v2256_v6 = vmul.f32 %v4122_v27, %v2218_v60  ;;  %v2219_v22 = vmul.f32 %v2724_v1, %v4038_v55  ;;  %v2087_v18 = vpop.xlane.xlu1 %2086 }
 0x547   :  { %v2726_v29 = vpop.eup %2725  ;;  %2735 = vrsqrt.f32 %v2165_v7  ;;  %v2162_v57 = vadd.f32 1e-05, %v2130_v53  ;;  %v2131_v50 = vmul.f32 0.03125, %v2087_v18 }
 0x548   :  { %2329 = vst.msk [vmem:[%s4366_s13 + $0x98] sm:$0xff] %vm177_vm0, %v2297_v2  ;;  %v2294_v33 = vadd.f32 %v4128_v0, %v2256_v6  ;;  %v2257_v37 = vmul.f32 %v4122_v27, %v2219_v22  ;;  %v2224_v34 = vmul.f32 %v2726_v29, %v4044_v16 }
 0x549   :  { %v2728_v20 = vpop.eup %2727  ;;  %2737 = vrsqrt.f32 %v2162_v57  ;;  %v2163_v43 = vadd.f32 1e-05, %v2131_v50  ;;  %v2096_v55 = vpop.xlane.xlu0 %2095 }
 0x54a   :  { %2326 = vst.msk [vmem:[%s4366_s13 + $0x80] sm:$0xff] %vm177_vm0, %v2294_v33  ;;  %v2295_v46 = vadd.f32 %v4128_v0, %v2257_v37  ;;  %v2262_v8 = vmul.f32 %v4122_v27, %v2224_v34  ;;  %v2225_v52 = vmul.f32 %v2728_v20, %v4050_v28  ;;  %v2134_v35 = vmul.f32 0.03125, %v2096_v55 }
 0x54b   :  { %v2730_v26 = vpop.eup %2729  ;;  %2739 = vrsqrt.f32 %v2163_v43  ;;  %v2099_v11 = vpop.xlane.xlu1 %2098 }
 0x54c   :  { %2327 = vst.msk [vmem:[%s4366_s13 + $0x88] sm:$0xff] %vm177_vm0, %v2295_v46  ;;  %v2300_v16 = vadd.f32 %v4128_v0, %v2262_v8  ;;  %v2263_v4 = vmul.f32 %v4122_v27, %v2225_v52  ;;  %v2222_v54 = vmul.f32 %v2730_v26, %v4056_v61  ;;  %v2166_v47 = vadd.f32 1e-05, %v2134_v35 }
 0x54d   :  { %v2732_v59 = vpop.eup %2731  ;;  %v2135_v21 = vmul.f32 0.03125, %v2099_v11  ;;  %v2102_v23 = vpop.xlane.xlu0 %2101 }
 0x54e   :  { %2332 = vst.msk [vmem:[%s4366_s13 + $0xb0] sm:$0xff] %vm177_vm0, %v2300_v16  ;;  %v2301_v28 = vadd.f32 %v4128_v0, %v2263_v4  ;;  %v2260_v40 = vmul.f32 %v4122_v27, %v2222_v54  ;;  %v2223_v25 = vmul.f32 %v2732_v59, %v4062_v48  ;;  %2741 = vrsqrt.f32 %v2166_v47 }
 0x54f   :  { %v2734_v39 = vpop.eup %2733  ;;  %v2167_v51 = vadd.f32 1e-05, %v2135_v21  ;;  %v2136_v14 = vmul.f32 0.03125, %v2102_v23  ;;  %v2105_v61 = vpop.xlane.xlu1 %2104 }
 0x550   :  { %2333 = vst.msk [vmem:[%s4366_s13 + $0xb8] sm:$0xff] %vm177_vm0, %v2301_v28  ;;  %v2298_v62 = vadd.f32 %v4128_v0, %v2260_v40  ;;  %v2261_v32 = vmul.f32 %v4122_v27, %v2223_v25  ;;  %v2228_v9 = vmul.f32 %v2734_v39, %v4068_v42  ;;  %v2137_v63 = vmul.f32 0.03125, %v2105_v61 }
 0x551   :  { %v2736_v13 = vpop.eup %2735  ;;  %2743 = vrsqrt.f32 %v2167_v51  ;;  %v2168_v48 = vadd.f32 1e-05, %v2136_v14 }
 0x552   :  { %2330 = vst.msk [vmem:[%s4366_s13 + $0xa0] sm:$0xff] %vm177_vm0, %v2298_v62  ;;  %v2299_v12 = vadd.f32 %v4128_v0, %v2261_v32  ;;  %v2266_v5 = vmul.f32 %v4122_v27, %v2228_v9  ;;  %v2229_v58 = vmul.f32 %v2736_v13, %v4074_v31  ;;  %v2169_v15 = vadd.f32 1e-05, %v2137_v63 }
 0x553   :  { %v2738_v19 = vpop.eup %2737  ;;  %2745 = vrsqrt.f32 %v2168_v48 }
 0x554   :  { %2331 = vst.msk [vmem:[%s4366_s13 + $0xa8] sm:$0xff] %vm177_vm0, %v2299_v12  ;;  %v2304_v42 = vadd.f32 %v4128_v0, %v2266_v5  ;;  %v2267_v49 = vmul.f32 %v4122_v27, %v2229_v58  ;;  %v2226_v17 = vmul.f32 %v2738_v19, %v4080_v24  ;;  %2747 = vrsqrt.f32 %v2169_v15 }
 0x555   :  { %v2740_v45 = vpop.eup %2739 }
 0x556   :  { %2336 = vst.msk [vmem:[%s4366_s13 + $0xd0] sm:$0xff] %vm177_vm0, %v2304_v42  ;;  %v2305_v31 = vadd.f32 %v4128_v0, %v2267_v49  ;;  %v2264_v30 = vmul.f32 %v4122_v27, %v2226_v17  ;;  %v2227_v56 = vmul.f32 %v2740_v45, %v4086_v44 }
 0x558   :  { %v2742_v60 = vpop.eup %2741  ;;  %2337 = vst.msk [vmem:[%s4366_s13 + $0xd8] sm:$0xff] %vm177_vm0, %v2305_v31  ;;  %v2302_v24 = vadd.f32 %v4128_v0, %v2264_v30  ;;  %v2265_v36 = vmul.f32 %v4122_v27, %v2227_v56 }
 0x559   :  { %v2230_v1 = vmul.f32 %v2742_v60, %v4095_v3 }
 0x55a   :  { %2334 = vst.msk [vmem:[%s4366_s13 + $0xc0] sm:$0xff] %vm177_vm0, %v2302_v24  ;;  %v2303_v7 = vadd.f32 %v4128_v0, %v2265_v36 }
 0x55b   :  { %v2744_v44 = vpop.eup %2743  ;;  %v2268_v53 = vmul.f32 %v4122_v27, %v2230_v1 }
 0x55c   :  { %2335 = vst.msk [vmem:[%s4366_s13 + $0xc8] sm:$0xff] %vm177_vm0, %v2303_v7  ;;  %v2231_v2 = vmul.f32 %v2744_v44, %v4099_v10 }
 0x55d   :  { %v2746_v6 = vpop.eup %2745  ;;  %v2306_v3 = vadd.f32 %v4128_v0, %v2268_v53 }
 0x55e   :  { %v2748_v22 = vpop.eup %2747  ;;  %v2269_v18 = vmul.f32 %v4122_v27, %v2231_v2  ;;  %v2232_v29 = vmul.f32 %v2746_v6, %v4104_v38 }
 0x55f   :  { %2338 = vst.msk [vmem:[%s4366_s13 + $0xe0] sm:$0xff] %vm177_vm0, %v2306_v3  ;;  %v2233_v57 = vmul.f32 %v2748_v22, %v4110_v41 }
 0x560   :  { %v2307_v50 = vadd.f32 %v4128_v0, %v2269_v18  ;;  %v2270_v33 = vmul.f32 %v4122_v27, %v2232_v29 }
 0x561   :  { %v2271_v10 = vmul.f32 %v4122_v27, %v2233_v57 }
 0x562   :  { %2339 = vst.msk [vmem:[%s4366_s13 + $0xe8] sm:$0xff] %vm177_vm0, %v2307_v50  ;;  %v2308_v38 = vadd.f32 %v4128_v0, %v2270_v33 }
 0x563   :  { %v2309_v37 = vadd.f32 %v4128_v0, %v2271_v10 }
 0x564   :  { %2340 = vst.msk [vmem:[%s4366_s13 + $0xf0] sm:$0xff] %vm177_vm0, %v2308_v38 }
 0x565   :  { %2341 = vst.msk [vmem:[%s4366_s13 + $0xf8] sm:$0xff] %vm177_vm0, %v2309_v37 }

// kernel: transformer_xl_encoder.11
= control target key start
LH: loop header
LB: loop body
LE: loop exit
PB: predicated region body
PF: predicated region fallthrough
CT: control target
= control target key end

     0   :  { %vm177_vm0 = vcmask 261120   ;;  %vm1403_vm1 = vcmask 523264   ;;  %s5339_s2 = inlined_call_operand.vmem [shape: bf16[32,32], index: 2, kind: input, shape index: {}]   ;;  %s5340_s0 = inlined_call_operand.vmem [shape: bf16[256,32], index: 0, kind: input, shape index: {}]   ;;  %s5341_s1 = inlined_call_operand.vmem [shape: f32[256,32], index: 1, kind: input, shape index: {}]   ;;  %s5342_s5 = inlined_call_operand.vmem [shape: bf16[32,64], index: 5, kind: input, shape index: {}]   ;;  %s5343_s7 = inlined_call_operand.vmem [shape: bf16[64,32], index: 7, kind: input, shape index: {}]   ;;  %s5344_s3 = inlined_call_operand.vmem [shape: f32[1,32], index: 3, kind: input, shape index: {}]   ;;  %s5345_s4 = inlined_call_operand.vmem [shape: f32[1,32], index: 4, kind: input, shape index: {}]   ;;  %s5346_s6 = inlined_call_operand.vmem [shape: f32[1,64], index: 6, kind: input, shape index: {}]   ;;  %s5347_s8 = inlined_call_operand.vmem [shape: f32[1,32], index: 8, kind: input, shape index: {}]   ;;  %s5348_s9 = inlined_call_operand.vmem [shape: f32[1,32], index: 9, kind: input, shape index: {}]   ;;  %s5349_s10 = inlined_call_operand.vmem [shape: f32[1,32], index: 10, kind: input, shape index: {}]   ;;  %s5350_s11 = inlined_call_operand.vmem [shape: f32[1,32], index: 11, kind: input, shape index: {}]   ;;  %s5351_s12 = inlined_call_operand.vmem [shape: f32[1,32], index: 12, kind: input, shape index: {}]   ;;  %s5352_s13 = inlined_call_operand.vmem [shape: f32[256,32], index: 13, kind: output, shape index: {}]  }
   0x1   :  { %v3093_v0 = vld [vmem:[%s5339_s2] sm:$0xff]   ;;  %v3094_v1 = vld [vmem:[%s5339_s2 + $0x8] sm:$0xff]   ;;  %v3097_v4 = vld [vmem:[%s5340_s0 + $0x10] sm:$0xff]  }
   0x2   :  { %2976 = vmatprep.subr.bf16.mxu0 %v3093_v0  ;;  %v3095_v2 = vld [vmem:[%s5340_s0] sm:$0xff]   ;;  %3088 = vmatprep.subr.bf16.mxu1 %v3093_v0  ;;  %v3096_v3 = vld [vmem:[%s5340_s0 + $0x8] sm:$0xff]   ;;  %v3105_v7 = vld [vmem:[%s5340_s0 + $0x50] sm:$0xff]  }
   0x3   :  { %2977 = vmatpush3.bf16.msra.mxu0 %v3093_v0  ;;  %3090 = vmatpush3.bf16.msra.mxu1 %v3093_v0  ;;  %v3103_v5 = vld [vmem:[%s5340_s0 + $0x40] sm:$0xff]   ;;  %v3104_v6 = vld [vmem:[%s5340_s0 + $0x48] sm:$0xff]   ;;  %v3098_v8 = vld [vmem:[%s5340_s0 + $0x18] sm:$0xff]  }
   0x4   :  { %2978 = vmatprep.subr.bf16.mxu0 %v3094_v1  ;;  %2980 = vmatprep.mubr.msk.bf16.mxu0 %vm177_vm0, %v3095_v2  ;;  %v3099_v9 = vld [vmem:[%s5340_s0 + $0x20] sm:$0xff]   ;;  %v3106_v10 = vld [vmem:[%s5340_s0 + $0x58] sm:$0xff]   ;;  %v3100_v12 = vld [vmem:[%s5340_s0 + $0x28] sm:$0xff]  }
   0x5   :  { %3089 = vmatprep.subr.bf16.mxu1 %v3094_v1  ;;  %2996 = vmatprep.mubr.msk.bf16.mxu1 %vm177_vm0, %v3103_v5  ;;  %v3107_v11 = vld [vmem:[%s5340_s0 + $0x60] sm:$0xff]   ;;  %v3101_v13 = vld [vmem:[%s5340_s0 + $0x30] sm:$0xff]   ;;  %v3108_v14 = vld [vmem:[%s5340_s0 + $0x68] sm:$0xff]  }
   0x6   :  { %v3109_v15 = vld [vmem:[%s5340_s0 + $0x70] sm:$0xff]   ;;  %v3102_v16 = vld [vmem:[%s5340_s0 + $0x38] sm:$0xff]   ;;  %v387_v19 = vld [vmem:[%s5341_s1] sm:$0xff] }
   0x7   :  { %2979 = vmatpush3.bf16.msra.mxu0 %v3094_v1  ;;  %3091 = vmatpush3.bf16.msra.mxu1 %v3094_v1  ;;  %v3110_v17 = vld [vmem:[%s5340_s0 + $0x78] sm:$0xff]   ;;  %v389_v18 = vld [vmem:[%s5341_s1 + $0x10] sm:$0xff]  ;;  %v388_v24 = vld [vmem:[%s5341_s1 + $0x8] sm:$0xff] }
   0x8   :  { %v390_v21 = vld [vmem:[%s5341_s1 + $0x18] sm:$0xff]  ;;  %v391_v37 = vld [vmem:[%s5341_s1 + $0x20] sm:$0xff]  ;;  %v393_v40 = vld [vmem:[%s5341_s1 + $0x30] sm:$0xff] }
   0x9   :  { %v392_v42 = vld [vmem:[%s5341_s1 + $0x28] sm:$0xff]  ;;  %v394_v45 = vld [vmem:[%s5341_s1 + $0x38] sm:$0xff]  ;;  %v395_v56 = vld [vmem:[%s5341_s1 + $0x40] sm:$0xff] }
   0xa   :  { %2981 = vmatmul.mubr.msk.bf16.vlgmr.msra.gmra.mrb[0].mxu0 %vm177_vm0, %v3096_v3  ;;  %2997 = vmatmul.mubr.msk.bf16.vlgmr.msra.gmra.mrb[0].mxu1 %vm177_vm0, %v3104_v6  ;;  %v397_v59 = vld [vmem:[%s5341_s1 + $0x50] sm:$0xff]  ;;  %v396_v61 = vld [vmem:[%s5341_s1 + $0x48] sm:$0xff]  ;;  %v398_v1 = vld [vmem:[%s5341_s1 + $0x58] sm:$0xff] }
   0xb   :  { %2984 = vmatprep.mubr.msk.bf16.mxu0 %vm177_vm0, %v3097_v4  ;;  %3000 = vmatprep.mubr.msk.bf16.mxu1 %vm177_vm0, %v3105_v7 }
  0x12   :  { %2985 = vmatmul.mubr.msk.bf16.gmra.mrb[4].mxu0 %vm177_vm0, %v3098_v8  ;;  %3001 = vmatmul.mubr.msk.bf16.gmra.mrb[4].mxu1 %vm177_vm0, %v3106_v10 }
  0x13   :  { %2988 = vmatprep.mubr.msk.bf16.mxu0 %vm177_vm0, %v3099_v9  ;;  %3004 = vmatprep.mubr.msk.bf16.mxu1 %vm177_vm0, %v3107_v11 }
  0x1a   :  { %2989 = vmatmul.mubr.msk.bf16.gmra.mrb[8].mxu0 %vm177_vm0, %v3100_v12  ;;  %3005 = vmatmul.mubr.msk.bf16.gmra.mrb[8].mxu1 %vm177_vm0, %v3108_v14  ;;  %v399_v12 = vld [vmem:[%s5341_s1 + $0x60] sm:$0xff] }
  0x1b   :  { %2992 = vmatprep.mubr.msk.bf16.mxu0 %vm177_vm0, %v3101_v13  ;;  %3008 = vmatprep.mubr.msk.bf16.mxu1 %vm177_vm0, %v3109_v15  ;;  %v401_v15 = vld [vmem:[%s5341_s1 + $0x70] sm:$0xff] }
  0x22   :  { %2993 = vmatmul.mubr.msk.bf16.gmra.mrb[12].mxu0 %vm177_vm0, %v3102_v16  ;;  %3009 = vmatmul.mubr.msk.bf16.gmra.mrb[12].mxu1 %vm177_vm0, %v3110_v17  ;;  %v400_v17 = vld [vmem:[%s5341_s1 + $0x68] sm:$0xff] }
  0xdd   :  { %v2982_v20 = vpop.f32.mrb[0].mxu0  ;;  %v3470_v30 = vpop.f32.mrb[0].mxu1 }
  0xde   :  { %v3459_v22 = vadd.f32 %v2982_v20, %v389_v18  ;;  %v260_v23 = vpop.f32.mrb[1].mxu0  ;;  %v3476_v33 = vpop.f32.mrb[1].mxu1 }
  0xdf   :  { %v3464_v25 = vadd.f32 %v387_v19, %v260_v23  ;;  %v2983_v26 = vpop.f32.mrb[2].mxu0  ;;  %v3478_v34 = vpop.f32.mrb[2].mxu1 }
  0xe0   :  { %v3466_v27 = vadd.f32 %v2983_v26, %v390_v21  ;;  %v263_v28 = vpop.f32.mrb[3].mxu0  ;;  %v459_v29 = vsel %vm177_vm0, %v3459_v22, 0.0  ;;  %v3480_v35 = vpop.f32.mrb[3].mxu1  ;;  %v402_v21 = vld [vmem:[%s5341_s1 + $0x78] sm:$0xff] }
  0xe1   :  { %v3472_v31 = vadd.f32 %v388_v24, %v263_v28  ;;  %460 = vadd.xlane.f32.xlu1 %v459_v29  ;;  %v453_v32 = vsel %vm177_vm0, %v3464_v25, 0.0  ;;  %v403_v24 = vld [vmem:[%s5341_s1 + $0x80] sm:$0xff] }
  0xe2   :  { %454 = vadd.xlane.f32.xlu0 %v453_v32  ;;  %v462_v36 = vsel %vm177_vm0, %v3466_v27, 0.0 }
  0xe3   :  { %v456_v39 = vsel %vm177_vm0, %v3472_v31, 0.0 }
  0xe5   :  { %463 = vadd.xlane.f32.xlu1 %v462_v36  ;;  %v2986_v38 = vpop.f32.mrb[4].mxu0  ;;  %v3500_v47 = vpop.f32.mrb[4].mxu1 }
  0xe6   :  { %457 = vadd.xlane.f32.xlu0 %v456_v39  ;;  %v276_v41 = vpop.f32.mrb[5].mxu0  ;;  %v3502_v48 = vadd.f32 %v2986_v38, %v393_v40  ;;  %v3508_v51 = vpop.f32.mrb[5].mxu1 }
  0xe7   :  { %v3495_v43 = vadd.f32 %v391_v37, %v276_v41  ;;  %v2987_v44 = vpop.f32.mrb[6].mxu0  ;;  %v3510_v52 = vpop.f32.mrb[6].mxu1  ;;  %v404_v37 = vld [vmem:[%s5341_s1 + $0x88] sm:$0xff]  ;;  %v3591_v41 = vadd.f32 %v403_v24, %v3476_v33 }
  0xe8   :  { %v279_v46 = vpop.f32.mrb[7].mxu0  ;;  %v3512_v53 = vadd.f32 %v2987_v44, %v394_v45  ;;  %v3516_v55 = vpop.f32.mrb[7].mxu1  ;;  %v471_v58 = vsel %vm177_vm0, %v3502_v48, 0.0  ;;  %v3596_v45 = vadd.f32 %v404_v37, %v3480_v35  ;;  %v407_v35 = vld [vmem:[%s5341_s1 + $0xa0] sm:$0xff] }
  0xe9   :  { %v3504_v49 = vadd.f32 %v392_v42, %v279_v46  ;;  %v465_v50 = vsel %vm177_vm0, %v3495_v43, 0.0  ;;  %v405_v46 = vld [vmem:[%s5341_s1 + $0x90] sm:$0xff]  ;;  %v501_v33 = vsel %vm177_vm0, %v3591_v41, 0.0 }
  0xea   :  { %466 = vadd.xlane.f32.xlu0 %v465_v50  ;;  %v474_v0 = vsel %vm177_vm0, %v3512_v53, 0.0 }
  0xeb   :  { %v468_v54 = vsel %vm177_vm0, %v3504_v49, 0.0 }
  0xec   :  { %469 = vadd.xlane.f32.xlu1 %v468_v54  ;;  %v406_v54 = vld [vmem:[%s5341_s1 + $0x98] sm:$0xff] }
  0xed   :  { %v2990_v57 = vpop.f32.mrb[8].mxu0  ;;  %v3536_v3 = vpop.f32.mrb[8].mxu1 }
  0xee   :  { %472 = vadd.xlane.f32.xlu0 %v471_v58  ;;  %v292_v60 = vpop.f32.mrb[9].mxu0  ;;  %v3538_v4 = vadd.f32 %v2990_v57, %v397_v59  ;;  %v3544_v7 = vpop.f32.mrb[9].mxu1  ;;  %v504_v57 = vsel %vm177_vm0, %v3596_v45, 0.0  ;;  %v408_v58 = vld [vmem:[%s5341_s1 + $0xa8] sm:$0xff]  ;;  %v3620_v59 = vadd.f32 %v3478_v34, %v406_v54 }
  0xef   :  { %v3529_v62 = vadd.f32 %v395_v56, %v292_v60  ;;  %v2991_v63 = vpop.f32.mrb[10].mxu0  ;;  %v3546_v8 = vpop.f32.mrb[10].mxu1  ;;  %v3612_v56 = vadd.f32 %v3470_v30, %v405_v46  ;;  %v3623_v60 = vadd.f32 %v407_v35, %v3508_v51  ;;  %v3628_v30 = vadd.f32 %v408_v58, %v3516_v55  ;;  %v410_v51 = vld [vmem:[%s5341_s1 + $0xb8] sm:$0xff]  ;;  %v411_v55 = vld [vmem:[%s5341_s1 + $0xc0] sm:$0xff] }
  0xf0   :  { %475 = vadd.xlane.f32.xlu1 %v474_v0  ;;  %v295_v2 = vpop.f32.mrb[11].mxu0  ;;  %v3548_v9 = vadd.f32 %v2991_v63, %v398_v1  ;;  %v359_v11 = vpop.f32.mrb[11].mxu1  ;;  %v483_v14 = vsel %vm177_vm0, %v3538_v4, 0.0  ;;  %v409_v63 = vld [vmem:[%s5341_s1 + $0xb0] sm:$0xff]  ;;  %v510_v0 = vsel %vm177_vm0, %v3620_v59, 0.0 }
  0xf1   :  { %v3540_v5 = vadd.f32 %v396_v61, %v295_v2  ;;  %v477_v6 = vsel %vm177_vm0, %v3529_v62, 0.0  ;;  %v507_v61 = vsel %vm177_vm0, %v3612_v56, 0.0  ;;  %v513_v34 = vsel %vm177_vm0, %v3623_v60, 0.0 }
  0xf2   :  { %478 = vadd.xlane.f32.xlu0 %v477_v6  ;;  %v486_v20 = vsel %vm177_vm0, %v3548_v9, 0.0  ;;  %v3644_v1 = vadd.f32 %v3500_v47, %v409_v63  ;;  %v516_v2 = vsel %vm177_vm0, %v3628_v30, 0.0  ;;  %v412_v6 = vld [vmem:[%s5341_s1 + $0xc8] sm:$0xff] }
  0xf3   :  { %v480_v10 = vsel %vm177_vm0, %v3540_v5, 0.0  ;;  %v3659_v47 = vadd.f32 %v412_v6, %v359_v11  ;;  %v415_v11 = vld [vmem:[%s5341_s1 + $0xe0] sm:$0xff] }
  0xf4   :  { %481 = vadd.xlane.f32.xlu1 %v480_v10  ;;  %v3652_v10 = vadd.f32 %v3510_v52, %v410_v51 }
  0xf5   :  { %v2994_v13 = vpop.f32.mrb[12].mxu0  ;;  %v3573_v26 = vpop.f32.mrb[12].mxu1 }
  0xf6   :  { %484 = vadd.xlane.f32.xlu0 %v483_v14  ;;  %v308_v16 = vpop.f32.mrb[13].mxu0  ;;  %v3575_v28 = vadd.f32 %v2994_v13, %v401_v15  ;;  %v372_v36 = vpop.f32.mrb[13].mxu1  ;;  %v519_v13 = vsel %vm177_vm0, %v3644_v1, 0.0  ;;  %v413_v14 = vld [vmem:[%s5341_s1 + $0xd0] sm:$0xff]  ;;  %v522_v15 = vsel %vm177_vm0, %v3652_v10, 0.0 }
  0xf7   :  { %v3563_v18 = vadd.f32 %v399_v12, %v308_v16  ;;  %v2995_v19 = vpop.f32.mrb[14].mxu0  ;;  %v3584_v38 = vpop.f32.mrb[14].mxu1  ;;  %v3655_v12 = vadd.f32 %v411_v55, %v3544_v7  ;;  %v414_v7 = vld [vmem:[%s5341_s1 + $0xd8] sm:$0xff]  ;;  %v3675_v16 = vadd.f32 %v3536_v3, %v413_v14  ;;  %v417_v3 = vld [vmem:[%s5341_s1 + $0xf0] sm:$0xff] }
  0xf8   :  { %487 = vadd.xlane.f32.xlu1 %v486_v20  ;;  %v311_v23 = vpop.f32.mrb[15].mxu0  ;;  %v3586_v39 = vadd.f32 %v2995_v19, %v402_v21  ;;  %v375_v42 = vpop.f32.mrb[15].mxu1  ;;  %v495_v44 = vsel %vm177_vm0, %v3575_v28, 0.0  ;;  %v416_v19 = vld [vmem:[%s5341_s1 + $0xe8] sm:$0xff]  ;;  %v3683_v20 = vadd.f32 %v3546_v8, %v414_v7  ;;  %v3685_v21 = vadd.f32 %v415_v11, %v372_v36  ;;  %v418_v36 = vld [vmem:[%s5341_s1 + $0xf8] sm:$0xff] }
  0xf9   :  { %v3577_v29 = vadd.f32 %v400_v17, %v311_v23  ;;  %v489_v32 = vsel %vm177_vm0, %v3563_v18, 0.0  ;;  %v525_v52 = vsel %vm177_vm0, %v3655_v12, 0.0  ;;  %v528_v17 = vsel %vm177_vm0, %v3659_v47, 0.0 }
  0xfa   :  { %490 = vadd.xlane.f32.xlu0 %v489_v32  ;;  %v498_v50 = vsel %vm177_vm0, %v3586_v39, 0.0  ;;  %v531_v23 = vsel %vm177_vm0, %v3675_v16, 0.0  ;;  %v3689_v24 = vadd.f32 %v416_v19, %v375_v42  ;;  %v534_v32 = vsel %vm177_vm0, %v3683_v20, 0.0 }
  0xfb   :  { %v492_v40 = vsel %vm177_vm0, %v3577_v29, 0.0  ;;  %v537_v8 = vsel %vm177_vm0, %v3685_v21, 0.0  ;;  %v3702_v37 = vadd.f32 %v3573_v26, %v417_v3  ;;  %v3707_v42 = vadd.f32 %v3584_v38, %v418_v36 }
  0xfc   :  { %493 = vadd.xlane.f32.xlu1 %v492_v40  ;;  %v540_v40 = vsel %vm177_vm0, %v3689_v24, 0.0 }
  0xfd   :  { %v546_v46 = vsel %vm177_vm0, %v3707_v42, 0.0 }
  0xfe   :  { %496 = vadd.xlane.f32.xlu0 %v495_v44  ;;  %v543_v44 = vsel %vm177_vm0, %v3702_v37, 0.0 }
 0x100   :  { %499 = vadd.xlane.f32.xlu1 %v498_v50 }
 0x102   :  { %502 = vadd.xlane.f32.xlu0 %v501_v33 }
 0x104   :  { %505 = vadd.xlane.f32.xlu1 %v504_v57 }
 0x106   :  { %508 = vadd.xlane.f32.xlu0 %v507_v61 }
 0x108   :  { %511 = vadd.xlane.f32.xlu1 %v510_v0 }
 0x10a   :  { %514 = vadd.xlane.f32.xlu0 %v513_v34 }
 0x10c   :  { %517 = vadd.xlane.f32.xlu1 %v516_v2 }
 0x10e   :  { %520 = vadd.xlane.f32.xlu0 %v519_v13 }
 0x110   :  { %523 = vadd.xlane.f32.xlu1 %v522_v15 }
 0x112   :  { %526 = vadd.xlane.f32.xlu0 %v525_v52 }
 0x114   :  { %529 = vadd.xlane.f32.xlu1 %v528_v17 }
 0x116   :  { %532 = vadd.xlane.f32.xlu0 %v531_v23 }
 0x118   :  { %535 = vadd.xlane.f32.xlu1 %v534_v32 }
 0x11a   :  { %538 = vadd.xlane.f32.xlu0 %v537_v8 }
 0x11c   :  { %541 = vadd.xlane.f32.xlu1 %v540_v40 }
 0x11e   :  { %544 = vadd.xlane.f32.xlu0 %v543_v44 }
 0x120   :  { %547 = vadd.xlane.f32.xlu1 %v546_v46 }
 0x16e   :  { %v461_v50 = vpop.xlane.xlu1 %460 }
 0x16f   :  { %v552_v33 = vmul.f32 0.03125, %v461_v50  ;;  %v455_v26 = vpop.xlane.xlu0 %454 }
 0x170   :  { %v550_v54 = vmul.f32 0.03125, %v455_v26 }
 0x171   :  { %v3714_v35 = vsub.f32 %v3459_v22, %v552_v33 }
 0x172   :  { %v3717_v57 = vsub.f32 %v3464_v25, %v550_v54  ;;  %v464_v38 = vpop.xlane.xlu1 %463 }
 0x173   :  { %v553_v58 = vmul.f32 0.03125, %v464_v38  ;;  %v458_v61 = vpop.xlane.xlu0 %457  ;;  %v616_v22 = vmul.f32 %v3714_v35, %v3714_v35 }
 0x174   :  { %v551_v63 = vmul.f32 0.03125, %v458_v61  ;;  %v614_v0 = vmul.f32 %v3717_v57, %v3717_v57 }
 0x175   :  { %v3722_v34 = vsub.f32 %v3466_v27, %v553_v58  ;;  %v652_v15 = vsel %vm177_vm0, %v616_v22, 0.0 }
 0x176   :  { %v3725_v51 = vsub.f32 %v3472_v31, %v551_v63  ;;  %v646_v55 = vsel %vm177_vm0, %v614_v0, 0.0 }
 0x177   :  { %v467_v25 = vpop.xlane.xlu0 %466  ;;  %647 = vadd.xlane.f32.xlu0 %v646_v55  ;;  %v617_v14 = vmul.f32 %v3722_v34, %v3722_v34 }
 0x178   :  { %v554_v2 = vmul.f32 0.03125, %v467_v25  ;;  %v615_v6 = vmul.f32 %v3725_v51, %v3725_v51 }
 0x179   :  { %v470_v13 = vpop.xlane.xlu1 %469  ;;  %v655_v3 = vsel %vm177_vm0, %v617_v14, 0.0 }
 0x17a   :  { %v3735_v27 = vsub.f32 %v3495_v43, %v554_v2  ;;  %v555_v31 = vmul.f32 0.03125, %v470_v13  ;;  %v649_v52 = vsel %vm177_vm0, %v615_v6, 0.0 }
 0x17b   :  { %v473_v7 = vpop.xlane.xlu0 %472  ;;  %653 = vadd.xlane.f32.xlu0 %v652_v15  ;;  %650 = vadd.xlane.f32.xlu1 %v649_v52 }
 0x17c   :  { %v3740_v11 = vsub.f32 %v3504_v49, %v555_v31  ;;  %v556_v17 = vmul.f32 0.03125, %v473_v7  ;;  %v618_v19 = vmul.f32 %v3735_v27, %v3735_v27 }
 0x17d   :  { %v476_v23 = vpop.xlane.xlu1 %475 }
 0x17e   :  { %v3746_v43 = vsub.f32 %v3502_v48, %v556_v17  ;;  %v557_v32 = vmul.f32 0.03125, %v476_v23  ;;  %v658_v8 = vsel %vm177_vm0, %v618_v19, 0.0  ;;  %v619_v36 = vmul.f32 %v3740_v11, %v3740_v11 }
 0x17f   :  { %v479_v40 = vpop.xlane.xlu0 %478  ;;  %659 = vadd.xlane.f32.xlu0 %v658_v8  ;;  %656 = vadd.xlane.f32.xlu1 %v655_v3 }
 0x180   :  { %v3752_v49 = vsub.f32 %v3512_v53, %v557_v32  ;;  %v558_v44 = vmul.f32 0.03125, %v479_v40  ;;  %v620_v46 = vmul.f32 %v3746_v43, %v3746_v43  ;;  %v661_v48 = vsel %vm177_vm0, %v619_v36, 0.0 }
 0x181   :  { %v482_v50 = vpop.xlane.xlu1 %481 }
 0x182   :  { %v3758_v33 = vsub.f32 %v3529_v62, %v558_v44  ;;  %v559_v26 = vmul.f32 0.03125, %v482_v50  ;;  %v664_v54 = vsel %vm177_vm0, %v620_v46, 0.0  ;;  %v621_v38 = vmul.f32 %v3752_v49, %v3752_v49 }
 0x183   :  { %v485_v58 = vpop.xlane.xlu0 %484  ;;  %665 = vadd.xlane.f32.xlu0 %v664_v54  ;;  %662 = vadd.xlane.f32.xlu1 %v661_v48 }
 0x184   :  { %v3764_v53 = vsub.f32 %v3540_v5, %v559_v26  ;;  %v560_v61 = vmul.f32 0.03125, %v485_v58  ;;  %v622_v63 = vmul.f32 %v3758_v33, %v3758_v33  ;;  %v667_v62 = vsel %vm177_vm0, %v621_v38, 0.0 }
 0x185   :  { %v488_v0 = vpop.xlane.xlu1 %487 }
 0x186   :  { %v3770_v55 = vsub.f32 %v3538_v4, %v560_v61  ;;  %v561_v22 = vmul.f32 0.03125, %v488_v0  ;;  %v670_v25 = vsel %vm177_vm0, %v622_v63, 0.0  ;;  %v623_v2 = vmul.f32 %v3764_v53, %v3764_v53 }
 0x187   :  { %671 = vadd.xlane.f32.xlu0 %v670_v25  ;;  %v491_v6 = vpop.xlane.xlu0 %490  ;;  %668 = vadd.xlane.f32.xlu1 %v667_v62 }
 0x188   :  { %v3776_v5 = vsub.f32 %v3548_v9, %v561_v22  ;;  %v562_v13 = vmul.f32 0.03125, %v491_v6  ;;  %v624_v14 = vmul.f32 %v3770_v55, %v3770_v55  ;;  %v673_v4 = vsel %vm177_vm0, %v623_v2, 0.0 }
 0x189   :  { %v494_v31 = vpop.xlane.xlu1 %493 }
 0x18a   :  { %v3782_v15 = vsub.f32 %v3563_v18, %v562_v13  ;;  %v563_v52 = vmul.f32 0.03125, %v494_v31  ;;  %v676_v7 = vsel %vm177_vm0, %v624_v14, 0.0  ;;  %v625_v17 = vmul.f32 %v3776_v5, %v3776_v5 }
 0x18b   :  { %677 = vadd.xlane.f32.xlu0 %v676_v7  ;;  %v497_v19 = vpop.xlane.xlu0 %496  ;;  %674 = vadd.xlane.f32.xlu1 %v673_v4 }
 0x18c   :  { %v3788_v9 = vsub.f32 %v3577_v29, %v563_v52  ;;  %v564_v23 = vmul.f32 0.03125, %v497_v19  ;;  %v626_v3 = vmul.f32 %v3782_v15, %v3782_v15  ;;  %v679_v18 = vsel %vm177_vm0, %v625_v17, 0.0 }
 0x18d   :  { %v500_v32 = vpop.xlane.xlu1 %499 }
 0x18e   :  { %v3794_v8 = vsub.f32 %v3575_v28, %v564_v23  ;;  %v565_v36 = vmul.f32 0.03125, %v500_v32  ;;  %v682_v40 = vsel %vm177_vm0, %v626_v3, 0.0  ;;  %v627_v44 = vmul.f32 %v3788_v9, %v3788_v9 }
 0x18f   :  { %683 = vadd.xlane.f32.xlu0 %v682_v40  ;;  %v503_v46 = vpop.xlane.xlu0 %502  ;;  %680 = vadd.xlane.f32.xlu1 %v679_v18 }
 0x190   :  { %v3800_v29 = vsub.f32 %v3586_v39, %v565_v36  ;;  %v566_v50 = vmul.f32 0.03125, %v503_v46  ;;  %v628_v48 = vmul.f32 %v3794_v8, %v3794_v8  ;;  %v685_v28 = vsel %vm177_vm0, %v627_v44, 0.0 }
 0x191   :  { %v506_v26 = vpop.xlane.xlu1 %505 }
 0x192   :  { %v3806_v54 = vsub.f32 %v3591_v41, %v566_v50  ;;  %v567_v38 = vmul.f32 0.03125, %v506_v26  ;;  %v688_v58 = vsel %vm177_vm0, %v628_v48, 0.0  ;;  %v629_v61 = vmul.f32 %v3800_v29, %v3800_v29 }
 0x193   :  { %689 = vadd.xlane.f32.xlu0 %v688_v58  ;;  %v509_v63 = vpop.xlane.xlu0 %508  ;;  %686 = vadd.xlane.f32.xlu1 %v685_v28  ;;  %v3111_v58 = vld [vmem:[%s5342_s5] sm:$0xff]  }
 0x194   :  { %v3812_v39 = vsub.f32 %v3596_v45, %v567_v38  ;;  %v568_v0 = vmul.f32 0.03125, %v509_v63  ;;  %v630_v62 = vmul.f32 %v3806_v54, %v3806_v54  ;;  %v691_v41 = vsel %vm177_vm0, %v629_v61, 0.0  ;;  %3012 = vmatprep.subr.bf16.mxu1 %v3111_v58 }
 0x195   :  { %v512_v22 = vpop.xlane.xlu1 %511  ;;  %3013 = vmatpush3.bf16.msra.mxu1 %v3111_v58 }
 0x196   :  { %v3818_v25 = vsub.f32 %v3612_v56, %v568_v0  ;;  %v569_v2 = vmul.f32 0.03125, %v512_v22  ;;  %v694_v6 = vsel %vm177_vm0, %v630_v62, 0.0  ;;  %v631_v13 = vmul.f32 %v3812_v39, %v3812_v39 }
 0x197   :  { %695 = vadd.xlane.f32.xlu0 %v694_v6  ;;  %v515_v14 = vpop.xlane.xlu0 %514  ;;  %692 = vadd.xlane.f32.xlu1 %v691_v41 }
 0x198   :  { %v3824_v45 = vsub.f32 %v3620_v59, %v569_v2  ;;  %v570_v31 = vmul.f32 0.03125, %v515_v14  ;;  %v632_v4 = vmul.f32 %v3818_v25, %v3818_v25  ;;  %v697_v56 = vsel %vm177_vm0, %v631_v13, 0.0 }
 0x199   :  { %v518_v52 = vpop.xlane.xlu1 %517 }
 0x19a   :  { %v3830_v7 = vsub.f32 %v3623_v60, %v570_v31  ;;  %v571_v17 = vmul.f32 0.03125, %v518_v52  ;;  %v700_v19 = vsel %vm177_vm0, %v632_v4, 0.0  ;;  %v633_v23 = vmul.f32 %v3824_v45, %v3824_v45  ;;  %v3112_v52 = vld [vmem:[%s5342_s5 + $0x8] sm:$0xff]  }
 0x19b   :  { %701 = vadd.xlane.f32.xlu0 %v700_v19  ;;  %v521_v3 = vpop.xlane.xlu0 %520  ;;  %698 = vadd.xlane.f32.xlu1 %v697_v56 }
 0x19c   :  { %v3836_v59 = vsub.f32 %v3628_v30, %v571_v17  ;;  %v572_v32 = vmul.f32 0.03125, %v521_v3  ;;  %v634_v18 = vmul.f32 %v3830_v7, %v3830_v7  ;;  %v703_v60 = vsel %vm177_vm0, %v633_v23, 0.0  ;;  %3014 = vmatprep.subr.bf16.mxu1 %v3112_v52 }
 0x19d   :  { %v524_v36 = vpop.xlane.xlu1 %523  ;;  %3015 = vmatpush3.bf16.msra.mxu1 %v3112_v52 }
 0x19e   :  { %v3842_v40 = vsub.f32 %v3644_v1, %v572_v32  ;;  %v573_v44 = vmul.f32 0.03125, %v524_v36  ;;  %v706_v46 = vsel %vm177_vm0, %v634_v18, 0.0  ;;  %v635_v50 = vmul.f32 %v3836_v59, %v3836_v59 }
 0x19f   :  { %707 = vadd.xlane.f32.xlu0 %v706_v46  ;;  %v527_v48 = vpop.xlane.xlu0 %526  ;;  %704 = vadd.xlane.f32.xlu1 %v703_v60 }
 0x1a0   :  { %v3848_v30 = vsub.f32 %v3652_v10, %v573_v44  ;;  %v574_v26 = vmul.f32 0.03125, %v527_v48  ;;  %v636_v28 = vmul.f32 %v3842_v40, %v3842_v40  ;;  %v709_v1 = vsel %vm177_vm0, %v635_v50, 0.0 }
 0x1a1   :  { %v530_v38 = vpop.xlane.xlu1 %529 }
 0x1a2   :  { %v3857_v61 = vsub.f32 %v3655_v12, %v574_v26  ;;  %v575_v63 = vmul.f32 0.03125, %v530_v38  ;;  %v712_v0 = vsel %vm177_vm0, %v636_v28, 0.0  ;;  %v637_v10 = vmul.f32 %v3848_v30, %v3848_v30 }
 0x1a3   :  { %713 = vadd.xlane.f32.xlu0 %v712_v0  ;;  %v533_v62 = vpop.xlane.xlu0 %532  ;;  %710 = vadd.xlane.f32.xlu1 %v709_v1 }
 0x1a4   :  { %v3863_v22 = vsub.f32 %v3659_v47, %v575_v63  ;;  %v576_v41 = vmul.f32 0.03125, %v533_v62  ;;  %v638_v2 = vmul.f32 %v3857_v61, %v3857_v61  ;;  %v715_v12 = vsel %vm177_vm0, %v637_v10, 0.0  ;;  %v3114_v10 = vld [vmem:[%s5343_s7 + $0x8] sm:$0xff]   ;;  %v3115_v62 = vld [vmem:[%s5343_s7 + $0x10] sm:$0xff]  }
 0x1a5   :  { %v536_v6 = vpop.xlane.xlu1 %535 }
 0x1a6   :  { %v3869_v13 = vsub.f32 %v3675_v16, %v576_v41  ;;  %v577_v14 = vmul.f32 0.03125, %v536_v6  ;;  %v718_v31 = vsel %vm177_vm0, %v638_v2, 0.0  ;;  %v639_v4 = vmul.f32 %v3863_v22, %v3863_v22 }
 0x1a7   :  { %719 = vadd.xlane.f32.xlu0 %v718_v31  ;;  %v539_v47 = vpop.xlane.xlu0 %538  ;;  %716 = vadd.xlane.f32.xlu1 %v715_v12 }
 0x1a8   :  { %v3878_v56 = vsub.f32 %v3683_v20, %v577_v14  ;;  %v578_v17 = vmul.f32 0.03125, %v539_v47  ;;  %v640_v16 = vmul.f32 %v3869_v13, %v3869_v13  ;;  %v721_v23 = vsel %vm177_vm0, %v639_v4, 0.0 }
 0x1a9   :  { %v542_v19 = vpop.xlane.xlu1 %541 }
 0x1aa   :  { %v3884_v3 = vsub.f32 %v3685_v21, %v578_v17  ;;  %v579_v32 = vmul.f32 0.03125, %v542_v19  ;;  %v724_v18 = vsel %vm177_vm0, %v640_v16, 0.0  ;;  %v641_v36 = vmul.f32 %v3878_v56, %v3878_v56 }
 0x1ab   :  { %725 = vadd.xlane.f32.xlu0 %v724_v18  ;;  %v545_v20 = vpop.xlane.xlu0 %544  ;;  %722 = vadd.xlane.f32.xlu1 %v721_v23 }
 0x1ac   :  { %v3890_v60 = vsub.f32 %v3689_v24, %v579_v32  ;;  %v580_v44 = vmul.f32 0.03125, %v545_v20  ;;  %v642_v46 = vmul.f32 %v3884_v3, %v3884_v3  ;;  %v727_v21 = vsel %vm177_vm0, %v641_v36, 0.0 }
 0x1ad   :  { %v548_v50 = vpop.xlane.xlu1 %547 }
 0x1ae   :  { %v3896_v48 = vsub.f32 %v3702_v37, %v580_v44  ;;  %v581_v26 = vmul.f32 0.03125, %v548_v50  ;;  %v730_v28 = vsel %vm177_vm0, %v642_v46, 0.0  ;;  %v643_v38 = vmul.f32 %v3890_v60, %v3890_v60 }
 0x1af   :  { %731 = vadd.xlane.f32.xlu0 %v730_v28  ;;  %728 = vadd.xlane.f32.xlu1 %v727_v21  ;;  %v3923_v21 = vld [vmem:[%s5344_s3] ss:$0 sm:$0xff] }
 0x1b0   :  { %v3902_v24 = vsub.f32 %v3707_v42, %v581_v26  ;;  %v644_v1 = vmul.f32 %v3896_v48, %v3896_v48  ;;  %v733_v63 = vsel %vm177_vm0, %v643_v38, 0.0  ;;  %v3113_v42 = vld [vmem:[%s5343_s7] sm:$0xff]  }
 0x1b1   :  { %3048 = vmatprep.subr.bf16.mxu0 %v3113_v42 }
 0x1b2   :  { %v736_v58 = vsel %vm177_vm0, %v644_v1, 0.0  ;;  %v645_v37 = vmul.f32 %v3902_v24, %v3902_v24  ;;  %3049 = vmatpush3.bf16.msra.mxu0 %v3113_v42 }
 0x1b3   :  { %737 = vadd.xlane.f32.xlu0 %v736_v58  ;;  %734 = vadd.xlane.f32.xlu1 %v733_v63  ;;  %v3929_v63 = vld [vmem:[%s5345_s4] ss:$0 sm:$0xff] }
 0x1b4   :  { %v739_v0 = vsel %vm177_vm0, %v645_v37, 0.0  ;;  %3050 = vmatprep.subr.bf16.mxu0 %v3114_v10 }
 0x1b6   :  { %3051 = vmatpush3.bf16.msra.mxu0 %v3114_v10 }
 0x1b7   :  { %740 = vadd.xlane.f32.xlu1 %v739_v0  ;;  %3052 = vmatprep.subr.bf16.mxu0 %v3115_v62 }
 0x1ba   :  { %3053 = vmatpush3.bf16.msra.mxu0 %v3115_v62 }
 0x204   :  { %v648_v41 = vpop.xlane.xlu0 %647 }
 0x205   :  { %v742_v2 = vmul.f32 0.03125, %v648_v41 }
 0x207   :  { %v774_v6 = vadd.f32 1e-05, %v742_v2 }
 0x208   :  { %v654_v12 = vpop.xlane.xlu0 %653  ;;  %v651_v14 = vpop.xlane.xlu1 %650 }
 0x209   :  { %3117 = vrsqrt.f32 %v774_v6  ;;  %v744_v31 = vmul.f32 0.03125, %v654_v12  ;;  %v743_v4 = vmul.f32 0.03125, %v651_v14 }
 0x20b   :  { %v776_v47 = vadd.f32 1e-05, %v744_v31  ;;  %v775_v52 = vadd.f32 1e-05, %v743_v4 }
 0x20c   :  { %v660_v17 = vpop.xlane.xlu0 %659  ;;  %v657_v16 = vpop.xlane.xlu1 %656 }
 0x20d   :  { %3119 = vrsqrt.f32 %v776_v47  ;;  %v746_v19 = vmul.f32 0.03125, %v660_v17  ;;  %v745_v23 = vmul.f32 0.03125, %v657_v16 }
 0x20e   :  { %3121 = vrsqrt.f32 %v775_v52 }
 0x20f   :  { %v778_v32 = vadd.f32 1e-05, %v746_v19  ;;  %v777_v18 = vadd.f32 1e-05, %v745_v23 }
 0x210   :  { %v666_v36 = vpop.xlane.xlu0 %665  ;;  %v663_v20 = vpop.xlane.xlu1 %662 }
 0x211   :  { %3123 = vrsqrt.f32 %v778_v32  ;;  %v748_v44 = vmul.f32 0.03125, %v666_v36  ;;  %v747_v46 = vmul.f32 0.03125, %v663_v20 }
 0x212   :  { %3125 = vrsqrt.f32 %v777_v18 }
 0x213   :  { %v3118_v50 = vpop.eup %3117  ;;  %v780_v26 = vadd.f32 1e-05, %v748_v44  ;;  %v779_v28 = vadd.f32 1e-05, %v747_v46 }
 0x214   :  { %v838_v38 = vmul.f32 %v3118_v50, %v3717_v57  ;;  %v672_v1 = vpop.xlane.xlu0 %671  ;;  %v669_v58 = vpop.xlane.xlu1 %668 }
 0x215   :  { %3127 = vrsqrt.f32 %v780_v26  ;;  %v750_v37 = vmul.f32 0.03125, %v672_v1  ;;  %v749_v0 = vmul.f32 0.03125, %v669_v58 }
 0x216   :  { %v876_v42 = vmul.f32 %v3923_v21, %v838_v38  ;;  %3129 = vrsqrt.f32 %v779_v28 }
 0x217   :  { %v3120_v10 = vpop.eup %3119  ;;  %v782_v62 = vadd.f32 1e-05, %v750_v37  ;;  %v781_v41 = vadd.f32 1e-05, %v749_v0 }
 0x218   :  { %v3122_v2 = vpop.eup %3121  ;;  %v914_v6 = vadd.f32 %v3929_v63, %v876_v42  ;;  %v840_v57 = vmul.f32 %v3120_v10, %v3714_v35  ;;  %v678_v12 = vpop.xlane.xlu0 %677 }
 0x219   :  { %v675_v14 = vpop.xlane.xlu1 %674  ;;  %v839_v31 = vmul.f32 %v3122_v2, %v3725_v51  ;;  %3131 = vrsqrt.f32 %v782_v62  ;;  %v752_v4 = vmul.f32 0.03125, %v678_v12 }
 0x21a   :  { %v751_v47 = vmul.f32 0.03125, %v675_v14  ;;  %946 = vst.msk [vmem:[#allocation2] sm:$0xff] %vm177_vm0, %v914_v6  ;;  %v878_v52 = vmul.f32 %v3923_v21, %v840_v57  ;;  %3133 = vrsqrt.f32 %v781_v41 }
 0x21b   :  { %v3124_v17 = vpop.eup %3123  ;;  %v877_v16 = vmul.f32 %v3923_v21, %v839_v31  ;;  %v784_v19 = vadd.f32 1e-05, %v752_v4 }
 0x21c   :  { %v783_v23 = vadd.f32 1e-05, %v751_v47  ;;  %v3126_v32 = vpop.eup %3125  ;;  %v916_v35 = vadd.f32 %v3929_v63, %v878_v52  ;;  %v842_v18 = vmul.f32 %v3124_v17, %v3735_v27  ;;  %v684_v36 = vpop.xlane.xlu0 %683 }
 0x21d   :  { %v681_v51 = vpop.xlane.xlu1 %680  ;;  %v915_v20 = vadd.f32 %v3929_v63, %v877_v16  ;;  %v841_v44 = vmul.f32 %v3126_v32, %v3722_v34  ;;  %3135 = vrsqrt.f32 %v784_v19  ;;  %v754_v46 = vmul.f32 0.03125, %v684_v36 }
 0x21e   :  { %948 = vst.msk [vmem:[#allocation2 + $0x10] sm:$0xff] %vm177_vm0, %v916_v35  ;;  %v880_v50 = vmul.f32 %v3923_v21, %v842_v18  ;;  %3137 = vrsqrt.f32 %v783_v23  ;;  %v753_v26 = vmul.f32 0.03125, %v681_v51 }
 0x21f   :  { %v3128_v28 = vpop.eup %3127  ;;  %947 = vst.msk [vmem:[#allocation2 + $0x8] sm:$0xff] %vm177_vm0, %v915_v20  ;;  %v879_v38 = vmul.f32 %v3923_v21, %v841_v44  ;;  %v786_v27 = vadd.f32 1e-05, %v754_v46 }
 0x220   :  { %v3130_v1 = vpop.eup %3129  ;;  %v918_v58 = vadd.f32 %v3929_v63, %v880_v50  ;;  %v844_v37 = vmul.f32 %v3128_v28, %v3746_v43  ;;  %v785_v34 = vadd.f32 1e-05, %v753_v26  ;;  %v690_v0 = vpop.xlane.xlu0 %689 }
 0x221   :  { %v687_v42 = vpop.xlane.xlu1 %686  ;;  %v917_v10 = vadd.f32 %v3929_v63, %v879_v38  ;;  %v843_v62 = vmul.f32 %v3130_v1, %v3740_v11  ;;  %3139 = vrsqrt.f32 %v786_v27  ;;  %v756_v41 = vmul.f32 0.03125, %v690_v0  ;;  %v3960_v35 = vld [vmem:[#allocation2] sm:$0xff] }
 0x222   :  { %950 = vst.msk [vmem:[#allocation2 + $0x20] sm:$0xff] %vm177_vm0, %v918_v58  ;;  %v882_v2 = vmul.f32 %v3923_v21, %v844_v37  ;;  %3141 = vrsqrt.f32 %v785_v34  ;;  %v755_v6 = vmul.f32 0.03125, %v687_v42 }
 0x223   :  { %v3132_v57 = vpop.eup %3131  ;;  %949 = vst.msk [vmem:[#allocation2 + $0x18] sm:$0xff] %vm177_vm0, %v917_v10  ;;  %v881_v43 = vmul.f32 %v3923_v21, %v843_v62  ;;  %v788_v12 = vadd.f32 1e-05, %v756_v41 }
 0x224   :  { %v3134_v14 = vpop.eup %3133  ;;  %v920_v31 = vadd.f32 %v3929_v63, %v882_v2  ;;  %v846_v4 = vmul.f32 %v3132_v57, %v3758_v33  ;;  %v787_v11 = vadd.f32 1e-05, %v755_v6  ;;  %v696_v47 = vpop.xlane.xlu0 %695 }
 0x225   :  { %v693_v52 = vpop.xlane.xlu1 %692  ;;  %v919_v17 = vadd.f32 %v3929_v63, %v881_v43  ;;  %v845_v16 = vmul.f32 %v3134_v14, %v3752_v49  ;;  %3143 = vrsqrt.f32 %v788_v12  ;;  %v758_v19 = vmul.f32 0.03125, %v696_v47  ;;  %v3975_v34 = vld [vmem:[#allocation2 + $0x10] sm:$0xff] }
 0x226   :  { %952 = vst.msk [vmem:[#allocation2 + $0x30] sm:$0xff] %vm177_vm0, %v920_v31  ;;  %v884_v23 = vmul.f32 %v3923_v21, %v846_v4  ;;  %3145 = vrsqrt.f32 %v787_v11  ;;  %v757_v32 = vmul.f32 0.03125, %v693_v52  ;;  %v3962_v18 = vld [vmem:[#allocation2 + $0x8] sm:$0xff] }
 0x227   :  { %v3136_v33 = vpop.eup %3135  ;;  %951 = vst.msk [vmem:[#allocation2 + $0x28] sm:$0xff] %vm177_vm0, %v919_v17  ;;  %v883_v36 = vmul.f32 %v3923_v21, %v845_v16  ;;  %v790_v51 = vadd.f32 1e-05, %v758_v19  ;;  %v1042_v49 = vpack.c.bf16 %v3962_v18, %v3960_v35 }
 0x228   :  { %v3138_v20 = vpop.eup %3137  ;;  %v922_v44 = vadd.f32 %v3929_v63, %v884_v23  ;;  %v848_v46 = vmul.f32 %v3136_v33, %v3770_v55  ;;  %v789_v50 = vadd.f32 1e-05, %v757_v32  ;;  %v702_v26 = vpop.xlane.xlu0 %701 }
 0x229   :  { %v699_v28 = vpop.xlane.xlu1 %698  ;;  %v921_v38 = vadd.f32 %v3929_v63, %v883_v36  ;;  %v847_v27 = vmul.f32 %v3138_v20, %v3764_v53  ;;  %3147 = vrsqrt.f32 %v790_v51  ;;  %v760_v1 = vmul.f32 0.03125, %v702_v26  ;;  %3016 = vmatprep.mubr.msk.bf16.mxu1 %vm177_vm0, %v1042_v49  ;;  %v3990_v47 = vld [vmem:[#allocation2 + $0x20] sm:$0xff] }
 0x22a   :  { %954 = vst.msk [vmem:[#allocation2 + $0x40] sm:$0xff] %vm177_vm0, %v922_v44  ;;  %v886_v58 = vmul.f32 %v3923_v21, %v848_v46  ;;  %3149 = vrsqrt.f32 %v789_v50  ;;  %v759_v37 = vmul.f32 0.03125, %v699_v28  ;;  %v3977_v55 = vld [vmem:[#allocation2 + $0x18] sm:$0xff] }
 0x22b   :  { %v3140_v0 = vpop.eup %3139  ;;  %953 = vst.msk [vmem:[#allocation2 + $0x38] sm:$0xff] %vm177_vm0, %v921_v38  ;;  %v885_v42 = vmul.f32 %v3923_v21, %v847_v27  ;;  %v792_v53 = vadd.f32 1e-05, %v760_v1  ;;  %v1043_v10 = vpack.c.bf16 %v3977_v55, %v3975_v34 }
 0x22c   :  { %v3142_v62 = vpop.eup %3141  ;;  %v924_v41 = vadd.f32 %v3929_v63, %v886_v58  ;;  %v850_v2 = vmul.f32 %v3140_v0, %v3782_v15  ;;  %v791_v6 = vadd.f32 1e-05, %v759_v37  ;;  %v708_v57 = vpop.xlane.xlu0 %707 }
 0x22d   :  { %v705_v43 = vpop.xlane.xlu1 %704  ;;  %v923_v12 = vadd.f32 %v3929_v63, %v885_v42  ;;  %v849_v14 = vmul.f32 %v3142_v62, %v3776_v5  ;;  %3151 = vrsqrt.f32 %v792_v53  ;;  %v762_v31 = vmul.f32 0.03125, %v708_v57  ;;  %3017 = vmatmul.mubr.msk.bf16.vlgmr.msra.gmra.mrb[16].mxu1 %vm177_vm0, %v1043_v10  ;;  %v4005_v26 = vld [vmem:[#allocation2 + $0x30] sm:$0xff] }
 0x22e   :  { %956 = vst.msk [vmem:[#allocation2 + $0x50] sm:$0xff] %vm177_vm0, %v924_v41  ;;  %v888_v4 = vmul.f32 %v3923_v21, %v850_v2  ;;  %3153 = vrsqrt.f32 %v791_v6  ;;  %v761_v11 = vmul.f32 0.03125, %v705_v43  ;;  %v3992_v15 = vld [vmem:[#allocation2 + $0x28] sm:$0xff] }
 0x22f   :  { %v3144_v52 = vpop.eup %3143  ;;  %955 = vst.msk [vmem:[#allocation2 + $0x48] sm:$0xff] %vm177_vm0, %v923_v12  ;;  %v887_v17 = vmul.f32 %v3923_v21, %v849_v14  ;;  %v794_v5 = vadd.f32 1e-05, %v762_v31  ;;  %v1044_v16 = vpack.c.bf16 %v3992_v15, %v3990_v47 }
 0x230   :  { %v3146_v19 = vpop.eup %3145  ;;  %v926_v23 = vadd.f32 %v3929_v63, %v888_v4  ;;  %v852_v32 = vmul.f32 %v3144_v52, %v3794_v8  ;;  %v793_v33 = vadd.f32 1e-05, %v761_v11  ;;  %v714_v36 = vpop.xlane.xlu0 %713 }
 0x231   :  { %v711_v51 = vpop.xlane.xlu1 %710  ;;  %v925_v49 = vadd.f32 %v3929_v63, %v887_v17  ;;  %v851_v20 = vmul.f32 %v3146_v19, %v3788_v9  ;;  %3155 = vrsqrt.f32 %v794_v5  ;;  %v764_v44 = vmul.f32 0.03125, %v714_v36  ;;  %3020 = vmatprep.mubr.msk.bf16.mxu1 %vm177_vm0, %v1044_v16  ;;  %v4020_v57 = vld [vmem:[#allocation2 + $0x40] sm:$0xff] }
 0x232   :  { %958 = vst.msk [vmem:[#allocation2 + $0x60] sm:$0xff] %vm177_vm0, %v926_v23  ;;  %v890_v46 = vmul.f32 %v3923_v21, %v852_v32  ;;  %3157 = vrsqrt.f32 %v793_v33  ;;  %v763_v50 = vmul.f32 0.03125, %v711_v51  ;;  %v4007_v8 = vld [vmem:[#allocation2 + $0x38] sm:$0xff] }
 0x233   :  { %v3148_v28 = vpop.eup %3147  ;;  %957 = vst.msk [vmem:[#allocation2 + $0x58] sm:$0xff] %vm177_vm0, %v925_v49  ;;  %v889_v38 = vmul.f32 %v3923_v21, %v851_v20  ;;  %v796_v9 = vadd.f32 1e-05, %v764_v44  ;;  %v1045_v27 = vpack.c.bf16 %v4007_v8, %v4005_v26 }
 0x234   :  { %v3150_v1 = vpop.eup %3149  ;;  %v928_v58 = vadd.f32 %v3929_v63, %v890_v46  ;;  %v854_v37 = vmul.f32 %v3148_v28, %v3806_v54  ;;  %v795_v0 = vadd.f32 1e-05, %v763_v50  ;;  %v720_v42 = vpop.xlane.xlu0 %719 }
 0x235   :  { %v717_v53 = vpop.xlane.xlu1 %716  ;;  %v927_v10 = vadd.f32 %v3929_v63, %v889_v38  ;;  %v853_v62 = vmul.f32 %v3150_v1, %v3800_v29  ;;  %3159 = vrsqrt.f32 %v796_v9  ;;  %v766_v41 = vmul.f32 0.03125, %v720_v42  ;;  %3021 = vmatmul.mubr.msk.bf16.gmra.mrb[20].mxu1 %vm177_vm0, %v1045_v27  ;;  %v4035_v36 = vld [vmem:[#allocation2 + $0x50] sm:$0xff] }
 0x236   :  { %960 = vst.msk [vmem:[#allocation2 + $0x70] sm:$0xff] %vm177_vm0, %v928_v58  ;;  %v892_v2 = vmul.f32 %v3923_v21, %v854_v37  ;;  %3161 = vrsqrt.f32 %v795_v0  ;;  %v765_v6 = vmul.f32 0.03125, %v717_v53  ;;  %v4022_v54 = vld [vmem:[#allocation2 + $0x48] sm:$0xff] }
 0x237   :  { %v3152_v43 = vpop.eup %3151  ;;  %959 = vst.msk [vmem:[#allocation2 + $0x68] sm:$0xff] %vm177_vm0, %v927_v10  ;;  %v891_v12 = vmul.f32 %v3923_v21, %v853_v62  ;;  %v798_v29 = vadd.f32 1e-05, %v766_v41  ;;  %v1046_v14 = vpack.c.bf16 %v4022_v54, %v4020_v57 }
 0x238   :  { %v3154_v31 = vpop.eup %3153  ;;  %v930_v4 = vadd.f32 %v3929_v63, %v892_v2  ;;  %v856_v11 = vmul.f32 %v3152_v43, %v3818_v25  ;;  %v797_v52 = vadd.f32 1e-05, %v765_v6  ;;  %v726_v17 = vpop.xlane.xlu0 %725 }
 0x239   :  { %v723_v5 = vpop.xlane.xlu1 %722  ;;  %v929_v16 = vadd.f32 %v3929_v63, %v891_v12  ;;  %v855_v19 = vmul.f32 %v3154_v31, %v3812_v39  ;;  %3163 = vrsqrt.f32 %v798_v29  ;;  %v768_v23 = vmul.f32 0.03125, %v726_v17  ;;  %3024 = vmatprep.mubr.msk.bf16.mxu1 %vm177_vm0, %v1046_v14  ;;  %v4050_v42 = vld [vmem:[#allocation2 + $0x60] sm:$0xff] }
 0x23a   :  { %962 = vst.msk [vmem:[#allocation2 + $0x80] sm:$0xff] %vm177_vm0, %v930_v4  ;;  %v894_v32 = vmul.f32 %v3923_v21, %v856_v11  ;;  %3165 = vrsqrt.f32 %v797_v52  ;;  %v767_v33 = vmul.f32 0.03125, %v723_v5  ;;  %v4037_v25 = vld [vmem:[#allocation2 + $0x58] sm:$0xff] }
 0x23b   :  { %v3156_v51 = vpop.eup %3155  ;;  %961 = vst.msk [vmem:[#allocation2 + $0x78] sm:$0xff] %vm177_vm0, %v929_v16  ;;  %v893_v49 = vmul.f32 %v3923_v21, %v855_v19  ;;  %v800_v39 = vadd.f32 1e-05, %v768_v23  ;;  %v1047_v20 = vpack.c.bf16 %v4037_v25, %v4035_v36 }
 0x23c   :  { %v3158_v44 = vpop.eup %3157  ;;  %v932_v46 = vadd.f32 %v3929_v63, %v894_v32  ;;  %v858_v50 = vmul.f32 %v3156_v51, %v3830_v7  ;;  %v799_v28 = vadd.f32 1e-05, %v767_v33  ;;  %v732_v38 = vpop.xlane.xlu0 %731 }
 0x23d   :  { %v729_v9 = vpop.xlane.xlu1 %728  ;;  %v931_v27 = vadd.f32 %v3929_v63, %v893_v49  ;;  %v857_v1 = vmul.f32 %v3158_v44, %v3824_v45  ;;  %3167 = vrsqrt.f32 %v800_v39  ;;  %v770_v58 = vmul.f32 0.03125, %v732_v38  ;;  %3025 = vmatmul.mubr.msk.bf16.gmra.mrb[24].mxu1 %vm177_vm0, %v1047_v20  ;;  %v4065_v17 = vld [vmem:[#allocation2 + $0x70] sm:$0xff] }
 0x23e   :  { %964 = vst.msk [vmem:[#allocation2 + $0x90] sm:$0xff] %vm177_vm0, %v932_v46  ;;  %v896_v37 = vmul.f32 %v3923_v21, %v858_v50  ;;  %3169 = vrsqrt.f32 %v799_v28  ;;  %v769_v0 = vmul.f32 0.03125, %v729_v9  ;;  %v4052_v7 = vld [vmem:[#allocation2 + $0x68] sm:$0xff] }
 0x23f   :  { %v3160_v53 = vpop.eup %3159  ;;  %963 = vst.msk [vmem:[#allocation2 + $0x88] sm:$0xff] %vm177_vm0, %v931_v27  ;;  %v895_v10 = vmul.f32 %v3923_v21, %v857_v1  ;;  %v802_v45 = vadd.f32 1e-05, %v770_v58  ;;  %v1048_v62 = vpack.c.bf16 %v4052_v7, %v4050_v42 }
 0x240   :  { %v3162_v41 = vpop.eup %3161  ;;  %v934_v2 = vadd.f32 %v3929_v63, %v896_v37  ;;  %v860_v6 = vmul.f32 %v3160_v53, %v3842_v40  ;;  %v801_v43 = vadd.f32 1e-05, %v769_v0  ;;  %v738_v12 = vpop.xlane.xlu0 %737 }
 0x241   :  { %v735_v29 = vpop.xlane.xlu1 %734  ;;  %v933_v14 = vadd.f32 %v3929_v63, %v895_v10  ;;  %v859_v31 = vmul.f32 %v3162_v41, %v3836_v59  ;;  %3171 = vrsqrt.f32 %v802_v45  ;;  %v772_v4 = vmul.f32 0.03125, %v738_v12  ;;  %3028 = vmatprep.mubr.msk.bf16.mxu1 %vm177_vm0, %v1048_v62  ;;  %v4080_v50 = vld [vmem:[#allocation2 + $0x80] sm:$0xff] }
 0x242   :  { %966 = vst.msk [vmem:[#allocation2 + $0xa0] sm:$0xff] %vm177_vm0, %v934_v2  ;;  %v898_v11 = vmul.f32 %v3923_v21, %v860_v6  ;;  %3173 = vrsqrt.f32 %v801_v43  ;;  %v771_v52 = vmul.f32 0.03125, %v735_v29  ;;  %v4067_v40 = vld [vmem:[#allocation2 + $0x78] sm:$0xff] }
 0x243   :  { %v3164_v5 = vpop.eup %3163  ;;  %965 = vst.msk [vmem:[#allocation2 + $0x98] sm:$0xff] %vm177_vm0, %v933_v14  ;;  %v897_v16 = vmul.f32 %v3923_v21, %v859_v31  ;;  %v804_v59 = vadd.f32 1e-05, %v772_v4  ;;  %v1049_v19 = vpack.c.bf16 %v4067_v40, %v4065_v17 }
 0x244   :  { %v3166_v23 = vpop.eup %3165  ;;  %v936_v32 = vadd.f32 %v3929_v63, %v898_v11  ;;  %v862_v33 = vmul.f32 %v3164_v5, %v3857_v61  ;;  %v803_v51 = vadd.f32 1e-05, %v771_v52 }
 0x245   :  { %v741_v49 = vpop.xlane.xlu1 %740  ;;  %v935_v39 = vadd.f32 %v3929_v63, %v897_v16  ;;  %v861_v20 = vmul.f32 %v3166_v23, %v3848_v30  ;;  %3175 = vrsqrt.f32 %v804_v59  ;;  %3029 = vmatmul.mubr.msk.bf16.gmra.mrb[28].mxu1 %vm177_vm0, %v1049_v19  ;;  %v4095_v10 = vld [vmem:[#allocation2 + $0x90] sm:$0xff] }
 0x246   :  { %v773_v44 = vmul.f32 0.03125, %v741_v49  ;;  %968 = vst.msk [vmem:[#allocation2 + $0xb0] sm:$0xff] %vm177_vm0, %v936_v32  ;;  %v900_v46 = vmul.f32 %v3923_v21, %v862_v33  ;;  %3177 = vrsqrt.f32 %v803_v51  ;;  %v4082_v28 = vld [vmem:[#allocation2 + $0x88] sm:$0xff] }
 0x247   :  { %v3168_v61 = vpop.eup %3167  ;;  %967 = vst.msk [vmem:[#allocation2 + $0xa8] sm:$0xff] %vm177_vm0, %v935_v39  ;;  %v899_v38 = vmul.f32 %v3923_v21, %v861_v20  ;;  %v1050_v30 = vpack.c.bf16 %v4082_v28, %v4080_v50 }
 0x248   :  { %v805_v9 = vadd.f32 1e-05, %v773_v44  ;;  %v3170_v27 = vpop.eup %3169  ;;  %v938_v1 = vadd.f32 %v3929_v63, %v900_v46  ;;  %v864_v58 = vmul.f32 %v3168_v61, %v3869_v13 }
 0x249   :  { %v937_v37 = vadd.f32 %v3929_v63, %v899_v38  ;;  %v863_v0 = vmul.f32 %v3170_v27, %v3863_v22  ;;  %3032 = vmatprep.mubr.msk.bf16.mxu1 %vm177_vm0, %v1050_v30  ;;  %v4110_v14 = vld [vmem:[#allocation2 + $0xa0] sm:$0xff] }
 0x24a   :  { %3179 = vrsqrt.f32 %v805_v9  ;;  %970 = vst.msk [vmem:[#allocation2 + $0xc0] sm:$0xff] %vm177_vm0, %v938_v1  ;;  %v902_v53 = vmul.f32 %v3923_v21, %v864_v58  ;;  %v4097_v45 = vld [vmem:[#allocation2 + $0x98] sm:$0xff] }
 0x24b   :  { %v3172_v62 = vpop.eup %3171  ;;  %969 = vst.msk [vmem:[#allocation2 + $0xb8] sm:$0xff] %vm177_vm0, %v937_v37  ;;  %v901_v13 = vmul.f32 %v3923_v21, %v863_v0  ;;  %v1051_v41 = vpack.c.bf16 %v4097_v45, %v4095_v10  ;;  %v3116_v0 = vld [vmem:[%s5343_s7 + $0x18] sm:$0xff]  }
 0x24c   :  { %v3174_v22 = vpop.eup %3173  ;;  %v940_v2 = vadd.f32 %v3929_v63, %v902_v53  ;;  %v866_v6 = vmul.f32 %v3172_v62, %v3884_v3  ;;  %3054 = vmatprep.subr.bf16.mxu0 %v3116_v0  ;;  %v3309_v53 = vmov 0.0   ;;  %v4208_v62 = vld [vmem:[%s5346_s6] ss:$0 sm:$0xff] }
 0x24d   :  { %v939_v43 = vadd.f32 %v3929_v63, %v901_v13  ;;  %v865_v12 = vmul.f32 %v3174_v22, %v3878_v56  ;;  %3033 = vmatmul.mubr.msk.bf16.gmra.mrb[32].mxu1 %vm177_vm0, %v1051_v41  ;;  %v4125_v23 = vld [vmem:[#allocation2 + $0xb0] sm:$0xff]  ;;  %3055 = vmatpush3.bf16.msra.mxu0 %v3116_v0  ;;  %980 = vst.msk [vmem:[#allocation3 + $0x10] sm:$0xff] %vm177_vm0, %v3309_v53  ;;  %978 = vst.msk [vmem:[#allocation3] sm:$0xff] %vm177_vm0, %v3309_v53 }
 0x24e   :  { %972 = vst.msk [vmem:[#allocation2 + $0xd0] sm:$0xff] %vm177_vm0, %v940_v2  ;;  %v904_v29 = vmul.f32 %v3923_v21, %v866_v6  ;;  %v4112_v31 = vld [vmem:[#allocation2 + $0xa8] sm:$0xff]  ;;  %979 = vst.msk [vmem:[#allocation3 + $0x8] sm:$0xff] %vm177_vm0, %v3309_v53 }
 0x24f   :  { %v3176_v4 = vpop.eup %3175  ;;  %971 = vst.msk [vmem:[#allocation2 + $0xc8] sm:$0xff] %vm177_vm0, %v939_v43  ;;  %v903_v11 = vmul.f32 %v3923_v21, %v865_v12  ;;  %v1052_v3 = vpack.c.bf16 %v4112_v31, %v4110_v14  ;;  %981 = vst.msk [vmem:[#allocation3 + $0x18] sm:$0xff] %vm177_vm0, %v3309_v53 }
 0x250   :  { %v3178_v52 = vpop.eup %3177  ;;  %v942_v56 = vadd.f32 %v3929_v63, %v904_v29  ;;  %v868_v5 = vmul.f32 %v3176_v4, %v3896_v48  ;;  %982 = vst.msk [vmem:[#allocation3 + $0x20] sm:$0xff] %vm177_vm0, %v3309_v53  ;;  %983 = vst.msk [vmem:[#allocation3 + $0x28] sm:$0xff] %vm177_vm0, %v3309_v53 }
 0x251   :  { %v941_v16 = vadd.f32 %v3929_v63, %v903_v11  ;;  %v867_v59 = vmul.f32 %v3178_v52, %v3890_v60  ;;  %3036 = vmatprep.mubr.msk.bf16.mxu1 %vm177_vm0, %v1052_v3  ;;  %v4139_v44 = vld [vmem:[#allocation2 + $0xc0] sm:$0xff]  ;;  %984 = vst.msk [vmem:[#allocation3 + $0x30] sm:$0xff] %vm177_vm0, %v3309_v53  ;;  %985 = vst.msk [vmem:[#allocation3 + $0x38] sm:$0xff] %vm177_vm0, %v3309_v53 }
 0x252   :  { %974 = vst.msk [vmem:[#allocation2 + $0xe0] sm:$0xff] %vm177_vm0, %v942_v56  ;;  %v906_v19 = vmul.f32 %v3923_v21, %v868_v5  ;;  %v4127_v32 = vld [vmem:[#allocation2 + $0xb8] sm:$0xff]  ;;  %986 = vst.msk [vmem:[#allocation3 + $0x40] sm:$0xff] %vm177_vm0, %v3309_v53 }
 0x253   :  { %973 = vst.msk [vmem:[#allocation2 + $0xd8] sm:$0xff] %vm177_vm0, %v941_v16  ;;  %v905_v51 = vmul.f32 %v3923_v21, %v867_v59  ;;  %v1053_v48 = vpack.c.bf16 %v4127_v32, %v4125_v23  ;;  %987 = vst.msk [vmem:[#allocation3 + $0x48] sm:$0xff] %vm177_vm0, %v3309_v53 }
 0x254   :  { %v3180_v33 = vpop.eup %3179  ;;  %v944_v60 = vadd.f32 %v3929_v63, %v906_v19  ;;  %988 = vst.msk [vmem:[#allocation3 + $0x50] sm:$0xff] %vm177_vm0, %v3309_v53  ;;  %989 = vst.msk [vmem:[#allocation3 + $0x58] sm:$0xff] %vm177_vm0, %v3309_v53 }
 0x255   :  { %v869_v49 = vmul.f32 %v3180_v33, %v3902_v24  ;;  %v943_v39 = vadd.f32 %v3929_v63, %v905_v51  ;;  %3037 = vmatmul.mubr.msk.bf16.gmra.mrb[36].mxu1 %vm177_vm0, %v1053_v48  ;;  %v4149_v24 = vld [vmem:[#allocation2 + $0xd0] sm:$0xff]  ;;  %990 = vst.msk [vmem:[#allocation3 + $0x60] sm:$0xff] %vm177_vm0, %v3309_v53  ;;  %991 = vst.msk [vmem:[#allocation3 + $0x68] sm:$0xff] %vm177_vm0, %v3309_v53 }
 0x256   :  { %976 = vst.msk [vmem:[#allocation2 + $0xf0] sm:$0xff] %vm177_vm0, %v944_v60  ;;  %v4141_v46 = vld [vmem:[#allocation2 + $0xc8] sm:$0xff]  ;;  %992 = vst.msk [vmem:[#allocation3 + $0x70] sm:$0xff] %vm177_vm0, %v3309_v53 }
 0x257   :  { %v907_v20 = vmul.f32 %v3923_v21, %v869_v49  ;;  %975 = vst.msk [vmem:[#allocation2 + $0xe8] sm:$0xff] %vm177_vm0, %v943_v39  ;;  %v1054_v61 = vpack.c.bf16 %v4141_v46, %v4139_v44  ;;  %993 = vst.msk [vmem:[#allocation3 + $0x78] sm:$0xff] %vm177_vm0, %v3309_v53 }
 0x258   :  { %994 = vst.msk [vmem:[#allocation3 + $0x80] sm:$0xff] %vm177_vm0, %v3309_v53  ;;  %995 = vst.msk [vmem:[#allocation3 + $0x88] sm:$0xff] %vm177_vm0, %v3309_v53 }
 0x259   :  { %v945_v38 = vadd.f32 %v3929_v63, %v907_v20  ;;  %3040 = vmatprep.mubr.msk.bf16.mxu1 %vm177_vm0, %v1054_v61  ;;  %v4156_v30 = vld [vmem:[#allocation2 + $0xe0] sm:$0xff]  ;;  %996 = vst.msk [vmem:[#allocation3 + $0x90] sm:$0xff] %vm177_vm0, %v3309_v53  ;;  %997 = vst.msk [vmem:[#allocation3 + $0x98] sm:$0xff] %vm177_vm0, %v3309_v53 }
 0x25a   :  { %v4151_v9 = vld [vmem:[#allocation2 + $0xd8] sm:$0xff]  ;;  %998 = vst.msk [vmem:[#allocation3 + $0xa0] sm:$0xff] %vm177_vm0, %v3309_v53  ;;  %999 = vst.msk [vmem:[#allocation3 + $0xa8] sm:$0xff] %vm177_vm0, %v3309_v53 }
 0x25b   :  { %977 = vst.msk [vmem:[#allocation2 + $0xf8] sm:$0xff] %vm177_vm0, %v945_v38  ;;  %v1055_v21 = vpack.c.bf16 %v4151_v9, %v4149_v24  ;;  %1000 = vst.msk [vmem:[#allocation3 + $0xb0] sm:$0xff] %vm177_vm0, %v3309_v53 }
 0x25c   :  { %1001 = vst.msk [vmem:[#allocation3 + $0xb8] sm:$0xff] %vm177_vm0, %v3309_v53  ;;  %1002 = vst.msk [vmem:[#allocation3 + $0xc0] sm:$0xff] %vm177_vm0, %v3309_v53 }
 0x25d   :  { %3041 = vmatmul.mubr.msk.bf16.gmra.mrb[40].mxu1 %vm177_vm0, %v1055_v21  ;;  %v4163_v1 = vld [vmem:[#allocation2 + $0xf0] sm:$0xff]  ;;  %1003 = vst.msk [vmem:[#allocation3 + $0xc8] sm:$0xff] %vm177_vm0, %v3309_v53  ;;  %1004 = vst.msk [vmem:[#allocation3 + $0xd0] sm:$0xff] %vm177_vm0, %v3309_v53 }
 0x25e   :  { %v4158_v27 = vld [vmem:[#allocation2 + $0xe8] sm:$0xff]  ;;  %1005 = vst.msk [vmem:[#allocation3 + $0xd8] sm:$0xff] %vm177_vm0, %v3309_v53  ;;  %1006 = vst.msk [vmem:[#allocation3 + $0xe0] sm:$0xff] %vm177_vm0, %v3309_v53 }
 0x25f   :  { %v1056_v63 = vpack.c.bf16 %v4158_v27, %v4156_v30  ;;  %1007 = vst.msk [vmem:[#allocation3 + $0xe8] sm:$0xff] %vm177_vm0, %v3309_v53  ;;  %1008 = vst.msk [vmem:[#allocation3 + $0xf0] sm:$0xff] %vm177_vm0, %v3309_v53 }
 0x260   :  { %1009 = vst.msk [vmem:[#allocation3 + $0xf8] sm:$0xff] %vm177_vm0, %v3309_v53 }
 0x261   :  { %3044 = vmatprep.mubr.msk.bf16.mxu1 %vm177_vm0, %v1056_v63 }
 0x262   :  { %v4165_v58 = vld [vmem:[#allocation2 + $0xf8] sm:$0xff] }
 0x263   :  { %v1057_v37 = vpack.c.bf16 %v4165_v58, %v4163_v1 }
 0x265   :  { %3045 = vmatmul.mubr.msk.bf16.gmra.mrb[44].mxu1 %vm177_vm0, %v1057_v37 }
 0x300   :  { %v3018_v13 = vpop.f32.mrb[16].mxu1 }
 0x301   :  { %v1173_v41 = vadd.f32 %v3018_v13, %v4208_v62  ;;  %v1164_v22 = vpop.f32.mrb[17].mxu1 }
 0x302   :  { %v1165_v2 = vadd.f32 %v4208_v62, %v1164_v22  ;;  %v3019_v6 = vpop.f32.mrb[18].mxu1 }
 0x303   :  { %v1176_v43 = vadd.f32 %v3019_v6, %v4208_v62  ;;  %v1167_v12 = vpop.f32.mrb[19].mxu1  ;;  %v1293_v4 = vmax.f32 %v1173_v41, 0.0 }
 0x304   :  { %v1168_v29 = vadd.f32 %v4208_v62, %v1167_v12  ;;  %v1291_v3 = vmax.f32 %v1165_v2, 0.0 }
 0x305   :  { %v1294_v11 = vmax.f32 %v1176_v43, 0.0 }
 0x306   :  { %v1292_v52 = vmax.f32 %v1168_v29, 0.0 }
 0x307   :  { %v1356_v56 = vpack.c.bf16 %v1294_v11, %v1293_v4 }
 0x308   :  { %v1355_v5 = vpack.c.bf16 %v1292_v52, %v1291_v3  ;;  %v3022_v16 = vpop.f32.mrb[20].mxu1 }
 0x309   :  { %v1189_v59 = vadd.f32 %v3022_v16, %v4208_v62  ;;  %v1180_v19 = vpop.f32.mrb[21].mxu1 }
 0x30a   :  { %v1181_v33 = vadd.f32 %v4208_v62, %v1180_v19  ;;  %v3023_v51 = vpop.f32.mrb[22].mxu1  ;;  %3056 = vmatprep.mubr.msk.bf16.mxu0 %vm1403_vm1, %v1355_v5 }
 0x30b   :  { %v1192_v48 = vadd.f32 %v3023_v51, %v4208_v62  ;;  %v1183_v60 = vpop.f32.mrb[23].mxu1  ;;  %3057 = vmatmul.mubr.msk.bf16.vlgmr.msra.gmra.mrb[16].mxu0 %vm1403_vm1, %v1356_v56  ;;  %v1297_v39 = vmax.f32 %v1189_v59, 0.0 }
 0x30c   :  { %v1184_v49 = vadd.f32 %v4208_v62, %v1183_v60  ;;  %v1295_v61 = vmax.f32 %v1181_v33, 0.0 }
 0x30d   :  { %v1298_v20 = vmax.f32 %v1192_v48, 0.0 }
 0x30e   :  { %v1296_v38 = vmax.f32 %v1184_v49, 0.0 }
 0x30f   :  { %v1358_v21 = vpack.c.bf16 %v1298_v20, %v1297_v39 }
 0x310   :  { %v1357_v63 = vpack.c.bf16 %v1296_v38, %v1295_v61  ;;  %v3026_v37 = vpop.f32.mrb[24].mxu1 }
 0x311   :  { %v1205_v0 = vadd.f32 %v3026_v37, %v4208_v62  ;;  %v1196_v53 = vpop.f32.mrb[25].mxu1 }
 0x312   :  { %v1197_v13 = vadd.f32 %v4208_v62, %v1196_v53  ;;  %v3027_v41 = vpop.f32.mrb[26].mxu1  ;;  %3060 = vmatprep.mubr.msk.bf16.mxu0 %vm1403_vm1, %v1357_v63 }
 0x313   :  { %v1208_v22 = vadd.f32 %v3027_v41, %v4208_v62  ;;  %v1199_v2 = vpop.f32.mrb[27].mxu1  ;;  %3061 = vmatmul.mubr.msk.bf16.gmra.mrb[20].mxu0 %vm1403_vm1, %v1358_v21  ;;  %v1301_v43 = vmax.f32 %v1205_v0, 0.0 }
 0x314   :  { %v1200_v6 = vadd.f32 %v4208_v62, %v1199_v2  ;;  %v1299_v29 = vmax.f32 %v1197_v13, 0.0 }
 0x315   :  { %v1302_v12 = vmax.f32 %v1208_v22, 0.0 }
 0x316   :  { %v1300_v4 = vmax.f32 %v1200_v6, 0.0 }
 0x317   :  { %v1360_v11 = vpack.c.bf16 %v1302_v12, %v1301_v43 }
 0x318   :  { %v1359_v3 = vpack.c.bf16 %v1300_v4, %v1299_v29  ;;  %v3030_v52 = vpop.f32.mrb[28].mxu1 }
 0x319   :  { %v1221_v56 = vadd.f32 %v3030_v52, %v4208_v62  ;;  %v1212_v5 = vpop.f32.mrb[29].mxu1 }
 0x31a   :  { %v1213_v16 = vadd.f32 %v4208_v62, %v1212_v5  ;;  %v3031_v59 = vpop.f32.mrb[30].mxu1  ;;  %3064 = vmatprep.mubr.msk.bf16.mxu0 %vm1403_vm1, %v1359_v3 }
 0x31b   :  { %v1224_v19 = vadd.f32 %v3031_v59, %v4208_v62  ;;  %v1215_v33 = vpop.f32.mrb[31].mxu1  ;;  %3065 = vmatmul.mubr.msk.bf16.gmra.mrb[24].mxu0 %vm1403_vm1, %v1360_v11  ;;  %v1305_v48 = vmax.f32 %v1221_v56, 0.0 }
 0x31c   :  { %v1216_v51 = vadd.f32 %v4208_v62, %v1215_v33  ;;  %v1303_v49 = vmax.f32 %v1213_v16, 0.0 }
 0x31d   :  { %v1306_v60 = vmax.f32 %v1224_v19, 0.0 }
 0x31e   :  { %v1304_v39 = vmax.f32 %v1216_v51, 0.0 }
 0x31f   :  { %v1362_v20 = vpack.c.bf16 %v1306_v60, %v1305_v48 }
 0x320   :  { %v1361_v61 = vpack.c.bf16 %v1304_v39, %v1303_v49  ;;  %v3034_v38 = vpop.f32.mrb[32].mxu1 }
 0x321   :  { %v1237_v21 = vadd.f32 %v3034_v38, %v4208_v62  ;;  %v1228_v63 = vpop.f32.mrb[33].mxu1 }
 0x322   :  { %v1229_v37 = vadd.f32 %v4208_v62, %v1228_v63  ;;  %v3035_v0 = vpop.f32.mrb[34].mxu1  ;;  %3068 = vmatprep.mubr.msk.bf16.mxu0 %vm1403_vm1, %v1361_v61 }
 0x323   :  { %v1240_v53 = vadd.f32 %v3035_v0, %v4208_v62  ;;  %v1231_v13 = vpop.f32.mrb[35].mxu1  ;;  %3069 = vmatmul.mubr.msk.bf16.gmra.mrb[28].mxu0 %vm1403_vm1, %v1362_v20  ;;  %v1309_v22 = vmax.f32 %v1237_v21, 0.0 }
 0x324   :  { %v1232_v41 = vadd.f32 %v4208_v62, %v1231_v13  ;;  %v1307_v6 = vmax.f32 %v1229_v37, 0.0 }
 0x325   :  { %v1310_v2 = vmax.f32 %v1240_v53, 0.0 }
 0x326   :  { %v1308_v43 = vmax.f32 %v1232_v41, 0.0 }
 0x327   :  { %v1364_v12 = vpack.c.bf16 %v1310_v2, %v1309_v22 }
 0x328   :  { %v1363_v29 = vpack.c.bf16 %v1308_v43, %v1307_v6  ;;  %v3038_v4 = vpop.f32.mrb[36].mxu1 }
 0x329   :  { %v1253_v11 = vadd.f32 %v3038_v4, %v4208_v62  ;;  %v1244_v3 = vpop.f32.mrb[37].mxu1 }
 0x32a   :  { %v1245_v52 = vadd.f32 %v4208_v62, %v1244_v3  ;;  %v3039_v56 = vpop.f32.mrb[38].mxu1  ;;  %3072 = vmatprep.mubr.msk.bf16.mxu0 %vm1403_vm1, %v1363_v29 }
 0x32b   :  { %v1256_v5 = vadd.f32 %v3039_v56, %v4208_v62  ;;  %v1247_v16 = vpop.f32.mrb[39].mxu1  ;;  %3073 = vmatmul.mubr.msk.bf16.gmra.mrb[32].mxu0 %vm1403_vm1, %v1364_v12  ;;  %v1313_v19 = vmax.f32 %v1253_v11, 0.0 }
 0x32c   :  { %v1248_v59 = vadd.f32 %v4208_v62, %v1247_v16  ;;  %v1311_v51 = vmax.f32 %v1245_v52, 0.0 }
 0x32d   :  { %v1314_v33 = vmax.f32 %v1256_v5, 0.0 }
 0x32e   :  { %v1312_v48 = vmax.f32 %v1248_v59, 0.0 }
 0x32f   :  { %v1366_v60 = vpack.c.bf16 %v1314_v33, %v1313_v19 }
 0x330   :  { %v1365_v49 = vpack.c.bf16 %v1312_v48, %v1311_v51  ;;  %v3042_v39 = vpop.f32.mrb[40].mxu1  ;;  %v1325_v48 = vld [vmem:[#allocation3 + $0x10] sm:$0xff] }
 0x331   :  { %v1269_v20 = vadd.f32 %v3042_v39, %v4208_v62  ;;  %v1260_v61 = vpop.f32.mrb[41].mxu1  ;;  %v1326_v39 = vld [vmem:[#allocation3 + $0x18] sm:$0xff] }
 0x332   :  { %v1261_v38 = vadd.f32 %v4208_v62, %v1260_v61  ;;  %v3043_v21 = vpop.f32.mrb[42].mxu1  ;;  %3076 = vmatprep.mubr.msk.bf16.mxu0 %vm1403_vm1, %v1365_v49 }
 0x333   :  { %v1272_v63 = vadd.f32 %v3043_v21, %v4208_v62  ;;  %v1263_v37 = vpop.f32.mrb[43].mxu1  ;;  %3077 = vmatmul.mubr.msk.bf16.gmra.mrb[36].mxu0 %vm1403_vm1, %v1366_v60  ;;  %v1317_v53 = vmax.f32 %v1269_v20, 0.0  ;;  %v1323_v60 = vld [vmem:[#allocation3] sm:$0xff] }
 0x334   :  { %v1264_v0 = vadd.f32 %v4208_v62, %v1263_v37  ;;  %v1315_v41 = vmax.f32 %v1261_v38, 0.0  ;;  %v1324_v38 = vld [vmem:[#allocation3 + $0x8] sm:$0xff] }
 0x335   :  { %v1318_v13 = vmax.f32 %v1272_v63, 0.0 }
 0x336   :  { %v1316_v22 = vmax.f32 %v1264_v0, 0.0 }
 0x337   :  { %v1368_v2 = vpack.c.bf16 %v1318_v13, %v1317_v53  ;;  %v1329_v53 = vld [vmem:[#allocation3 + $0x30] sm:$0xff]  ;;  %v1327_v13 = vld [vmem:[#allocation3 + $0x20] sm:$0xff] }
 0x338   :  { %v1367_v6 = vpack.c.bf16 %v1316_v22, %v1315_v41  ;;  %v3046_v43 = vpop.f32.mrb[44].mxu1  ;;  %v1330_v22 = vld [vmem:[#allocation3 + $0x38] sm:$0xff] }
 0x339   :  { %v1285_v12 = vadd.f32 %v3046_v43, %v4208_v62  ;;  %v1276_v29 = vpop.f32.mrb[45].mxu1  ;;  %v1328_v43 = vld [vmem:[#allocation3 + $0x28] sm:$0xff] }
 0x33a   :  { %v1277_v4 = vadd.f32 %v4208_v62, %v1276_v29  ;;  %v3047_v11 = vpop.f32.mrb[46].mxu1  ;;  %3080 = vmatprep.mubr.msk.bf16.mxu0 %vm1403_vm1, %v1367_v6 }
 0x33b   :  { %v1288_v3 = vadd.f32 %v3047_v11, %v4208_v62  ;;  %v1279_v52 = vpop.f32.mrb[47].mxu1  ;;  %3081 = vmatmul.mubr.msk.bf16.gmra.mrb[40].mxu0 %vm1403_vm1, %v1368_v2  ;;  %v1321_v5 = vmax.f32 %v1285_v12, 0.0  ;;  %v4265_v11 = vld [vmem:[%s5347_s8] ss:$0 sm:$0xff] }
 0x33c   :  { %v1280_v56 = vadd.f32 %v4208_v62, %v1279_v52  ;;  %v1319_v59 = vmax.f32 %v1277_v4, 0.0 }
 0x33d   :  { %v1322_v16 = vmax.f32 %v1288_v3, 0.0 }
 0x33e   :  { %v1320_v19 = vmax.f32 %v1280_v56, 0.0 }
 0x33f   :  { %v1370_v33 = vpack.c.bf16 %v1322_v16, %v1321_v5 }
 0x340   :  { %v1369_v51 = vpack.c.bf16 %v1320_v19, %v1319_v59 }
 0x342   :  { %3084 = vmatprep.mubr.msk.bf16.mxu0 %vm1403_vm1, %v1369_v51 }
 0x343   :  { %3085 = vmatmul.mubr.msk.bf16.gmra.mrb[44].mxu0 %vm1403_vm1, %v1370_v33 }
 0x3de   :  { %v3058_v49 = vpop.f32.mrb[16].mxu0 }
 0x3df   :  { %v1615_v20 = vadd.f32 %v3058_v49, %v1325_v48  ;;  %v1486_v61 = vpop.f32.mrb[17].mxu0 }
 0x3e0   :  { %v1613_v21 = vadd.f32 %v1486_v61, %v1323_v60  ;;  %v3059_v63 = vpop.f32.mrb[18].mxu0  ;;  %v1333_v60 = vld [vmem:[#allocation3 + $0x50] sm:$0xff] }
 0x3e1   :  { %1647 = vst.msk [vmem:[#allocation3 + $0x10] sm:$0xff] %vm177_vm0, %v1615_v20  ;;  %v1616_v62 = vadd.f32 %v3059_v63, %v1326_v39  ;;  %v1489_v37 = vpop.f32.mrb[19].mxu0  ;;  %v1331_v39 = vld [vmem:[#allocation3 + $0x40] sm:$0xff] }
 0x3e2   :  { %1645 = vst.msk [vmem:[#allocation3] sm:$0xff] %vm177_vm0, %v1613_v21  ;;  %v1614_v0 = vadd.f32 %v1489_v37, %v1324_v38  ;;  %v1334_v38 = vld [vmem:[#allocation3 + $0x58] sm:$0xff] }
 0x3e3   :  { %1648 = vst.msk [vmem:[#allocation3 + $0x18] sm:$0xff] %vm177_vm0, %v1616_v62  ;;  %v1332_v62 = vld [vmem:[#allocation3 + $0x48] sm:$0xff] }
 0x3e4   :  { %1646 = vst.msk [vmem:[#allocation3 + $0x8] sm:$0xff] %vm177_vm0, %v1614_v0 }
 0x3e6   :  { %v3062_v41 = vpop.f32.mrb[20].mxu0 }
 0x3e7   :  { %v1619_v2 = vadd.f32 %v3062_v41, %v1329_v53  ;;  %v1502_v6 = vpop.f32.mrb[21].mxu0 }
 0x3e8   :  { %v1617_v12 = vadd.f32 %v1502_v6, %v1327_v13  ;;  %v3063_v29 = vpop.f32.mrb[22].mxu0  ;;  %v1714_v4 = vld [vmem:[#allocation3 + $0x10] sm:$0xff] }
 0x3e9   :  { %1651 = vst.msk [vmem:[#allocation3 + $0x30] sm:$0xff] %vm177_vm0, %v1619_v2  ;;  %v1620_v3 = vadd.f32 %v3063_v29, %v1330_v22  ;;  %v1505_v52 = vpop.f32.mrb[23].mxu0  ;;  %v1746_v56 = vadd.f32 %v1714_v4, %v3975_v34  ;;  %v1712_v5 = vld [vmem:[#allocation3] sm:$0xff] }
 0x3ea   :  { %1649 = vst.msk [vmem:[#allocation3 + $0x20] sm:$0xff] %vm177_vm0, %v1617_v12  ;;  %v1618_v16 = vadd.f32 %v1505_v52, %v1328_v43  ;;  %v1715_v59 = vld [vmem:[#allocation3 + $0x18] sm:$0xff]  ;;  %v1744_v19 = vadd.f32 %v1712_v5, %v3960_v35 }
 0x3eb   :  { %1652 = vst.msk [vmem:[#allocation3 + $0x38] sm:$0xff] %vm177_vm0, %v1620_v3  ;;  %v4273_v33 = vadd.f32 %v4265_v11, %v1746_v56  ;;  %v1747_v51 = vadd.f32 %v1715_v59, %v3977_v55  ;;  %v1713_v48 = vld [vmem:[#allocation3 + $0x8] sm:$0xff] }
 0x3ec   :  { %1650 = vst.msk [vmem:[#allocation3 + $0x28] sm:$0xff] %vm177_vm0, %v1618_v16  ;;  %v1745_v34 = vadd.f32 %v1713_v48, %v3962_v18  ;;  %v4284_v35 = vadd.f32 %v4265_v11, %v1744_v19  ;;  %v1335_v16 = vld [vmem:[#allocation3 + $0x60] sm:$0xff] }
 0x3ed   :  { %v1823_v49 = vsel %vm177_vm0, %v4273_v33, 0.0  ;;  %v4281_v20 = vadd.f32 %v4265_v11, %v1747_v51 }
 0x3ee   :  { %1824 = vadd.xlane.f32.xlu0 %v1823_v49  ;;  %v3066_v61 = vpop.f32.mrb[24].mxu0  ;;  %v4289_v18 = vadd.f32 %v4265_v11, %v1745_v34  ;;  %v1817_v22 = vsel %vm177_vm0, %v4284_v35, 0.0  ;;  %v1336_v49 = vld [vmem:[#allocation3 + $0x68] sm:$0xff] }
 0x3ef   :  { %v1623_v55 = vadd.f32 %v3066_v61, %v1333_v60  ;;  %v1518_v21 = vpop.f32.mrb[25].mxu0  ;;  %v1826_v63 = vsel %vm177_vm0, %v4281_v20, 0.0 }
 0x3f0   :  { %v1621_v37 = vadd.f32 %v1518_v21, %v1331_v39  ;;  %1827 = vadd.xlane.f32.xlu1 %v1826_v63  ;;  %v3067_v0 = vpop.f32.mrb[26].mxu0  ;;  %v1718_v53 = vld [vmem:[#allocation3 + $0x30] sm:$0xff]  ;;  %v1820_v4 = vsel %vm177_vm0, %v4289_v18, 0.0 }
 0x3f1   :  { %1655 = vst.msk [vmem:[#allocation3 + $0x50] sm:$0xff] %vm177_vm0, %v1623_v55  ;;  %v1624_v13 = vadd.f32 %v3067_v0, %v1334_v38  ;;  %v1521_v41 = vpop.f32.mrb[27].mxu0  ;;  %v1750_v2 = vadd.f32 %v1718_v53, %v4005_v26  ;;  %v1716_v6 = vld [vmem:[#allocation3 + $0x20] sm:$0xff]  ;;  %v1337_v26 = vld [vmem:[#allocation3 + $0x70] sm:$0xff] }
 0x3f2   :  { %1653 = vst.msk [vmem:[#allocation3 + $0x40] sm:$0xff] %vm177_vm0, %v1621_v37  ;;  %v1622_v43 = vadd.f32 %v1521_v41, %v1332_v62  ;;  %1818 = vadd.xlane.f32.xlu0 %v1817_v22  ;;  %v1719_v12 = vld [vmem:[#allocation3 + $0x38] sm:$0xff]  ;;  %v1748_v29 = vadd.f32 %v1716_v6, %v3990_v47 }
 0x3f3   :  { %1656 = vst.msk [vmem:[#allocation3 + $0x58] sm:$0xff] %vm177_vm0, %v1624_v13  ;;  %v4301_v3 = vadd.f32 %v4265_v11, %v1750_v2  ;;  %v1751_v52 = vadd.f32 %v1719_v12, %v4007_v8  ;;  %v1717_v56 = vld [vmem:[#allocation3 + $0x28] sm:$0xff]  ;;  %v1338_v8 = vld [vmem:[#allocation3 + $0x78] sm:$0xff]  ;;  %v1339_v12 = vld [vmem:[#allocation3 + $0x80] sm:$0xff] }
 0x3f4   :  { %1654 = vst.msk [vmem:[#allocation3 + $0x48] sm:$0xff] %vm177_vm0, %v1622_v43  ;;  %1821 = vadd.xlane.f32.xlu1 %v1820_v4  ;;  %v1749_v5 = vadd.f32 %v1717_v56, %v3992_v15  ;;  %v4312_v19 = vadd.f32 %v4265_v11, %v1748_v29 }
 0x3f5   :  { %v1835_v47 = vsel %vm177_vm0, %v4301_v3, 0.0  ;;  %v4309_v59 = vadd.f32 %v4265_v11, %v1751_v52 }
 0x3f6   :  { %1836 = vadd.xlane.f32.xlu0 %v1835_v47  ;;  %v3070_v51 = vpop.f32.mrb[28].mxu0  ;;  %v4317_v15 = vadd.f32 %v4265_v11, %v1749_v5  ;;  %v1829_v63 = vsel %vm177_vm0, %v4312_v19, 0.0  ;;  %v1340_v47 = vld [vmem:[#allocation3 + $0x88] sm:$0xff] }
 0x3f7   :  { %v1627_v48 = vadd.f32 %v3070_v51, %v1337_v26  ;;  %v1534_v60 = vpop.f32.mrb[29].mxu0  ;;  %v1838_v34 = vsel %vm177_vm0, %v4309_v59, 0.0 }
 0x3f8   :  { %v1625_v39 = vadd.f32 %v1534_v60, %v1335_v16  ;;  %1839 = vadd.xlane.f32.xlu1 %v1838_v34  ;;  %v3071_v61 = vpop.f32.mrb[30].mxu0  ;;  %v1722_v38 = vld [vmem:[#allocation3 + $0x50] sm:$0xff]  ;;  %v1832_v41 = vsel %vm177_vm0, %v4317_v15, 0.0 }
 0x3f9   :  { %1659 = vst.msk [vmem:[#allocation3 + $0x70] sm:$0xff] %vm177_vm0, %v1627_v48  ;;  %v1628_v55 = vadd.f32 %v3071_v61, %v1338_v8  ;;  %v1537_v21 = vpop.f32.mrb[31].mxu0  ;;  %v1754_v62 = vadd.f32 %v1722_v38, %v4035_v36  ;;  %v1720_v37 = vld [vmem:[#allocation3 + $0x40] sm:$0xff]  ;;  %v1341_v36 = vld [vmem:[#allocation3 + $0x90] sm:$0xff] }
 0x3fa   :  { %1657 = vst.msk [vmem:[#allocation3 + $0x60] sm:$0xff] %vm177_vm0, %v1625_v39  ;;  %v1626_v0 = vadd.f32 %v1537_v21, %v1336_v49  ;;  %1830 = vadd.xlane.f32.xlu0 %v1829_v63  ;;  %v1723_v53 = vld [vmem:[#allocation3 + $0x58] sm:$0xff]  ;;  %v1752_v13 = vadd.f32 %v1720_v37, %v4020_v57 }
 0x3fb   :  { %1660 = vst.msk [vmem:[#allocation3 + $0x78] sm:$0xff] %vm177_vm0, %v1628_v55  ;;  %v4329_v22 = vadd.f32 %v4265_v11, %v1754_v62  ;;  %v1755_v2 = vadd.f32 %v1723_v53, %v4037_v25  ;;  %v1721_v6 = vld [vmem:[#allocation3 + $0x48] sm:$0xff]  ;;  %v1342_v25 = vld [vmem:[#allocation3 + $0x98] sm:$0xff]  ;;  %v1343_v53 = vld [vmem:[#allocation3 + $0xa0] sm:$0xff] }
 0x3fc   :  { %1658 = vst.msk [vmem:[#allocation3 + $0x68] sm:$0xff] %vm177_vm0, %v1626_v0  ;;  %1833 = vadd.xlane.f32.xlu1 %v1832_v41  ;;  %v1753_v43 = vadd.f32 %v1721_v6, %v4022_v54  ;;  %v4340_v4 = vadd.f32 %v4265_v11, %v1752_v13 }
 0x3fd   :  { %v1847_v57 = vsel %vm177_vm0, %v4329_v22, 0.0  ;;  %v4337_v29 = vadd.f32 %v4265_v11, %v1755_v2 }
 0x3fe   :  { %1848 = vadd.xlane.f32.xlu0 %v1847_v57  ;;  %v3074_v52 = vpop.f32.mrb[32].mxu0  ;;  %v4345_v54 = vadd.f32 %v4265_v11, %v1753_v43  ;;  %v1841_v34 = vsel %vm177_vm0, %v4340_v4, 0.0  ;;  %v1344_v57 = vld [vmem:[#allocation3 + $0xa8] sm:$0xff] }
 0x3ff   :  { %v1631_v56 = vadd.f32 %v3074_v52, %v1341_v36  ;;  %v1550_v26 = vpop.f32.mrb[33].mxu0  ;;  %v1850_v5 = vsel %vm177_vm0, %v4337_v29, 0.0 }
 0x400   :  { %v1629_v16 = vadd.f32 %v1550_v26, %v1339_v12  ;;  %1851 = vadd.xlane.f32.xlu1 %v1850_v5  ;;  %v3075_v51 = vpop.f32.mrb[34].mxu0  ;;  %v1726_v8 = vld [vmem:[#allocation3 + $0x70] sm:$0xff]  ;;  %v1844_v21 = vsel %vm177_vm0, %v4345_v54, 0.0 }
 0x401   :  { %1663 = vst.msk [vmem:[#allocation3 + $0x90] sm:$0xff] %vm177_vm0, %v1631_v56  ;;  %v1632_v48 = vadd.f32 %v3075_v51, %v1342_v25  ;;  %v1553_v60 = vpop.f32.mrb[35].mxu0  ;;  %v1758_v49 = vadd.f32 %v1726_v8, %v4065_v17  ;;  %v1724_v39 = vld [vmem:[#allocation3 + $0x60] sm:$0xff]  ;;  %v1345_v17 = vld [vmem:[#allocation3 + $0xb0] sm:$0xff] }
 0x402   :  { %1661 = vst.msk [vmem:[#allocation3 + $0x80] sm:$0xff] %vm177_vm0, %v1629_v16  ;;  %v1630_v61 = vadd.f32 %v1553_v60, %v1340_v47  ;;  %1842 = vadd.xlane.f32.xlu0 %v1841_v34  ;;  %v1727_v38 = vld [vmem:[#allocation3 + $0x78] sm:$0xff]  ;;  %v1756_v55 = vadd.f32 %v1724_v39, %v4050_v42 }
 0x403   :  { %1664 = vst.msk [vmem:[#allocation3 + $0x98] sm:$0xff] %vm177_vm0, %v1632_v48  ;;  %v4357_v63 = vadd.f32 %v4265_v11, %v1758_v49  ;;  %v1759_v62 = vadd.f32 %v1727_v38, %v4067_v40  ;;  %v1725_v37 = vld [vmem:[#allocation3 + $0x68] sm:$0xff]  ;;  %v1346_v40 = vld [vmem:[#allocation3 + $0xb8] sm:$0xff]  ;;  %v1347_v38 = vld [vmem:[#allocation3 + $0xc0] sm:$0xff] }
 0x404   :  { %1662 = vst.msk [vmem:[#allocation3 + $0x88] sm:$0xff] %vm177_vm0, %v1630_v61  ;;  %1845 = vadd.xlane.f32.xlu1 %v1844_v21  ;;  %v1757_v0 = vadd.f32 %v1725_v37, %v4052_v7  ;;  %v4368_v41 = vadd.f32 %v4265_v11, %v1756_v55 }
 0x405   :  { %v1859_v42 = vsel %vm177_vm0, %v4357_v63, 0.0  ;;  %v4365_v13 = vadd.f32 %v4265_v11, %v1759_v62 }
 0x406   :  { %1860 = vadd.xlane.f32.xlu0 %v1859_v42  ;;  %v3078_v2 = vpop.f32.mrb[36].mxu0  ;;  %v4373_v7 = vadd.f32 %v4265_v11, %v1757_v0  ;;  %v1853_v5 = vsel %vm177_vm0, %v4368_v41, 0.0  ;;  %v1348_v42 = vld [vmem:[#allocation3 + $0xc8] sm:$0xff] }
 0x407   :  { %v1635_v6 = vadd.f32 %v3078_v2, %v1345_v17  ;;  %v1566_v36 = vpop.f32.mrb[37].mxu0  ;;  %v1862_v43 = vsel %vm177_vm0, %v4365_v13, 0.0 }
 0x408   :  { %v1633_v12 = vadd.f32 %v1566_v36, %v1343_v53  ;;  %1863 = vadd.xlane.f32.xlu1 %v1862_v43  ;;  %v3079_v52 = vpop.f32.mrb[38].mxu0  ;;  %v1730_v25 = vld [vmem:[#allocation3 + $0x90] sm:$0xff]  ;;  %v1856_v60 = vsel %vm177_vm0, %v4373_v7, 0.0 }
 0x409   :  { %1667 = vst.msk [vmem:[#allocation3 + $0xb0] sm:$0xff] %vm177_vm0, %v1635_v6  ;;  %v1636_v56 = vadd.f32 %v3079_v52, %v1346_v40  ;;  %v1569_v26 = vpop.f32.mrb[39].mxu0  ;;  %v1762_v47 = vadd.f32 %v1730_v25, %v4095_v10  ;;  %v1728_v16 = vld [vmem:[#allocation3 + $0x80] sm:$0xff]  ;;  %v1349_v10 = vld [vmem:[#allocation3 + $0xd0] sm:$0xff] }
 0x40a   :  { %1665 = vst.msk [vmem:[#allocation3 + $0xa0] sm:$0xff] %vm177_vm0, %v1633_v12  ;;  %v1634_v51 = vadd.f32 %v1569_v26, %v1344_v57  ;;  %1854 = vadd.xlane.f32.xlu0 %v1853_v5  ;;  %v1731_v8 = vld [vmem:[#allocation3 + $0x98] sm:$0xff]  ;;  %v1760_v48 = vadd.f32 %v1728_v16, %v4080_v50 }
 0x40b   :  { %1668 = vst.msk [vmem:[#allocation3 + $0xb8] sm:$0xff] %vm177_vm0, %v1636_v56  ;;  %v4385_v34 = vadd.f32 %v4265_v11, %v1762_v47  ;;  %v1763_v49 = vadd.f32 %v1731_v8, %v4097_v45  ;;  %v1729_v39 = vld [vmem:[#allocation3 + $0x88] sm:$0xff]  ;;  %v1350_v45 = vld [vmem:[#allocation3 + $0xd8] sm:$0xff]  ;;  %v1351_v8 = vld [vmem:[#allocation3 + $0xe0] sm:$0xff] }
 0x40c   :  { %1666 = vst.msk [vmem:[#allocation3 + $0xa8] sm:$0xff] %vm177_vm0, %v1634_v51  ;;  %1857 = vadd.xlane.f32.xlu1 %v1856_v60  ;;  %v1761_v61 = vadd.f32 %v1729_v39, %v4082_v28  ;;  %v4396_v21 = vadd.f32 %v4265_v11, %v1760_v48 }
 0x40d   :  { %v1871_v50 = vsel %vm177_vm0, %v4385_v34, 0.0  ;;  %v4393_v55 = vadd.f32 %v4265_v11, %v1763_v49 }
 0x40e   :  { %1872 = vadd.xlane.f32.xlu0 %v1871_v50  ;;  %v3082_v62 = vpop.f32.mrb[40].mxu0  ;;  %v4401_v28 = vadd.f32 %v4265_v11, %v1761_v61  ;;  %v1865_v43 = vsel %vm177_vm0, %v4396_v21, 0.0  ;;  %v1352_v50 = vld [vmem:[#allocation3 + $0xe8] sm:$0xff] }
 0x40f   :  { %v1639_v37 = vadd.f32 %v3082_v62, %v1349_v10  ;;  %v1582_v17 = vpop.f32.mrb[41].mxu0  ;;  %v1874_v0 = vsel %vm177_vm0, %v4393_v55, 0.0 }
 0x410   :  { %v1637_v53 = vadd.f32 %v1582_v17, %v1347_v38  ;;  %1875 = vadd.xlane.f32.xlu1 %v1874_v0  ;;  %v3083_v2 = vpop.f32.mrb[42].mxu0  ;;  %v1734_v40 = vld [vmem:[#allocation3 + $0xb0] sm:$0xff]  ;;  %v1868_v26 = vsel %vm177_vm0, %v4401_v28, 0.0 }
 0x411   :  { %1671 = vst.msk [vmem:[#allocation3 + $0xd0] sm:$0xff] %vm177_vm0, %v1639_v37  ;;  %v1640_v6 = vadd.f32 %v3083_v2, %v1350_v45  ;;  %v1585_v36 = vpop.f32.mrb[43].mxu0  ;;  %v1766_v57 = vadd.f32 %v1734_v40, %v4125_v23  ;;  %v1732_v12 = vld [vmem:[#allocation3 + $0xa0] sm:$0xff]  ;;  %v1353_v23 = vld [vmem:[#allocation3 + $0xf0] sm:$0xff] }
 0x412   :  { %1669 = vst.msk [vmem:[#allocation3 + $0xc0] sm:$0xff] %vm177_vm0, %v1637_v53  ;;  %v1638_v52 = vadd.f32 %v1585_v36, %v1348_v42  ;;  %1866 = vadd.xlane.f32.xlu0 %v1865_v43  ;;  %v1735_v25 = vld [vmem:[#allocation3 + $0xb8] sm:$0xff]  ;;  %v1764_v56 = vadd.f32 %v1732_v12, %v4110_v14 }
 0x413   :  { %1672 = vst.msk [vmem:[#allocation3 + $0xd8] sm:$0xff] %vm177_vm0, %v1640_v6  ;;  %v4413_v5 = vadd.f32 %v4265_v11, %v1766_v57  ;;  %v1767_v47 = vadd.f32 %v1735_v25, %v4127_v32  ;;  %v1733_v16 = vld [vmem:[#allocation3 + $0xa8] sm:$0xff]  ;;  %v1354_v32 = vld [vmem:[#allocation3 + $0xf8] sm:$0xff] }
 0x414   :  { %1670 = vst.msk [vmem:[#allocation3 + $0xc8] sm:$0xff] %vm177_vm0, %v1638_v52  ;;  %1869 = vadd.xlane.f32.xlu1 %v1868_v26  ;;  %v1765_v51 = vadd.f32 %v1733_v16, %v4112_v31  ;;  %v4424_v60 = vadd.f32 %v4265_v11, %v1764_v56 }
 0x415   :  { %v1883_v14 = vsel %vm177_vm0, %v4413_v5, 0.0  ;;  %v4421_v48 = vadd.f32 %v4265_v11, %v1767_v47 }
 0x416   :  { %1884 = vadd.xlane.f32.xlu0 %v1883_v14  ;;  %v3086_v49 = vpop.f32.mrb[44].mxu0  ;;  %v4429_v31 = vadd.f32 %v4265_v11, %v1765_v51  ;;  %v1877_v0 = vsel %vm177_vm0, %v4424_v60, 0.0 }
 0x417   :  { %v1643_v39 = vadd.f32 %v3086_v49, %v1353_v23  ;;  %v1598_v10 = vpop.f32.mrb[45].mxu0  ;;  %v1886_v61 = vsel %vm177_vm0, %v4421_v48, 0.0 }
 0x418   :  { %v1641_v38 = vadd.f32 %v1598_v10, %v1351_v8  ;;  %1887 = vadd.xlane.f32.xlu1 %v1886_v61  ;;  %v3087_v62 = vpop.f32.mrb[46].mxu0  ;;  %v1738_v45 = vld [vmem:[#allocation3 + $0xd0] sm:$0xff]  ;;  %v1880_v36 = vsel %vm177_vm0, %v4429_v31, 0.0 }
 0x419   :  { %1675 = vst.msk [vmem:[#allocation3 + $0xf0] sm:$0xff] %vm177_vm0, %v1643_v39  ;;  %v1644_v37 = vadd.f32 %v3087_v62, %v1354_v32  ;;  %v1601_v17 = vpop.f32.mrb[47].mxu0  ;;  %v1770_v42 = vadd.f32 %v1738_v45, %v4149_v24  ;;  %v1736_v53 = vld [vmem:[#allocation3 + $0xc0] sm:$0xff] }
 0x41a   :  { %1673 = vst.msk [vmem:[#allocation3 + $0xe0] sm:$0xff] %vm177_vm0, %v1641_v38  ;;  %v1642_v2 = vadd.f32 %v1601_v17, %v1352_v50  ;;  %1878 = vadd.xlane.f32.xlu0 %v1877_v0  ;;  %v1739_v40 = vld [vmem:[#allocation3 + $0xd8] sm:$0xff]  ;;  %v1768_v6 = vadd.f32 %v1736_v53, %v4139_v44 }
 0x41b   :  { %1676 = vst.msk [vmem:[#allocation3 + $0xf8] sm:$0xff] %vm177_vm0, %v1644_v37  ;;  %v4441_v43 = vadd.f32 %v4265_v11, %v1770_v42  ;;  %v1771_v57 = vadd.f32 %v1739_v40, %v4151_v9  ;;  %v1737_v12 = vld [vmem:[#allocation3 + $0xc8] sm:$0xff] }
 0x41c   :  { %1674 = vst.msk [vmem:[#allocation3 + $0xe8] sm:$0xff] %vm177_vm0, %v1642_v2  ;;  %1881 = vadd.xlane.f32.xlu1 %v1880_v36  ;;  %v1769_v24 = vadd.f32 %v1737_v12, %v4141_v46  ;;  %v4452_v25 = vadd.f32 %v4265_v11, %v1768_v6 }
 0x41d   :  { %v1895_v52 = vsel %vm177_vm0, %v4441_v43, 0.0  ;;  %v4449_v44 = vadd.f32 %v4265_v11, %v1771_v57 }
 0x41e   :  { %1896 = vadd.xlane.f32.xlu0 %v1895_v52  ;;  %v4457_v9 = vadd.f32 %v4265_v11, %v1769_v24  ;;  %v1889_v46 = vsel %vm177_vm0, %v4452_v25, 0.0 }
 0x41f   :  { %v1898_v56 = vsel %vm177_vm0, %v4449_v44, 0.0 }
 0x420   :  { %1899 = vadd.xlane.f32.xlu1 %v1898_v56  ;;  %v1742_v26 = vld [vmem:[#allocation3 + $0xf0] sm:$0xff]  ;;  %v1892_v14 = vsel %vm177_vm0, %v4457_v9, 0.0 }
 0x421   :  { %v1740_v47 = vld [vmem:[#allocation3 + $0xe0] sm:$0xff]  ;;  %v1774_v23 = vadd.f32 %v1742_v26, %v4163_v1 }
 0x422   :  { %1890 = vadd.xlane.f32.xlu0 %v1889_v46  ;;  %v1772_v16 = vadd.f32 %v1740_v47, %v4156_v30  ;;  %v1743_v51 = vld [vmem:[#allocation3 + $0xf8] sm:$0xff] }
 0x423   :  { %v1741_v8 = vld [vmem:[#allocation3 + $0xe8] sm:$0xff]  ;;  %v1775_v39 = vadd.f32 %v1743_v51, %v4165_v58  ;;  %v4476_v1 = vadd.f32 %v4265_v11, %v1774_v23 }
 0x424   :  { %1893 = vadd.xlane.f32.xlu1 %v1892_v14  ;;  %v4466_v49 = vadd.f32 %v4265_v11, %v1772_v16  ;;  %v1773_v32 = vadd.f32 %v1741_v8, %v4158_v27 }
 0x425   :  { %v4481_v50 = vadd.f32 %v4265_v11, %v1775_v39  ;;  %v1907_v27 = vsel %vm177_vm0, %v4476_v1, 0.0 }
 0x426   :  { %v1901_v10 = vsel %vm177_vm0, %v4466_v49, 0.0  ;;  %v4473_v30 = vadd.f32 %v4265_v11, %v1773_v32 }
 0x427   :  { %1902 = vadd.xlane.f32.xlu0 %v1901_v10  ;;  %v1910_v58 = vsel %vm177_vm0, %v4481_v50, 0.0 }
 0x428   :  { %v1904_v61 = vsel %vm177_vm0, %v4473_v30, 0.0 }
 0x429   :  { %1905 = vadd.xlane.f32.xlu1 %v1904_v61 }
 0x42b   :  { %1908 = vadd.xlane.f32.xlu0 %v1907_v27 }
 0x42d   :  { %1911 = vadd.xlane.f32.xlu1 %v1910_v58 }
 0x47b   :  { %v1825_v38 = vpop.xlane.xlu0 %1824 }
 0x47c   :  { %v1916_v62 = vmul.f32 0.03125, %v1825_v38 }
 0x47d   :  { %v1828_v45 = vpop.xlane.xlu1 %1827 }
 0x47e   :  { %v4488_v37 = vsub.f32 %v4273_v33, %v1916_v62  ;;  %v1917_v17 = vmul.f32 0.03125, %v1828_v45 }
 0x47f   :  { %v1819_v0 = vpop.xlane.xlu0 %1818 }
 0x480   :  { %v4491_v11 = vsub.f32 %v4281_v20, %v1917_v17  ;;  %v1914_v42 = vmul.f32 0.03125, %v1819_v0  ;;  %v1980_v53 = vmul.f32 %v4488_v37, %v4488_v37 }
 0x481   :  { %v1822_v2 = vpop.xlane.xlu1 %1821 }
 0x482   :  { %v4496_v40 = vsub.f32 %v4284_v35, %v1914_v42  ;;  %v1915_v6 = vmul.f32 0.03125, %v1822_v2  ;;  %v2016_v36 = vsel %vm177_vm0, %v1980_v53, 0.0  ;;  %v1981_v33 = vmul.f32 %v4491_v11, %v4491_v11 }
 0x483   :  { %v1837_v57 = vpop.xlane.xlu0 %1836  ;;  %2017 = vadd.xlane.f32.xlu0 %v2016_v36 }
 0x484   :  { %v4502_v12 = vsub.f32 %v4289_v18, %v1915_v6  ;;  %v1920_v20 = vmul.f32 0.03125, %v1837_v57  ;;  %v2019_v24 = vsel %vm177_vm0, %v1981_v33, 0.0  ;;  %v1978_v52 = vmul.f32 %v4496_v40, %v4496_v40 }
 0x485   :  { %2020 = vadd.xlane.f32.xlu1 %v2019_v24  ;;  %v1840_v35 = vpop.xlane.xlu1 %1839 }
 0x486   :  { %v4508_v56 = vsub.f32 %v4301_v3, %v1920_v20  ;;  %v1921_v26 = vmul.f32 0.03125, %v1840_v35  ;;  %v2010_v46 = vsel %vm177_vm0, %v1978_v52, 0.0  ;;  %v1979_v47 = vmul.f32 %v4502_v12, %v4502_v12 }
 0x487   :  { %v1831_v16 = vpop.xlane.xlu0 %1830  ;;  %2011 = vadd.xlane.f32.xlu0 %v2010_v46 }
 0x488   :  { %v4514_v18 = vsub.f32 %v4309_v59, %v1921_v26  ;;  %v1918_v23 = vmul.f32 0.03125, %v1831_v16  ;;  %v2013_v51 = vsel %vm177_vm0, %v1979_v47, 0.0  ;;  %v1984_v14 = vmul.f32 %v4508_v56, %v4508_v56 }
 0x489   :  { %2014 = vadd.xlane.f32.xlu1 %v2013_v51  ;;  %v1834_v3 = vpop.xlane.xlu1 %1833 }
 0x48a   :  { %v4520_v8 = vsub.f32 %v4312_v19, %v1918_v23  ;;  %v1919_v32 = vmul.f32 0.03125, %v1834_v3  ;;  %v2028_v39 = vsel %vm177_vm0, %v1984_v14, 0.0  ;;  %v1985_v10 = vmul.f32 %v4514_v18, %v4514_v18 }
 0x48b   :  { %v1849_v61 = vpop.xlane.xlu0 %1848  ;;  %2029 = vadd.xlane.f32.xlu0 %v2028_v39 }
 0x48c   :  { %v4526_v59 = vsub.f32 %v4317_v15, %v1919_v32  ;;  %v1924_v27 = vmul.f32 0.03125, %v1849_v61  ;;  %v2031_v58 = vsel %vm177_vm0, %v1985_v10, 0.0  ;;  %v1982_v38 = vmul.f32 %v4520_v8, %v4520_v8 }
 0x48d   :  { %2032 = vadd.xlane.f32.xlu1 %v2031_v58  ;;  %v1852_v19 = vpop.xlane.xlu1 %1851 }
 0x48e   :  { %v4532_v62 = vsub.f32 %v4329_v22, %v1924_v27  ;;  %v1925_v45 = vmul.f32 0.03125, %v1852_v19  ;;  %v2022_v17 = vsel %vm177_vm0, %v1982_v38, 0.0  ;;  %v1983_v0 = vmul.f32 %v4526_v59, %v4526_v59 }
 0x48f   :  { %v1843_v42 = vpop.xlane.xlu0 %1842  ;;  %2023 = vadd.xlane.f32.xlu0 %v2022_v17 }
 0x490   :  { %v4538_v15 = vsub.f32 %v4337_v29, %v1925_v45  ;;  %v1922_v53 = vmul.f32 0.03125, %v1843_v42  ;;  %v2025_v2 = vsel %vm177_vm0, %v1983_v0, 0.0  ;;  %v1988_v6 = vmul.f32 %v4532_v62, %v4532_v62 }
 0x491   :  { %2026 = vadd.xlane.f32.xlu1 %v2025_v2  ;;  %v1846_v22 = vpop.xlane.xlu1 %1845 }
 0x492   :  { %v4544_v36 = vsub.f32 %v4340_v4, %v1922_v53  ;;  %v1923_v33 = vmul.f32 0.03125, %v1846_v22  ;;  %v2040_v57 = vsel %vm177_vm0, %v1988_v6, 0.0  ;;  %v1989_v20 = vmul.f32 %v4538_v15, %v4538_v15 }
 0x493   :  { %v1861_v24 = vpop.xlane.xlu0 %1860  ;;  %2041 = vadd.xlane.f32.xlu0 %v2040_v57 }
 0x494   :  { %v4550_v29 = vsub.f32 %v4345_v54, %v1923_v33  ;;  %v1928_v52 = vmul.f32 0.03125, %v1861_v24  ;;  %v2043_v35 = vsel %vm177_vm0, %v1989_v20, 0.0  ;;  %v1986_v26 = vmul.f32 %v4544_v36, %v4544_v36 }
 0x495   :  { %2044 = vadd.xlane.f32.xlu1 %v2043_v35  ;;  %v1864_v4 = vpop.xlane.xlu1 %1863 }
 0x496   :  { %v4556_v46 = vsub.f32 %v4357_v63, %v1928_v52  ;;  %v1929_v47 = vmul.f32 0.03125, %v1864_v4  ;;  %v2034_v16 = vsel %vm177_vm0, %v1986_v26, 0.0  ;;  %v1987_v23 = vmul.f32 %v4550_v29, %v4550_v29 }
 0x497   :  { %v1855_v51 = vpop.xlane.xlu0 %1854  ;;  %2035 = vadd.xlane.f32.xlu0 %v2034_v16 }
 0x498   :  { %v4562_v54 = vsub.f32 %v4365_v13, %v1929_v47  ;;  %v1926_v14 = vmul.f32 0.03125, %v1855_v51  ;;  %v2037_v3 = vsel %vm177_vm0, %v1987_v23, 0.0  ;;  %v1992_v32 = vmul.f32 %v4556_v46, %v4556_v46 }
 0x499   :  { %2038 = vadd.xlane.f32.xlu1 %v2037_v3  ;;  %v1858_v63 = vpop.xlane.xlu1 %1857 }
 0x49a   :  { %v4568_v39 = vsub.f32 %v4368_v41, %v1926_v14  ;;  %v1927_v10 = vmul.f32 0.03125, %v1858_v63  ;;  %v2052_v61 = vsel %vm177_vm0, %v1992_v32, 0.0  ;;  %v1993_v27 = vmul.f32 %v4562_v54, %v4562_v54 }
 0x49b   :  { %v1873_v58 = vpop.xlane.xlu0 %1872  ;;  %2053 = vadd.xlane.f32.xlu0 %v2052_v61 }
 0x49c   :  { %v4574_v13 = vsub.f32 %v4373_v7, %v1927_v10  ;;  %v1932_v38 = vmul.f32 0.03125, %v1873_v58  ;;  %v2055_v19 = vsel %vm177_vm0, %v1993_v27, 0.0  ;;  %v1990_v45 = vmul.f32 %v4568_v39, %v4568_v39 }
 0x49d   :  { %2056 = vadd.xlane.f32.xlu1 %v2055_v19  ;;  %v1876_v41 = vpop.xlane.xlu1 %1875 }
 0x49e   :  { %v4580_v17 = vsub.f32 %v4385_v34, %v1932_v38  ;;  %v1933_v0 = vmul.f32 0.03125, %v1876_v41  ;;  %v2046_v42 = vsel %vm177_vm0, %v1990_v45, 0.0  ;;  %v1991_v53 = vmul.f32 %v4574_v13, %v4574_v13 }
 0x49f   :  { %v1867_v2 = vpop.xlane.xlu0 %1866  ;;  %2047 = vadd.xlane.f32.xlu0 %v2046_v42 }
 0x4a0   :  { %v4586_v7 = vsub.f32 %v4393_v55, %v1933_v0  ;;  %v1930_v6 = vmul.f32 0.03125, %v1867_v2  ;;  %v2049_v22 = vsel %vm177_vm0, %v1991_v53, 0.0  ;;  %v1996_v33 = vmul.f32 %v4580_v17, %v4580_v17 }
 0x4a1   :  { %2050 = vadd.xlane.f32.xlu1 %v2049_v22  ;;  %v1870_v34 = vpop.xlane.xlu1 %1869 }
 0x4a2   :  { %v4592_v57 = vsub.f32 %v4396_v21, %v1930_v6  ;;  %v1931_v20 = vmul.f32 0.03125, %v1870_v34  ;;  %v2064_v24 = vsel %vm177_vm0, %v1996_v33, 0.0  ;;  %v1997_v52 = vmul.f32 %v4586_v7, %v4586_v7 }
 0x4a3   :  { %v1885_v35 = vpop.xlane.xlu0 %1884  ;;  %2065 = vadd.xlane.f32.xlu0 %v2064_v24 }
 0x4a4   :  { %v4598_v55 = vsub.f32 %v4401_v28, %v1931_v20  ;;  %v1936_v26 = vmul.f32 0.03125, %v1885_v35  ;;  %v2067_v4 = vsel %vm177_vm0, %v1997_v52, 0.0  ;;  %v1994_v47 = vmul.f32 %v4592_v57, %v4592_v57 }
 0x4a5   :  { %2068 = vadd.xlane.f32.xlu1 %v2067_v4  ;;  %v1888_v21 = vpop.xlane.xlu1 %1887 }
 0x4a6   :  { %v4604_v16 = vsub.f32 %v4413_v5, %v1936_v26  ;;  %v1937_v23 = vmul.f32 0.03125, %v1888_v21  ;;  %v2058_v51 = vsel %vm177_vm0, %v1994_v47, 0.0  ;;  %v1995_v14 = vmul.f32 %v4598_v55, %v4598_v55 }
 0x4a7   :  { %v1879_v3 = vpop.xlane.xlu0 %1878  ;;  %2059 = vadd.xlane.f32.xlu0 %v2058_v51 }
 0x4a8   :  { %v4610_v28 = vsub.f32 %v4421_v48, %v1937_v23  ;;  %v1934_v32 = vmul.f32 0.03125, %v1879_v3  ;;  %v2061_v63 = vsel %vm177_vm0, %v1995_v14, 0.0  ;;  %v2000_v10 = vmul.f32 %v4604_v16, %v4604_v16 }
 0x4a9   :  { %2062 = vadd.xlane.f32.xlu1 %v2061_v63  ;;  %v1882_v5 = vpop.xlane.xlu1 %1881 }
 0x4aa   :  { %v4616_v61 = vsub.f32 %v4424_v60, %v1934_v32  ;;  %v1935_v27 = vmul.f32 0.03125, %v1882_v5  ;;  %v2076_v58 = vsel %vm177_vm0, %v2000_v10, 0.0  ;;  %v2001_v38 = vmul.f32 %v4610_v28, %v4610_v28 }
 0x4ab   :  { %v1897_v19 = vpop.xlane.xlu0 %1896  ;;  %2077 = vadd.xlane.f32.xlu0 %v2076_v58 }
 0x4ac   :  { %v4622_v48 = vsub.f32 %v4429_v31, %v1935_v27  ;;  %v1940_v45 = vmul.f32 0.03125, %v1897_v19  ;;  %v2079_v41 = vsel %vm177_vm0, %v2001_v38, 0.0  ;;  %v1998_v0 = vmul.f32 %v4616_v61, %v4616_v61 }
 0x4ad   :  { %2080 = vadd.xlane.f32.xlu1 %v2079_v41  ;;  %v1900_v60 = vpop.xlane.xlu1 %1899 }
 0x4ae   :  { %v4628_v42 = vsub.f32 %v4441_v43, %v1940_v45  ;;  %v1941_v53 = vmul.f32 0.03125, %v1900_v60  ;;  %v2070_v2 = vsel %vm177_vm0, %v1998_v0, 0.0  ;;  %v1999_v6 = vmul.f32 %v4622_v48, %v4622_v48 }
 0x4af   :  { %v1891_v22 = vpop.xlane.xlu0 %1890  ;;  %2071 = vadd.xlane.f32.xlu0 %v2070_v2 }
 0x4b0   :  { %v4634_v31 = vsub.f32 %v4449_v44, %v1941_v53  ;;  %v1938_v33 = vmul.f32 0.03125, %v1891_v22  ;;  %v2073_v34 = vsel %vm177_vm0, %v1999_v6, 0.0  ;;  %v2004_v20 = vmul.f32 %v4628_v42, %v4628_v42 }
 0x4b1   :  { %2074 = vadd.xlane.f32.xlu1 %v2073_v34  ;;  %v1894_v43 = vpop.xlane.xlu1 %1893 }
 0x4b2   :  { %v4640_v24 = vsub.f32 %v4452_v25, %v1938_v33  ;;  %v1939_v52 = vmul.f32 0.03125, %v1894_v43  ;;  %v2088_v35 = vsel %vm177_vm0, %v2004_v20, 0.0  ;;  %v2005_v26 = vmul.f32 %v4634_v31, %v4634_v31 }
 0x4b3   :  { %2089 = vadd.xlane.f32.xlu0 %v2088_v35 }
 0x4b4   :  { %v4646_v44 = vsub.f32 %v4457_v9, %v1939_v52  ;;  %v1903_v4 = vpop.xlane.xlu0 %1902  ;;  %v2091_v47 = vsel %vm177_vm0, %v2005_v26, 0.0  ;;  %v2002_v21 = vmul.f32 %v4640_v24, %v4640_v24 }
 0x4b5   :  { %v1942_v23 = vmul.f32 0.03125, %v1903_v4  ;;  %2092 = vadd.xlane.f32.xlu1 %v2091_v47 }
 0x4b6   :  { %v1906_v25 = vpop.xlane.xlu1 %1905  ;;  %v2082_v51 = vsel %vm177_vm0, %v2002_v21, 0.0  ;;  %v2003_v14 = vmul.f32 %v4646_v44, %v4646_v44 }
 0x4b7   :  { %v4655_v3 = vsub.f32 %v4466_v49, %v1942_v23  ;;  %v1943_v32 = vmul.f32 0.03125, %v1906_v25  ;;  %2083 = vadd.xlane.f32.xlu0 %v2082_v51 }
 0x4b8   :  { %v1909_v9 = vpop.xlane.xlu0 %1908  ;;  %v2085_v63 = vsel %vm177_vm0, %v2003_v14, 0.0 }
 0x4b9   :  { %v4659_v10 = vsub.f32 %v4473_v30, %v1943_v32  ;;  %v1944_v5 = vmul.f32 0.03125, %v1909_v9  ;;  %2086 = vadd.xlane.f32.xlu1 %v2085_v63  ;;  %v2006_v27 = vmul.f32 %v4655_v3, %v4655_v3 }
 0x4ba   :  { %v1912_v58 = vpop.xlane.xlu1 %1911 }
 0x4bb   :  { %v4664_v38 = vsub.f32 %v4476_v1, %v1944_v5  ;;  %v1945_v19 = vmul.f32 0.03125, %v1912_v58  ;;  %v2094_v49 = vsel %vm177_vm0, %v2006_v27, 0.0  ;;  %v2007_v45 = vmul.f32 %v4659_v10, %v4659_v10 }
 0x4bc   :  { %2095 = vadd.xlane.f32.xlu0 %v2094_v49 }
 0x4bd   :  { %v4670_v41 = vsub.f32 %v4481_v50, %v1945_v19  ;;  %v2097_v30 = vsel %vm177_vm0, %v2007_v45, 0.0  ;;  %v2008_v0 = vmul.f32 %v4664_v38, %v4664_v38  ;;  %v4682_v19 = vld [vmem:[%s5348_s9] ss:$0 sm:$0xff] }
 0x4be   :  { %2098 = vadd.xlane.f32.xlu1 %v2097_v30 }
 0x4bf   :  { %v2100_v60 = vsel %vm177_vm0, %v2008_v0, 0.0  ;;  %v2009_v1 = vmul.f32 %v4670_v41, %v4670_v41 }
 0x4c0   :  { %2101 = vadd.xlane.f32.xlu0 %v2100_v60 }
 0x4c1   :  { %v2103_v53 = vsel %vm177_vm0, %v2009_v1, 0.0  ;;  %v4688_v1 = vld [vmem:[%s5349_s10] ss:$0 sm:$0xff] }
 0x4c2   :  { %2104 = vadd.xlane.f32.xlu1 %v2103_v53 }
 0x510   :  { %v2018_v2 = vpop.xlane.xlu0 %2017 }
 0x511   :  { %v2108_v6 = vmul.f32 0.03125, %v2018_v2 }
 0x512   :  { %v2021_v22 = vpop.xlane.xlu1 %2020 }
 0x513   :  { %v2140_v50 = vadd.f32 1e-05, %v2108_v6  ;;  %v2109_v33 = vmul.f32 0.03125, %v2021_v22 }
 0x514   :  { %v2012_v34 = vpop.xlane.xlu0 %2011 }
 0x515   :  { %3181 = vrsqrt.f32 %v2140_v50  ;;  %v2141_v20 = vadd.f32 1e-05, %v2109_v33  ;;  %v2106_v43 = vmul.f32 0.03125, %v2012_v34 }
 0x516   :  { %v2015_v52 = vpop.xlane.xlu1 %2014 }
 0x517   :  { %3183 = vrsqrt.f32 %v2141_v20  ;;  %v2138_v35 = vadd.f32 1e-05, %v2106_v43  ;;  %v2107_v26 = vmul.f32 0.03125, %v2015_v52 }
 0x518   :  { %v2030_v4 = vpop.xlane.xlu0 %2029 }
 0x519   :  { %3185 = vrsqrt.f32 %v2138_v35  ;;  %v2139_v47 = vadd.f32 1e-05, %v2107_v26  ;;  %v2112_v21 = vmul.f32 0.03125, %v2030_v4 }
 0x51a   :  { %v2033_v23 = vpop.xlane.xlu1 %2032 }
 0x51b   :  { %3187 = vrsqrt.f32 %v2139_v47  ;;  %v2144_v25 = vadd.f32 1e-05, %v2112_v21  ;;  %v2113_v51 = vmul.f32 0.03125, %v2033_v23 }
 0x51c   :  { %v2024_v14 = vpop.xlane.xlu0 %2023 }
 0x51d   :  { %3189 = vrsqrt.f32 %v2144_v25  ;;  %v2145_v32 = vadd.f32 1e-05, %v2113_v51  ;;  %v2110_v9 = vmul.f32 0.03125, %v2024_v14 }
 0x51e   :  { %v2027_v63 = vpop.xlane.xlu1 %2026 }
 0x51f   :  { %v3182_v5 = vpop.eup %3181  ;;  %3191 = vrsqrt.f32 %v2145_v32  ;;  %v2142_v27 = vadd.f32 1e-05, %v2110_v9  ;;  %v2111_v58 = vmul.f32 0.03125, %v2027_v63 }
 0x520   :  { %v2042_v49 = vpop.xlane.xlu0 %2041  ;;  %v2204_v45 = vmul.f32 %v3182_v5, %v4488_v37 }
 0x521   :  { %v3184_v30 = vpop.eup %3183  ;;  %3193 = vrsqrt.f32 %v2142_v27  ;;  %v2143_v0 = vadd.f32 1e-05, %v2111_v58  ;;  %v2116_v60 = vmul.f32 0.03125, %v2042_v49 }
 0x522   :  { %v2045_v53 = vpop.xlane.xlu1 %2044  ;;  %v2242_v2 = vmul.f32 %v4682_v19, %v2204_v45  ;;  %v2205_v6 = vmul.f32 %v3184_v30, %v4491_v11 }
 0x523   :  { %v3186_v22 = vpop.eup %3185  ;;  %3195 = vrsqrt.f32 %v2143_v0  ;;  %v2148_v50 = vadd.f32 1e-05, %v2116_v60  ;;  %v2117_v33 = vmul.f32 0.03125, %v2045_v53 }
 0x524   :  { %v2036_v34 = vpop.xlane.xlu0 %2035  ;;  %v4693_v37 = vadd.f32 %v4688_v1, %v2242_v2  ;;  %v2243_v20 = vmul.f32 %v4682_v19, %v2205_v6  ;;  %v2202_v43 = vmul.f32 %v3186_v22, %v4496_v40 }
 0x525   :  { %v3188_v52 = vpop.eup %3187  ;;  %3197 = vrsqrt.f32 %v2148_v50  ;;  %v2149_v35 = vadd.f32 1e-05, %v2117_v33  ;;  %v2114_v26 = vmul.f32 0.03125, %v2036_v34 }
 0x526   :  { %v2039_v4 = vpop.xlane.xlu1 %2038  ;;  %v2318_v11 = vsel %vm177_vm0, %v4693_v37, 0.0  ;;  %v4700_v47 = vadd.f32 %v4688_v1, %v2243_v20  ;;  %v2240_v21 = vmul.f32 %v4682_v19, %v2202_v43  ;;  %v2203_v23 = vmul.f32 %v3188_v52, %v4502_v12 }
 0x527   :  { %v3190_v25 = vpop.eup %3189  ;;  %3199 = vrsqrt.f32 %v2149_v35  ;;  %v2146_v51 = vadd.f32 1e-05, %v2114_v26  ;;  %v2115_v14 = vmul.f32 0.03125, %v2039_v4  ;;  %2319 = vadd.xlane.f32.xlu0 %v2318_v11 }
 0x528   :  { %v2054_v40 = vpop.xlane.xlu0 %2053  ;;  %v2321_v32 = vsel %vm177_vm0, %v4700_v47, 0.0  ;;  %v4707_v9 = vadd.f32 %v4688_v1, %v2240_v21  ;;  %v2241_v63 = vmul.f32 %v4682_v19, %v2203_v23  ;;  %v2208_v5 = vmul.f32 %v3190_v25, %v4508_v56 }
 0x529   :  { %v3192_v27 = vpop.eup %3191  ;;  %3201 = vrsqrt.f32 %v2146_v51  ;;  %v2147_v58 = vadd.f32 1e-05, %v2115_v14  ;;  %v2120_v12 = vmul.f32 0.03125, %v2054_v40  ;;  %2322 = vadd.xlane.f32.xlu1 %v2321_v32 }
 0x52a   :  { %v2057_v49 = vpop.xlane.xlu1 %2056  ;;  %v2312_v45 = vsel %vm177_vm0, %v4707_v9, 0.0  ;;  %v4714_v30 = vadd.f32 %v4688_v1, %v2241_v63  ;;  %v2246_v0 = vmul.f32 %v4682_v19, %v2208_v5  ;;  %v2209_v60 = vmul.f32 %v3192_v27, %v4514_v18 }
 0x52b   :  { %v3194_v53 = vpop.eup %3193  ;;  %3203 = vrsqrt.f32 %v2147_v58  ;;  %v2152_v2 = vadd.f32 1e-05, %v2120_v12  ;;  %v2121_v56 = vmul.f32 0.03125, %v2057_v49  ;;  %2313 = vadd.xlane.f32.xlu0 %v2312_v45 }
 0x52c   :  { %v2048_v6 = vpop.xlane.xlu0 %2047  ;;  %v2315_v22 = vsel %vm177_vm0, %v4714_v30, 0.0  ;;  %v4721_v50 = vadd.f32 %v4688_v1, %v2246_v0  ;;  %v2247_v33 = vmul.f32 %v4682_v19, %v2209_v60  ;;  %v2206_v34 = vmul.f32 %v3194_v53, %v4520_v8 }
 0x52d   :  { %v3196_v20 = vpop.eup %3195  ;;  %3205 = vrsqrt.f32 %v2152_v2  ;;  %v2153_v43 = vadd.f32 1e-05, %v2121_v56  ;;  %v2118_v18 = vmul.f32 0.03125, %v2048_v6  ;;  %2316 = vadd.xlane.f32.xlu1 %v2315_v22 }
 0x52e   :  { %v2051_v52 = vpop.xlane.xlu1 %2050  ;;  %v2330_v35 = vsel %vm177_vm0, %v4721_v50, 0.0  ;;  %v4728_v26 = vadd.f32 %v4688_v1, %v2247_v33  ;;  %v2244_v4 = vmul.f32 %v4682_v19, %v2206_v34  ;;  %v2207_v11 = vmul.f32 %v3196_v20, %v4526_v59 }
 0x52f   :  { %v3198_v21 = vpop.eup %3197  ;;  %3207 = vrsqrt.f32 %v2153_v43  ;;  %v2150_v23 = vadd.f32 1e-05, %v2118_v18  ;;  %v2119_v8 = vmul.f32 0.03125, %v2051_v52  ;;  %2331 = vadd.xlane.f32.xlu0 %v2330_v35 }
 0x530   :  { %v2066_v25 = vpop.xlane.xlu0 %2065  ;;  %v2333_v51 = vsel %vm177_vm0, %v4728_v26, 0.0  ;;  %v4735_v14 = vadd.f32 %v4688_v1, %v2244_v4  ;;  %v2245_v40 = vmul.f32 %v4682_v19, %v2207_v11  ;;  %v2212_v32 = vmul.f32 %v3198_v21, %v4532_v62 }
 0x531   :  { %v3200_v63 = vpop.eup %3199  ;;  %3209 = vrsqrt.f32 %v2150_v23  ;;  %v2151_v5 = vadd.f32 1e-05, %v2119_v8  ;;  %v2124_v59 = vmul.f32 0.03125, %v2066_v25  ;;  %2334 = vadd.xlane.f32.xlu1 %v2333_v51 }
 0x532   :  { %v2069_v27 = vpop.xlane.xlu1 %2068  ;;  %v2324_v58 = vsel %vm177_vm0, %v4735_v14, 0.0  ;;  %v4742_v12 = vadd.f32 %v4688_v1, %v2245_v40  ;;  %v2250_v49 = vmul.f32 %v4682_v19, %v2212_v32  ;;  %v2213_v45 = vmul.f32 %v3200_v63, %v4538_v15 }
 0x533   :  { %v3202_v0 = vpop.eup %3201  ;;  %3211 = vrsqrt.f32 %v2151_v5  ;;  %v2156_v60 = vadd.f32 1e-05, %v2124_v59  ;;  %v2125_v62 = vmul.f32 0.03125, %v2069_v27  ;;  %2325 = vadd.xlane.f32.xlu0 %v2324_v58 }
 0x534   :  { %v2060_v53 = vpop.xlane.xlu0 %2059  ;;  %v2327_v2 = vsel %vm177_vm0, %v4742_v12, 0.0  ;;  %v4749_v56 = vadd.f32 %v4688_v1, %v2250_v49  ;;  %v2251_v6 = vmul.f32 %v4682_v19, %v2213_v45  ;;  %v2210_v22 = vmul.f32 %v3202_v0, %v4544_v36 }
 0x535   :  { %v3204_v33 = vpop.eup %3203  ;;  %3213 = vrsqrt.f32 %v2156_v60  ;;  %v2157_v34 = vadd.f32 1e-05, %v2125_v62  ;;  %v2122_v15 = vmul.f32 0.03125, %v2060_v53  ;;  %2328 = vadd.xlane.f32.xlu1 %v2327_v2 }
 0x536   :  { %v2063_v20 = vpop.xlane.xlu1 %2062  ;;  %v2342_v43 = vsel %vm177_vm0, %v4749_v56, 0.0  ;;  %v4756_v18 = vadd.f32 %v4688_v1, %v2251_v6  ;;  %v2248_v52 = vmul.f32 %v4682_v19, %v2210_v22  ;;  %v2211_v35 = vmul.f32 %v3204_v33, %v4550_v29 }
 0x537   :  { %v3206_v4 = vpop.eup %3205  ;;  %3215 = vrsqrt.f32 %v2157_v34  ;;  %v2154_v11 = vadd.f32 1e-05, %v2122_v15  ;;  %v2123_v36 = vmul.f32 0.03125, %v2063_v20  ;;  %2343 = vadd.xlane.f32.xlu0 %v2342_v43 }
 0x538   :  { %v2078_v21 = vpop.xlane.xlu0 %2077  ;;  %v2345_v23 = vsel %vm177_vm0, %v4756_v18, 0.0  ;;  %v4763_v8 = vadd.f32 %v4688_v1, %v2248_v52  ;;  %v2249_v25 = vmul.f32 %v4682_v19, %v2211_v35  ;;  %v2216_v51 = vmul.f32 %v3206_v4, %v4556_v46 }
 0x539   :  { %v3208_v40 = vpop.eup %3207  ;;  %3217 = vrsqrt.f32 %v2154_v11  ;;  %v2155_v32 = vadd.f32 1e-05, %v2123_v36  ;;  %v2128_v29 = vmul.f32 0.03125, %v2078_v21  ;;  %2346 = vadd.xlane.f32.xlu1 %v2345_v23 }
 0x53a   :  { %v2081_v63 = vpop.xlane.xlu1 %2080  ;;  %v2336_v5 = vsel %vm177_vm0, %v4763_v8, 0.0  ;;  %v4770_v59 = vadd.f32 %v4688_v1, %v2249_v25  ;;  %v2254_v27 = vmul.f32 %v4682_v19, %v2216_v51  ;;  %v2217_v58 = vmul.f32 %v3208_v40, %v4562_v54 }
 0x53b   :  { %v3210_v49 = vpop.eup %3209  ;;  %3219 = vrsqrt.f32 %v2155_v32  ;;  %v2160_v45 = vadd.f32 1e-05, %v2128_v29  ;;  %v2129_v46 = vmul.f32 0.03125, %v2081_v63  ;;  %2337 = vadd.xlane.f32.xlu0 %v2336_v5 }
 0x53c   :  { %v2072_v0 = vpop.xlane.xlu0 %2071  ;;  %v2339_v60 = vsel %vm177_vm0, %v4770_v59, 0.0  ;;  %v4777_v62 = vadd.f32 %v4688_v1, %v2254_v27  ;;  %v2255_v53 = vmul.f32 %v4682_v19, %v2217_v58  ;;  %v2214_v2 = vmul.f32 %v3210_v49, %v4568_v39 }
 0x53d   :  { %v3212_v6 = vpop.eup %3211  ;;  %3221 = vrsqrt.f32 %v2160_v45  ;;  %v2161_v22 = vadd.f32 1e-05, %v2129_v46  ;;  %v2126_v54 = vmul.f32 0.03125, %v2072_v0  ;;  %2340 = vadd.xlane.f32.xlu1 %v2339_v60 }
 0x53e   :  { %v2075_v33 = vpop.xlane.xlu1 %2074  ;;  %v2354_v34 = vsel %vm177_vm0, %v4777_v62, 0.0  ;;  %v4784_v15 = vadd.f32 %v4688_v1, %v2255_v53  ;;  %v2252_v20 = vmul.f32 %v4682_v19, %v2214_v2  ;;  %v2215_v43 = vmul.f32 %v3212_v6, %v4574_v13 }
 0x53f   :  { %v3214_v52 = vpop.eup %3213  ;;  %3223 = vrsqrt.f32 %v2161_v22  ;;  %v2158_v35 = vadd.f32 1e-05, %v2126_v54  ;;  %v2127_v39 = vmul.f32 0.03125, %v2075_v33  ;;  %2355 = vadd.xlane.f32.xlu0 %v2354_v34 }
 0x540   :  { %v2090_v4 = vpop.xlane.xlu0 %2089  ;;  %v2357_v11 = vsel %vm177_vm0, %v4784_v15, 0.0  ;;  %v4791_v36 = vadd.f32 %v4688_v1, %v2252_v20  ;;  %v2253_v21 = vmul.f32 %v4682_v19, %v2215_v43  ;;  %v2220_v23 = vmul.f32 %v3214_v52, %v4580_v17 }
 0x541   :  { %v3216_v25 = vpop.eup %3215  ;;  %3225 = vrsqrt.f32 %v2158_v35  ;;  %v2159_v51 = vadd.f32 1e-05, %v2127_v39  ;;  %v2132_v13 = vmul.f32 0.03125, %v2090_v4  ;;  %2358 = vadd.xlane.f32.xlu1 %v2357_v11 }
 0x542   :  { %v2093_v40 = vpop.xlane.xlu1 %2092  ;;  %v2348_v32 = vsel %vm177_vm0, %v4791_v36, 0.0  ;;  %v4798_v29 = vadd.f32 %v4688_v1, %v2253_v21  ;;  %v2258_v63 = vmul.f32 %v4682_v19, %v2220_v23  ;;  %v2221_v5 = vmul.f32 %v3216_v25, %v4586_v7 }
 0x543   :  { %v3218_v27 = vpop.eup %3217  ;;  %3227 = vrsqrt.f32 %v2159_v51  ;;  %v2164_v58 = vadd.f32 1e-05, %v2132_v13  ;;  %v2133_v17 = vmul.f32 0.03125, %v2093_v40  ;;  %2349 = vadd.xlane.f32.xlu0 %v2348_v32 }
 0x544   :  { %v2084_v49 = vpop.xlane.xlu0 %2083  ;;  %v2351_v45 = vsel %vm177_vm0, %v4798_v29, 0.0  ;;  %v4805_v46 = vadd.f32 %v4688_v1, %v2258_v63  ;;  %v2259_v0 = vmul.f32 %v4682_v19, %v2221_v5  ;;  %v2218_v60 = vmul.f32 %v3218_v27, %v4592_v57 }
 0x545   :  { %v3220_v53 = vpop.eup %3219  ;;  %3229 = vrsqrt.f32 %v2164_v58  ;;  %v2165_v2 = vadd.f32 1e-05, %v2133_v17  ;;  %v2130_v7 = vmul.f32 0.03125, %v2084_v49  ;;  %2352 = vadd.xlane.f32.xlu1 %v2351_v45 }
 0x546   :  { %v2087_v6 = vpop.xlane.xlu1 %2086  ;;  %v2366_v22 = vsel %vm177_vm0, %v4805_v46, 0.0  ;;  %v4812_v54 = vadd.f32 %v4688_v1, %v2259_v0  ;;  %v2256_v33 = vmul.f32 %v4682_v19, %v2218_v60  ;;  %v2219_v34 = vmul.f32 %v3220_v53, %v4598_v55 }
 0x547   :  { %v3222_v20 = vpop.eup %3221  ;;  %3231 = vrsqrt.f32 %v2165_v2  ;;  %v2162_v43 = vadd.f32 1e-05, %v2130_v7  ;;  %v2131_v57 = vmul.f32 0.03125, %v2087_v6  ;;  %2367 = vadd.xlane.f32.xlu0 %v2366_v22 }
 0x548   :  { %v2369_v52 = vsel %vm177_vm0, %v4812_v54, 0.0  ;;  %v4819_v35 = vadd.f32 %v4688_v1, %v2256_v33  ;;  %v2257_v39 = vmul.f32 %v4682_v19, %v2219_v34  ;;  %v2224_v4 = vmul.f32 %v3222_v20, %v4604_v16 }
 0x549   :  { %v3224_v11 = vpop.eup %3223  ;;  %3233 = vrsqrt.f32 %v2162_v43  ;;  %v2163_v21 = vadd.f32 1e-05, %v2131_v57  ;;  %v2096_v23 = vpop.xlane.xlu0 %2095  ;;  %2370 = vadd.xlane.f32.xlu1 %v2369_v52 }
 0x54a   :  { %v2134_v55 = vmul.f32 0.03125, %v2096_v23  ;;  %v2360_v25 = vsel %vm177_vm0, %v4819_v35, 0.0  ;;  %v4826_v51 = vadd.f32 %v4688_v1, %v2257_v39  ;;  %v2262_v13 = vmul.f32 %v4682_v19, %v2224_v4 }
 0x54b   :  { %v3226_v40 = vpop.eup %3225  ;;  %3235 = vrsqrt.f32 %v2163_v21  ;;  %2361 = vadd.xlane.f32.xlu0 %v2360_v25  ;;  %v2099_v32 = vpop.xlane.xlu1 %2098  ;;  %v2225_v16 = vmul.f32 %v3224_v11, %v4610_v28 }
 0x54c   :  { %v2166_v63 = vadd.f32 1e-05, %v2134_v55  ;;  %v2135_v5 = vmul.f32 0.03125, %v2099_v32  ;;  %v2363_v27 = vsel %vm177_vm0, %v4826_v51, 0.0  ;;  %v4833_v58 = vadd.f32 %v4688_v1, %v2262_v13 }
 0x54d   :  { %v3228_v17 = vpop.eup %3227  ;;  %v2102_v49 = vpop.xlane.xlu0 %2101  ;;  %2364 = vadd.xlane.f32.xlu1 %v2363_v27  ;;  %v2263_v45 = vmul.f32 %v4682_v19, %v2225_v16  ;;  %v2222_v0 = vmul.f32 %v3226_v40, %v4616_v61 }
 0x54e   :  { %3237 = vrsqrt.f32 %v2166_v63  ;;  %v2167_v60 = vadd.f32 1e-05, %v2135_v5  ;;  %v2136_v53 = vmul.f32 0.03125, %v2102_v49  ;;  %v2378_v28 = vsel %vm177_vm0, %v4833_v58, 0.0 }
 0x54f   :  { %v3230_v2 = vpop.eup %3229  ;;  %2379 = vadd.xlane.f32.xlu0 %v2378_v28  ;;  %v2105_v7 = vpop.xlane.xlu1 %2104  ;;  %v4840_v6 = vadd.f32 %v4688_v1, %v2263_v45  ;;  %v2260_v22 = vmul.f32 %v4682_v19, %v2222_v0  ;;  %v2223_v33 = vmul.f32 %v3228_v17, %v4622_v48 }
 0x550   :  { %3239 = vrsqrt.f32 %v2167_v60  ;;  %v2168_v34 = vadd.f32 1e-05, %v2136_v53  ;;  %v2137_v20 = vmul.f32 0.03125, %v2105_v7  ;;  %v2228_v61 = vmul.f32 %v3230_v2, %v4628_v42 }
 0x551   :  { %v3232_v43 = vpop.eup %3231  ;;  %v2381_v57 = vsel %vm177_vm0, %v4840_v6, 0.0  ;;  %v4848_v52 = vadd.f32 %v4688_v1, %v2260_v22  ;;  %v2261_v39 = vmul.f32 %v4682_v19, %v2223_v33 }
 0x552   :  { %3241 = vrsqrt.f32 %v2168_v34  ;;  %v2169_v4 = vadd.f32 1e-05, %v2137_v20  ;;  %2382 = vadd.xlane.f32.xlu1 %v2381_v57  ;;  %v2266_v11 = vmul.f32 %v4682_v19, %v2228_v61  ;;  %v2229_v48 = vmul.f32 %v3232_v43, %v4634_v31 }
 0x553   :  { %v3234_v21 = vpop.eup %3233  ;;  %v2372_v42 = vsel %vm177_vm0, %v4848_v52, 0.0  ;;  %v4856_v23 = vadd.f32 %v4688_v1, %v2261_v39 }
 0x554   :  { %3243 = vrsqrt.f32 %v2169_v4  ;;  %2373 = vadd.xlane.f32.xlu0 %v2372_v42  ;;  %v4859_v55 = vadd.f32 %v4688_v1, %v2266_v11  ;;  %v2267_v25 = vmul.f32 %v4682_v19, %v2229_v48  ;;  %v2226_v13 = vmul.f32 %v3234_v21, %v4640_v24 }
 0x555   :  { %v3236_v40 = vpop.eup %3235  ;;  %v2375_v31 = vsel %vm177_vm0, %v4856_v23, 0.0 }
 0x556   :  { %2376 = vadd.xlane.f32.xlu1 %v2375_v31  ;;  %v2390_v32 = vsel %vm177_vm0, %v4859_v55, 0.0  ;;  %v4868_v16 = vadd.f32 %v4688_v1, %v2267_v25  ;;  %v2264_v63 = vmul.f32 %v4682_v19, %v2226_v13  ;;  %v2227_v5 = vmul.f32 %v3236_v40, %v4646_v44 }
 0x558   :  { %v3238_v27 = vpop.eup %3237  ;;  %2391 = vadd.xlane.f32.xlu0 %v2390_v32  ;;  %v2393_v24 = vsel %vm177_vm0, %v4868_v16, 0.0  ;;  %v4875_v17 = vadd.f32 %v4688_v1, %v2264_v63  ;;  %v2265_v49 = vmul.f32 %v4682_v19, %v2227_v5 }
 0x559   :  { %v2230_v45 = vmul.f32 %v3238_v27, %v4655_v3 }
 0x55a   :  { %v3240_v0 = vpop.eup %3239  ;;  %2394 = vadd.xlane.f32.xlu1 %v2393_v24  ;;  %v2384_v60 = vsel %vm177_vm0, %v4875_v17, 0.0  ;;  %v4882_v53 = vadd.f32 %v4688_v1, %v2265_v49 }
 0x55b   :  { %v2268_v44 = vmul.f32 %v4682_v19, %v2230_v45  ;;  %v2231_v28 = vmul.f32 %v3240_v0, %v4659_v10 }
 0x55c   :  { %v3242_v2 = vpop.eup %3241  ;;  %2385 = vadd.xlane.f32.xlu0 %v2384_v60  ;;  %v2387_v7 = vsel %vm177_vm0, %v4882_v53, 0.0 }
 0x55d   :  { %v4889_v22 = vadd.f32 %v4688_v1, %v2268_v44  ;;  %v2269_v3 = vmul.f32 %v4682_v19, %v2231_v28  ;;  %v2232_v33 = vmul.f32 %v3242_v2, %v4664_v38 }
 0x55e   :  { %v3244_v34 = vpop.eup %3243  ;;  %2388 = vadd.xlane.f32.xlu1 %v2387_v7 }
 0x55f   :  { %v2396_v20 = vsel %vm177_vm0, %v4889_v22, 0.0  ;;  %v4896_v61 = vadd.f32 %v4688_v1, %v2269_v3  ;;  %v2270_v10 = vmul.f32 %v4682_v19, %v2232_v33  ;;  %v2233_v43 = vmul.f32 %v3244_v34, %v4670_v41 }
 0x560   :  { %2397 = vadd.xlane.f32.xlu0 %v2396_v20 }
 0x561   :  { %v2399_v57 = vsel %vm177_vm0, %v4896_v61, 0.0  ;;  %v4903_v39 = vadd.f32 %v4688_v1, %v2270_v10  ;;  %v2271_v38 = vmul.f32 %v4682_v19, %v2233_v43 }
 0x562   :  { %2400 = vadd.xlane.f32.xlu1 %v2399_v57 }
 0x563   :  { %v2402_v4 = vsel %vm177_vm0, %v4903_v39, 0.0  ;;  %v4909_v11 = vadd.f32 %v4688_v1, %v2271_v38 }
 0x564   :  { %2403 = vadd.xlane.f32.xlu0 %v2402_v4 }
 0x565   :  { %v2405_v41 = vsel %vm177_vm0, %v4909_v11, 0.0 }
 0x566   :  { %2406 = vadd.xlane.f32.xlu1 %v2405_v41 }
 0x5b4   :  { %v2320_v48 = vpop.xlane.xlu0 %2319 }
 0x5b5   :  { %v2410_v21 = vmul.f32 0.03125, %v2320_v48 }
 0x5b6   :  { %v2323_v42 = vpop.xlane.xlu1 %2322 }
 0x5b7   :  { %v4914_v25 = vsub.f32 %v4693_v37, %v2410_v21  ;;  %v2411_v13 = vmul.f32 0.03125, %v2323_v42 }
 0x5b8   :  { %v2314_v19 = vpop.xlane.xlu0 %2313 }
 0x5b9   :  { %v4917_v40 = vsub.f32 %v4700_v47, %v2411_v13  ;;  %v2408_v31 = vmul.f32 0.03125, %v2314_v19  ;;  %v2474_v1 = vmul.f32 %v4914_v25, %v4914_v25 }
 0x5ba   :  { %v2317_v32 = vpop.xlane.xlu1 %2316 }
 0x5bb   :  { %v4922_v63 = vsub.f32 %v4707_v9, %v2408_v31  ;;  %v2409_v5 = vmul.f32 0.03125, %v2317_v32  ;;  %v2510_v27 = vsel %vm177_vm0, %v2474_v1, 0.0  ;;  %v2475_v37 = vmul.f32 %v4917_v40, %v4917_v40 }
 0x5bc   :  { %2511 = vadd.xlane.f32.xlu0 %v2510_v27  ;;  %v2332_v24 = vpop.xlane.xlu0 %2331 }
 0x5bd   :  { %v4928_v49 = vsub.f32 %v4714_v30, %v2409_v5  ;;  %v2414_v47 = vmul.f32 0.03125, %v2332_v24  ;;  %v2513_v45 = vsel %vm177_vm0, %v2475_v37, 0.0  ;;  %v2472_v0 = vmul.f32 %v4922_v63, %v4922_v63 }
 0x5be   :  { %2514 = vadd.xlane.f32.xlu1 %v2513_v45  ;;  %v2335_v9 = vpop.xlane.xlu1 %2334 }
 0x5bf   :  { %v4934_v60 = vsub.f32 %v4721_v50, %v2414_v47  ;;  %v2415_v44 = vmul.f32 0.03125, %v2335_v9  ;;  %v2504_v28 = vsel %vm177_vm0, %v2472_v0, 0.0  ;;  %v2473_v2 = vmul.f32 %v4928_v49, %v4928_v49 }
 0x5c0   :  { %2505 = vadd.xlane.f32.xlu0 %v2504_v28  ;;  %v2326_v30 = vpop.xlane.xlu0 %2325 }
 0x5c1   :  { %v4940_v7 = vsub.f32 %v4728_v26, %v2415_v44  ;;  %v2412_v3 = vmul.f32 0.03125, %v2326_v30  ;;  %v2507_v33 = vsel %vm177_vm0, %v2473_v2, 0.0  ;;  %v2478_v34 = vmul.f32 %v4934_v60, %v4934_v60 }
 0x5c2   :  { %2508 = vadd.xlane.f32.xlu1 %v2507_v33  ;;  %v2329_v50 = vpop.xlane.xlu1 %2328 }
 0x5c3   :  { %v4946_v20 = vsub.f32 %v4735_v14, %v2412_v3  ;;  %v2413_v10 = vmul.f32 0.03125, %v2329_v50  ;;  %v2522_v43 = vsel %vm177_vm0, %v2478_v34, 0.0  ;;  %v2479_v57 = vmul.f32 %v4940_v7, %v4940_v7 }
 0x5c4   :  { %2523 = vadd.xlane.f32.xlu0 %v2522_v43  ;;  %v2344_v26 = vpop.xlane.xlu0 %2343 }
 0x5c5   :  { %v4952_v38 = vsub.f32 %v4742_v12, %v2413_v10  ;;  %v2418_v4 = vmul.f32 0.03125, %v2344_v26  ;;  %v2525_v41 = vsel %vm177_vm0, %v2479_v57, 0.0  ;;  %v2476_v48 = vmul.f32 %v4946_v20, %v4946_v20 }
 0x5c6   :  { %2526 = vadd.xlane.f32.xlu1 %v2525_v41  ;;  %v2347_v14 = vpop.xlane.xlu1 %2346 }
 0x5c7   :  { %v4958_v21 = vsub.f32 %v4749_v56, %v2418_v4  ;;  %v2419_v42 = vmul.f32 0.03125, %v2347_v14  ;;  %v2516_v13 = vsel %vm177_vm0, %v2476_v48, 0.0  ;;  %v2477_v19 = vmul.f32 %v4952_v38, %v4952_v38 }
 0x5c8   :  { %2517 = vadd.xlane.f32.xlu0 %v2516_v13  ;;  %v2338_v12 = vpop.xlane.xlu0 %2337 }
 0x5c9   :  { %v4964_v31 = vsub.f32 %v4756_v18, %v2419_v42  ;;  %v2416_v1 = vmul.f32 0.03125, %v2338_v12  ;;  %v2519_v32 = vsel %vm177_vm0, %v2477_v19, 0.0  ;;  %v2482_v5 = vmul.f32 %v4958_v21, %v4958_v21 }
 0x5ca   :  { %2520 = vadd.xlane.f32.xlu1 %v2519_v32  ;;  %v2341_v56 = vpop.xlane.xlu1 %2340 }
 0x5cb   :  { %v4970_v27 = vsub.f32 %v4763_v8, %v2416_v1  ;;  %v2417_v37 = vmul.f32 0.03125, %v2341_v56  ;;  %v2534_v24 = vsel %vm177_vm0, %v2482_v5, 0.0  ;;  %v2483_v47 = vmul.f32 %v4964_v31, %v4964_v31 }
 0x5cc   :  { %2535 = vadd.xlane.f32.xlu0 %v2534_v24  ;;  %v2356_v18 = vpop.xlane.xlu0 %2355 }
 0x5cd   :  { %v4976_v45 = vsub.f32 %v4770_v59, %v2417_v37  ;;  %v2422_v0 = vmul.f32 0.03125, %v2356_v18  ;;  %v2537_v9 = vsel %vm177_vm0, %v2483_v47, 0.0  ;;  %v2480_v44 = vmul.f32 %v4970_v27, %v4970_v27 }
 0x5ce   :  { %2538 = vadd.xlane.f32.xlu1 %v2537_v9  ;;  %v2359_v8 = vpop.xlane.xlu1 %2358 }
 0x5cf   :  { %v4982_v28 = vsub.f32 %v4777_v62, %v2422_v0  ;;  %v2423_v2 = vmul.f32 0.03125, %v2359_v8  ;;  %v2528_v30 = vsel %vm177_vm0, %v2480_v44, 0.0  ;;  %v2481_v3 = vmul.f32 %v4976_v45, %v4976_v45 }
 0x5d0   :  { %2529 = vadd.xlane.f32.xlu0 %v2528_v30  ;;  %v2350_v59 = vpop.xlane.xlu0 %2349 }
 0x5d1   :  { %v4988_v33 = vsub.f32 %v4784_v15, %v2423_v2  ;;  %v2420_v34 = vmul.f32 0.03125, %v2350_v59  ;;  %v2531_v50 = vsel %vm177_vm0, %v2481_v3, 0.0  ;;  %v2486_v10 = vmul.f32 %v4982_v28, %v4982_v28 }
 0x5d2   :  { %2532 = vadd.xlane.f32.xlu1 %v2531_v50  ;;  %v2353_v62 = vpop.xlane.xlu1 %2352 }
 0x5d3   :  { %v4994_v43 = vsub.f32 %v4791_v36, %v2420_v34  ;;  %v2421_v57 = vmul.f32 0.03125, %v2353_v62  ;;  %v2546_v26 = vsel %vm177_vm0, %v2486_v10, 0.0  ;;  %v2487_v4 = vmul.f32 %v4988_v33, %v4988_v33 }
 0x5d4   :  { %2547 = vadd.xlane.f32.xlu0 %v2546_v26  ;;  %v2368_v15 = vpop.xlane.xlu0 %2367 }
 0x5d5   :  { %v5000_v41 = vsub.f32 %v4798_v29, %v2421_v57  ;;  %v2426_v48 = vmul.f32 0.03125, %v2368_v15  ;;  %v2549_v14 = vsel %vm177_vm0, %v2487_v4, 0.0  ;;  %v2484_v42 = vmul.f32 %v4994_v43, %v4994_v43 }
 0x5d6   :  { %2550 = vadd.xlane.f32.xlu1 %v2549_v14  ;;  %v2371_v36 = vpop.xlane.xlu1 %2370 }
 0x5d7   :  { %v5006_v13 = vsub.f32 %v4805_v46, %v2426_v48  ;;  %v2427_v19 = vmul.f32 0.03125, %v2371_v36  ;;  %v2540_v12 = vsel %vm177_vm0, %v2484_v42, 0.0  ;;  %v2485_v1 = vmul.f32 %v5000_v41, %v5000_v41 }
 0x5d8   :  { %2541 = vadd.xlane.f32.xlu0 %v2540_v12  ;;  %v2362_v29 = vpop.xlane.xlu0 %2361 }
 0x5d9   :  { %v5012_v32 = vsub.f32 %v4812_v54, %v2427_v19  ;;  %v2424_v5 = vmul.f32 0.03125, %v2362_v29  ;;  %v2543_v56 = vsel %vm177_vm0, %v2485_v1, 0.0  ;;  %v2490_v37 = vmul.f32 %v5006_v13, %v5006_v13 }
 0x5da   :  { %2544 = vadd.xlane.f32.xlu1 %v2543_v56  ;;  %v2365_v46 = vpop.xlane.xlu1 %2364 }
 0x5db   :  { %v5018_v24 = vsub.f32 %v4819_v35, %v2424_v5  ;;  %v2425_v47 = vmul.f32 0.03125, %v2365_v46  ;;  %v2558_v18 = vsel %vm177_vm0, %v2490_v37, 0.0  ;;  %v2491_v0 = vmul.f32 %v5012_v32, %v5012_v32 }
 0x5dc   :  { %2559 = vadd.xlane.f32.xlu0 %v2558_v18  ;;  %v2380_v54 = vpop.xlane.xlu0 %2379 }
 0x5dd   :  { %v5024_v9 = vsub.f32 %v4826_v51, %v2425_v47  ;;  %v2430_v44 = vmul.f32 0.03125, %v2380_v54  ;;  %v2561_v8 = vsel %vm177_vm0, %v2491_v0, 0.0  ;;  %v2488_v2 = vmul.f32 %v5018_v24, %v5018_v24 }
 0x5de   :  { %2562 = vadd.xlane.f32.xlu1 %v2561_v8 }
 0x5df   :  { %v5030_v35 = vsub.f32 %v4833_v58, %v2430_v44  ;;  %v2383_v30 = vpop.xlane.xlu1 %2382  ;;  %v2552_v3 = vsel %vm177_vm0, %v2488_v2, 0.0  ;;  %v2489_v59 = vmul.f32 %v5024_v9, %v5024_v9 }
 0x5e0   :  { %v2431_v34 = vmul.f32 0.03125, %v2383_v30  ;;  %2553 = vadd.xlane.f32.xlu0 %v2552_v3 }
 0x5e1   :  { %v2374_v51 = vpop.xlane.xlu0 %2373  ;;  %v2555_v50 = vsel %vm177_vm0, %v2489_v59, 0.0  ;;  %v2494_v10 = vmul.f32 %v5030_v35, %v5030_v35 }
 0x5e2   :  { %v5039_v62 = vsub.f32 %v4840_v6, %v2431_v34  ;;  %v2428_v57 = vmul.f32 0.03125, %v2374_v51  ;;  %2556 = vadd.xlane.f32.xlu1 %v2555_v50 }
 0x5e3   :  { %v2377_v58 = vpop.xlane.xlu1 %2376  ;;  %v2570_v26 = vsel %vm177_vm0, %v2494_v10, 0.0 }
 0x5e4   :  { %v5043_v4 = vsub.f32 %v4848_v52, %v2428_v57  ;;  %v2429_v15 = vmul.f32 0.03125, %v2377_v58  ;;  %2571 = vadd.xlane.f32.xlu0 %v2570_v26  ;;  %v2495_v48 = vmul.f32 %v5039_v62, %v5039_v62 }
 0x5e5   :  { %v2392_v14 = vpop.xlane.xlu0 %2391 }
 0x5e6   :  { %v5048_v42 = vsub.f32 %v4856_v23, %v2429_v15  ;;  %v2434_v36 = vmul.f32 0.03125, %v2392_v14  ;;  %v2573_v6 = vsel %vm177_vm0, %v2495_v48, 0.0  ;;  %v2492_v19 = vmul.f32 %v5043_v4, %v5043_v4 }
 0x5e7   :  { %2574 = vadd.xlane.f32.xlu1 %v2573_v6  ;;  %v2395_v12 = vpop.xlane.xlu1 %2394 }
 0x5e8   :  { %v5054_v52 = vsub.f32 %v4859_v55, %v2434_v36  ;;  %v2435_v1 = vmul.f32 0.03125, %v2395_v12  ;;  %v2564_v29 = vsel %vm177_vm0, %v2492_v19, 0.0  ;;  %v2493_v5 = vmul.f32 %v5048_v42, %v5048_v42 }
 0x5e9   :  { %2565 = vadd.xlane.f32.xlu0 %v2564_v29  ;;  %v2386_v23 = vpop.xlane.xlu0 %2385 }
 0x5ea   :  { %v5060_v56 = vsub.f32 %v4868_v16, %v2435_v1  ;;  %v2432_v37 = vmul.f32 0.03125, %v2386_v23  ;;  %v2567_v46 = vsel %vm177_vm0, %v2493_v5, 0.0  ;;  %v2498_v47 = vmul.f32 %v5054_v52, %v5054_v52 }
 0x5eb   :  { %2568 = vadd.xlane.f32.xlu1 %v2567_v46  ;;  %v2389_v55 = vpop.xlane.xlu1 %2388 }
 0x5ec   :  { %v5066_v18 = vsub.f32 %v4875_v17, %v2432_v37  ;;  %v2433_v0 = vmul.f32 0.03125, %v2389_v55  ;;  %v2582_v54 = vsel %vm177_vm0, %v2498_v47, 0.0  ;;  %v2499_v44 = vmul.f32 %v5060_v56, %v5060_v56 }
 0x5ed   :  { %2583 = vadd.xlane.f32.xlu0 %v2582_v54  ;;  %v2398_v16 = vpop.xlane.xlu0 %2397 }
 0x5ee   :  { %v5072_v8 = vsub.f32 %v4882_v53, %v2433_v0  ;;  %v2436_v2 = vmul.f32 0.03125, %v2398_v16  ;;  %v2585_v30 = vsel %vm177_vm0, %v2499_v44, 0.0  ;;  %v2496_v3 = vmul.f32 %v5066_v18, %v5066_v18 }
 0x5ef   :  { %2586 = vadd.xlane.f32.xlu1 %v2585_v30  ;;  %v2401_v17 = vpop.xlane.xlu1 %2400 }
 0x5f0   :  { %v5078_v59 = vsub.f32 %v4889_v22, %v2436_v2  ;;  %v2437_v34 = vmul.f32 0.03125, %v2401_v17  ;;  %v2576_v51 = vsel %vm177_vm0, %v2496_v3, 0.0  ;;  %v2497_v50 = vmul.f32 %v5072_v8, %v5072_v8 }
 0x5f1   :  { %2577 = vadd.xlane.f32.xlu0 %v2576_v51  ;;  %v2404_v53 = vpop.xlane.xlu0 %2403 }
 0x5f2   :  { %v5084_v10 = vsub.f32 %v4896_v61, %v2437_v34  ;;  %v2438_v57 = vmul.f32 0.03125, %v2404_v53  ;;  %v2579_v58 = vsel %vm177_vm0, %v2497_v50, 0.0  ;;  %v2500_v26 = vmul.f32 %v5078_v59, %v5078_v59 }
 0x5f3   :  { %2580 = vadd.xlane.f32.xlu1 %v2579_v58  ;;  %v2407_v22 = vpop.xlane.xlu1 %2406 }
 0x5f4   :  { %v5090_v15 = vsub.f32 %v4903_v39, %v2438_v57  ;;  %v2439_v48 = vmul.f32 0.03125, %v2407_v22  ;;  %v2588_v14 = vsel %vm177_vm0, %v2500_v26, 0.0  ;;  %v2501_v36 = vmul.f32 %v5084_v10, %v5084_v10  ;;  %v5108_v26 = vld [vmem:[%s5350_s11] ss:$0 sm:$0xff] }
 0x5f5   :  { %2589 = vadd.xlane.f32.xlu0 %v2588_v14 }
 0x5f6   :  { %v5096_v61 = vsub.f32 %v4909_v11, %v2439_v48  ;;  %v2591_v6 = vsel %vm177_vm0, %v2501_v36, 0.0  ;;  %v2502_v19 = vmul.f32 %v5090_v15, %v5090_v15 }
 0x5f7   :  { %2592 = vadd.xlane.f32.xlu1 %v2591_v6 }
 0x5f8   :  { %v2594_v12 = vsel %vm177_vm0, %v2502_v19, 0.0  ;;  %v2503_v39 = vmul.f32 %v5096_v61, %v5096_v61  ;;  %v5114_v19 = vld [vmem:[%s5351_s12] ss:$0 sm:$0xff] }
 0x5f9   :  { %2595 = vadd.xlane.f32.xlu0 %v2594_v12 }
 0x5fa   :  { %v2597_v1 = vsel %vm177_vm0, %v2503_v39, 0.0 }
 0x5fb   :  { %2598 = vadd.xlane.f32.xlu1 %v2597_v1 }
 0x649   :  { %v2512_v29 = vpop.xlane.xlu0 %2511 }
 0x64a   :  { %v2602_v5 = vmul.f32 0.03125, %v2512_v29 }
 0x64b   :  { %v2515_v23 = vpop.xlane.xlu1 %2514 }
 0x64c   :  { %v2634_v11 = vadd.f32 1e-05, %v2602_v5  ;;  %v2603_v37 = vmul.f32 0.03125, %v2515_v23 }
 0x64d   :  { %v2506_v46 = vpop.xlane.xlu0 %2505 }
 0x64e   :  { %3245 = vrsqrt.f32 %v2634_v11  ;;  %v2635_v47 = vadd.f32 1e-05, %v2603_v37  ;;  %v2600_v55 = vmul.f32 0.03125, %v2506_v46 }
 0x64f   :  { %v2509_v0 = vpop.xlane.xlu1 %2508 }
 0x650   :  { %3247 = vrsqrt.f32 %v2635_v47  ;;  %v2632_v54 = vadd.f32 1e-05, %v2600_v55  ;;  %v2601_v44 = vmul.f32 0.03125, %v2509_v0 }
 0x651   :  { %v2524_v16 = vpop.xlane.xlu0 %2523 }
 0x652   :  { %3249 = vrsqrt.f32 %v2632_v54  ;;  %v2633_v2 = vadd.f32 1e-05, %v2601_v44  ;;  %v2606_v30 = vmul.f32 0.03125, %v2524_v16 }
 0x653   :  { %v2527_v3 = vpop.xlane.xlu1 %2526 }
 0x654   :  { %3251 = vrsqrt.f32 %v2633_v2  ;;  %v2638_v17 = vadd.f32 1e-05, %v2606_v30  ;;  %v2607_v34 = vmul.f32 0.03125, %v2527_v3 }
 0x655   :  { %v2518_v51 = vpop.xlane.xlu0 %2517 }
 0x656   :  { %3253 = vrsqrt.f32 %v2638_v17  ;;  %v2639_v50 = vadd.f32 1e-05, %v2607_v34  ;;  %v2604_v53 = vmul.f32 0.03125, %v2518_v51 }
 0x657   :  { %v2521_v57 = vpop.xlane.xlu1 %2520 }
 0x658   :  { %v3246_v58 = vpop.eup %3245  ;;  %3255 = vrsqrt.f32 %v2639_v50  ;;  %v2636_v22 = vadd.f32 1e-05, %v2604_v53  ;;  %v2605_v48 = vmul.f32 0.03125, %v2521_v57 }
 0x659   :  { %v2698_v14 = vmul.f32 %v3246_v58, %v4914_v25  ;;  %v2536_v36 = vpop.xlane.xlu0 %2535 }
 0x65a   :  { %v3248_v6 = vpop.eup %3247  ;;  %3257 = vrsqrt.f32 %v2636_v22  ;;  %v2637_v12 = vadd.f32 1e-05, %v2605_v48  ;;  %v2610_v39 = vmul.f32 0.03125, %v2536_v36 }
 0x65b   :  { %v2736_v1 = vmul.f32 %v5108_v26, %v2698_v14  ;;  %v2699_v29 = vmul.f32 %v3248_v6, %v4917_v40  ;;  %v2539_v5 = vpop.xlane.xlu1 %2538 }
 0x65c   :  { %v3250_v23 = vpop.eup %3249  ;;  %3259 = vrsqrt.f32 %v2637_v12  ;;  %v2642_v11 = vadd.f32 1e-05, %v2610_v39  ;;  %v2611_v37 = vmul.f32 0.03125, %v2539_v5 }
 0x65d   :  { %v2774_v25 = vadd.f32 %v5114_v19, %v2736_v1  ;;  %v2737_v46 = vmul.f32 %v5108_v26, %v2699_v29  ;;  %v2696_v47 = vmul.f32 %v3250_v23, %v4922_v63  ;;  %v2530_v55 = vpop.xlane.xlu0 %2529 }
 0x65e   :  { %v3252_v0 = vpop.eup %3251  ;;  %3261 = vrsqrt.f32 %v2642_v11  ;;  %v2643_v54 = vadd.f32 1e-05, %v2611_v37  ;;  %v2608_v44 = vmul.f32 0.03125, %v2530_v55 }
 0x65f   :  { %2806 = vst.msk [vmem:[%s5352_s13 + $0x10] sm:$0xff] %vm177_vm0, %v2774_v25  ;;  %v2775_v40 = vadd.f32 %v5114_v19, %v2737_v46  ;;  %v2734_v16 = vmul.f32 %v5108_v26, %v2696_v47  ;;  %v2697_v2 = vmul.f32 %v3252_v0, %v4928_v49  ;;  %v2533_v30 = vpop.xlane.xlu1 %2532 }
 0x660   :  { %v3254_v3 = vpop.eup %3253  ;;  %3263 = vrsqrt.f32 %v2643_v54  ;;  %v2640_v63 = vadd.f32 1e-05, %v2608_v44  ;;  %v2609_v17 = vmul.f32 0.03125, %v2533_v30 }
 0x661   :  { %2807 = vst.msk [vmem:[%s5352_s13 + $0x18] sm:$0xff] %vm177_vm0, %v2775_v40  ;;  %v2772_v34 = vadd.f32 %v5114_v19, %v2734_v16  ;;  %v2735_v51 = vmul.f32 %v5108_v26, %v2697_v2  ;;  %v2702_v50 = vmul.f32 %v3254_v3, %v4934_v60  ;;  %v2548_v53 = vpop.xlane.xlu0 %2547 }
 0x662   :  { %v3256_v57 = vpop.eup %3255  ;;  %3265 = vrsqrt.f32 %v2640_v63  ;;  %v2641_v49 = vadd.f32 1e-05, %v2609_v17  ;;  %v2614_v58 = vmul.f32 0.03125, %v2548_v53 }
 0x663   :  { %2804 = vst.msk [vmem:[%s5352_s13] sm:$0xff] %vm177_vm0, %v2772_v34  ;;  %v2773_v22 = vadd.f32 %v5114_v19, %v2735_v51  ;;  %v2740_v48 = vmul.f32 %v5108_v26, %v2702_v50  ;;  %v2703_v14 = vmul.f32 %v3256_v57, %v4940_v7  ;;  %v2551_v36 = vpop.xlane.xlu1 %2550 }
 0x664   :  { %v3258_v6 = vpop.eup %3257  ;;  %3267 = vrsqrt.f32 %v2641_v49  ;;  %v2646_v60 = vadd.f32 1e-05, %v2614_v58  ;;  %v2615_v12 = vmul.f32 0.03125, %v2551_v36 }
 0x665   :  { %2805 = vst.msk [vmem:[%s5352_s13 + $0x8] sm:$0xff] %vm177_vm0, %v2773_v22  ;;  %v2778_v39 = vadd.f32 %v5114_v19, %v2740_v48  ;;  %v2741_v1 = vmul.f32 %v5108_v26, %v2703_v14  ;;  %v2700_v29 = vmul.f32 %v3258_v6, %v4946_v20  ;;  %v2542_v5 = vpop.xlane.xlu0 %2541 }
 0x666   :  { %v3260_v23 = vpop.eup %3259  ;;  %3269 = vrsqrt.f32 %v2646_v60  ;;  %v2647_v7 = vadd.f32 1e-05, %v2615_v12  ;;  %v2612_v11 = vmul.f32 0.03125, %v2542_v5 }
 0x667   :  { %2810 = vst.msk [vmem:[%s5352_s13 + $0x30] sm:$0xff] %vm177_vm0, %v2778_v39  ;;  %v2779_v37 = vadd.f32 %v5114_v19, %v2741_v1  ;;  %v2738_v25 = vmul.f32 %v5108_v26, %v2700_v29  ;;  %v2701_v46 = vmul.f32 %v3260_v23, %v4952_v38  ;;  %v2545_v47 = vpop.xlane.xlu1 %2544 }
 0x668   :  { %v3262_v55 = vpop.eup %3261  ;;  %3271 = vrsqrt.f32 %v2647_v7  ;;  %v2644_v20 = vadd.f32 1e-05, %v2612_v11  ;;  %v2613_v0 = vmul.f32 0.03125, %v2545_v47 }
 0x669   :  { %2811 = vst.msk [vmem:[%s5352_s13 + $0x38] sm:$0xff] %vm177_vm0, %v2779_v37  ;;  %v2776_v54 = vadd.f32 %v5114_v19, %v2738_v25  ;;  %v2739_v44 = vmul.f32 %v5108_v26, %v2701_v46  ;;  %v2706_v40 = vmul.f32 %v3262_v55, %v4958_v21  ;;  %v2560_v16 = vpop.xlane.xlu0 %2559 }
 0x66a   :  { %v3264_v2 = vpop.eup %3263  ;;  %3273 = vrsqrt.f32 %v2644_v20  ;;  %v2645_v38 = vadd.f32 1e-05, %v2613_v0  ;;  %v2618_v30 = vmul.f32 0.03125, %v2560_v16 }
 0x66b   :  { %2808 = vst.msk [vmem:[%s5352_s13 + $0x20] sm:$0xff] %vm177_vm0, %v2776_v54  ;;  %v2777_v3 = vadd.f32 %v5114_v19, %v2739_v44  ;;  %v2744_v63 = vmul.f32 %v5108_v26, %v2706_v40  ;;  %v2707_v17 = vmul.f32 %v3264_v2, %v4964_v31  ;;  %v2563_v34 = vpop.xlane.xlu1 %2562 }
 0x66c   :  { %v3266_v51 = vpop.eup %3265  ;;  %3275 = vrsqrt.f32 %v2645_v38  ;;  %v2650_v21 = vadd.f32 1e-05, %v2618_v30  ;;  %v2619_v50 = vmul.f32 0.03125, %v2563_v34 }
 0x66d   :  { %2809 = vst.msk [vmem:[%s5352_s13 + $0x28] sm:$0xff] %vm177_vm0, %v2777_v3  ;;  %v2782_v53 = vadd.f32 %v5114_v19, %v2744_v63  ;;  %v2745_v57 = vmul.f32 %v5108_v26, %v2707_v17  ;;  %v2704_v49 = vmul.f32 %v3266_v51, %v4970_v27  ;;  %v2554_v58 = vpop.xlane.xlu0 %2553 }
 0x66e   :  { %v3268_v22 = vpop.eup %3267  ;;  %3277 = vrsqrt.f32 %v2650_v21  ;;  %v2651_v31 = vadd.f32 1e-05, %v2619_v50  ;;  %v2616_v48 = vmul.f32 0.03125, %v2554_v58 }
 0x66f   :  { %2814 = vst.msk [vmem:[%s5352_s13 + $0x50] sm:$0xff] %vm177_vm0, %v2782_v53  ;;  %v2783_v14 = vadd.f32 %v5114_v19, %v2745_v57  ;;  %v2742_v36 = vmul.f32 %v5108_v26, %v2704_v49  ;;  %v2705_v6 = vmul.f32 %v3268_v22, %v4976_v45  ;;  %v2557_v60 = vpop.xlane.xlu1 %2556 }
 0x670   :  { %v3270_v12 = vpop.eup %3269  ;;  %3279 = vrsqrt.f32 %v2651_v31  ;;  %v2648_v27 = vadd.f32 1e-05, %v2616_v48  ;;  %v2617_v39 = vmul.f32 0.03125, %v2557_v60 }
 0x671   :  { %2815 = vst.msk [vmem:[%s5352_s13 + $0x58] sm:$0xff] %vm177_vm0, %v2783_v14  ;;  %v2780_v1 = vadd.f32 %v5114_v19, %v2742_v36  ;;  %v2743_v29 = vmul.f32 %v5108_v26, %v2705_v6  ;;  %v2710_v5 = vmul.f32 %v3270_v12, %v4982_v28  ;;  %v2572_v23 = vpop.xlane.xlu0 %2571 }
 0x672   :  { %v3272_v7 = vpop.eup %3271  ;;  %3281 = vrsqrt.f32 %v2648_v27  ;;  %v2649_v45 = vadd.f32 1e-05, %v2617_v39  ;;  %v2622_v11 = vmul.f32 0.03125, %v2572_v23 }
 0x673   :  { %2812 = vst.msk [vmem:[%s5352_s13 + $0x40] sm:$0xff] %vm177_vm0, %v2780_v1  ;;  %v2781_v37 = vadd.f32 %v5114_v19, %v2743_v29  ;;  %v2748_v25 = vmul.f32 %v5108_v26, %v2710_v5  ;;  %v2711_v46 = vmul.f32 %v3272_v7, %v4988_v33 }
 0x674   :  { %v3274_v47 = vpop.eup %3273  ;;  %3283 = vrsqrt.f32 %v2649_v45  ;;  %v2654_v55 = vadd.f32 1e-05, %v2622_v11  ;;  %v2575_v28 = vpop.xlane.xlu1 %2574 }
 0x675   :  { %2813 = vst.msk [vmem:[%s5352_s13 + $0x48] sm:$0xff] %vm177_vm0, %v2781_v37  ;;  %v2786_v20 = vadd.f32 %v5114_v19, %v2748_v25  ;;  %v2749_v0 = vmul.f32 %v5108_v26, %v2711_v46  ;;  %v2708_v54 = vmul.f32 %v3274_v47, %v4994_v43  ;;  %v2623_v44 = vmul.f32 0.03125, %v2575_v28 }
 0x676   :  { %v3276_v40 = vpop.eup %3275  ;;  %3285 = vrsqrt.f32 %v2654_v55  ;;  %v2566_v16 = vpop.xlane.xlu0 %2565 }
 0x677   :  { %2818 = vst.msk [vmem:[%s5352_s13 + $0x70] sm:$0xff] %vm177_vm0, %v2786_v20  ;;  %v2787_v33 = vadd.f32 %v5114_v19, %v2749_v0  ;;  %v2746_v2 = vmul.f32 %v5108_v26, %v2708_v54  ;;  %v2709_v38 = vmul.f32 %v3276_v40, %v5000_v41  ;;  %v2655_v30 = vadd.f32 1e-05, %v2623_v44 }
 0x678   :  { %v3278_v3 = vpop.eup %3277  ;;  %v2620_v63 = vmul.f32 0.03125, %v2566_v16  ;;  %v2569_v17 = vpop.xlane.xlu1 %2568 }
 0x679   :  { %2819 = vst.msk [vmem:[%s5352_s13 + $0x78] sm:$0xff] %vm177_vm0, %v2787_v33  ;;  %v2784_v43 = vadd.f32 %v5114_v19, %v2746_v2  ;;  %v2747_v34 = vmul.f32 %v5108_v26, %v2709_v38  ;;  %v2714_v51 = vmul.f32 %v3278_v3, %v5006_v13  ;;  %3287 = vrsqrt.f32 %v2655_v30 }
 0x67a   :  { %v3280_v21 = vpop.eup %3279  ;;  %v2652_v50 = vadd.f32 1e-05, %v2620_v63  ;;  %v2621_v53 = vmul.f32 0.03125, %v2569_v17  ;;  %v2584_v41 = vpop.xlane.xlu0 %2583 }
 0x67b   :  { %2816 = vst.msk [vmem:[%s5352_s13 + $0x60] sm:$0xff] %vm177_vm0, %v2784_v43  ;;  %v2785_v57 = vadd.f32 %v5114_v19, %v2747_v34  ;;  %v2752_v49 = vmul.f32 %v5108_v26, %v2714_v51  ;;  %v2715_v58 = vmul.f32 %v3280_v21, %v5012_v32  ;;  %v2626_v22 = vmul.f32 0.03125, %v2584_v41 }
 0x67c   :  { %v3282_v31 = vpop.eup %3281  ;;  %3289 = vrsqrt.f32 %v2652_v50  ;;  %v2653_v13 = vadd.f32 1e-05, %v2621_v53  ;;  %v2587_v48 = vpop.xlane.xlu1 %2586 }
 0x67d   :  { %2817 = vst.msk [vmem:[%s5352_s13 + $0x68] sm:$0xff] %vm177_vm0, %v2785_v57  ;;  %v2790_v14 = vadd.f32 %v5114_v19, %v2752_v49  ;;  %v2753_v36 = vmul.f32 %v5108_v26, %v2715_v58  ;;  %v2712_v6 = vmul.f32 %v3282_v31, %v5018_v24  ;;  %v2658_v60 = vadd.f32 1e-05, %v2626_v22 }
 0x67e   :  { %v3284_v12 = vpop.eup %3283  ;;  %3291 = vrsqrt.f32 %v2653_v13  ;;  %v2627_v32 = vmul.f32 0.03125, %v2587_v48  ;;  %v2578_v27 = vpop.xlane.xlu0 %2577 }
 0x67f   :  { %2822 = vst.msk [vmem:[%s5352_s13 + $0x90] sm:$0xff] %vm177_vm0, %v2790_v14  ;;  %v2791_v39 = vadd.f32 %v5114_v19, %v2753_v36  ;;  %v2750_v1 = vmul.f32 %v5108_v26, %v2712_v6  ;;  %v2713_v29 = vmul.f32 %v3284_v12, %v5024_v9  ;;  %3293 = vrsqrt.f32 %v2658_v60 }
 0x680   :  { %v3286_v5 = vpop.eup %3285  ;;  %v2659_v23 = vadd.f32 1e-05, %v2627_v32  ;;  %v2624_v24 = vmul.f32 0.03125, %v2578_v27  ;;  %v2581_v7 = vpop.xlane.xlu1 %2580 }
 0x681   :  { %2823 = vst.msk [vmem:[%s5352_s13 + $0x98] sm:$0xff] %vm177_vm0, %v2791_v39  ;;  %v2788_v45 = vadd.f32 %v5114_v19, %v2750_v1  ;;  %v2751_v11 = vmul.f32 %v5108_v26, %v2713_v29  ;;  %v2718_v37 = vmul.f32 %v3286_v5, %v5030_v35  ;;  %v2625_v25 = vmul.f32 0.03125, %v2581_v7 }
 0x682   :  { %3295 = vrsqrt.f32 %v2659_v23  ;;  %v2656_v46 = vadd.f32 1e-05, %v2624_v24  ;;  %v2590_v9 = vpop.xlane.xlu0 %2589 }
 0x683   :  { %v3288_v47 = vpop.eup %3287  ;;  %2820 = vst.msk [vmem:[%s5352_s13 + $0x80] sm:$0xff] %vm177_vm0, %v2788_v45  ;;  %v2789_v55 = vadd.f32 %v5114_v19, %v2751_v11  ;;  %v2756_v28 = vmul.f32 %v5108_v26, %v2718_v37  ;;  %v2657_v20 = vadd.f32 1e-05, %v2625_v25  ;;  %v2628_v0 = vmul.f32 0.03125, %v2590_v9 }
 0x684   :  { %v2719_v54 = vmul.f32 %v3288_v47, %v5039_v62  ;;  %3297 = vrsqrt.f32 %v2656_v46  ;;  %v2593_v35 = vpop.xlane.xlu1 %2592 }
 0x685   :  { %2821 = vst.msk [vmem:[%s5352_s13 + $0x88] sm:$0xff] %vm177_vm0, %v2789_v55  ;;  %v2794_v44 = vadd.f32 %v5114_v19, %v2756_v28  ;;  %3299 = vrsqrt.f32 %v2657_v20  ;;  %v2660_v40 = vadd.f32 1e-05, %v2628_v0  ;;  %v2629_v16 = vmul.f32 0.03125, %v2593_v35 }
 0x686   :  { %v3290_v33 = vpop.eup %3289  ;;  %v2757_v2 = vmul.f32 %v5108_v26, %v2719_v54  ;;  %v2596_v38 = vpop.xlane.xlu0 %2595 }
 0x687   :  { %2826 = vst.msk [vmem:[%s5352_s13 + $0xb0] sm:$0xff] %vm177_vm0, %v2794_v44  ;;  %v2716_v62 = vmul.f32 %v3290_v33, %v5043_v4  ;;  %3301 = vrsqrt.f32 %v2660_v40  ;;  %v2661_v30 = vadd.f32 1e-05, %v2629_v16  ;;  %v2630_v3 = vmul.f32 0.03125, %v2596_v38 }
 0x688   :  { %v3292_v63 = vpop.eup %3291  ;;  %v2795_v17 = vadd.f32 %v5114_v19, %v2757_v2  ;;  %v2599_v43 = vpop.xlane.xlu1 %2598 }
 0x689   :  { %v3294_v34 = vpop.eup %3293  ;;  %v2754_v51 = vmul.f32 %v5108_v26, %v2716_v62  ;;  %v2717_v21 = vmul.f32 %v3292_v63, %v5048_v42  ;;  %3303 = vrsqrt.f32 %v2661_v30  ;;  %v2662_v50 = vadd.f32 1e-05, %v2630_v3 }
 0x68a   :  { %2827 = vst.msk [vmem:[%s5352_s13 + $0xb8] sm:$0xff] %vm177_vm0, %v2795_v17  ;;  %v2722_v4 = vmul.f32 %v3294_v34, %v5054_v52  ;;  %v2631_v53 = vmul.f32 0.03125, %v2599_v43 }
 0x68b   :  { %v2792_v41 = vadd.f32 %v5114_v19, %v2754_v51  ;;  %v2755_v57 = vmul.f32 %v5108_v26, %v2717_v21  ;;  %3305 = vrsqrt.f32 %v2662_v50 }
 0x68c   :  { %v3296_v49 = vpop.eup %3295  ;;  %v2760_v58 = vmul.f32 %v5108_v26, %v2722_v4  ;;  %v2663_v22 = vadd.f32 1e-05, %v2631_v53 }
 0x68d   :  { %2824 = vst.msk [vmem:[%s5352_s13 + $0xa0] sm:$0xff] %vm177_vm0, %v2792_v41  ;;  %v2793_v42 = vadd.f32 %v5114_v19, %v2755_v57  ;;  %v2723_v31 = vmul.f32 %v3296_v49, %v5060_v56 }
 0x68e   :  { %v3298_v52 = vpop.eup %3297  ;;  %v2798_v13 = vadd.f32 %v5114_v19, %v2760_v58  ;;  %3307 = vrsqrt.f32 %v2663_v22 }
 0x68f   :  { %v3300_v48 = vpop.eup %3299  ;;  %2825 = vst.msk [vmem:[%s5352_s13 + $0xa8] sm:$0xff] %vm177_vm0, %v2793_v42  ;;  %v2761_v14 = vmul.f32 %v5108_v26, %v2723_v31  ;;  %v2720_v36 = vmul.f32 %v3298_v52, %v5066_v18 }
 0x690   :  { %2830 = vst.msk [vmem:[%s5352_s13 + $0xd0] sm:$0xff] %vm177_vm0, %v2798_v13  ;;  %v2721_v56 = vmul.f32 %v3300_v48, %v5072_v8 }
 0x691   :  { %v3302_v6 = vpop.eup %3301  ;;  %v2799_v60 = vadd.f32 %v5114_v19, %v2761_v14  ;;  %v2758_v12 = vmul.f32 %v5108_v26, %v2720_v36 }
 0x692   :  { %v2759_v32 = vmul.f32 %v5108_v26, %v2721_v56  ;;  %v2724_v27 = vmul.f32 %v3302_v6, %v5078_v59 }
 0x693   :  { %v3304_v39 = vpop.eup %3303  ;;  %2831 = vst.msk [vmem:[%s5352_s13 + $0xd8] sm:$0xff] %vm177_vm0, %v2799_v60  ;;  %v2796_v18 = vadd.f32 %v5114_v19, %v2758_v12 }
 0x694   :  { %v2797_v1 = vadd.f32 %v5114_v19, %v2759_v32  ;;  %v2762_v8 = vmul.f32 %v5108_v26, %v2724_v27  ;;  %v2725_v29 = vmul.f32 %v3304_v39, %v5084_v10 }
 0x695   :  { %v3306_v5 = vpop.eup %3305  ;;  %2828 = vst.msk [vmem:[%s5352_s13 + $0xc0] sm:$0xff] %vm177_vm0, %v2796_v18 }
 0x696   :  { %2829 = vst.msk [vmem:[%s5352_s13 + $0xc8] sm:$0xff] %vm177_vm0, %v2797_v1  ;;  %v2800_v59 = vadd.f32 %v5114_v19, %v2762_v8  ;;  %v2763_v23 = vmul.f32 %v5108_v26, %v2725_v29  ;;  %v2726_v24 = vmul.f32 %v3306_v5, %v5090_v15 }
 0x698   :  { %v3308_v7 = vpop.eup %3307  ;;  %2832 = vst.msk [vmem:[%s5352_s13 + $0xe0] sm:$0xff] %vm177_vm0, %v2800_v59  ;;  %v2801_v10 = vadd.f32 %v5114_v19, %v2763_v23  ;;  %v2764_v45 = vmul.f32 %v5108_v26, %v2726_v24 }
 0x699   :  { %v2727_v11 = vmul.f32 %v3308_v7, %v5096_v61 }
 0x69a   :  { %2833 = vst.msk [vmem:[%s5352_s13 + $0xe8] sm:$0xff] %vm177_vm0, %v2801_v10  ;;  %v2802_v37 = vadd.f32 %v5114_v19, %v2764_v45 }
 0x69b   :  { %v2765_v15 = vmul.f32 %v5108_v26, %v2727_v11 }
 0x69c   :  { %2834 = vst.msk [vmem:[%s5352_s13 + $0xf0] sm:$0xff] %vm177_vm0, %v2802_v37 }
 0x69d   :  { %v2803_v25 = vadd.f32 %v5114_v19, %v2765_v15 }
 0x69f   :  { %2835 = vst.msk [vmem:[%s5352_s13 + $0xf8] sm:$0xff] %vm177_vm0, %v2803_v25 }

</bundles_post_ra>
